<compile_context>
chip_gen: v6e
topology: v6e:2x2x1
jax: 0.10.0
libtpu: 0.0.40
codegen_flags: <defaults>
</compile_context>

<pallas_src>
import functools

import jax
import jax.numpy as jnp
from jax.experimental import pallas as pl
from jax.experimental.pallas import tpu as pltpu

_HIDDEN = 100       # true hidden width of the PyTorch module
_HPAD_F32 = 104     # 100 -> next multiple of 8  (f32 sublane granule)
_HPAD_BF16 = 112    # 100 -> next multiple of 16 (bf16 packed sublane granule)


# ----------------------------------------------------------------------------
# Device-dependent defaults
# ----------------------------------------------------------------------------
def _device_kind():
    try:
        return jax.devices()[0].device_kind.lower()
    except Exception:  # pragma: no cover
        return ""


def _is_dual_tensorcore():
    # v7x has 2 TensorCores per chip sharing the "parallel" grid axis.
    k = _device_kind()
    return ("v7" in k) or ("7x" in k)


def _default_matmul_dtype():
    # bf16 MXU weights on bf16-native v6e/v7x (f32 matmul is multi-pass there);
    # keep exact f32 on v5e (no bf16 VALU -> casts are real filler) / unknown.
    k = _device_kind()
    if ("v6" in k) or ("v7" in k) or ("7x" in k):
        return jnp.bfloat16
    return jnp.float32


def _default_block_m(n):
    """Pick block_m (multiple of 128): grid=1 on single-TC chips, balanced
    grid>=2 on dual-TC v7x; cap at 2048 lanes per step for large batches."""
    cores = 2 if _is_dual_tensorcore() else 1
    lane_tiles = max(1, -(-n // 128))          # ceil(n / 128)
    per_core = -(-lane_tiles // cores)         # ceil(tiles / cores)
    return int(min(per_core * 128, 2048))


# ----------------------------------------------------------------------------
# Kernel
# ----------------------------------------------------------------------------
def _mlp_kernel(xT_ref, w1_ref, b1_ref, w2_ref, b2_ref, w3_ref, b3_ref,
                w4_ref, b4_ref, o_ref):
    # Features on sublanes, batch on lanes.  xT_ref: (2, block_m) f32.
    mxu_dtype = w2_ref.dtype                  # f32 (v5e) or bf16 (v6e/v7x)
    xT = xT_ref[...]                          # (2, bm)
    w1 = w1_ref[...]                          # (hpad, 2) f32

    # Layer 1 (K=2) on the VPU: two broadcast FMAs instead of a tiny MXU pass.
    pre = w1[:, 0:1] * xT[0:1, :] + w1[:, 1:2] * xT[1:2, :] + b1_ref[...]
    h = jnp.tanh(pre).astype(mxu_dtype)       # (hpad, bm)

    # Layers 2 & 3 on the MXU, f32 accumulation.
    pre = jnp.dot(w2_ref[...], h, preferred_element_type=jnp.float32) + b2_ref[...]
    h = jnp.tanh(pre).astype(mxu_dtype)
    pre = jnp.dot(w3_ref[...], h, preferred_element_type=jnp.float32) + b3_ref[...]
    h = jnp.tanh(pre).astype(mxu_dtype)
    # NOTE: if profiling shows the single EUP saturated on v6e/v7x, the tanh's
    # can be computed in bf16 (cast `pre` before tanh) for ~2x EUP throughput.

    # Output layer: (1, hpad) @ (hpad, bm) -> lane-dense (1, bm) row.
    out = jnp.dot(w4_ref[...], h, preferred_element_type=jnp.float32) + b4_ref[...]
    o_ref[...] = out.astype(o_ref.dtype)


# ----------------------------------------------------------------------------
# Parameter preparation (one-time: pad hidden dim, cast MXU weights)
# ----------------------------------------------------------------------------
def _pad2(a, rows, cols):
    return jnp.pad(a, ((0, rows - a.shape[0]), (0, cols - a.shape[1])))


def prepare_params(params, matmul_dtype=None):
    """Pad PyTorch-(out,in)-layout params once, outside the per-call path.

    Zero-padded rows/cols + zero-padded biases keep the padded hidden units
    exactly inert (tanh(0)=0 feeding zero weight columns).
    """
    if matmul_dtype is None:
        matmul_dtype = _default_matmul_dtype()
    hpad = _HPAD_F32 if matmul_dtype == jnp.float32 else _HPAD_BF16

    f32 = jnp.float32
    w1p = _pad2(params["w1"].astype(f32), hpad, 2)                      # (hpad, 2)
    b1p = _pad2(params["b1"].reshape(-1, 1).astype(f32), hpad, 1)       # (hpad, 1)
    w2p = _pad2(params["w2"], hpad, hpad).astype(matmul_dtype)          # (hpad, hpad)
    b2p = _pad2(params["b2"].reshape(-1, 1).astype(f32), hpad, 1)
    w3p = _pad2(params["w3"], hpad, hpad).astype(matmul_dtype)
    b3p = _pad2(params["b3"].reshape(-1, 1).astype(f32), hpad, 1)
    w4p = _pad2(params["w4"], 1, hpad).astype(matmul_dtype)             # (1, hpad)
    b4p = params["b4"].reshape(1, 1).astype(f32)                        # (1, 1)
    return (w1p, b1p, w2p, b2p, w3p, b3p, w4p, b4p)


# ----------------------------------------------------------------------------
# Forward pass
# ----------------------------------------------------------------------------
@functools.partial(
    jax.jit, static_argnames=("block_m", "single_buffer_consts", "transposed"))
def _forward_impl(x, prepared, block_m, single_buffer_consts, transposed):
    w1p, b1p, w2p, b2p, w3p, b3p, w4p, b4p = prepared

    xT = x if transposed else x.T                      # (2, n)
    assert xT.shape[0] == 2, xT.shape
    n = xT.shape[1]
    n_pad = -(-n // block_m) * block_m
    if n_pad != n:
        xT = jnp.pad(xT, ((0, 0), (0, n_pad - n)))

    grid = (n_pad // block_m,)
    const_mode = pl.Buffered(1) if single_buffer_consts else None

    def _const(arr):
        # Weight / bias blocks: whole array, same block every grid step
        # (resident in VMEM after step 0) -> single-buffer them when possible.
        if const_mode is None:
            return pl.BlockSpec(arr.shape, lambda i: (0, 0))
        return pl.BlockSpec(arr.shape, lambda i: (0, 0), pipeline_mode=const_mode)

    out = pl.pallas_call(
        _mlp_kernel,
        out_shape=jax.ShapeDtypeStruct((1, n_pad), jnp.float32),
        grid_spec=pltpu.PrefetchScalarGridSpec(
            num_scalar_prefetch=0,
            grid=grid,
            in_specs=[
                pl.BlockSpec((2, block_m), lambda i: (0, i)),   # lane-dense x tile
                _const(w1p), _const(b1p),
                _const(w2p), _const(b2p),
                _const(w3p), _const(b3p),
                _const(w4p), _const(b4p),
            ],
            out_specs=pl.BlockSpec((1, block_m), lambda i: (0, i)),  # lane-dense out
        ),
        compiler_params=pltpu.CompilerParams(
            dimension_semantics=("parallel",)),
    )(xT, w1p, b1p, w2p, b2p, w3p, b3p, w4p, b4p)

    if n_pad != n:
        out = out[:, :n]
    # (1, n) -> (n, 1) is a pure (free) reshape in row-major order.
    return out.reshape(n, 1).astype(x.dtype)


_SINGLE_BUFFER_CONSTS = True   # downgraded automatically if unsupported


def _dispatch(x, prepared, block_m, transposed):
    global _SINGLE_BUFFER_CONSTS
    n = x.shape[1] if transposed else x.shape[0]
    if block_m is None:
        block_m = _default_block_m(n)
    block_m = max(128, ((int(block_m) + 127) // 128) * 128)   # keep lane-aligned
    try:
        return _forward_impl(x, prepared, block_m=block_m,
                             single_buffer_consts=_SINGLE_BUFFER_CONSTS,
                             transposed=transposed)
    except Exception:
        if not _SINGLE_BUFFER_CONSTS:
            raise
        # pipeline_mode=pl.Buffered(1) not supported by this Pallas build;
        # fall back to default double-buffered constants (correctness identical).
        _SINGLE_BUFFER_CONSTS = False
        return _forward_impl(x, prepared, block_m=block_m,
                             single_buffer_consts=False,
                             transposed=transposed)


def net_forward(x, params, *, block_m=None):
    """Forward pass.  x: (N, 2) float32.  params: dict of PyTorch (out,in)-layout
    arrays, or the tuple returned by prepare_params() (preferred: pads once)."""
    if isinstance(params, dict):
        params = prepare_params(params)
    return _dispatch(x, params, block_m, transposed=False)


def net_forward_T(xT, params, *, block_m=None):
    """Same forward pass, but takes x already transposed to (2, N) so the
    wrapper transpose is skipped (use when the caller can supply this layout)."""
    if isinstance(params, dict):
        params = prepare_params(params)
    return _dispatch(xT, params, block_m, transposed=True)


# ----------------------------------------------------------------------------
# Reference + init
# ----------------------------------------------------------------------------
def init_params(key):
    """Deterministic init mimicking nn.Linear (uniform +/- 1/sqrt(fan_in)),
    stored in PyTorch (out_features, in_features) layout."""
    dims = [(100, 2), (100, 100), (100, 100), (1, 100)]   # (out, in)
    params = {}
    for idx, (fan_out, fan_in) in enumerate(dims, start=1):
        key, kw, kb = jax.random.split(key, 3)
        bound = 1.0 / jnp.sqrt(float(fan_in))
        params[f"w{idx}"] = jax.random.uniform(
            kw, (fan_out, fan_in), jnp.float32, minval=-bound, maxval=bound)
        params[f"b{idx}"] = jax.random.uniform(
            kb, (fan_out,), jnp.float32, minval=-bound, maxval=bound)
    return params


def _reference(x, p):
    h = jnp.tanh(x @ p["w1"].T + p["b1"])
    h = jnp.tanh(h @ p["w2"].T + p["b2"])
    h = jnp.tanh(h @ p["w3"].T + p["b3"])
    return h @ p["w4"].T + p["b4"]


if __name__ == "__main__":
    key = jax.random.PRNGKey(0)
    key, kx = jax.random.split(key)

    params = init_params(key)
    # (x, y) collocation points for the steady 2D heat equation PINN.
    x = jax.random.uniform(kx, (1024, 2), jnp.float32)
    ref = _reference(x, params)

    # 1) Exact f32 path: matches the PyTorch module within fp32 rounding.
    prepared_f32 = prepare_params(params, matmul_dtype=jnp.float32)
    out_f32 = jax.block_until_ready(net_forward(x, prepared_f32))
    assert out_f32.shape == (1024, 1), out_f32.shape
    assert jnp.allclose(out_f32, ref, atol=2e-5, rtol=1e-4), \
        float(jnp.max(jnp.abs(out_f32 - ref)))

    # 2) Auto path: bf16 MXU weights on v6e/v7x (f32 accumulation), f32 elsewhere.
    prepared = prepare_params(params)
    bf16_weights = prepared[2].dtype == jnp.bfloat16
    tol = 5e-2 if bf16_weights else 2e-5
    out = jax.block_until_ready(net_forward(x, prepared))
    assert out.shape == (1024, 1), out.shape
    assert jnp.allclose(out, ref, atol=tol, rtol=tol), \
        float(jnp.max(jnp.abs(out - ref)))

    # 3) Batch that is not a multiple of block_m exercises the padding path.
    x_small = x[:300]
    out_small = jax.block_until_ready(net_forward(x_small, prepared))
    assert out_small.shape == (300, 1), out_small.shape
    assert jnp.allclose(out_small, ref[:300], atol=tol, rtol=tol)

    # 4) Pre-transposed entry point ((2, N) input, no wrapper transpose).
    out_T = jax.block_until_ready(net_forward_T(x.T, prepared))
    assert jnp.allclose(out_T, out, atol=1e-6, rtol=0.0)

    print("KERNEL_OK")
</pallas_src>

<mosaic_0001>
module attributes {stable_mosaic.version = 11 : i64} {
  func.func @_mlp_kernel(%arg0: i32, %arg1: memref<2x1024xf32, #tpu.memory_space<vmem>>, %arg2: memref<104x2xf32, #tpu.memory_space<vmem>>, %arg3: memref<104x1xf32, #tpu.memory_space<vmem>>, %arg4: memref<104x104xf32, #tpu.memory_space<vmem>>, %arg5: memref<104x1xf32, #tpu.memory_space<vmem>>, %arg6: memref<104x104xf32, #tpu.memory_space<vmem>>, %arg7: memref<104x1xf32, #tpu.memory_space<vmem>>, %arg8: memref<1x104xf32, #tpu.memory_space<vmem>>, %arg9: memref<1x1xf32, #tpu.memory_space<vmem>>, %arg10: memref<1x1024xf32, #tpu.memory_space<vmem>>) attributes {dimension_semantics = [#tpu.dimension_semantics<parallel>], iteration_bounds = array<i64: 1>, scalar_prefetch = 0 : i64, scratch_operands = 0 : i64, tpu.core_type = #tpu.core_type<tc>, window_params = [{transform_indices = @transform_0, window_bounds = array<i64: 2, 1024>}, {pipeline_mode = #tpu.pipeline_mode<synchronous>, transform_indices = @transform_1, window_bounds = array<i64: 104, 2>}, {pipeline_mode = #tpu.pipeline_mode<synchronous>, transform_indices = @transform_2, window_bounds = array<i64: 104, 1>}, {pipeline_mode = #tpu.pipeline_mode<synchronous>, transform_indices = @transform_3, window_bounds = array<i64: 104, 104>}, {pipeline_mode = #tpu.pipeline_mode<synchronous>, transform_indices = @transform_4, window_bounds = array<i64: 104, 1>}, {pipeline_mode = #tpu.pipeline_mode<synchronous>, transform_indices = @transform_5, window_bounds = array<i64: 104, 104>}, {pipeline_mode = #tpu.pipeline_mode<synchronous>, transform_indices = @transform_6, window_bounds = array<i64: 104, 1>}, {pipeline_mode = #tpu.pipeline_mode<synchronous>, transform_indices = @transform_7, window_bounds = array<i64: 1, 104>}, {pipeline_mode = #tpu.pipeline_mode<synchronous>, transform_indices = @transform_8, window_bounds = array<i64: 1, 1>}, {transform_indices = @transform_9, window_bounds = array<i64: 1, 1024>}]} {
    %c0 = arith.constant 0 : index
    %c0_0 = arith.constant 0 : index
    %0 = vector.load %arg1[%c0, %c0_0] : memref<2x1024xf32, #tpu.memory_space<vmem>>, vector<2x1024xf32>
    %c0_1 = arith.constant 0 : index
    %c0_2 = arith.constant 0 : index
    %1 = vector.load %arg2[%c0_1, %c0_2] : memref<104x2xf32, #tpu.memory_space<vmem>>, vector<104x2xf32>
    %2 = vector.extract_strided_slice %1 {offsets = [0, 0], sizes = [104, 1], strides = [1, 1]} : vector<104x2xf32> to vector<104x1xf32>
    %3 = vector.extract_strided_slice %0 {offsets = [0, 0], sizes = [1, 1024], strides = [1, 1]} : vector<2x1024xf32> to vector<1x1024xf32>
    %4 = vector.broadcast %2 : vector<104x1xf32> to vector<104x1024xf32>
    %5 = vector.broadcast %3 : vector<1x1024xf32> to vector<104x1024xf32>
    %6 = arith.mulf %4, %5 : vector<104x1024xf32>
    %7 = vector.extract_strided_slice %1 {offsets = [0, 1], sizes = [104, 1], strides = [1, 1]} : vector<104x2xf32> to vector<104x1xf32>
    %8 = vector.extract_strided_slice %0 {offsets = [1, 0], sizes = [1, 1024], strides = [1, 1]} : vector<2x1024xf32> to vector<1x1024xf32>
    %9 = vector.broadcast %7 : vector<104x1xf32> to vector<104x1024xf32>
    %10 = vector.broadcast %8 : vector<1x1024xf32> to vector<104x1024xf32>
    %11 = arith.mulf %9, %10 : vector<104x1024xf32>
    %12 = arith.addf %6, %11 : vector<104x1024xf32>
    %c0_3 = arith.constant 0 : index
    %c0_4 = arith.constant 0 : index
    %13 = vector.load %arg3[%c0_3, %c0_4] : memref<104x1xf32, #tpu.memory_space<vmem>>, vector<104x1xf32>
    %14 = vector.broadcast %13 : vector<104x1xf32> to vector<104x1024xf32>
    %15 = arith.addf %12, %14 : vector<104x1024xf32>
    %16 = math.tanh %15 : vector<104x1024xf32>
    %c0_5 = arith.constant 0 : index
    %c0_6 = arith.constant 0 : index
    %17 = vector.load %arg4[%c0_5, %c0_6] : memref<104x104xf32, #tpu.memory_space<vmem>>, vector<104x104xf32>
    %cst = arith.constant dense<0.000000e+00> : vector<104x1024xf32>
    %18 = tpu.matmul %17, %16, %cst {dimension_numbers = #tpu.dot_dimension_numbers<[1], [0], [0], [1], [0, 0, 1, 1], [], []>} : vector<104x104xf32>, vector<104x1024xf32>, vector<104x1024xf32> -> vector<104x1024xf32>
    %c0_7 = arith.constant 0 : index
    %c0_8 = arith.constant 0 : index
    %19 = vector.load %arg5[%c0_7, %c0_8] : memref<104x1xf32, #tpu.memory_space<vmem>>, vector<104x1xf32>
    %20 = vector.broadcast %19 : vector<104x1xf32> to vector<104x1024xf32>
    %21 = arith.addf %18, %20 : vector<104x1024xf32>
    %22 = math.tanh %21 : vector<104x1024xf32>
    %c0_9 = arith.constant 0 : index
    %c0_10 = arith.constant 0 : index
    %23 = vector.load %arg6[%c0_9, %c0_10] : memref<104x104xf32, #tpu.memory_space<vmem>>, vector<104x104xf32>
    %cst_11 = arith.constant dense<0.000000e+00> : vector<104x1024xf32>
    %24 = tpu.matmul %23, %22, %cst_11 {dimension_numbers = #tpu.dot_dimension_numbers<[1], [0], [0], [1], [0, 0, 1, 1], [], []>} : vector<104x104xf32>, vector<104x1024xf32>, vector<104x1024xf32> -> vector<104x1024xf32>
    %c0_12 = arith.constant 0 : index
    %c0_13 = arith.constant 0 : index
    %25 = vector.load %arg7[%c0_12, %c0_13] : memref<104x1xf32, #tpu.memory_space<vmem>>, vector<104x1xf32>
    %26 = vector.broadcast %25 : vector<104x1xf32> to vector<104x1024xf32>
    %27 = arith.addf %24, %26 : vector<104x1024xf32>
    %28 = math.tanh %27 : vector<104x1024xf32>
    %c0_14 = arith.constant 0 : index
    %c0_15 = arith.constant 0 : index
    %29 = vector.load %arg8[%c0_14, %c0_15] : memref<1x104xf32, #tpu.memory_space<vmem>>, vector<1x104xf32>
    %cst_16 = arith.constant dense<0.000000e+00> : vector<1x1024xf32>
    %30 = tpu.matmul %29, %28, %cst_16 {dimension_numbers = #tpu.dot_dimension_numbers<[1], [0], [0], [1], [0, 0, 1, 1], [], []>} : vector<1x104xf32>, vector<104x1024xf32>, vector<1x1024xf32> -> vector<1x1024xf32>
    %c0_17 = arith.constant 0 : index
    %c0_18 = arith.constant 0 : index
    %31 = vector.load %arg9[%c0_17, %c0_18] : memref<1x1xf32, #tpu.memory_space<vmem>>, vector<1x1xf32>
    %32 = vector.broadcast %31 : vector<1x1xf32> to vector<1x1024xf32>
    %33 = arith.addf %30, %32 : vector<1x1024xf32>
    %c0_19 = arith.constant 0 : index
    %c0_20 = arith.constant 0 : index
    %34 = vector.load %arg10[%c0_19, %c0_20] : memref<1x1024xf32, #tpu.memory_space<vmem>>, vector<1x1024xf32>
    tpu.vector_store %arg10[%c0_19, %c0_20], %33 {strides = array<i32>} : memref<1x1024xf32, #tpu.memory_space<vmem>>, vector<1x1024xf32>,
    return
  }
  func.func @transform_0(%arg0: i32) -> (i32, i32) {
    %c0_i32 = arith.constant 0 : i32
    %c0_i32_0 = arith.constant 0 : i32
    return %c0_i32, %arg0 : i32, i32
  }
  func.func @transform_1(%arg0: i32) -> (i32, i32) {
    %c0_i32 = arith.constant 0 : i32
    %c0_i32_0 = arith.constant 0 : i32
    %c0_i32_1 = arith.constant 0 : i32
    return %c0_i32, %c0_i32_0 : i32, i32
  }
  func.func @transform_2(%arg0: i32) -> (i32, i32) {
    %c0_i32 = arith.constant 0 : i32
    %c0_i32_0 = arith.constant 0 : i32
    %c0_i32_1 = arith.constant 0 : i32
    return %c0_i32, %c0_i32_0 : i32, i32
  }
  func.func @transform_3(%arg0: i32) -> (i32, i32) {
    %c0_i32 = arith.constant 0 : i32
    %c0_i32_0 = arith.constant 0 : i32
    %c0_i32_1 = arith.constant 0 : i32
    return %c0_i32, %c0_i32_0 : i32, i32
  }
  func.func @transform_4(%arg0: i32) -> (i32, i32) {
    %c0_i32 = arith.constant 0 : i32
    %c0_i32_0 = arith.constant 0 : i32
    %c0_i32_1 = arith.constant 0 : i32
    return %c0_i32, %c0_i32_0 : i32, i32
  }
  func.func @transform_5(%arg0: i32) -> (i32, i32) {
    %c0_i32 = arith.constant 0 : i32
    %c0_i32_0 = arith.constant 0 : i32
    %c0_i32_1 = arith.constant 0 : i32
    return %c0_i32, %c0_i32_0 : i32, i32
  }
  func.func @transform_6(%arg0: i32) -> (i32, i32) {
    %c0_i32 = arith.constant 0 : i32
    %c0_i32_0 = arith.constant 0 : i32
    %c0_i32_1 = arith.constant 0 : i32
    return %c0_i32, %c0_i32_0 : i32, i32
  }
  func.func @transform_7(%arg0: i32) -> (i32, i32) {
    %c0_i32 = arith.constant 0 : i32
    %c0_i32_0 = arith.constant 0 : i32
    %c0_i32_1 = arith.constant 0 : i32
    return %c0_i32, %c0_i32_0 : i32, i32
  }
  func.func @transform_8(%arg0: i32) -> (i32, i32) {
    %c0_i32 = arith.constant 0 : i32
    %c0_i32_0 = arith.constant 0 : i32
    %c0_i32_1 = arith.constant 0 : i32
    return %c0_i32, %c0_i32_0 : i32, i32
  }
  func.func @transform_9(%arg0: i32) -> (i32, i32) {
    %c0_i32 = arith.constant 0 : i32
    %c0_i32_0 = arith.constant 0 : i32
    return %c0_i32, %arg0 : i32, i32
  }
}

module attributes {stable_mosaic.version = 11 : i64} {
  func.func @_mlp_kernel(%arg0: i32, %arg1: memref<2x1024xf32, #tpu.memory_space<vmem>>, %arg2: memref<104x2xf32, #tpu.memory_space<vmem>>, %arg3: memref<104x1xf32, #tpu.memory_space<vmem>>, %arg4: memref<104x104xf32, #tpu.memory_space<vmem>>, %arg5: memref<104x1xf32, #tpu.memory_space<vmem>>, %arg6: memref<104x104xf32, #tpu.memory_space<vmem>>, %arg7: memref<104x1xf32, #tpu.memory_space<vmem>>, %arg8: memref<1x104xf32, #tpu.memory_space<vmem>>, %arg9: memref<1x1xf32, #tpu.memory_space<vmem>>, %arg10: memref<1x1024xf32, #tpu.memory_space<vmem>>) attributes {dimension_semantics = [#tpu.dimension_semantics<parallel>], iteration_bounds = array<i64: 1>, scalar_prefetch = 0 : i64, scratch_operands = 0 : i64, tpu.core_type = #tpu.core_type<tc>, window_params = [{transform_indices = @transform_0, window_bounds = array<i64: 2, 1024>}, {pipeline_mode = #tpu.pipeline_mode<synchronous>, transform_indices = @transform_1, window_bounds = array<i64: 104, 2>}, {pipeline_mode = #tpu.pipeline_mode<synchronous>, transform_indices = @transform_2, window_bounds = array<i64: 104, 1>}, {pipeline_mode = #tpu.pipeline_mode<synchronous>, transform_indices = @transform_3, window_bounds = array<i64: 104, 104>}, {pipeline_mode = #tpu.pipeline_mode<synchronous>, transform_indices = @transform_4, window_bounds = array<i64: 104, 1>}, {pipeline_mode = #tpu.pipeline_mode<synchronous>, transform_indices = @transform_5, window_bounds = array<i64: 104, 104>}, {pipeline_mode = #tpu.pipeline_mode<synchronous>, transform_indices = @transform_6, window_bounds = array<i64: 104, 1>}, {pipeline_mode = #tpu.pipeline_mode<synchronous>, transform_indices = @transform_7, window_bounds = array<i64: 1, 104>}, {pipeline_mode = #tpu.pipeline_mode<synchronous>, transform_indices = @transform_8, window_bounds = array<i64: 1, 1>}, {transform_indices = @transform_9, window_bounds = array<i64: 1, 1024>}]} {
    %c0 = arith.constant 0 : index
    %c0_0 = arith.constant 0 : index
    %0 = vector.load %arg1[%c0, %c0_0] : memref<2x1024xf32, #tpu.memory_space<vmem>>, vector<2x1024xf32>
    %c0_1 = arith.constant 0 : index
    %c0_2 = arith.constant 0 : index
    %1 = vector.load %arg2[%c0_1, %c0_2] : memref<104x2xf32, #tpu.memory_space<vmem>>, vector<104x2xf32>
    %2 = vector.extract_strided_slice %1 {offsets = [0, 0], sizes = [104, 1], strides = [1, 1]} : vector<104x2xf32> to vector<104x1xf32>
    %3 = vector.extract_strided_slice %0 {offsets = [0, 0], sizes = [1, 1024], strides = [1, 1]} : vector<2x1024xf32> to vector<1x1024xf32>
    %4 = vector.broadcast %2 : vector<104x1xf32> to vector<104x1024xf32>
    %5 = vector.broadcast %3 : vector<1x1024xf32> to vector<104x1024xf32>
    %6 = arith.mulf %4, %5 : vector<104x1024xf32>
    %7 = vector.extract_strided_slice %1 {offsets = [0, 1], sizes = [104, 1], strides = [1, 1]} : vector<104x2xf32> to vector<104x1xf32>
    %8 = vector.extract_strided_slice %0 {offsets = [1, 0], sizes = [1, 1024], strides = [1, 1]} : vector<2x1024xf32> to vector<1x1024xf32>
    %9 = vector.broadcast %7 : vector<104x1xf32> to vector<104x1024xf32>
    %10 = vector.broadcast %8 : vector<1x1024xf32> to vector<104x1024xf32>
    %11 = arith.mulf %9, %10 : vector<104x1024xf32>
    %12 = arith.addf %6, %11 : vector<104x1024xf32>
    %c0_3 = arith.constant 0 : index
    %c0_4 = arith.constant 0 : index
    %13 = vector.load %arg3[%c0_3, %c0_4] : memref<104x1xf32, #tpu.memory_space<vmem>>, vector<104x1xf32>
    %14 = vector.broadcast %13 : vector<104x1xf32> to vector<104x1024xf32>
    %15 = arith.addf %12, %14 : vector<104x1024xf32>
    %16 = math.tanh %15 : vector<104x1024xf32>
    %c0_5 = arith.constant 0 : index
    %c0_6 = arith.constant 0 : index
    %17 = vector.load %arg4[%c0_5, %c0_6] : memref<104x104xf32, #tpu.memory_space<vmem>>, vector<104x104xf32>
    %cst = arith.constant dense<0.000000e+00> : vector<104x1024xf32>
    %18 = tpu.matmul %17, %16, %cst {dimension_numbers = #tpu.dot_dimension_numbers<[1], [0], [0], [1], [0, 0, 1, 1], [], []>} : vector<104x104xf32>, vector<104x1024xf32>, vector<104x1024xf32> -> vector<104x1024xf32>
    %c0_7 = arith.constant 0 : index
    %c0_8 = arith.constant 0 : index
    %19 = vector.load %arg5[%c0_7, %c0_8] : memref<104x1xf32, #tpu.memory_space<vmem>>, vector<104x1xf32>
    %20 = vector.broadcast %19 : vector<104x1xf32> to vector<104x1024xf32>
    %21 = arith.addf %18, %20 : vector<104x1024xf32>
    %22 = math.tanh %21 : vector<104x1024xf32>
    %c0_9 = arith.constant 0 : index
    %c0_10 = arith.constant 0 : index
    %23 = vector.load %arg6[%c0_9, %c0_10] : memref<104x104xf32, #tpu.memory_space<vmem>>, vector<104x104xf32>
    %cst_11 = arith.constant dense<0.000000e+00> : vector<104x1024xf32>
    %24 = tpu.matmul %23, %22, %cst_11 {dimension_numbers = #tpu.dot_dimension_numbers<[1], [0], [0], [1], [0, 0, 1, 1], [], []>} : vector<104x104xf32>, vector<104x1024xf32>, vector<104x1024xf32> -> vector<104x1024xf32>
    %c0_12 = arith.constant 0 : index
    %c0_13 = arith.constant 0 : index
    %25 = vector.load %arg7[%c0_12, %c0_13] : memref<104x1xf32, #tpu.memory_space<vmem>>, vector<104x1xf32>
    %26 = vector.broadcast %25 : vector<104x1xf32> to vector<104x1024xf32>
    %27 = arith.addf %24, %26 : vector<104x1024xf32>
    %28 = math.tanh %27 : vector<104x1024xf32>
    %c0_14 = arith.constant 0 : index
    %c0_15 = arith.constant 0 : index
    %29 = vector.load %arg8[%c0_14, %c0_15] : memref<1x104xf32, #tpu.memory_space<vmem>>, vector<1x104xf32>
    %cst_16 = arith.constant dense<0.000000e+00> : vector<1x1024xf32>
    %30 = tpu.matmul %29, %28, %cst_16 {dimension_numbers = #tpu.dot_dimension_numbers<[1], [0], [0], [1], [0, 0, 1, 1], [], []>} : vector<1x104xf32>, vector<104x1024xf32>, vector<1x1024xf32> -> vector<1x1024xf32>
    %c0_17 = arith.constant 0 : index
    %c0_18 = arith.constant 0 : index
    %31 = vector.load %arg9[%c0_17, %c0_18] : memref<1x1xf32, #tpu.memory_space<vmem>>, vector<1x1xf32>
    %32 = vector.broadcast %31 : vector<1x1xf32> to vector<1x1024xf32>
    %33 = arith.addf %30, %32 : vector<1x1024xf32>
    %c0_19 = arith.constant 0 : index
    %c0_20 = arith.constant 0 : index
    %34 = vector.load %arg10[%c0_19, %c0_20] : memref<1x1024xf32, #tpu.memory_space<vmem>>, vector<1x1024xf32>
    tpu.vector_store %arg10[%c0_19, %c0_20], %33 {strides = array<i32>} : memref<1x1024xf32, #tpu.memory_space<vmem>>, vector<1x1024xf32>,
    return
  }
  func.func @transform_0(%arg0: i32) -> (i32, i32) {
    %c0_i32 = arith.constant 0 : i32
    %c0_i32_0 = arith.constant 0 : i32
    return %c0_i32, %arg0 : i32, i32
  }
  func.func @transform_1(%arg0: i32) -> (i32, i32) {
    %c0_i32 = arith.constant 0 : i32
    %c0_i32_0 = arith.constant 0 : i32
    %c0_i32_1 = arith.constant 0 : i32
    return %c0_i32, %c0_i32_0 : i32, i32
  }
  func.func @transform_2(%arg0: i32) -> (i32, i32) {
    %c0_i32 = arith.constant 0 : i32
    %c0_i32_0 = arith.constant 0 : i32
    %c0_i32_1 = arith.constant 0 : i32
    return %c0_i32, %c0_i32_0 : i32, i32
  }
  func.func @transform_3(%arg0: i32) -> (i32, i32) {
    %c0_i32 = arith.constant 0 : i32
    %c0_i32_0 = arith.constant 0 : i32
    %c0_i32_1 = arith.constant 0 : i32
    return %c0_i32, %c0_i32_0 : i32, i32
  }
  func.func @transform_4(%arg0: i32) -> (i32, i32) {
    %c0_i32 = arith.constant 0 : i32
    %c0_i32_0 = arith.constant 0 : i32
    %c0_i32_1 = arith.constant 0 : i32
    return %c0_i32, %c0_i32_0 : i32, i32
  }
  func.func @transform_5(%arg0: i32) -> (i32, i32) {
    %c0_i32 = arith.constant 0 : i32
    %c0_i32_0 = arith.constant 0 : i32
    %c0_i32_1 = arith.constant 0 : i32
    return %c0_i32, %c0_i32_0 : i32, i32
  }
  func.func @transform_6(%arg0: i32) -> (i32, i32) {
    %c0_i32 = arith.constant 0 : i32
    %c0_i32_0 = arith.constant 0 : i32
    %c0_i32_1 = arith.constant 0 : i32
    return %c0_i32, %c0_i32_0 : i32, i32
  }
  func.func @transform_7(%arg0: i32) -> (i32, i32) {
    %c0_i32 = arith.constant 0 : i32
    %c0_i32_0 = arith.constant 0 : i32
    %c0_i32_1 = arith.constant 0 : i32
    return %c0_i32, %c0_i32_0 : i32, i32
  }
  func.func @transform_8(%arg0: i32) -> (i32, i32) {
    %c0_i32 = arith.constant 0 : i32
    %c0_i32_0 = arith.constant 0 : i32
    %c0_i32_1 = arith.constant 0 : i32
    return %c0_i32, %c0_i32_0 : i32, i32
  }
  func.func @transform_9(%arg0: i32) -> (i32, i32) {
    %c0_i32 = arith.constant 0 : i32
    %c0_i32_0 = arith.constant 0 : i32
    return %c0_i32, %arg0 : i32, i32
  }
}

</mosaic_0001>

<bundles_post_ra>
// kernel: _forward_impl.1
= control target key start
LH: loop header
LB: loop body
LE: loop exit
PB: predicated region body
PF: predicated region fallthrough
CT: control target
= control target key end

     0   :  { %s6292_s0 = inlined_call_operand.vmem [shape: f32[2,1024], index: 0, kind: input, shape index: {}]   ;;  %s6293_s1 = inlined_call_operand.vmem [shape: f32[104,2], index: 1, kind: input, shape index: {}]   ;;  %s6294_s2 = inlined_call_operand.vmem [shape: f32[104,1], index: 2, kind: input, shape index: {}]   ;;  %s6295_s3 = inlined_call_operand.vmem [shape: f32[104,104], index: 3, kind: input, shape index: {}]   ;;  %s6296_s4 = inlined_call_operand.vmem [shape: f32[104,1], index: 4, kind: input, shape index: {}]   ;;  %s6297_s5 = inlined_call_operand.vmem [shape: f32[104,104], index: 5, kind: input, shape index: {}]   ;;  %s6298_s6 = inlined_call_operand.vmem [shape: f32[104,1], index: 6, kind: input, shape index: {}]   ;;  %s6299_s7 = inlined_call_operand.vmem [shape: f32[1,104], index: 7, kind: input, shape index: {}]   ;;  %s6300_s8 = inlined_call_operand.<no memory space> [shape: f32[1,1], index: 8, kind: input, shape index: {}]   ;;  %s6301_s9 = inlined_call_operand.hbm [shape: f32[1,1024], index: 9, kind: output, shape index: {}]  }
   0x1   :  { %v14_v0 = vstv %s6300_s8 }
   0x2   :  { %15 = vst [vmem:[#allocation2] sm:$0x1] %v14_v0 }
   0x3   :  { %v49_v1 = vld [vmem:[%s6293_s1 + $0x60] sm:$0xff]  ;;  %v48_v2 = vld [vmem:[%s6293_s1 + $0x58] sm:$0xff]  ;;  %v3671_v3 = vmov 1   ;;  %v3672_v4 = vmov 0   ;;  %v47_v5 = vld [vmem:[%s6293_s1 + $0x50] sm:$0xff]  ;;  %v117_v7 = vlaneseq }
   0x4   :  { %3008 = vset.pattern.permute.xlu0 %v3671_v3  ;;  %3009 = vset.pattern.permute.xlu1 %v3672_v4  ;;  %v44_v6 = vld [vmem:[%s6293_s1 + $0x38] sm:$0xff]  ;;  %v43_v8 = vld [vmem:[%s6293_s1 + $0x30] sm:$0xff]  ;;  %v637_v9 = vld [vmem:[%s6294_s2 + $0x60] sm:$0xff] }
   0x5   :  { %342 = vperm.xlu0 %3008, %v49_v1   ;;  %107 = vperm.xlu1 %3009, %v48_v2   ;;  %v3751_v10 = vshrl.u32 %v117_v7, 7  ;;  %v40_v11 = vld [vmem:[%s6293_s1 + $0x18] sm:$0xff] }
   0x7   :  { %6344 = vst [vmem:[#allocation6_spill] sm:$0xff] %v3751_v10  ;;  %v6304_v12 = vsub.s32 3, %v3751_v10  ;;  %v6303_v13 = vsub.s32 5, %v3751_v10  ;;  %v6302_v14 = vsub.s32 7, %v3751_v10 }
   0x9   :  { %3010 = vset.pattern.permute.xlu1 %v3671_v3  ;;  %334 = vperm.xlu0 %3008, %v47_v5  }
   0xa   :  { %338 = vperm.xlu1 %3010, %v48_v2  }
   0xd   :  { %322 = vperm.xlu0 %3008, %v44_v6  }
   0xe   :  { %3011 = vset.pattern.permute.xlu1 %v3672_v4 }
   0xf   :  { %102 = vperm.xlu1 %3011, %v47_v5  }
  0x11   :  { %318 = vperm.xlu0 %3008, %v43_v8  }
  0x13   :  { %700 = vperm.xlu1 %3011, %v637_v9  }
  0x14   :  { %16 = vsyncpa [#allocation4], 0  ;;  %v46_v15 = vld [vmem:[%s6293_s1 + $0x48] sm:$0xff]  ;;  %v39_v16 = vld [vmem:[%s6293_s1 + $0x10] sm:$0xff]  ;;  %v3772_v18 = vsub.s32 1, %v3751_v10  ;;  %v123_v58 = vsub.s32 2, %v3751_v10 }
  0x15   :  { %306 = vperm.xlu0 %3008, %v40_v11   ;;  %v3768_v17 = vld [vmem:[%s6292_s0 + $0x8] sm:$0xff]  ;;  %v636_v25 = vld [vmem:[%s6294_s2 + $0x58] sm:$0xff]  ;;  %v45_v26 = vld [vmem:[%s6293_s1 + $0x40] sm:$0xff]  ;;  %v127_v59 = vsub.s32 4, %v3751_v10  ;;  %v6305_v60 = vsub.s32 6, %v3751_v10  ;;  %vm1002_vm0 = vcmask 850944  }
  0x16   :  { %v368_v19 = vrot.slane %v3768_v17, %v6304_v12  ;;  %v372_v20 = vrot.slane %v3768_v17, %v6303_v13  ;;  %v376_v21 = vrot.slane %v3768_v17, %v6302_v14  ;;  %v635_v27 = vld [vmem:[%s6294_s2 + $0x50] sm:$0xff]  ;;  %v634_v28 = vld [vmem:[%s6294_s2 + $0x48] sm:$0xff]  ;;  %v41_v30 = vld [vmem:[%s6293_s1 + $0x20] sm:$0xff]  ;;  %v140_v63 = vrot.slane %v3768_v17, %v123_v58 }
  0x17   :  { %3012 = vset.pattern.permute.xlu1 %v3671_v3  ;;  %v42_v29 = vld [vmem:[%s6293_s1 + $0x28] sm:$0xff]  ;;  %v633_v31 = vld [vmem:[%s6294_s2 + $0x40] sm:$0xff]  ;;  %v631_v32 = vld [vmem:[%s6294_s2 + $0x30] sm:$0xff]  ;;  %v144_v0 = vrot.slane %v3768_v17, %v127_v59 }
  0x18   :  { %330 = vperm.xlu1 %3012, %v46_v15   ;;  %v3784_v22 = vrot.slane %v368_v19, %v3772_v18  ;;  %v3787_v23 = vrot.slane %v372_v20, %v3772_v18  ;;  %v3790_v24 = vrot.slane %v376_v21, %v3772_v18  ;;  %v38_v33 = vld [vmem:[%s6293_s1 + $0x8] sm:$0xff]  ;;  %v632_v34 = vld [vmem:[%s6294_s2 + $0x38] sm:$0xff]  ;;  %v37_v35 = vld [vmem:[%s6293_s1] sm:$0xff] }
  0x19   :  { %302 = vperm.xlu0 %3008, %v39_v16   ;;  %v627_v36 = vld [vmem:[%s6294_s2 + $0x10] sm:$0xff]  ;;  %v625_v37 = vld [vmem:[%s6294_s2] sm:$0xff]  ;;  %v935_v38 = vld [vmem:[%s6296_s4 + $0x58] sm:$0xff] }
  0x1a   :  { %6345 = vst [vmem:[#allocation7_spill] sm:$0xff] %v3784_v22  ;;  %6346 = vst [vmem:[#allocation8_spill] sm:$0xff] %v3787_v23  ;;  %v630_v39 = vld [vmem:[%s6294_s2 + $0x28] sm:$0xff]  ;;  %v931_v41 = vld [vmem:[%s6296_s4 + $0x38] sm:$0xff] }
  0x1b   :  { %6347 = vst [vmem:[#allocation9_spill] sm:$0xff] %v3790_v24  ;;  %v933_v40 = vld [vmem:[%s6296_s4 + $0x48] sm:$0xff]  ;;  %v629_v42 = vld [vmem:[%s6294_s2 + $0x20] sm:$0xff]  ;;  %v927_v44 = vld [vmem:[%s6296_s4 + $0x18] sm:$0xff] }
  0x1c   :  { %3013 = vset.pattern.permute.xlu1 %v3672_v4  ;;  %v929_v43 = vld [vmem:[%s6296_s4 + $0x28] sm:$0xff]  ;;  %v628_v45 = vld [vmem:[%s6294_s2 + $0x18] sm:$0xff]  ;;  %v1743_v47 = vld [vmem:[%s6298_s6 + $0x60] sm:$0xff] }
  0x1d   :  { %695 = vperm.xlu1 %3013, %v636_v25   ;;  %3020 = vset.pattern.permute.xlu0 %v3672_v4  ;;  %v925_v46 = vld [vmem:[%s6296_s4 + $0x8] sm:$0xff]  ;;  %v1741_v48 = vld [vmem:[%s6298_s6 + $0x50] sm:$0xff]  ;;  %v1739_v50 = vld [vmem:[%s6298_s6 + $0x40] sm:$0xff] }
  0x1e   :  { %112 = vperm.xlu0 %3020, %v49_v1   ;;  %v626_v49 = vld [vmem:[%s6294_s2 + $0x8] sm:$0xff]  ;;  %v936_v51 = vld [vmem:[%s6296_s4 + $0x60] sm:$0xff]  ;;  %v1737_v52 = vld [vmem:[%s6298_s6 + $0x30] sm:$0xff]  ;;  %v148_v1 = vrot.slane %v3768_v17, %v6305_v60 }
  0x1f   :  { %v934_v53 = vld [vmem:[%s6296_s4 + $0x50] sm:$0xff]  ;;  %v1735_v54 = vld [vmem:[%s6298_s6 + $0x20] sm:$0xff] }
  0x20   :  { %v932_v55 = vld [vmem:[%s6296_s4 + $0x40] sm:$0xff]  ;;  %v1733_v56 = vld [vmem:[%s6298_s6 + $0x10] sm:$0xff] }
  0x21   :  { %3014 = vset.pattern.permute.xlu1 %v3671_v3  ;;  %v930_v57 = vld [vmem:[%s6296_s4 + $0x30] sm:$0xff]  ;;  %v1731_v61 = vld [vmem:[%s6298_s6] sm:$0xff] }
  0x22   :  { %326 = vperm.xlu1 %3014, %v45_v26   ;;  %97 = vperm.xlu0 %3020, %v46_v15   ;;  %v928_v62 = vld [vmem:[%s6296_s4 + $0x20] sm:$0xff]  ;;  %v926_v2 = vld [vmem:[%s6296_s4 + $0x10] sm:$0xff] }
  0x26   :  { %3015 = vset.pattern.permute.xlu1 %v3672_v4  ;;  %92 = vperm.xlu0 %3020, %v45_v26  }
  0x27   :  { %87 = vperm.xlu1 %3015, %v44_v6  }
  0x2a   :  { %690 = vperm.xlu0 %3020, %v635_v27  }
  0x2b   :  { %685 = vperm.xlu1 %3015, %v634_v28  }
  0x2e   :  { %77 = vperm.xlu0 %3020, %v42_v29  }
  0x2f   :  { %82 = vperm.xlu1 %3015, %v43_v8  }
  0x32   :  { %72 = vperm.xlu0 %3020, %v41_v30  }
  0x33   :  { %680 = vperm.xlu1 %3015, %v633_v31  }
  0x36   :  { %670 = vperm.xlu0 %3020, %v631_v32  }
  0x37   :  { %3016 = vset.pattern.permute.xlu1 %v3671_v3 }
  0x38   :  { %314 = vperm.xlu1 %3016, %v42_v29   ;;  %v1742_v29 = vld [vmem:[%s6298_s6 + $0x58] sm:$0xff] }
  0x3a   :  { %57 = vperm.xlu0 %3020, %v38_v33  }
  0x3c   :  { %3017 = vset.pattern.permute.xlu1 %v3672_v4 }
  0x3d   :  { %675 = vperm.xlu1 %3017, %v632_v34  }
  0x3e   :  { %52 = vperm.xlu0 %3020, %v37_v35  }
  0x41   :  { %3018 = vset.pattern.permute.xlu1 %v3671_v3 }
  0x42   :  { %310 = vperm.xlu1 %3018, %v41_v30   ;;  %650 = vperm.xlu0 %3020, %v627_v36  }
  0x46   :  { %3019 = vset.pattern.permute.xlu1 %v3672_v4  ;;  %640 = vperm.xlu0 %3020, %v625_v37  }
  0x47   :  { %67 = vperm.xlu1 %3019, %v40_v11   ;;  %v924_v11 = vld [vmem:[%s6296_s4] sm:$0xff] }
  0x4a   :  { %994 = vperm.xlu0 %3020, %v935_v38  }
  0x4b   :  { %665 = vperm.xlu1 %3019, %v630_v39  }
  0x4e   :  { %984 = vperm.xlu0 %3020, %v933_v40   ;;  %v1740_v40 = vld [vmem:[%s6298_s6 + $0x48] sm:$0xff] }
  0x4f   :  { %62 = vperm.xlu1 %3019, %v39_v16  }
  0x52   :  { %974 = vperm.xlu0 %3020, %v931_v41  }
  0x53   :  { %660 = vperm.xlu1 %3019, %v629_v42  }
  0x56   :  { %964 = vperm.xlu0 %3020, %v929_v43  }
  0x57   :  { %3021 = vset.pattern.permute.xlu1 %v3671_v3 }
  0x58   :  { %298 = vperm.xlu1 %3021, %v38_v33  }
  0x5a   :  { %954 = vperm.xlu0 %3020, %v927_v44  }
  0x5c   :  { %3022 = vset.pattern.permute.xlu1 %v3672_v4 }
  0x5d   :  { %655 = vperm.xlu1 %3022, %v628_v45  }
  0x5e   :  { %944 = vperm.xlu0 %3020, %v925_v46  }
  0x61   :  { %3023 = vset.pattern.permute.xlu1 %v3671_v3  ;;  %v3925_v3 = vsub.s32 0, %v3751_v10 }
  0x62   :  { %294 = vperm.xlu1 %3023, %v37_v35   ;;  %1806 = vperm.xlu0 %3020, %v1743_v47  }
  0x63   :  { %6348 = vst [vmem:[#allocation10_spill] sm:$0xff] %v3925_v3  ;;  %v3930_v5 = vrot.slane %v140_v63, %v3925_v3  ;;  %v3933_v6 = vrot.slane %v144_v0, %v3925_v3  ;;  %v3936_v7 = vrot.slane %v148_v1, %v3925_v3  ;;  %v136_v30 = vrot.slane %v3768_v17, %v3925_v3 }
  0x65   :  { %v4001_v41 = vrot.slane %v136_v30, %v3925_v3 }
  0x66   :  { %3024 = vset.pattern.permute.xlu1 %v3672_v4  ;;  %1796 = vperm.xlu0 %3020, %v1741_v48   ;;  %v364_v4 = vrot.slane %v3768_v17, %v3772_v18 }
  0x67   :  { %645 = vperm.xlu1 %3024, %v626_v49  }
  0x68   :  { %v3946_v15 = vrot.slane %v364_v4, %v3772_v18 }
  0x6a   :  { %1786 = vperm.xlu0 %3020, %v1739_v50   ;;  %6349 = vst [vmem:[#allocation11_spill] sm:$0xff] %v3946_v15 }
  0x6b   :  { %999 = vperm.xlu1 %3024, %v936_v51   ;;  %v1738_v51 = vld [vmem:[%s6298_s6 + $0x38] sm:$0xff] }
  0x6e   :  { %1776 = vperm.xlu0 %3020, %v1737_v52  }
  0x6f   :  { %989 = vperm.xlu1 %3024, %v934_v53  }
  0x72   :  { %1766 = vperm.xlu0 %3020, %v1735_v54  }
  0x73   :  { %979 = vperm.xlu1 %3024, %v932_v55  }
  0x76   :  { %1756 = vperm.xlu0 %3020, %v1733_v56  }
  0x77   :  { %969 = vperm.xlu1 %3024, %v930_v57  }
  0x7a   :  { %1746 = vperm.xlu0 %3020, %v1731_v61  }
  0x7b   :  { %959 = vperm.xlu1 %3024, %v928_v62   ;;  %v1736_v62 = vld [vmem:[%s6298_s6 + $0x28] sm:$0xff] }
  0x7f   :  { %949 = vperm.xlu1 %3024, %v926_v2  }
  0x80   :  { %v3938_v8 = vpop.permute.xlu1 %107  ;;  %v3940_v9 = vpop.permute.xlu0 %342 }
  0x81   :  { %v282_v16 = vmul.f32 %v3930_v5, %v3938_v8  ;;  %v283_v19 = vmul.f32 %v3933_v6, %v3938_v8  ;;  %v284_v20 = vmul.f32 %v3936_v7, %v3938_v8  ;;  %v3956_v21 = vmul.f32 %v3946_v15, %v3940_v9 }
  0x82   :  { %v3960_v25 = vmul.f32 %v3784_v22, %v3940_v9  ;;  %v3964_v26 = vmul.f32 %v3787_v23, %v3940_v9  ;;  %v3968_v27 = vmul.f32 %v3790_v24, %v3940_v9  ;;  %v281_v52 = vmul.f32 %v4001_v41, %v3938_v8 }
  0x83   :  { %939 = vperm.xlu1 %3024, %v924_v11  }
  0x84   :  { %v3970_v28 = vpop.permute.xlu0 %334 }
  0x85   :  { %v3977_v31 = vpop.permute.xlu1 %338  ;;  %v501_v36 = vmul.f32 %v3946_v15, %v3970_v28  ;;  %v502_v17 = vmul.f32 %v3784_v22, %v3970_v28  ;;  %v503_v37 = vmul.f32 %v3787_v23, %v3970_v28  ;;  %v504_v38 = vmul.f32 %v3790_v24, %v3970_v28 }
  0x86   :  { %v509_v32 = vmul.f32 %v3946_v15, %v3977_v31  ;;  %v510_v33 = vmul.f32 %v3784_v22, %v3977_v31  ;;  %v511_v34 = vmul.f32 %v3787_v23, %v3977_v31  ;;  %v512_v35 = vmul.f32 %v3790_v24, %v3977_v31 }
  0x87   :  { %1801 = vperm.xlu1 %3024, %v1742_v29  }
  0x88   :  { %v3995_v39 = vpop.permute.xlu0 %322  ;;  %v613_v63 = vadd.f32 %v509_v32, %v281_v52  ;;  %v614_v0 = vadd.f32 %v510_v33, %v282_v16  ;;  %v615_v1 = vadd.f32 %v511_v34, %v283_v19  ;;  %v616_v2 = vadd.f32 %v512_v35, %v284_v20  ;;  %v35_v16 = vld [vmem:[%s6292_s0] sm:$0xff]  ;;  %v1734_v33 = vld [vmem:[%s6298_s6 + $0x18] sm:$0xff] }
  0x89   :  { %v4005_v42 = vmul.f32 %v3946_v15, %v3995_v39  ;;  %v4009_v43 = vmul.f32 %v3784_v22, %v3995_v39  ;;  %v4013_v44 = vmul.f32 %v3787_v23, %v3995_v39  ;;  %v4017_v45 = vmul.f32 %v3790_v24, %v3995_v39 }
  0x8a   :  { %v4019_v46 = vpop.permute.xlu1 %102  ;;  %v120_v52 = vrot.slane %v35_v16, %v3925_v3  ;;  %v128_v14 = vrot.slane %v35_v16, %v127_v59  ;;  %v1732_v59 = vld [vmem:[%s6298_s6 + $0x8] sm:$0xff] }
  0x8b   :  { %6350 = vst [vmem:[#allocation12_spill] sm:$0xff] %v4005_v42  ;;  %6351 = vst [vmem:[#allocation13_spill] sm:$0xff] %v4009_v43  ;;  %1791 = vperm.xlu1 %3024, %v1740_v40   ;;  %v274_v47 = vmul.f32 %v3930_v5, %v4019_v46  ;;  %v275_v48 = vmul.f32 %v3933_v6, %v4019_v46  ;;  %v276_v49 = vmul.f32 %v3936_v7, %v4019_v46 }
  0x8c   :  { %6352 = vst [vmem:[#allocation14_spill] sm:$0xff] %v4013_v44  ;;  %6353 = vst [vmem:[#allocation15_spill] sm:$0xff] %v4017_v45  ;;  %v4027_v50 = vpop.permute.xlu0 %318  ;;  %v273_v20 = vmul.f32 %v4001_v41, %v4019_v46 }
  0x8d   :  { %v4036_v53 = vmul.f32 %v3946_v15, %v4027_v50  ;;  %v4040_v54 = vmul.f32 %v3784_v22, %v4027_v50  ;;  %v4044_v55 = vmul.f32 %v3787_v23, %v4027_v50  ;;  %v4048_v56 = vmul.f32 %v3790_v24, %v4027_v50 }
  0x8e   :  { %v4050_v57 = vpop.permute.xlu1 %700 }
  0x8f   :  { %6354 = vst [vmem:[#allocation16_spill] sm:$0xff] %v4036_v53  ;;  %6355 = vst [vmem:[#allocation17_spill] sm:$0xff] %v4040_v54  ;;  %1781 = vperm.xlu1 %3024, %v1738_v51  }
  0x90   :  { %6356 = vst [vmem:[#allocation18_spill] sm:$0xff] %v4044_v55  ;;  %6357 = vst [vmem:[#allocation19_spill] sm:$0xff] %v4048_v56  ;;  %v4052_v61 = vpop.permute.xlu0 %306 }
  0x91   :  { %6358 = vst [vmem:[#allocation20_spill] sm:$0xff] %v4050_v57  ;;  %6359 = vst [vmem:[#allocation21_spill] sm:$0xff] %v4052_v61  ;;  %v4059_v4 = vmul.f32 %v3946_v15, %v4052_v61  ;;  %v4063_v11 = vmul.f32 %v3784_v22, %v4052_v61  ;;  %v4067_v29 = vmul.f32 %v3787_v23, %v4052_v61 }
  0x92   :  { %v4071_v30 = vmul.f32 %v3790_v24, %v4052_v61  ;;  %v6369_v61 = vsub.s32 6, %v3751_v10 }
  0x93   :  { %6360 = vst [vmem:[#allocation22_spill] sm:$0xff] %v4059_v4  ;;  %6361 = vst [vmem:[#allocation23_spill] sm:$0xff] %v4063_v11  ;;  %v4076_v19 = vpop.permute.xlu1 %330  ;;  %1771 = vperm.xlu1 %3024, %v1736_v62   ;;  %v124_v62 = vrot.slane %v35_v16, %v123_v58  ;;  %v4131_v11 = vadd.f32 %v503_v37, %v275_v48  ;;  %v4133_v4 = vadd.f32 %v504_v38, %v276_v49 }
  0x94   :  { %6362 = vst [vmem:[#allocation24_spill] sm:$0xff] %v4067_v29  ;;  %6363 = vst [vmem:[#allocation25_spill] sm:$0xff] %v4071_v30  ;;  %v4080_v32 = vpop.permute.xlu0 %302  ;;  %v4087_v34 = vmul.f32 %v3946_v15, %v4076_v19  ;;  %v4091_v35 = vmul.f32 %v3784_v22, %v4076_v19  ;;  %v4095_v40 = vmul.f32 %v3787_v23, %v4076_v19 }
  0x95   :  { %6364 = vst [vmem:[#allocation26_spill] sm:$0xff] %v4080_v32  ;;  %v4099_v51 = vmul.f32 %v3790_v24, %v4076_v19  ;;  %v4108_v13 = vmul.f32 %v3946_v15, %v4080_v32  ;;  %v4112_v12 = vmul.f32 %v3784_v22, %v4080_v32  ;;  %v4116_v60 = vmul.f32 %v3787_v23, %v4080_v32 }
  0x96   :  { %v4120_v30 = vmul.f32 %v3790_v24, %v4080_v32  ;;  %v4129_v29 = vadd.f32 %v502_v17, %v274_v47  ;;  %v348_v32 = vrot.slane %v35_v16, %v3772_v18  ;;  %v6376_v47 = vsub.s32 7, %v3751_v10 }
  0x97   :  { %6365 = vst [vmem:[#allocation27_spill] sm:$0xff] %v4108_v13  ;;  %6366 = vst [vmem:[#allocation28_spill] sm:$0xff] %v4112_v12  ;;  %1761 = vperm.xlu1 %3024, %v1734_v33   ;;  %v4127_v13 = vadd.f32 %v501_v36, %v273_v20  ;;  %v6370_v33 = vsub.s32 3, %v3751_v10  ;;  %v6371_v12 = vsub.s32 5, %v3751_v10 }
  0x98   :  { %6367 = vst [vmem:[#allocation29_spill] sm:$0xff] %v4116_v60  ;;  %6368 = vst [vmem:[#allocation30_spill] sm:$0xff] %v4120_v30  ;;  %v4122_v58 = vpop.permute.xlu1 %695  ;;  %v132_v60 = vrot.slane %v35_v16, %v6369_v61  ;;  %v360_v48 = vrot.slane %v35_v16, %v6376_v47 }
  0x99   :  { %v352_v30 = vrot.slane %v35_v16, %v6370_v33  ;;  %v356_v45 = vrot.slane %v35_v16, %v6371_v12  ;;  %v4142_v44 = vpop.permute.xlu0 %112  ;;  %v4145_v36 = vadd.f32 %v4122_v58, %v613_v63  ;;  %v4148_v17 = vadd.f32 %v4122_v58, %v614_v0  ;;  %v2525_v16 = vld [vmem:[#allocation2] sm:$0x1] }
  0x9a   :  { %v4151_v37 = vadd.f32 %v4122_v58, %v615_v1  ;;  %v4154_v38 = vadd.f32 %v4122_v58, %v616_v2  ;;  %v289_v12 = vmul.f32 %v4001_v41, %v4142_v44  ;;  %v290_v49 = vmul.f32 %v3930_v5, %v4142_v44 }
  0x9b   :  { %6372 = vst [vmem:[#allocation31_spill] sm:$0xff] %v4145_v36  ;;  %6373 = vst [vmem:[#allocation32_spill] sm:$0xff] %v4148_v17  ;;  %v291_v61 = vmul.f32 %v3933_v6, %v4142_v44  ;;  %1751 = vperm.xlu1 %3024, %v1732_v59   ;;  %v4165_v63 = vrot.slane %v120_v52, %v3925_v3  ;;  %v4168_v0 = vrot.slane %v124_v62, %v3925_v3 }
  0x9c   :  { %6374 = vst [vmem:[#allocation33_spill] sm:$0xff] %v4151_v37  ;;  %6375 = vst [vmem:[#allocation34_spill] sm:$0xff] %v4154_v38  ;;  %v4171_v1 = vrot.slane %v128_v14, %v3925_v3  ;;  %v292_v2 = vmul.f32 %v3936_v7, %v4142_v44  ;;  %v4176_v20 = vrot.slane %v132_v60, %v3925_v3 }
  0x9d   :  { %v621_v33 = vadd.f32 %v3956_v21, %v289_v12  ;;  %v622_v59 = vadd.f32 %v3960_v25, %v290_v49  ;;  %v623_v52 = vadd.f32 %v3964_v26, %v291_v61  ;;  %v4181_v47 = vpop.permute.xlu0 %97  ;;  %v4184_v62 = vrot.slane %v348_v32, %v3772_v18  ;;  %v4193_v3 = vpop.permute.xlu1 %326 }
  0x9e   :  { %v4187_v14 = vrot.slane %v352_v30, %v3772_v18  ;;  %v4190_v10 = vrot.slane %v356_v45, %v3772_v18  ;;  %v624_v60 = vadd.f32 %v3968_v27, %v292_v2  ;;  %v4196_v21 = vrot.slane %v360_v48, %v3772_v18 }
  0x9f   :  { %v4199_v25 = vadd.f32 %v4050_v57, %v621_v33  ;;  %v4202_v26 = vadd.f32 %v4050_v57, %v622_v59  ;;  %v4205_v32 = vadd.f32 %v4050_v57, %v623_v52  ;;  %2528 = vperm.xlu1 %3024, %v2525_v16   ;;  %v277_v45 = vmul.f32 %v4165_v63, %v3938_v8 }
  0xa0   :  { %v278_v27 = vmul.f32 %v4168_v0, %v3938_v8  ;;  %v279_v18 = vmul.f32 %v4171_v1, %v3938_v8  ;;  %v4214_v30 = vadd.f32 %v4050_v57, %v624_v60  ;;  %v280_v48 = vmul.f32 %v4176_v20, %v3938_v8 }
  0xa1   :  { %6377 = vst [vmem:[#allocation35_spill] sm:$0xff] %v4199_v25  ;;  %6378 = vst [vmem:[#allocation36_spill] sm:$0xff] %v4202_v26  ;;  %v4220_v12 = vmul.f32 %v3946_v15, %v4193_v3  ;;  %v4224_v49 = vmul.f32 %v3784_v22, %v4193_v3  ;;  %v4228_v61 = vmul.f32 %v3787_v23, %v4193_v3  ;;  %v4230_v2 = vpop.permute.xlu0 %92 }
  0xa2   :  { %6379 = vst [vmem:[#allocation37_spill] sm:$0xff] %v4205_v32  ;;  %6380 = vst [vmem:[#allocation38_spill] sm:$0xff] %v4214_v30  ;;  %v4234_v16 = vmul.f32 %v3790_v24, %v4193_v3  ;;  %v4238_v8 = vmul.f32 %v4187_v14, %v3940_v9  ;;  %v4242_v33 = vmul.f32 %v4196_v21, %v3940_v9  ;;  %v4266_v17 = vpop.permute.xlu1 %87 }
  0xa3   :  { %v4246_v59 = vmul.f32 %v4184_v62, %v3940_v9  ;;  %v497_v52 = vmul.f32 %v4184_v62, %v3970_v28  ;;  %v498_v60 = vmul.f32 %v4187_v14, %v3970_v28  ;;  %v499_v30 = vmul.f32 %v4190_v10, %v3970_v28 }
  0xa4   :  { %6381 = vst [vmem:[#allocation39_spill] sm:$0xff] %v4242_v33  ;;  %v4256_v32 = vmul.f32 %v4190_v10, %v3940_v9  ;;  %v500_v26 = vmul.f32 %v4196_v21, %v3970_v28  ;;  %v266_v25 = vmul.f32 %v3930_v5, %v4181_v47  ;;  %v267_v38 = vmul.f32 %v3933_v6, %v4181_v47 }
  0xa5   :  { %6382 = vst [vmem:[#allocation40_spill] sm:$0xff] %v4246_v59  ;;  %v268_v37 = vmul.f32 %v3936_v7, %v4181_v47  ;;  %v505_v36 = vmul.f32 %v4184_v62, %v3977_v31  ;;  %v506_v9 = vmul.f32 %v4187_v14, %v3977_v31  ;;  %v507_v28 = vmul.f32 %v4190_v10, %v3977_v31 }
  0xa6   :  { %6383 = vst [vmem:[#allocation41_spill] sm:$0xff] %v4256_v32  ;;  %v508_v43 = vmul.f32 %v4196_v21, %v3977_v31  ;;  %v4278_v42 = vmul.f32 %v4184_v62, %v3995_v39  ;;  %v4282_v24 = vmul.f32 %v4187_v14, %v3995_v39  ;;  %v4286_v23 = vmul.f32 %v4190_v10, %v3995_v39 }
  0xa7   :  { %v4290_v22 = vmul.f32 %v3930_v5, %v4230_v2  ;;  %v4294_v15 = vmul.f32 %v4196_v21, %v3995_v39  ;;  %v269_v31 = vmul.f32 %v4165_v63, %v4019_v46  ;;  %v270_v56 = vmul.f32 %v4168_v0, %v4019_v46 }
  0xa8   :  { %6384 = vst [vmem:[#allocation42_spill] sm:$0xff] %v4278_v42  ;;  %6385 = vst [vmem:[#allocation43_spill] sm:$0xff] %v4282_v24  ;;  %v4300_v42 = vmul.f32 %v3933_v6, %v4230_v2  ;;  %v4304_v24 = vmul.f32 %v3936_v7, %v4230_v2  ;;  %v271_v39 = vmul.f32 %v4171_v1, %v4019_v46 }
  0xa9   :  { %6386 = vst [vmem:[#allocation44_spill] sm:$0xff] %v4286_v23  ;;  %6387 = vst [vmem:[#allocation45_spill] sm:$0xff] %v4294_v15  ;;  %v4306_v23 = vpop.permute.xlu0 %690  ;;  %v272_v15 = vmul.f32 %v4176_v20, %v4019_v46  ;;  %v4316_v55 = vmul.f32 %v3930_v5, %v4266_v17  ;;  %v609_v54 = vadd.f32 %v505_v36, %v277_v45  ;;  %v4340_v45 = vpop.permute.xlu1 %685 }
  0xaa   :  { %v265_v53 = vmul.f32 %v4001_v41, %v4181_v47  ;;  %v4322_v57 = vmul.f32 %v3933_v6, %v4266_v17  ;;  %v4326_v32 = vmul.f32 %v3936_v7, %v4266_v17  ;;  %v4330_v59 = vmul.f32 %v4184_v62, %v4027_v50 }
  0xab   :  { %6388 = vst [vmem:[#allocation46_spill] sm:$0xff] %v4316_v55  ;;  %v610_v46 = vadd.f32 %v506_v9, %v278_v27  ;;  %v4334_v55 = vadd.f32 %v4306_v23, %v4127_v13  ;;  %v4338_v36 = vadd.f32 %v4306_v23, %v4129_v29  ;;  %v791_v33 = vadd.f32 %v4122_v58, %v609_v54 }
  0xac   :  { %6389 = vst [vmem:[#allocation47_spill] sm:$0xff] %v4322_v57  ;;  %6390 = vst [vmem:[#allocation48_spill] sm:$0xff] %v4326_v32  ;;  %v611_v57 = vadd.f32 %v507_v28, %v279_v18  ;;  %v4345_v32 = vadd.f32 %v4306_v23, %v4131_v11  ;;  %v4349_v27 = vadd.f32 %v4306_v23, %v4133_v4 }
  0xad   :  { %6391 = vst [vmem:[#allocation49_spill] sm:$0xff] %v4334_v55  ;;  %6392 = vst [vmem:[#allocation50_spill] sm:$0xff] %v4338_v36  ;;  %v4353_v13 = vmul.f32 %v4187_v14, %v4027_v50  ;;  %v612_v9 = vadd.f32 %v508_v43, %v280_v48  ;;  %v792_v29 = vadd.f32 %v4122_v58, %v610_v46  ;;  %3025 = vtanh.f32 %v791_v33 }
  0xae   :  { %6393 = vst [vmem:[#allocation51_spill] sm:$0xff] %v4345_v32  ;;  %6394 = vst [vmem:[#allocation52_spill] sm:$0xff] %v4349_v27  ;;  %v601_v36 = vadd.f32 %v497_v52, %v269_v31  ;;  %v793_v18 = vadd.f32 %v4122_v58, %v611_v57  ;;  %v597_v54 = vadd.f32 %v4087_v34, %v265_v53  ;;  %v4376_v34 = vpop.permute.xlu1 %82 }
  0xaf   :  { %v598_v28 = vadd.f32 %v4091_v35, %v266_v25  ;;  %v599_v11 = vadd.f32 %v4095_v40, %v267_v38  ;;  %v794_v32 = vadd.f32 %v4122_v58, %v612_v9  ;;  %v602_v4 = vadd.f32 %v498_v60, %v270_v56 }
  0xb0   :  { %v603_v27 = vadd.f32 %v499_v30, %v271_v39  ;;  %v600_v55 = vadd.f32 %v4099_v51, %v268_v37  ;;  %v489_v43 = vmul.f32 %v4184_v62, %v4076_v19  ;;  %v604_v48 = vadd.f32 %v500_v26, %v272_v15  ;;  %v4384_v51 = vpop.permute.xlu0 %77 }
  0xb1   :  { %v4365_v52 = vadd.f32 %v4340_v45, %v597_v54  ;;  %3027 = vtanh.f32 %v792_v29  ;;  %v4368_v53 = vadd.f32 %v4340_v45, %v598_v28  ;;  %v4371_v57 = vadd.f32 %v4340_v45, %v599_v11 }
  0xb2   :  { %v4374_v56 = vadd.f32 %v4340_v45, %v600_v55  ;;  %v490_v35 = vmul.f32 %v4187_v14, %v4076_v19  ;;  %v491_v15 = vmul.f32 %v4190_v10, %v4076_v19  ;;  %v492_v40 = vmul.f32 %v4196_v21, %v4076_v19  ;;  %v4435_v28 = vpop.permute.xlu1 %680 }
  0xb3   :  { %6395 = vst [vmem:[#allocation53_spill] sm:$0xff] %v4365_v52  ;;  %6396 = vst [vmem:[#allocation54_spill] sm:$0xff] %v4368_v53  ;;  %3029 = vtanh.f32 %v793_v18  ;;  %v4388_v58 = vmul.f32 %v3930_v5, %v4384_v51  ;;  %v286_v55 = vmul.f32 %v4168_v0, %v4142_v44  ;;  %v288_v37 = vmul.f32 %v4176_v20, %v4142_v44 }
  0xb4   :  { %6397 = vst [vmem:[#allocation55_spill] sm:$0xff] %v4371_v57  ;;  %6398 = vst [vmem:[#allocation56_spill] sm:$0xff] %v4374_v56  ;;  %3031 = vtanh.f32 %v794_v32  ;;  %v4396_v38 = vmul.f32 %v4184_v62, %v4193_v3  ;;  %v4400_v19 = vmul.f32 %v4187_v14, %v4193_v3  ;;  %v4404_v25 = vmul.f32 %v3933_v6, %v4384_v51  ;;  %v4444_v57 = vpop.permute.xlu0 %72 }
  0xb5   :  { %v4408_v26 = vmul.f32 %v3936_v7, %v4384_v51  ;;  %v4412_v32 = vmul.f32 %v4190_v10, %v4193_v3  ;;  %v261_v30 = vmul.f32 %v4165_v63, %v4181_v47  ;;  %v262_v33 = vmul.f32 %v4168_v0, %v4181_v47  ;;  %6401 = vst [vmem:[#allocation59_spill] sm:$0xff] %v4444_v57 }
  0xb6   :  { %6399 = vst [vmem:[#allocation57_spill] sm:$0xff] %v4404_v25  ;;  %v783_v60 = vadd.f32 %v4306_v23, %v601_v36  ;;  %v263_v31 = vmul.f32 %v4171_v1, %v4181_v47  ;;  %v784_v39 = vadd.f32 %v4306_v23, %v602_v4  ;;  %v242_v46 = vmul.f32 %v3930_v5, %v4376_v34 }
  0xb7   :  { %6400 = vst [vmem:[#allocation58_spill] sm:$0xff] %v4408_v26  ;;  %v4426_v9 = vmul.f32 %v3933_v6, %v4376_v34  ;;  %v264_v29 = vmul.f32 %v4176_v20, %v4181_v47  ;;  %v257_v18 = vmul.f32 %v4001_v41, %v4230_v2  ;;  %v785_v36 = vadd.f32 %v4306_v23, %v603_v27 }
  0xb8   :  { %v244_v54 = vmul.f32 %v3936_v7, %v4376_v34  ;;  %v484_v11 = vmul.f32 %v4196_v21, %v4193_v3  ;;  %v253_v4 = vmul.f32 %v4165_v63, %v4230_v2  ;;  %v254_v56 = vmul.f32 %v4168_v0, %v4230_v2 }
  0xb9   :  { %v786_v47 = vadd.f32 %v4306_v23, %v604_v48  ;;  %3033 = vtanh.f32 %v783_v60  ;;  %v4448_v27 = vmul.f32 %v3930_v5, %v4444_v57  ;;  %v4452_v53 = vmul.f32 %v3933_v6, %v4444_v57 }
  0xba   :  { %v4456_v3 = vmul.f32 %v3936_v7, %v4444_v57  ;;  %3035 = vtanh.f32 %v784_v39  ;;  %v593_v52 = vadd.f32 %v489_v43, %v261_v30  ;;  %v594_v26 = vadd.f32 %v490_v35, %v262_v33  ;;  %v4466_v39 = vpop.eup %3025 }
  0xbb   :  { %6402 = vst [vmem:[#allocation60_spill] sm:$0xff] %v4448_v27  ;;  %6403 = vst [vmem:[#allocation61_spill] sm:$0xff] %v4452_v53  ;;  %v595_v25 = vadd.f32 %v491_v15, %v263_v31  ;;  %3037 = vtanh.f32 %v785_v36  ;;  %v596_v23 = vadd.f32 %v492_v40, %v264_v29  ;;  %v589_v48 = vadd.f32 %v4220_v12, %v257_v18  ;;  %v6411_v18 = vld [vmem:[#allocation41_spill] sm:$0xff] }
  0xbc   :  { %6404 = vst [vmem:[#allocation62_spill] sm:$0xff] %v4456_v3  ;;  %v590_v60 = vadd.f32 %v4224_v49, %v4290_v22  ;;  %3039 = vtanh.f32 %v786_v47  ;;  %v775_v27 = vadd.f32 %v4340_v45, %v593_v52  ;;  %v591_v53 = vadd.f32 %v4228_v61, %v4300_v42  ;;  %v4476_v49 = vpop.permute.xlu1 %314  ;;  %v6412_v47 = vld [vmem:[#allocation20_spill] sm:$0xff] }
  0xbd   :  { %v592_v3 = vadd.f32 %v4234_v16, %v4304_v24  ;;  %v776_v43 = vadd.f32 %v4340_v45, %v594_v26  ;;  %v777_v35 = vadd.f32 %v4340_v45, %v595_v25  ;;  %v4471_v12 = vadd.f32 %v4435_v28, %v589_v48  ;;  %v6409_v25 = vld [vmem:[#allocation39_spill] sm:$0xff] }
  0xbe   :  { %v4474_v22 = vadd.f32 %v4435_v28, %v590_v60  ;;  %v4478_v52 = vpop.eup %3027  ;;  %v241_v42 = vmul.f32 %v4001_v41, %v4376_v34  ;;  %v4483_v24 = vadd.f32 %v4435_v28, %v591_v53  ;;  %v618_v16 = vadd.f32 %v4238_v8, %v286_v55  ;;  %v4515_v60 = vpop.permute.xlu0 %670 }
  0xbf   :  { %6405 = vst [vmem:[#allocation63_spill] sm:$0xff] %v4471_v12  ;;  %v4486_v61 = vadd.f32 %v4435_v28, %v592_v3  ;;  %v778_v40 = vadd.f32 %v4340_v45, %v596_v23  ;;  %v620_v26 = vadd.f32 %v6409_v25, %v288_v37  ;;  %v285_v30 = vmul.f32 %v4165_v63, %v4142_v44  ;;  %v6410_v37 = vld [vmem:[#allocation40_spill] sm:$0xff]  ;;  %v6432_v12 = vld [vmem:[#allocation47_spill] sm:$0xff] }
  0xc0   :  { %6406 = vst [vmem:[#allocation64_spill] sm:$0xff] %v4474_v22  ;;  %6407 = vst [vmem:[#allocation65_spill] sm:$0xff] %v4483_v24  ;;  %v4489_v15 = vpop.eup %3029  ;;  %v287_v33 = vmul.f32 %v4171_v1, %v4142_v44  ;;  %v255_v53 = vmul.f32 %v4171_v1, %v4230_v2  ;;  %v256_v8 = vmul.f32 %v4176_v20, %v4230_v2  ;;  %3041 = vtanh.f32 %v775_v27  ;;  %v6413_v23 = vld [vmem:[#allocation16_spill] sm:$0xff]  ;;  %v6430_v22 = vld [vmem:[#allocation46_spill] sm:$0xff] }
  0xc1   :  { %6408 = vst [vmem:[#allocation66_spill] sm:$0xff] %v4486_v61  ;;  %v4497_v31 = vpop.eup %3031  ;;  %v245_v55 = vmul.f32 %v4165_v63, %v4266_v17  ;;  %v246_v45 = vmul.f32 %v4168_v0, %v4266_v17  ;;  %3043 = vtanh.f32 %v776_v43  ;;  %v617_v29 = vadd.f32 %v6410_v37, %v285_v30  ;;  %v6414_v43 = vld [vmem:[#allocation17_spill] sm:$0xff]  ;;  %v4518_v30 = vpop.permute.xlu1 %675  ;;  %v6415_v37 = vld [vmem:[#allocation18_spill] sm:$0xff]  ;;  %v6429_v61 = vld [vmem:[#allocation12_spill] sm:$0xff] }
  0xc2   :  { %v619_v44 = vadd.f32 %v6411_v18, %v287_v33  ;;  %3045 = vtanh.f32 %v777_v35  ;;  %v238_v36 = vmul.f32 %v4168_v0, %v4376_v34  ;;  %v800_v3 = vadd.f32 %v6412_v47, %v618_v16  ;;  %v6416_v18 = vld [vmem:[#allocation19_spill] sm:$0xff] }
  0xc3   :  { %v573_v2 = vadd.f32 %v6413_v23, %v241_v42  ;;  %3047 = vtanh.f32 %v778_v40  ;;  %v585_v48 = vadd.f32 %v4396_v38, %v253_v4  ;;  %v802_v27 = vadd.f32 %v6412_v47, %v620_v26 }
  0xc4   :  { %v574_v25 = vadd.f32 %v6414_v43, %v242_v46  ;;  %v586_v35 = vadd.f32 %v4400_v19, %v254_v56  ;;  %v799_v33 = vadd.f32 %v6412_v47, %v617_v29  ;;  %v575_v16 = vadd.f32 %v6415_v37, %v4426_v9 }
  0xc5   :  { %v576_v42 = vadd.f32 %v6416_v18, %v244_v54  ;;  %v587_v40 = vadd.f32 %v4412_v32, %v255_v53  ;;  %v588_v38 = vadd.f32 %v484_v11, %v256_v8  ;;  %v767_v4 = vadd.f32 %v4435_v28, %v585_v48 }
  0xc6   :  { %v801_v26 = vadd.f32 %v6412_v47, %v619_v44  ;;  %v4528_v23 = vpop.eup %3033  ;;  %3049 = vtanh.f32 %v800_v3  ;;  %v4531_v46 = vadd.f32 %v4515_v60, %v573_v2  ;;  %v4534_v56 = vadd.f32 %v4515_v60, %v574_v25  ;;  %v6421_v44 = vld [vmem:[#allocation11_spill] sm:$0xff]  ;;  %v6424_v25 = vld [vmem:[#allocation9_spill] sm:$0xff] }
  0xc7   :  { %v4537_v19 = vadd.f32 %v4515_v60, %v575_v16  ;;  %v4539_v9 = vpop.eup %3035  ;;  %v237_v32 = vmul.f32 %v4165_v63, %v4376_v34  ;;  %v768_v54 = vadd.f32 %v4435_v28, %v586_v35  ;;  %3051 = vtanh.f32 %v802_v27  ;;  %v6422_v2 = vld [vmem:[#allocation7_spill] sm:$0xff]  ;;  %v6423_v27 = vld [vmem:[#allocation8_spill] sm:$0xff] }
  0xc8   :  { %6417 = vst [vmem:[#allocation39_spill] sm:$0xff] %v4531_v46  ;;  %6418 = vst [vmem:[#allocation40_spill] sm:$0xff] %v4534_v56  ;;  %v4545_v11 = vadd.f32 %v4515_v60, %v576_v42  ;;  %v4547_v53 = vpop.eup %3037  ;;  %v769_v8 = vadd.f32 %v4435_v28, %v587_v40  ;;  %v770_v29 = vadd.f32 %v4435_v28, %v588_v38  ;;  %3053 = vtanh.f32 %v799_v33  ;;  %v4569_v28 = vpop.permute.xlu1 %310 }
  0xc9   :  { %6419 = vst [vmem:[#allocation41_spill] sm:$0xff] %v4537_v19  ;;  %v4553_v47 = vmul.f32 %v6421_v44, %v4476_v49  ;;  %v4555_v3 = vpop.eup %3039  ;;  %3055 = vtanh.f32 %v801_v26  ;;  %v4559_v48 = vmul.f32 %v6422_v2, %v4476_v49  ;;  %v4563_v43 = vmul.f32 %v6423_v27, %v4476_v49  ;;  %v6427_v19 = vld [vmem:[#allocation43_spill] sm:$0xff] }
  0xca   :  { %6420 = vst [vmem:[#allocation20_spill] sm:$0xff] %v4545_v11  ;;  %v4567_v35 = vmul.f32 %v6424_v25, %v4476_v49  ;;  %v247_v33 = vmul.f32 %v4171_v1, %v4266_v17  ;;  %v249_v37 = vmul.f32 %v4001_v41, %v4266_v17  ;;  %3057 = vtanh.f32 %v767_v4  ;;  %v6426_v11 = vld [vmem:[#allocation42_spill] sm:$0xff] }
  0xcb   :  { %v570_v16 = vadd.f32 %v4353_v13, %v238_v36  ;;  %v467_v18 = vmul.f32 %v4190_v10, %v4027_v50  ;;  %v468_v42 = vmul.f32 %v4196_v21, %v4027_v50  ;;  %v248_v40 = vmul.f32 %v4176_v20, %v4266_v17 }
  0xcc   :  { %6425 = vst [vmem:[#allocation16_spill] sm:$0xff] %v4567_v35  ;;  %3059 = vtanh.f32 %v768_v54  ;;  %v239_v38 = vmul.f32 %v4171_v1, %v4376_v34  ;;  %v240_v26 = vmul.f32 %v4176_v20, %v4376_v34  ;;  %v569_v36 = vadd.f32 %v4330_v59, %v237_v32  ;;  %v6428_v54 = vld [vmem:[#allocation44_spill] sm:$0xff]  ;;  %v6431_v34 = vld [vmem:[#allocation13_spill] sm:$0xff] }
  0xcd   :  { %3061 = vtanh.f32 %v769_v8  ;;  %v752_v4 = vadd.f32 %v4515_v60, %v570_v16  ;;  %v4587_v13 = vpop.eup %3041  ;;  %v577_v50 = vadd.f32 %v6426_v11, %v245_v55  ;;  %v578_v56 = vadd.f32 %v6427_v19, %v246_v45  ;;  %v6433_v16 = vld [vmem:[#allocation14_spill] sm:$0xff]  ;;  %v6435_v32 = vld [vmem:[#allocation48_spill] sm:$0xff]  ;;  %v6436_v55 = vld [vmem:[#allocation15_spill] sm:$0xff] }
  0xce   :  { %3063 = vtanh.f32 %v770_v29  ;;  %v4592_v17 = vpop.eup %3043  ;;  %v579_v46 = vadd.f32 %v6428_v54, %v247_v33  ;;  %v581_v24 = vadd.f32 %v6429_v61, %v249_v37  ;;  %v582_v8 = vadd.f32 %v6431_v34, %v6430_v22  ;;  %v6434_v29 = vld [vmem:[#allocation45_spill] sm:$0xff]  ;;  %v4607_v33 = vpop.permute.xlu1 %67 }
  0xcf   :  { %v583_v57 = vadd.f32 %v6433_v16, %v6432_v12  ;;  %v4600_v35 = vpop.eup %3045  ;;  %v580_v59 = vadd.f32 %v6434_v29, %v248_v40  ;;  %v584_v11 = vadd.f32 %v6436_v55, %v6435_v32  ;;  %v759_v45 = vadd.f32 %v4518_v30, %v577_v50 }
  0xd0   :  { %v760_v19 = vadd.f32 %v4518_v30, %v578_v56  ;;  %v4609_v61 = vpop.eup %3047  ;;  %v572_v37 = vadd.f32 %v468_v42, %v240_v26  ;;  %3065 = vtanh.f32 %v752_v4  ;;  %v761_v22 = vadd.f32 %v4518_v30, %v579_v46 }
  0xd1   :  { %v4613_v12 = vadd.f32 %v4518_v30, %v581_v24  ;;  %v762_v40 = vadd.f32 %v4518_v30, %v580_v59  ;;  %v4617_v54 = vadd.f32 %v4518_v30, %v582_v8  ;;  %v4620_v50 = vadd.f32 %v4518_v30, %v583_v57 }
  0xd2   :  { %v4623_v56 = vadd.f32 %v4518_v30, %v584_v11  ;;  %v571_v34 = vadd.f32 %v467_v18, %v239_v38  ;;  %v751_v42 = vadd.f32 %v4515_v60, %v569_v36  ;;  %3067 = vtanh.f32 %v759_v45  ;;  %v666_v59 = vpop.permute.xlu1 %665 }
  0xd3   :  { %v3050_v26 = vpop.eup %3049  ;;  %v229_v24 = vmul.f32 %v4165_v63, %v4384_v51  ;;  %v230_v46 = vmul.f32 %v4168_v0, %v4384_v51  ;;  %v754_v4 = vadd.f32 %v4515_v60, %v572_v37  ;;  %3069 = vtanh.f32 %v760_v19 }
  0xd4   :  { %v3052_v8 = vpop.eup %3051  ;;  %v231_v57 = vmul.f32 %v4171_v1, %v4384_v51  ;;  %v232_v30 = vmul.f32 %v4176_v20, %v4384_v51  ;;  %1048 = vmatprep.subr.mxu0 %v3050_v26  ;;  %v753_v18 = vadd.f32 %v4515_v60, %v571_v34  ;;  %3071 = vtanh.f32 %v761_v22 }
  0xd5   :  { %v3054_v38 = vpop.eup %3053  ;;  %1191 = vmatprep.subr.mxu1 %v3052_v8  ;;  %v457_v36 = vmul.f32 %v4184_v62, %v4476_v49  ;;  %v458_v16 = vmul.f32 %v4187_v14, %v4476_v49  ;;  %v459_v29 = vmul.f32 %v4190_v10, %v4476_v49  ;;  %3073 = vtanh.f32 %v762_v40 }
  0xd6   :  { %v3056_v32 = vpop.eup %3055  ;;  %1049 = vmatpush1.msra.mxu0 %v3054_v38  ;;  %3075 = vtanh.f32 %v751_v42  ;;  %v4644_v60 = vmul.f32 %v6421_v44, %v4569_v28  ;;  %v4648_v55 = vmul.f32 %v6422_v2, %v4569_v28  ;;  %v4652_v11 = vmul.f32 %v6423_v27, %v4569_v28  ;;  %v4686_v8 = vpop.permute.xlu1 %62 }
  0xd7   :  { %v3058_v45 = vpop.eup %3057  ;;  %v233_v19 = vmul.f32 %v4001_v41, %v4384_v51  ;;  %1192 = vmatpush1.msra.mxu1 %v3056_v32  ;;  %1050 = vmatprep.subr.mxu0 %v4478_v52  ;;  %3077 = vtanh.f32 %v754_v4  ;;  %v460_v37 = vmul.f32 %v4196_v21, %v4476_v49  ;;  %v4661_v22 = vmul.f32 %v6424_v25, %v4569_v28 }
  0xd8   :  { %1193 = vmatprep.subr.mxu1 %v4497_v31  ;;  %3079 = vtanh.f32 %v753_v18  ;;  %1051 = vmatpush1.msra.mxu0 %v4466_v39  ;;  %v4669_v51 = vmul.f32 %v3930_v5, %v4607_v33  ;;  %v4673_v49 = vmul.f32 %v3933_v6, %v4607_v33  ;;  %v4677_v52 = vmul.f32 %v3936_v7, %v4607_v33 }
  0xd9   :  { %v3060_v40 = vpop.eup %3059  ;;  %1194 = vmatpush1.msra.mxu1 %v4489_v15  ;;  %1052 = vmatprep.subr.mxu0 %v4539_v9  ;;  %v561_v39 = vadd.f32 %v457_v36, %v229_v24  ;;  %v562_v15 = vadd.f32 %v458_v16, %v230_v46  ;;  %v563_v9 = vadd.f32 %v459_v29, %v231_v57  ;;  %v6438_v24 = vld [vmem:[#allocation58_spill] sm:$0xff]  ;;  %v6439_v46 = vld [vmem:[#allocation16_spill] sm:$0xff]  ;;  %v6324_v38 = vmov 0.0  }
  0xda   :  { %v3062_v34 = vpop.eup %3061  ;;  %1195 = vmatprep.subr.mxu1 %v4555_v3  ;;  %1053 = vmatpush1.msra.mxu0 %v4528_v23  ;;  %v564_v42 = vadd.f32 %v460_v37, %v232_v30  ;;  %v565_v26 = vadd.f32 %v4553_v47, %v233_v19  ;;  %v566_v4 = vadd.f32 %v4559_v48, %v4388_v58  ;;  %v6437_v23 = vld [vmem:[#allocation57_spill] sm:$0xff]  ;;  %v4711_v32 = vpop.permute.xlu1 %660  ;;  %v6441_v37 = vld [vmem:[#allocation31_spill] sm:$0xff] }
  0xdb   :  { %v3064_v31 = vpop.eup %3063  ;;  %1196 = vmatpush1.msra.mxu1 %v4547_v53  ;;  %1054 = vmatprep.subr.mxu0 %v4592_v17  ;;  %v567_v3 = vadd.f32 %v4563_v43, %v6437_v23  ;;  %v568_v53 = vadd.f32 %v6439_v46, %v6438_v24  ;;  %v743_v57 = vadd.f32 %v666_v59, %v561_v39  ;;  %v6446_v23 = vld [vmem:[#allocation30_spill] sm:$0xff]  ;;  %v6448_v46 = vld [vmem:[#allocation21_spill] sm:$0xff] }
  0xdc   :  { %1197 = vmatprep.subr.mxu1 %v4609_v61  ;;  %1055 = vmatpush1.msra.mxu0 %v4587_v13  ;;  %v744_v47 = vadd.f32 %v666_v59, %v562_v15  ;;  %v745_v30 = vadd.f32 %v666_v59, %v563_v9  ;;  %v746_v58 = vadd.f32 %v666_v59, %v564_v42  ;;  %v6443_v15 = vld [vmem:[#allocation32_spill] sm:$0xff]  ;;  %v6444_v9 = vld [vmem:[#allocation59_spill] sm:$0xff] }
  0xdd   :  { %v3066_v17 = vpop.eup %3065  ;;  %1198 = vmatpush1.msra.mxu1 %v4600_v35  ;;  %1056 = vmatprep.subr.mxu0 %v3060_v40  ;;  %v4695_v48 = vadd.f32 %v666_v59, %v565_v26  ;;  %v4697_v61 = vadd.f32 %v666_v59, %v566_v4  ;;  %v4699_v13 = vadd.f32 %v666_v59, %v567_v3  ;;  %3081 = vtanh.f32 %v743_v57  ;;  %v4714_v40 = vpop.permute.xlu0 %57  ;;  %v6445_v26 = vld [vmem:[#allocation29_spill] sm:$0xff] }
  0xde   :  { %1199 = vmatprep.subr.mxu1 %v3064_v31  ;;  %1057 = vmatpush1.msra.mxu0 %v3058_v45  ;;  %v4701_v18 = vadd.f32 %v666_v59, %v568_v53  ;;  %3083 = vtanh.f32 %v744_v47  ;;  %v210_v16 = vmul.f32 %v3930_v5, %v4686_v8  ;;  %v211_v29 = vmul.f32 %v3933_v6, %v4686_v8  ;;  %v6449_v57 = vld [vmem:[#allocation33_spill] sm:$0xff] }
  0xdf   :  { %v3068_v43 = vpop.eup %3067  ;;  %1200 = vmatpush1.msra.mxu1 %v3062_v34  ;;  %1106 = vmatprep.mubr.f32.mxu0 %v6324_v38  ;;  %3085 = vtanh.f32 %v745_v30  ;;  %v212_v59 = vmul.f32 %v3936_v7, %v4686_v8  ;;  %6440 = vst [vmem:[#allocation17_spill] sm:$0xff] %v4711_v32  ;;  %v6442_v34 = vld [vmem:[#allocation28_spill] sm:$0xff]  ;;  %v225_v42 = vmul.f32 %v4001_v41, %v6444_v9 }
  0xe0   :  { %v3070_v35 = vpop.eup %3069  ;;  %1249 = vmatprep.mubr.f32.mxu1 %v6324_v38  ;;  %3087 = vtanh.f32 %v746_v58  ;;  %v4717_v31 = vadd.f32 %v6442_v34, %v210_v16  ;;  %v4723_v4 = vadd.f32 %v6445_v26, %v211_v29  ;;  %v4730_v53 = vmul.f32 %v4184_v62, %v6448_v46  ;;  %v6450_v58 = vld [vmem:[#allocation34_spill] sm:$0xff]  ;;  %v6454_v26 = vld [vmem:[#allocation36_spill] sm:$0xff] }
  0xe1   :  { %v3072_v36 = vpop.eup %3071  ;;  %1058 = vmatprep.subr.mxu0 %v3070_v35  ;;  %3089 = vtanh.f32 %v6441_v37  ;;  %v4726_v3 = vadd.f32 %v6446_v23, %v212_v59  ;;  %v449_v47 = vmul.f32 %v4184_v62, %v4569_v28  ;;  %v4739_v30 = vmul.f32 %v4187_v14, %v6448_v46 }
  0xe2   :  { %v3074_v45 = vpop.eup %3073  ;;  %1059 = vmatpush1.msra.mxu0 %v3068_v43  ;;  %3091 = vtanh.f32 %v6443_v15  ;;  %v222_v43 = vmul.f32 %v4168_v0, %v6444_v9  ;;  %v450_v35 = vmul.f32 %v4187_v14, %v4569_v28  ;;  %v223_v16 = vmul.f32 %v4171_v1, %v6444_v9 }
  0xe3   :  { %v3076_v19 = vpop.eup %3075  ;;  %1201 = vmatprep.subr.mxu1 %v3074_v45  ;;  %1060 = vmatprep.subr.mxu0 %v3066_v17  ;;  %6447 = vst [vmem:[#allocation18_spill] sm:$0xff] %v4726_v3  ;;  %3093 = vtanh.f32 %v6449_v57  ;;  %v221_v17 = vmul.f32 %v4165_v63, %v6444_v9  ;;  %v224_v29 = vmul.f32 %v4176_v20, %v6444_v9  ;;  %v4753_v45 = vpop.permute.xlu1 %298 }
  0xe4   :  { %v3078_v39 = vpop.eup %3077  ;;  %1202 = vmatpush1.msra.mxu1 %v3072_v36  ;;  %1061 = vmatpush1.msra.mxu0 %v3076_v19  ;;  %3095 = vtanh.f32 %v6450_v58  ;;  %v6451_v36 = vld [vmem:[#allocation35_spill] sm:$0xff]  ;;  %v451_v59 = vmul.f32 %v4190_v10, %v4569_v28  ;;  %v452_v19 = vmul.f32 %v4196_v21, %v4569_v28  ;;  %v206_v37 = vmul.f32 %v4168_v0, %v4686_v8  ;;  %v4767_v9 = vpop.permute.xlu0 %52  ;;  %v6457_v28 = vld [vmem:[#allocation62_spill] sm:$0xff] }
  0xe5   :  { %v3080_v24 = vpop.eup %3079  ;;  %1203 = vmatprep.subr.mxu1 %v3078_v39  ;;  %3097 = vtanh.f32 %v6451_v36  ;;  %v4760_v34 = vadd.f32 %v4644_v60, %v225_v42  ;;  %v6452_v39 = vld [vmem:[#allocation60_spill] sm:$0xff]  ;;  %v553_v23 = vadd.f32 %v449_v47, %v221_v17  ;;  %v4775_v58 = vadd.f32 %v4661_v22, %v6457_v28  ;;  %v6459_v42 = vld [vmem:[#allocation26_spill] sm:$0xff]  ;;  %v6460_v36 = vld [vmem:[#allocation37_spill] sm:$0xff] }
  0xe6   :  { %1204 = vmatpush1.msra.mxu1 %v3080_v24  ;;  %v4764_v15 = vadd.f32 %v4648_v55, %v6452_v39  ;;  %3099 = vtanh.f32 %v6454_v26  ;;  %v6455_v24 = vld [vmem:[#allocation61_spill] sm:$0xff]  ;;  %v443_v60 = vmul.f32 %v4190_v10, %v6448_v46  ;;  %v434_v55 = vmul.f32 %v4187_v14, %v6459_v42  ;;  %v6461_v47 = vld [vmem:[#allocation38_spill] sm:$0xff] }
  0xe7   :  { %v4771_v57 = vadd.f32 %v4652_v11, %v6455_v24  ;;  %6458 = vst [vmem:[#allocation8_spill] sm:$0xff] %v4775_v58  ;;  %3101 = vtanh.f32 %v6460_v36  ;;  %v554_v39 = vadd.f32 %v450_v35, %v222_v43  ;;  %v444_v17 = vmul.f32 %v4196_v21, %v6448_v46  ;;  %v6462_v35 = vld [vmem:[#allocation49_spill] sm:$0xff] }
  0xe8   :  { %6453 = vst [vmem:[#allocation19_spill] sm:$0xff] %v4764_v15  ;;  %3103 = vtanh.f32 %v6461_v47  ;;  %v555_v11 = vadd.f32 %v451_v59, %v223_v16  ;;  %v735_v24 = vadd.f32 %v4711_v32, %v553_v23  ;;  %v217_v28 = vmul.f32 %v4001_v41, %v4607_v33  ;;  %v4795_v59 = vpop.permute.xlu1 %655  ;;  %v4804_v36 = vpop.permute.xlu0 %650 }
  0xe9   :  { %6456 = vst [vmem:[#allocation7_spill] sm:$0xff] %v4771_v57  ;;  %v538_v38 = vadd.f32 %v434_v55, %v206_v37  ;;  %v556_v3 = vadd.f32 %v452_v19, %v224_v29  ;;  %v736_v58 = vadd.f32 %v4711_v32, %v554_v39  ;;  %v433_v43 = vmul.f32 %v4184_v62, %v6459_v42 }
  0xea   :  { %v3082_v26 = vpop.eup %3081  ;;  %3105 = vtanh.f32 %v6462_v35  ;;  %v213_v46 = vmul.f32 %v4165_v63, %v4607_v33  ;;  %v737_v16 = vadd.f32 %v4711_v32, %v555_v11  ;;  %v214_v29 = vmul.f32 %v4168_v0, %v4607_v33  ;;  %v6465_v35 = vld [vmem:[#allocation23_spill] sm:$0xff] }
  0xeb   :  { %v3084_v22 = vpop.eup %3083  ;;  %v215_v19 = vmul.f32 %v4171_v1, %v4607_v33  ;;  %v216_v37 = vmul.f32 %v4176_v20, %v4607_v33  ;;  %v738_v55 = vadd.f32 %v4711_v32, %v556_v3  ;;  %v205_v39 = vmul.f32 %v4165_v63, %v4686_v8  ;;  %v6463_v3 = vld [vmem:[#allocation22_spill] sm:$0xff] }
  0xec   :  { %v3086_v57 = vpop.eup %3085  ;;  %1062 = vmatprep.subr.mxu0 %v3084_v22  ;;  %v207_v47 = vmul.f32 %v4171_v1, %v4686_v8  ;;  %v208_v11 = vmul.f32 %v4176_v20, %v4686_v8  ;;  %3107 = vtanh.f32 %v735_v24  ;;  %v720_v33 = vadd.f32 %v4804_v36, %v538_v38  ;;  %v6466_v24 = vld [vmem:[#allocation24_spill] sm:$0xff]  ;;  %v6468_v38 = vld [vmem:[#allocation25_spill] sm:$0xff] }
  0xed   :  { %v3088_v23 = vpop.eup %3087  ;;  %1063 = vmatpush1.msra.mxu0 %v3082_v26  ;;  %3109 = vtanh.f32 %v736_v58  ;;  %v4816_v26 = vadd.f32 %v6463_v3, %v217_v28  ;;  %v4820_v44 = vadd.f32 %v6465_v35, %v4669_v51  ;;  %v545_v32 = vadd.f32 %v4730_v53, %v213_v46  ;;  %v6469_v46 = vld [vmem:[#allocation50_spill] sm:$0xff]  ;;  %v4844_v35 = vpop.permute.xlu1 %294 }
  0xee   :  { %1205 = vmatprep.subr.mxu1 %v3088_v23  ;;  %v4812_v22 = vpop.eup %3089  ;;  %3111 = vtanh.f32 %v737_v16  ;;  %v4827_v23 = vadd.f32 %v6466_v24, %v4673_v49  ;;  %v4831_v58 = vadd.f32 %v6468_v38, %v4677_v52  ;;  %v435_v51 = vmul.f32 %v4190_v10, %v6459_v42 }
  0xef   :  { %6464 = vst [vmem:[#allocation9_spill] sm:$0xff] %v4816_v26  ;;  %1206 = vmatpush1.msra.mxu1 %v3086_v57  ;;  %v4822_v15 = vpop.eup %3091  ;;  %v436_v57 = vmul.f32 %v4196_v21, %v6459_v42  ;;  %3113 = vtanh.f32 %v738_v55  ;;  %v546_v16 = vadd.f32 %v4739_v30, %v214_v29  ;;  %v537_v49 = vadd.f32 %v433_v43, %v205_v39 }
  0xf0   :  { %6467 = vst [vmem:[#allocation42_spill] sm:$0xff] %v4827_v23  ;;  %v4833_v28 = vpop.eup %3093  ;;  %3115 = vtanh.f32 %v6469_v46  ;;  %v547_v3 = vadd.f32 %v443_v60, %v215_v19  ;;  %v727_v52 = vadd.f32 %v4795_v59, %v545_v32  ;;  %v539_v38 = vadd.f32 %v435_v51, %v207_v47 }
  0xf1   :  { %v4840_v53 = vpop.eup %3095  ;;  %v540_v23 = vadd.f32 %v436_v57, %v208_v11  ;;  %v548_v26 = vadd.f32 %v444_v17, %v216_v37  ;;  %v728_v42 = vadd.f32 %v4795_v59, %v546_v16  ;;  %v194_v30 = vmul.f32 %v3930_v5, %v4767_v9 }
  0xf2   :  { %v4846_v24 = vpop.eup %3097  ;;  %3117 = vtanh.f32 %v720_v33  ;;  %v729_v29 = vadd.f32 %v4795_v59, %v547_v3  ;;  %v422_v32 = vmul.f32 %v6422_v2, %v4844_v35  ;;  %v423_v43 = vmul.f32 %v6423_v27, %v4844_v35 }
  0xf3   :  { %v4852_v55 = vpop.eup %3099  ;;  %v730_v60 = vadd.f32 %v4795_v59, %v548_v26  ;;  %v424_v17 = vmul.f32 %v6424_v25, %v4844_v35  ;;  %v195_v37 = vmul.f32 %v3933_v6, %v4767_v9  ;;  %v196_v39 = vmul.f32 %v3936_v7, %v4767_v9 }
  0xf4   :  { %v4861_v19 = vpop.eup %3101  ;;  %v719_v47 = vadd.f32 %v4804_v36, %v537_v49  ;;  %3119 = vtanh.f32 %v727_v52  ;;  %v721_v33 = vadd.f32 %v4804_v36, %v539_v38  ;;  %v722_v26 = vadd.f32 %v4804_v36, %v540_v23 }
  0xf5   :  { %v4868_v11 = vpop.eup %3103  ;;  %3121 = vtanh.f32 %v728_v42  ;;  %v4872_v51 = vadd.f32 %v422_v32, %v194_v30  ;;  %v430_v57 = vmul.f32 %v6422_v2, %v4753_v45  ;;  %v4876_v16 = vadd.f32 %v423_v43, %v195_v37  ;;  %v6474_v37 = vld [vmem:[#allocation51_spill] sm:$0xff] }
  0xf6   :  { %3123 = vtanh.f32 %v729_v29  ;;  %v4878_v46 = vadd.f32 %v424_v17, %v196_v39  ;;  %v431_v49 = vmul.f32 %v6423_v27, %v4753_v45  ;;  %v432_v52 = vmul.f32 %v6424_v25, %v4753_v45 }
  0xf7   :  { %6470 = vst [vmem:[#allocation43_spill] sm:$0xff] %v4872_v51  ;;  %6471 = vst [vmem:[#allocation44_spill] sm:$0xff] %v4876_v16  ;;  %v4880_v3 = vpop.eup %3105  ;;  %3125 = vtanh.f32 %v730_v60  ;;  %v418_v23 = vmul.f32 %v4187_v14, %v4844_v35  ;;  %v202_v2 = vmul.f32 %v3930_v5, %v4714_v40  ;;  %v203_v42 = vmul.f32 %v3933_v6, %v4714_v40 }
  0xf8   :  { %6472 = vst [vmem:[#allocation12_spill] sm:$0xff] %v4878_v46  ;;  %3127 = vtanh.f32 %v719_v47  ;;  %v204_v30 = vmul.f32 %v3936_v7, %v4714_v40  ;;  %v190_v27 = vmul.f32 %v4168_v0, %v4767_v9  ;;  %v425_v29 = vmul.f32 %v4184_v62, %v4753_v45 }
  0xf9   :  { %v3108_v38 = vpop.eup %3107  ;;  %3129 = vtanh.f32 %v722_v26  ;;  %v426_v5 = vmul.f32 %v4187_v14, %v4753_v45  ;;  %v4900_v43 = vadd.f32 %v430_v57, %v202_v2  ;;  %v4902_v6 = vadd.f32 %v431_v49, %v203_v42  ;;  %v6475_v26 = vld [vmem:[#allocation52_spill] sm:$0xff] }
  0xfa   :  { %v3110_v25 = vpop.eup %3109  ;;  %3131 = vtanh.f32 %v721_v33  ;;  %v522_v32 = vadd.f32 %v418_v23, %v190_v27  ;;  %v4904_v7 = vadd.f32 %v432_v52, %v204_v30  ;;  %v197_v39 = vmul.f32 %v4165_v63, %v4714_v40  ;;  %v4922_v23 = vpop.permute.xlu1 %645 }
  0xfb   :  { %v3112_v60 = vpop.eup %3111  ;;  %1064 = vmatprep.subr.mxu0 %v3110_v25  ;;  %6473 = vst [vmem:[#allocation46_spill] sm:$0xff] %v4902_v6  ;;  %3133 = vtanh.f32 %v6474_v37  ;;  %v427_v47 = vmul.f32 %v4190_v10, %v4753_v45  ;;  %v417_v14 = vmul.f32 %v4184_v62, %v4844_v35  ;;  %v198_v57 = vmul.f32 %v4168_v0, %v4714_v40  ;;  %v6477_v6 = vld [vmem:[#allocation54_spill] sm:$0xff] }
  0xfc   :  { %v3114_v17 = vpop.eup %3113  ;;  %1065 = vmatpush1.msra.mxu0 %v3108_v38  ;;  %3135 = vtanh.f32 %v6475_v26  ;;  %v428_v49 = vmul.f32 %v4196_v21, %v4753_v45  ;;  %v420_v52 = vmul.f32 %v4196_v21, %v4844_v35  ;;  %v199_v62 = vmul.f32 %v4171_v1, %v4714_v40  ;;  %v4928_v38 = vpop.permute.xlu0 %640 }
  0xfd   :  { %v4913_v33 = vpop.eup %3115  ;;  %1207 = vmatprep.subr.mxu1 %v3114_v17  ;;  %v189_v2 = vmul.f32 %v4165_v63, %v4767_v9  ;;  %v419_v0 = vmul.f32 %v4190_v10, %v4844_v35  ;;  %v529_v42 = vadd.f32 %v425_v29, %v197_v39  ;;  %v200_v21 = vmul.f32 %v4176_v20, %v4714_v40 }
  0xfe   :  { %1208 = vmatpush1.msra.mxu1 %v3112_v60  ;;  %v192_v27 = vmul.f32 %v4176_v20, %v4767_v9  ;;  %v704_v25 = vadd.f32 %v4928_v38, %v522_v32  ;;  %v530_v17 = vadd.f32 %v426_v5, %v198_v57  ;;  %v191_v63 = vmul.f32 %v4171_v1, %v4767_v9  ;;  %v6476_v60 = vld [vmem:[#allocation53_spill] sm:$0xff] }
  0xff   :  { %v3118_v30 = vpop.eup %3117  ;;  %v521_v37 = vadd.f32 %v417_v14, %v189_v2  ;;  %v531_v26 = vadd.f32 %v427_v47, %v199_v62  ;;  %v711_v16 = vadd.f32 %v4922_v23, %v529_v42  ;;  %3137 = vtanh.f32 %v6476_v60  ;;  %v6479_v2 = vld [vmem:[#allocation56_spill] sm:$0xff] }
 0x100   :  { %v524_v29 = vadd.f32 %v420_v52, %v192_v27  ;;  %v532_v39 = vadd.f32 %v428_v49, %v200_v21  ;;  %v712_v46 = vadd.f32 %v4922_v23, %v530_v17  ;;  %3139 = vtanh.f32 %v6477_v6  ;;  %v6482_v27 = vld [vmem:[#allocation65_spill] sm:$0xff]  ;;  %v6483_v17 = vld [vmem:[#allocation66_spill] sm:$0xff]  ;;  %v6485_v60 = vld [vmem:[#allocation40_spill] sm:$0xff] }
 0x101   :  { %v3120_v10 = vpop.eup %3119  ;;  %v523_v20 = vadd.f32 %v419_v0, %v191_v63  ;;  %v713_v5 = vadd.f32 %v4922_v23, %v531_v26  ;;  %3141 = vtanh.f32 %v704_v25  ;;  %v703_v14 = vadd.f32 %v4928_v38, %v521_v37  ;;  %v6480_v0 = vld [vmem:[#allocation63_spill] sm:$0xff] }
 0x102   :  { %v3122_v51 = vpop.eup %3121  ;;  %v714_v1 = vadd.f32 %v4922_v23, %v532_v39  ;;  %3143 = vtanh.f32 %v711_v16  ;;  %v706_v49 = vadd.f32 %v4928_v38, %v524_v29  ;;  %v6484_v37 = vld [vmem:[#allocation39_spill] sm:$0xff]  ;;  %v209_v26 = vmul.f32 %v4001_v41, %v4686_v8  ;;  %v6486_v39 = vld [vmem:[#allocation41_spill] sm:$0xff] }
 0x103   :  { %v3124_v32 = vpop.eup %3123  ;;  %1066 = vmatprep.subr.mxu0 %v3122_v51  ;;  %3145 = vtanh.f32 %v712_v46  ;;  %v705_v52 = vadd.f32 %v4928_v38, %v523_v20  ;;  %v6478_v46 = vld [vmem:[#allocation55_spill] sm:$0xff] }
 0x104   :  { %v3126_v47 = vpop.eup %3125  ;;  %1067 = vmatpush1.msra.mxu0 %v3120_v10  ;;  %3147 = vtanh.f32 %v713_v5  ;;  %v6487_v5 = vld [vmem:[#allocation20_spill] sm:$0xff]  ;;  %v6488_v8 = vld [vmem:[#allocation27_spill] sm:$0xff] }
 0x105   :  { %v3128_v57 = vpop.eup %3127  ;;  %1209 = vmatprep.subr.mxu1 %v3126_v47  ;;  %1068 = vmatprep.subr.mxu0 %v3118_v30  ;;  %3149 = vtanh.f32 %v714_v1  ;;  %v6481_v30 = vld [vmem:[#allocation64_spill] sm:$0xff]  ;;  %v541_v47 = vadd.f32 %v6488_v8, %v209_v26 }
 0x106   :  { %v3130_v6 = vpop.eup %3129  ;;  %1210 = vmatpush1.msra.mxu1 %v3124_v32  ;;  %1069 = vmatpush1.msra.mxu0 %v3128_v57  ;;  %3151 = vtanh.f32 %v703_v14  ;;  %v4971_v32 = vld [vmem:[%s6295_s3] sm:$0xff] }
 0x107   :  { %v3132_v62 = vpop.eup %3131  ;;  %1211 = vmatprep.subr.mxu1 %v3130_v6  ;;  %3153 = vtanh.f32 %v706_v49 }
 0x108   :  { %1212 = vmatpush1.msra.mxu1 %v3132_v62  ;;  %v4948_v51 = vpop.eup %3133  ;;  %3155 = vtanh.f32 %v705_v52 }
 0x109   :  { %v4950_v16 = vpop.eup %3135  ;;  %3157 = vtanh.f32 %v6478_v46 }
 0x10a   :  { %3159 = vtanh.f32 %v6479_v2  ;;  %v732_v2 = vadd.f32 %v4795_v59, %v4820_v44 }
 0x10b   :  { %3161 = vtanh.f32 %v6480_v0 }
 0x10c   :  { %v4955_v42 = vpop.eup %3137  ;;  %3163 = vtanh.f32 %v6481_v30 }
 0x10d   :  { %v4958_v21 = vpop.eup %3139  ;;  %3165 = vtanh.f32 %v6482_v27 }
 0x10e   :  { %v3142_v25 = vpop.eup %3141  ;;  %3167 = vtanh.f32 %v6483_v17  ;;  %v6497_v17 = vld [vmem:[#allocation18_spill] sm:$0xff] }
 0x10f   :  { %v3144_v63 = vpop.eup %3143  ;;  %3169 = vtanh.f32 %v6484_v37 }
 0x110   :  { %v3146_v10 = vpop.eup %3145  ;;  %3171 = vtanh.f32 %v6485_v60 }
 0x111   :  { %v3148_v29 = vpop.eup %3147  ;;  %3173 = vtanh.f32 %v6486_v39  ;;  %1070 = vmatprep.subr.mxu0 %v3146_v10  ;;  %v5073_v10 = vld [vmem:[%s6295_s3 + $0x18] sm:$0xff]  ;;  %v6498_v39 = vld [vmem:[#allocation46_spill] sm:$0xff] }
 0x112   :  { %v3150_v20 = vpop.eup %3149  ;;  %3175 = vtanh.f32 %v6487_v5  ;;  %1071 = vmatpush1.msra.mxu0 %v3144_v63  ;;  %v726_v63 = vadd.f32 %v4804_v36, %v6497_v17  ;;  %v6499_v5 = vld [vmem:[#allocation43_spill] sm:$0xff] }
 0x113   :  { %v3152_v1 = vpop.eup %3151  ;;  %3177 = vtanh.f32 %v4613_v12  ;;  %1213 = vmatprep.subr.mxu1 %v3150_v20  ;;  %1072 = vmatprep.subr.mxu0 %v3142_v25 }
 0x114   :  { %v3154_v14 = vpop.eup %3153  ;;  %3179 = vtanh.f32 %v4617_v54  ;;  %1214 = vmatpush1.msra.mxu1 %v3148_v29  ;;  %1073 = vmatpush1.msra.mxu0 %v3152_v1  ;;  %v723_v54 = vadd.f32 %v4804_v36, %v541_v47  ;;  %v708_v1 = vadd.f32 %v4928_v38, %v6499_v5  ;;  %v6500_v47 = vld [vmem:[#allocation12_spill] sm:$0xff] }
 0x115   :  { %v3156_v57 = vpop.eup %3155  ;;  %3181 = vtanh.f32 %v4620_v50  ;;  %1215 = vmatprep.subr.mxu1 %v3154_v14  ;;  %2895 = vmatmul.mubr.msk.f32.vlgmr.msra.gmra.mxu0 %vm1002_vm0, %v4971_v32  ;;  %v710_v14 = vadd.f32 %v4928_v38, %v6500_v47 }
 0x116   :  { %v4979_v49 = vpop.eup %3157  ;;  %3183 = vtanh.f32 %v4623_v56  ;;  %1216 = vmatpush1.msra.mxu1 %v3156_v57  ;;  %1334 = vmatprep.subr.mxu0 %v4852_v55  ;;  %v724_v56 = vadd.f32 %v4804_v36, %v4717_v31  ;;  %v6501_v57 = vld [vmem:[#allocation44_spill] sm:$0xff] }
 0x117   :  { %v3160_v12 = vpop.eup %3159  ;;  %3185 = vtanh.f32 %v4695_v48  ;;  %2908 = vmatmul.mubr.msk.f32.vlgmr.msra.gmra.mxu1 %vm1002_vm0, %v4971_v32  ;;  %1477 = vmatprep.subr.mxu1 %v4868_v11  ;;  %v725_v48 = vadd.f32 %v4804_v36, %v4723_v4  ;;  %v6490_v11 = vmov 0.0   ;;  %v6491_v4 = vld [vmem:[#allocation19_spill] sm:$0xff]  ;;  %v718_v36 = vadd.f32 %v4922_v23, %v4904_v7 }
 0x118   :  { %v4988_v50 = vpop.eup %3161  ;;  %3187 = vtanh.f32 %v4697_v61  ;;  %1335 = vmatpush1.msra.mxu0 %v4846_v24  ;;  %1478 = vmatpush1.msra.mxu1 %v4861_v19  ;;  %v5003_v61 = vld [vmem:[%s6295_s3 + $0x8] sm:$0xff]  ;;  %v717_v7 = vadd.f32 %v4922_v23, %v6498_v39 }
 0x119   :  { %v3164_v55 = vpop.eup %3163  ;;  %3189 = vtanh.f32 %v4699_v13  ;;  %1336 = vmatprep.subr.mxu0 %v4822_v15  ;;  %1479 = vmatprep.subr.mxu1 %v4840_v53  ;;  %v6489_v24 = vld [vmem:[#allocation17_spill] sm:$0xff]  ;;  %v6492_v53 = vld [vmem:[#allocation11_spill] sm:$0xff] }
 0x11a   :  { %v3166_v31 = vpop.eup %3165  ;;  %3191 = vtanh.f32 %v4701_v18  ;;  %v739_v19 = vadd.f32 %v6489_v24, %v4760_v34  ;;  %1112 = vmatprep.mubr.f32.mxu0 %v6490_v11  ;;  %1255 = vmatprep.mubr.f32.mxu1 %v6490_v11  ;;  %v740_v15 = vadd.f32 %v6489_v24, %v6491_v4  ;;  %v421_v6 = vmul.f32 %v6492_v53, %v4844_v35  ;;  %v6493_v34 = vld [vmem:[#allocation7_spill] sm:$0xff] }
 0x11b   :  { %v3168_v13 = vpop.eup %3167  ;;  %3193 = vtanh.f32 %v723_v54  ;;  %1337 = vmatpush1.msra.mxu0 %v4812_v22  ;;  %1480 = vmatpush1.msra.mxu1 %v4833_v28  ;;  %v741_v52 = vadd.f32 %v6489_v24, %v6493_v34  ;;  %v193_v35 = vmul.f32 %v4001_v41, %v4767_v9  ;;  %v6494_v22 = vld [vmem:[#allocation8_spill] sm:$0xff]  ;;  %v734_v9 = vadd.f32 %v4795_v59, %v4831_v58 }
 0x11c   :  { %v5016_v18 = vpop.eup %3169  ;;  %3195 = vtanh.f32 %v724_v56  ;;  %2896 = vmatmul.mubr.msk.f32.gmra.mxu0 %vm1002_vm0, %v5003_v61  ;;  %2909 = vmatmul.mubr.msk.f32.gmra.mxu1 %vm1002_vm0, %v5003_v61  ;;  %v742_v28 = vadd.f32 %v6489_v24, %v6494_v22  ;;  %v429_v44 = vmul.f32 %v6492_v53, %v4753_v45  ;;  %v201_v45 = vmul.f32 %v4001_v41, %v4714_v40  ;;  %v5096_v54 = vld [vmem:[%s6295_s3 + $0x20] sm:$0xff]  ;;  %v5107_v24 = vld [vmem:[%s6295_s3 + $0x28] sm:$0xff]  ;;  %v5129_v22 = vld [vmem:[%s6295_s3 + $0x38] sm:$0xff] }
 0x11d   :  { %v5024_v62 = vpop.eup %3171  ;;  %3197 = vtanh.f32 %v725_v48  ;;  %1338 = vmatprep.subr.mxu0 %v4913_v33  ;;  %1481 = vmatprep.subr.mxu1 %v4950_v16  ;;  %v525_v30 = vadd.f32 %v421_v6, %v193_v35  ;;  %v5044_v33 = vld [vmem:[%s6295_s3 + $0x10] sm:$0xff]  ;;  %v716_v41 = vadd.f32 %v4922_v23, %v4900_v43 }
 0x11e   :  { %v5032_v46 = vpop.eup %3173  ;;  %3199 = vtanh.f32 %v739_v19  ;;  %1339 = vmatpush1.msra.mxu0 %v4880_v3  ;;  %1482 = vmatpush1.msra.mxu1 %v4948_v51  ;;  %v6495_v3 = vld [vmem:[#allocation9_spill] sm:$0xff]  ;;  %v533_v26 = vadd.f32 %v429_v44, %v201_v45 }
 0x11f   :  { %v3176_v0 = vpop.eup %3175  ;;  %3201 = vtanh.f32 %v740_v15  ;;  %1340 = vmatprep.subr.mxu0 %v4958_v21  ;;  %1483 = vmatprep.subr.mxu1 %v3160_v12  ;;  %v731_v51 = vadd.f32 %v4795_v59, %v6495_v3  ;;  %v6496_v21 = vld [vmem:[#allocation42_spill] sm:$0xff] }
 0x120   :  { %v3178_v16 = vpop.eup %3177  ;;  %3203 = vtanh.f32 %v741_v52  ;;  %1118 = vmatprep.mubr.f32.mxu0 %v6490_v11  ;;  %1261 = vmatprep.mubr.f32.mxu1 %v6490_v11  ;;  %v733_v27 = vadd.f32 %v4795_v59, %v6496_v21  ;;  %v707_v59 = vadd.f32 %v4928_v38, %v525_v30  ;;  %v715_v29 = vadd.f32 %v4922_v23, %v533_v26 }
 0x121   :  { %v3180_v58 = vpop.eup %3179  ;;  %3205 = vtanh.f32 %v742_v28  ;;  %1341 = vmatpush1.msra.mxu0 %v4955_v42  ;;  %1484 = vmatpush1.msra.mxu1 %v4979_v49  ;;  %v709_v49 = vadd.f32 %v4928_v38, %v6501_v57  ;;  %v919_v28 = vld [vmem:[%s6295_s3 + $0x40] sm:$0xff] }
 0x122   :  { %v3182_v25 = vpop.eup %3181  ;;  %3207 = vtanh.f32 %v732_v2  ;;  %2897 = vmatmul.mubr.msk.f32.gmra.mxu0 %vm1002_vm0, %v5044_v33  ;;  %2910 = vmatmul.mubr.msk.f32.gmra.mxu1 %vm1002_vm0, %v5044_v33  ;;  %v921_v2 = vld [vmem:[%s6295_s3 + $0x50] sm:$0xff] }
 0x123   :  { %v3184_v37 = vpop.eup %3183  ;;  %3209 = vtanh.f32 %v734_v9  ;;  %1342 = vmatprep.subr.mxu0 %v3164_v55  ;;  %1485 = vmatprep.subr.mxu1 %v3168_v13  ;;  %v923_v9 = vld [vmem:[%s6295_s3 + $0x60] sm:$0xff] }
 0x124   :  { %v3186_v42 = vpop.eup %3185  ;;  %3211 = vtanh.f32 %v731_v51  ;;  %1343 = vmatpush1.msra.mxu0 %v4988_v50  ;;  %1486 = vmatpush1.msra.mxu1 %v3166_v31 }
 0x125   :  { %v3188_v40 = vpop.eup %3187  ;;  %3213 = vtanh.f32 %v733_v27  ;;  %1344 = vmatprep.subr.mxu0 %v3180_v58  ;;  %1487 = vmatprep.subr.mxu1 %v3184_v37  ;;  %v5252_v58 = vpop.permute.xlu0 %994 }
 0x126   :  { %v3190_v60 = vpop.eup %3189  ;;  %3215 = vtanh.f32 %v726_v63  ;;  %1124 = vmatprep.mubr.f32.mxu0 %v6490_v11  ;;  %1267 = vmatprep.mubr.f32.mxu1 %v6490_v11  ;;  %6504 = vst [vmem:[#allocation14_spill] sm:$0xff] %v5252_v58 }
 0x127   :  { %v3192_v43 = vpop.eup %3191  ;;  %3217 = vtanh.f32 %v707_v59  ;;  %1345 = vmatpush1.msra.mxu0 %v3178_v16  ;;  %1488 = vmatpush1.msra.mxu1 %v3182_v25 }
 0x128   :  { %v3194_v20 = vpop.eup %3193  ;;  %3219 = vtanh.f32 %v716_v41  ;;  %2898 = vmatmul.mubr.msk.f32.gmra.mxu0 %vm1002_vm0, %v5073_v10  ;;  %2911 = vmatmul.mubr.msk.f32.gmra.mxu1 %vm1002_vm0, %v5073_v10 }
 0x129   :  { %v3196_v8 = vpop.eup %3195  ;;  %3221 = vtanh.f32 %v718_v36  ;;  %1346 = vmatprep.subr.mxu0 %v5024_v62  ;;  %1489 = vmatprep.subr.mxu1 %v3176_v0  ;;  %v922_v0 = vld [vmem:[%s6295_s3 + $0x58] sm:$0xff]  ;;  %v5260_v63 = vpop.permute.xlu0 %984 }
 0x12a   :  { %v3198_v23 = vpop.eup %3197  ;;  %3223 = vtanh.f32 %v715_v29  ;;  %1347 = vmatpush1.msra.mxu0 %v5016_v18  ;;  %1490 = vmatpush1.msra.mxu1 %v5032_v46  ;;  %v5118_v18 = vld [vmem:[%s6295_s3 + $0x30] sm:$0xff]  ;;  %v920_v46 = vld [vmem:[%s6295_s3 + $0x48] sm:$0xff] }
 0x12b   :  { %v3200_v12 = vpop.eup %3199  ;;  %3225 = vtanh.f32 %v717_v7  ;;  %1348 = vmatprep.subr.mxu0 %v3188_v40  ;;  %1491 = vmatprep.subr.mxu1 %v3192_v43 }
 0x12c   :  { %v3202_v50 = vpop.eup %3201  ;;  %3227 = vtanh.f32 %v708_v1  ;;  %1130 = vmatprep.mubr.f32.mxu0 %v6490_v11  ;;  %1273 = vmatprep.mubr.f32.mxu1 %v6490_v11 }
 0x12d   :  { %v3204_v38 = vpop.eup %3203  ;;  %3229 = vtanh.f32 %v710_v14  ;;  %1349 = vmatpush1.msra.mxu0 %v3186_v42  ;;  %1492 = vmatpush1.msra.mxu1 %v3190_v60  ;;  %v5268_v40 = vpop.permute.xlu0 %974 }
 0x12e   :  { %v3206_v56 = vpop.eup %3205  ;;  %3231 = vtanh.f32 %v709_v49  ;;  %2899 = vmatmul.mubr.msk.f32.gmra.mxu0 %vm1002_vm0, %v5096_v54  ;;  %2912 = vmatmul.mubr.msk.f32.gmra.mxu1 %vm1002_vm0, %v5096_v54 }
 0x12f   :  { %v3208_v55 = vpop.eup %3207  ;;  %1350 = vmatprep.subr.mxu0 %v3202_v50  ;;  %1493 = vmatprep.subr.mxu1 %v3206_v56 }
 0x130   :  { %v3210_v48 = vpop.eup %3209  ;;  %1351 = vmatpush1.msra.mxu0 %v3200_v12  ;;  %1494 = vmatpush1.msra.mxu1 %v3204_v38 }
 0x131   :  { %v3212_v31 = vpop.eup %3211  ;;  %1352 = vmatprep.subr.mxu0 %v3208_v55  ;;  %1495 = vmatprep.subr.mxu1 %v3210_v48  ;;  %v5276_v39 = vpop.permute.xlu0 %964 }
 0x132   :  { %v3214_v19 = vpop.eup %3213  ;;  %1136 = vmatprep.mubr.f32.mxu0 %v6490_v11  ;;  %1279 = vmatprep.mubr.f32.mxu1 %v6490_v11 }
 0x133   :  { %v3216_v13 = vpop.eup %3215  ;;  %1353 = vmatpush1.msra.mxu0 %v3212_v31  ;;  %1496 = vmatpush1.msra.mxu1 %v3214_v19 }
 0x134   :  { %v3218_v4 = vpop.eup %3217  ;;  %2900 = vmatmul.mubr.msk.f32.gmra.mxu0 %vm1002_vm0, %v5107_v24  ;;  %2913 = vmatmul.mubr.msk.f32.gmra.mxu1 %vm1002_vm0, %v5107_v24 }
 0x135   :  { %v3220_v15 = vpop.eup %3219  ;;  %1354 = vmatprep.subr.mxu0 %v3196_v8  ;;  %1497 = vmatprep.subr.mxu1 %v3216_v13  ;;  %v5284_v47 = vpop.permute.xlu0 %954 }
 0x136   :  { %v3222_v53 = vpop.eup %3221  ;;  %1355 = vmatpush1.msra.mxu0 %v3194_v20  ;;  %1498 = vmatpush1.msra.mxu1 %v3198_v23 }
 0x137   :  { %v3224_v6 = vpop.eup %3223  ;;  %1356 = vmatprep.subr.mxu0 %v3220_v15  ;;  %1499 = vmatprep.subr.mxu1 %v3222_v53 }
 0x138   :  { %v3226_v34 = vpop.eup %3225  ;;  %1142 = vmatprep.mubr.f32.mxu0 %v6490_v11  ;;  %1285 = vmatprep.mubr.f32.mxu1 %v6490_v11 }
 0x139   :  { %v3228_v52 = vpop.eup %3227  ;;  %1357 = vmatpush1.msra.mxu0 %v3224_v6  ;;  %1500 = vmatpush1.msra.mxu1 %v3226_v34  ;;  %v5293_v50 = vpop.permute.xlu0 %944 }
 0x13a   :  { %v3230_v62 = vpop.eup %3229  ;;  %2901 = vmatmul.mubr.msk.f32.gmra.mxu0 %vm1002_vm0, %v5118_v18  ;;  %2914 = vmatmul.mubr.msk.f32.gmra.mxu1 %vm1002_vm0, %v5118_v18 }
 0x13b   :  { %v3232_v35 = vpop.eup %3231  ;;  %1358 = vmatprep.subr.mxu0 %v3228_v52  ;;  %1501 = vmatprep.subr.mxu1 %v3230_v62 }
 0x13c   :  { %1359 = vmatpush1.msra.mxu0 %v3218_v4  ;;  %1502 = vmatpush1.msra.mxu1 %v3232_v35 }
 0x13d   :  { %1148 = vmatprep.mubr.f32.mxu0 %v6490_v11  ;;  %1291 = vmatprep.mubr.f32.mxu1 %v6490_v11 }
 0x13e   :  { %2902 = vmatmul.mubr.msk.f32.gmra.mxu0 %vm1002_vm0, %v5129_v22  ;;  %2915 = vmatmul.mubr.msk.f32.gmra.mxu1 %vm1002_vm0, %v5129_v22 }
 0x13f   :  { %1154 = vmatprep.mubr.f32.mxu0 %v6490_v11  ;;  %1297 = vmatprep.mubr.f32.mxu1 %v6490_v11 }
 0x142   :  { %2903 = vmatmul.mubr.msk.f32.gmra.mxu0 %vm1002_vm0, %v919_v28  ;;  %2916 = vmatmul.mubr.msk.f32.gmra.mxu1 %vm1002_vm0, %v919_v28 }
 0x143   :  { %1160 = vmatprep.mubr.f32.mxu0 %v6490_v11  ;;  %1303 = vmatprep.mubr.f32.mxu1 %v6490_v11 }
 0x146   :  { %2904 = vmatmul.mubr.msk.f32.gmra.mxu0 %vm1002_vm0, %v920_v46  ;;  %2917 = vmatmul.mubr.msk.f32.gmra.mxu1 %vm1002_vm0, %v920_v46 }
 0x147   :  { %1166 = vmatprep.mubr.f32.mxu0 %v6490_v11  ;;  %1309 = vmatprep.mubr.f32.mxu1 %v6490_v11 }
 0x14a   :  { %2905 = vmatmul.mubr.msk.f32.gmra.mxu0 %vm1002_vm0, %v921_v2  ;;  %2918 = vmatmul.mubr.msk.f32.gmra.mxu1 %vm1002_vm0, %v921_v2 }
 0x14b   :  { %1172 = vmatprep.mubr.f32.mxu0 %v6490_v11  ;;  %1315 = vmatprep.mubr.f32.mxu1 %v6490_v11 }
 0x14e   :  { %2906 = vmatmul.mubr.msk.f32.gmra.mxu0 %vm1002_vm0, %v922_v0  ;;  %2919 = vmatmul.mubr.msk.f32.gmra.mxu1 %vm1002_vm0, %v922_v0 }
 0x14f   :  { %1178 = vmatprep.mubr.f32.mxu0 %v6490_v11  ;;  %1321 = vmatprep.mubr.f32.mxu1 %v6490_v11 }
 0x152   :  { %2907 = vmatmul.mubr.msk.f32.gmra.mxu0 %vm1002_vm0, %v923_v9  ;;  %2920 = vmatmul.mubr.msk.f32.gmra.mxu1 %vm1002_vm0, %v923_v9 }
 0x153   :  { %1392 = vmatprep.mubr.f32.mxu0 %v6490_v11  ;;  %1535 = vmatprep.mubr.f32.mxu1 %v6490_v11 }
 0x156   :  { %2921 = vmatmul.mubr.msk.f32.vlgmr.msra.gmra.mxu0 %vm1002_vm0, %v4971_v32  ;;  %2934 = vmatmul.mubr.msk.f32.vlgmr.msra.gmra.mxu1 %vm1002_vm0, %v4971_v32  ;;  %v5242_v32 = vpop.permute.xlu1 %999 }
 0x157   :  { %1398 = vmatprep.mubr.f32.mxu0 %v6490_v11  ;;  %1541 = vmatprep.mubr.f32.mxu1 %v6490_v11  ;;  %6502 = vst [vmem:[#allocation13_spill] sm:$0xff] %v5242_v32 }
 0x15a   :  { %2922 = vmatmul.mubr.msk.f32.gmra.mxu0 %vm1002_vm0, %v5003_v61  ;;  %2935 = vmatmul.mubr.msk.f32.gmra.mxu1 %vm1002_vm0, %v5003_v61  ;;  %v5248_v44 = vpop.permute.xlu1 %989 }
 0x15b   :  { %1404 = vmatprep.mubr.f32.mxu0 %v6490_v11  ;;  %1547 = vmatprep.mubr.f32.mxu1 %v6490_v11  ;;  %6503 = vst [vmem:[#allocation47_spill] sm:$0xff] %v5248_v44 }
 0x15e   :  { %2923 = vmatmul.mubr.msk.f32.gmra.mxu0 %vm1002_vm0, %v5044_v33  ;;  %2936 = vmatmul.mubr.msk.f32.gmra.mxu1 %vm1002_vm0, %v5044_v33  ;;  %v5256_v25 = vpop.permute.xlu1 %979 }
 0x15f   :  { %1410 = vmatprep.mubr.f32.mxu0 %v6490_v11  ;;  %1553 = vmatprep.mubr.f32.mxu1 %v6490_v11 }
 0x162   :  { %2924 = vmatmul.mubr.msk.f32.gmra.mxu0 %vm1002_vm0, %v5073_v10  ;;  %2937 = vmatmul.mubr.msk.f32.gmra.mxu1 %vm1002_vm0, %v5073_v10  ;;  %v5264_v42 = vpop.permute.xlu1 %969 }
 0x163   :  { %1416 = vmatprep.mubr.f32.mxu0 %v6490_v11  ;;  %1559 = vmatprep.mubr.f32.mxu1 %v6490_v11 }
 0x166   :  { %2925 = vmatmul.mubr.msk.f32.gmra.mxu0 %vm1002_vm0, %v5096_v54  ;;  %2938 = vmatmul.mubr.msk.f32.gmra.mxu1 %vm1002_vm0, %v5096_v54  ;;  %v5272_v60 = vpop.permute.xlu1 %959 }
 0x167   :  { %1422 = vmatprep.mubr.f32.mxu0 %v6490_v11  ;;  %1565 = vmatprep.mubr.f32.mxu1 %v6490_v11 }
 0x16a   :  { %2926 = vmatmul.mubr.msk.f32.gmra.mxu0 %vm1002_vm0, %v5107_v24  ;;  %2939 = vmatmul.mubr.msk.f32.gmra.mxu1 %vm1002_vm0, %v5107_v24  ;;  %v5280_v5 = vpop.permute.xlu1 %949 }
 0x16b   :  { %1428 = vmatprep.mubr.f32.mxu0 %v6490_v11  ;;  %1571 = vmatprep.mubr.f32.mxu1 %v6490_v11 }
 0x16e   :  { %2927 = vmatmul.mubr.msk.f32.gmra.mxu0 %vm1002_vm0, %v5118_v18  ;;  %2940 = vmatmul.mubr.msk.f32.gmra.mxu1 %vm1002_vm0, %v5118_v18  ;;  %v5288_v57 = vpop.permute.xlu1 %939 }
 0x16f   :  { %1434 = vmatprep.mubr.f32.mxu0 %v6490_v11  ;;  %1577 = vmatprep.mubr.f32.mxu1 %v6490_v11 }
 0x172   :  { %2928 = vmatmul.mubr.msk.f32.gmra.mxu0 %vm1002_vm0, %v5129_v22  ;;  %2941 = vmatmul.mubr.msk.f32.gmra.mxu1 %vm1002_vm0, %v5129_v22 }
 0x173   :  { %1440 = vmatprep.mubr.f32.mxu0 %v6490_v11  ;;  %1583 = vmatprep.mubr.f32.mxu1 %v6490_v11 }
 0x176   :  { %2929 = vmatmul.mubr.msk.f32.gmra.mxu0 %vm1002_vm0, %v919_v28  ;;  %2942 = vmatmul.mubr.msk.f32.gmra.mxu1 %vm1002_vm0, %v919_v28 }
 0x177   :  { %1446 = vmatprep.mubr.f32.mxu0 %v6490_v11  ;;  %1589 = vmatprep.mubr.f32.mxu1 %v6490_v11 }
 0x17a   :  { %2930 = vmatmul.mubr.msk.f32.gmra.mxu0 %vm1002_vm0, %v920_v46  ;;  %2943 = vmatmul.mubr.msk.f32.gmra.mxu1 %vm1002_vm0, %v920_v46 }
 0x17b   :  { %1452 = vmatprep.mubr.f32.mxu0 %v6490_v11  ;;  %1595 = vmatprep.mubr.f32.mxu1 %v6490_v11 }
 0x17e   :  { %2931 = vmatmul.mubr.msk.f32.gmra.mxu0 %vm1002_vm0, %v921_v2  ;;  %2944 = vmatmul.mubr.msk.f32.gmra.mxu1 %vm1002_vm0, %v921_v2 }
 0x17f   :  { %1458 = vmatprep.mubr.f32.mxu0 %v6490_v11  ;;  %1601 = vmatprep.mubr.f32.mxu1 %v6490_v11 }
 0x182   :  { %2932 = vmatmul.mubr.msk.f32.gmra.mxu0 %vm1002_vm0, %v922_v0  ;;  %2945 = vmatmul.mubr.msk.f32.gmra.mxu1 %vm1002_vm0, %v922_v0 }
 0x183   :  { %1464 = vmatprep.mubr.f32.mxu0 %v6490_v11  ;;  %1607 = vmatprep.mubr.f32.mxu1 %v6490_v11 }
 0x186   :  { %2933 = vmatmul.mubr.msk.f32.gmra.mxu0 %vm1002_vm0, %v923_v9  ;;  %2946 = vmatmul.mubr.msk.f32.gmra.mxu1 %vm1002_vm0, %v923_v9 }
 0x187   :  { %1912 = vmatprep.mubr.f32.mxu0 %v6490_v11  ;;  %2055 = vmatprep.mubr.f32.mxu1 %v6490_v11 }
 0x1d5   :  { %v1108_v61 = vpop.f32.mrf.mxu0 }
 0x1d6   :  { %v1109_v49 = vadd.f32 %v1108_v61, %v5288_v57 }
 0x1d7   :  { %v5244_v30 = vpop.f32.mrf.mxu1  ;;  %v1110_v33 = vpop.f32.mrf.mxu0 }
 0x1d8   :  { %v1111_v38 = vadd.f32 %v1110_v33, %v5288_v57  ;;  %3233 = vtanh.f32 %v1109_v49 }
 0x1d9   :  { %v5246_v16 = vpop.f32.mrf.mxu1 }
 0x1da   :  { %3235 = vtanh.f32 %v1111_v38 }
 0x1dc   :  { %v1114_v3 = vpop.f32.mrf.mxu0  ;;  %v5250_v51 = vpop.f32.mrf.mxu1 }
 0x1dd   :  { %v1115_v56 = vadd.f32 %v1114_v3, %v5293_v50 }
 0x1de   :  { %v1116_v21 = vpop.f32.mrf.mxu0  ;;  %v5254_v27 = vpop.f32.mrf.mxu1 }
 0x1df   :  { %v1117_v31 = vadd.f32 %v1116_v21, %v5293_v50  ;;  %3237 = vtanh.f32 %v1115_v56 }
 0x1e1   :  { %3239 = vtanh.f32 %v1117_v31 }
 0x1e2   :  { %v1120_v45 = vpop.f32.mrf.mxu0  ;;  %v5258_v17 = vpop.f32.mrf.mxu1 }
 0x1e3   :  { %v1121_v24 = vadd.f32 %v1120_v45, %v5280_v5 }
 0x1e4   :  { %v1122_v37 = vpop.f32.mrf.mxu0  ;;  %v5262_v59 = vpop.f32.mrf.mxu1 }
 0x1e5   :  { %v1123_v4 = vadd.f32 %v1122_v37, %v5280_v5  ;;  %3241 = vtanh.f32 %v1121_v24 }
 0x1e7   :  { %3243 = vtanh.f32 %v1123_v4 }
 0x1e8   :  { %v1126_v26 = vpop.f32.mrf.mxu0  ;;  %v5266_v41 = vpop.f32.mrf.mxu1 }
 0x1e9   :  { %v1127_v15 = vadd.f32 %v1126_v26, %v5284_v47 }
 0x1ea   :  { %v1128_v36 = vpop.f32.mrf.mxu0  ;;  %v5270_v10 = vpop.f32.mrf.mxu1 }
 0x1eb   :  { %v1129_v18 = vadd.f32 %v1128_v36, %v5284_v47  ;;  %3245 = vtanh.f32 %v1127_v15 }
 0x1ed   :  { %3247 = vtanh.f32 %v1129_v18 }
 0x1ee   :  { %v1132_v29 = vpop.f32.mrf.mxu0  ;;  %v5274_v43 = vpop.f32.mrf.mxu1 }
 0x1ef   :  { %v1133_v34 = vadd.f32 %v1132_v29, %v5272_v60 }
 0x1f0   :  { %v1134_v7 = vpop.f32.mrf.mxu0  ;;  %v5278_v20 = vpop.f32.mrf.mxu1 }
 0x1f1   :  { %v1135_v35 = vadd.f32 %v1134_v7, %v5272_v60  ;;  %3249 = vtanh.f32 %v1133_v34  ;;  %v5325_v7 = vpop.eup %3233 }
 0x1f3   :  { %3251 = vtanh.f32 %v1135_v35 }
 0x1f4   :  { %v1138_v1 = vpop.f32.mrf.mxu0  ;;  %v5282_v8 = vpop.f32.mrf.mxu1 }
 0x1f5   :  { %v1139_v22 = vadd.f32 %v1138_v1, %v5276_v39 }
 0x1f6   :  { %v1140_v14 = vpop.f32.mrf.mxu0  ;;  %v5286_v23 = vpop.f32.mrf.mxu1 }
 0x1f7   :  { %v1141_v2 = vadd.f32 %v1140_v14, %v5276_v39  ;;  %3253 = vtanh.f32 %v1139_v22  ;;  %v5328_v14 = vpop.eup %3235 }
 0x1f8   :  { %v5331_v56 = vpop.eup %3237 }
 0x1f9   :  { %3255 = vtanh.f32 %v1141_v2  ;;  %v5334_v31 = vpop.eup %3239 }
 0x1fa   :  { %v1144_v12 = vpop.f32.mrf.mxu0  ;;  %v5291_v54 = vpop.f32.mrf.mxu1 }
 0x1fb   :  { %v1145_v0 = vadd.f32 %v1144_v12, %v5264_v42  ;;  %v5337_v15 = vpop.eup %3241 }
 0x1fc   :  { %v1146_v55 = vpop.f32.mrf.mxu0  ;;  %v5297_v48 = vpop.f32.mrf.mxu1 }
 0x1fd   :  { %v1147_v33 = vadd.f32 %v1146_v55, %v5264_v42  ;;  %3257 = vtanh.f32 %v1145_v0  ;;  %v5340_v18 = vpop.eup %3243 }
 0x1fe   :  { %v1150_v19 = vpop.f32.mrf.mxu0  ;;  %v5301_v13 = vpop.f32.mrf.mxu1 }
 0x1ff   :  { %v1151_v3 = vadd.f32 %v1150_v19, %v5268_v40  ;;  %3259 = vtanh.f32 %v1147_v33  ;;  %v5343_v22 = vpop.eup %3245 }
 0x200   :  { %v1152_v53 = vpop.f32.mrf.mxu0  ;;  %v5305_v6 = vpop.f32.mrf.mxu1 }
 0x201   :  { %v1153_v37 = vadd.f32 %v1152_v53, %v5268_v40  ;;  %3261 = vtanh.f32 %v1151_v3  ;;  %v5346_v2 = vpop.eup %3247 }
 0x202   :  { %v1156_v52 = vpop.f32.mrf.mxu0  ;;  %v5309_v62 = vpop.f32.mrf.mxu1 }
 0x203   :  { %v1157_v26 = vadd.f32 %v1156_v52, %v5256_v25  ;;  %3263 = vtanh.f32 %v1153_v37  ;;  %v5348_v33 = vpop.eup %3249 }
 0x204   :  { %v1158_v28 = vpop.f32.mrf.mxu0  ;;  %v5313_v46 = vpop.f32.mrf.mxu1 }
 0x205   :  { %v1159_v1 = vadd.f32 %v1158_v28, %v5256_v25  ;;  %3265 = vtanh.f32 %v1157_v26 }
 0x206   :  { %v1162_v9 = vpop.f32.mrf.mxu0  ;;  %v5317_v61 = vpop.f32.mrf.mxu1 }
 0x207   :  { %v1163_v49 = vadd.f32 %v1162_v9, %v5260_v63  ;;  %3267 = vtanh.f32 %v1159_v1 }
 0x208   :  { %v1164_v21 = vpop.f32.mrf.mxu0  ;;  %v5321_v45 = vpop.f32.mrf.mxu1 }
 0x209   :  { %v1165_v55 = vadd.f32 %v1164_v21, %v5260_v63  ;;  %3269 = vtanh.f32 %v1163_v49  ;;  %v5351_v21 = vpop.eup %3251 }
 0x20a   :  { %v1168_v36 = vpop.f32.mrf.mxu0  ;;  %v1311_v29 = vpop.f32.mrf.mxu1 }
 0x20b   :  { %v1169_v24 = vadd.f32 %v1168_v36, %v5248_v44  ;;  %3271 = vtanh.f32 %v1165_v55  ;;  %v5353_v36 = vpop.eup %3253 }
 0x20c   :  { %v1170_v12 = vpop.f32.mrf.mxu0  ;;  %v1313_v38 = vpop.f32.mrf.mxu1 }
 0x20d   :  { %v1171_v53 = vadd.f32 %v1170_v12, %v5248_v44  ;;  %3273 = vtanh.f32 %v1169_v24  ;;  %v5358_v55 = vpop.eup %3255 }
 0x20e   :  { %v1174_v19 = vpop.f32.mrf.mxu0  ;;  %v1317_v4 = vpop.f32.mrf.mxu1 }
 0x20f   :  { %v1175_v34 = vadd.f32 %v1174_v19, %v5252_v58  ;;  %3275 = vtanh.f32 %v1171_v53 }
 0x210   :  { %v1176_v52 = vpop.f32.mrf.mxu0  ;;  %v1319_v35 = vpop.f32.mrf.mxu1 }
 0x211   :  { %v1177_v28 = vadd.f32 %v1176_v52, %v5252_v58  ;;  %3277 = vtanh.f32 %v1175_v34  ;;  %v1320_v24 = vadd.f32 %v1319_v35, %v5252_v58  ;;  %v5365_v34 = vpop.eup %3257  ;;  %v1318_v52 = vadd.f32 %v1317_v4, %v5252_v58 }
 0x212   :  { %v1180_v0 = vpop.f32.mrf.mxu0  ;;  %v1323_v9 = vpop.f32.mrf.mxu1  ;;  %v1308_v4 = vadd.f32 %v5321_v45, %v5260_v63 }
 0x213   :  { %v1181_v3 = vadd.f32 %v1180_v0, %v5242_v32  ;;  %3279 = vtanh.f32 %v1177_v28  ;;  %v1324_v1 = vadd.f32 %v1323_v9, %v5242_v32  ;;  %v5368_v28 = vpop.eup %3259  ;;  %v1314_v0 = vadd.f32 %v1313_v38, %v5248_v44 }
 0x214   :  { %v1182_v37 = vpop.f32.mrf.mxu0  ;;  %v1325_v26 = vpop.f32.mrf.mxu1 }
 0x215   :  { %v1183_v49 = vadd.f32 %v1182_v37, %v5242_v32  ;;  %v1326_v12 = vadd.f32 %v1325_v26, %v5242_v32  ;;  %3281 = vtanh.f32 %v1181_v3  ;;  %v5375_v35 = vpop.eup %3261  ;;  %v1312_v3 = vadd.f32 %v1311_v29, %v5248_v44 }
 0x216   :  { %v5361_v19 = vpop.f32.mrf.mxu0  ;;  %v5363_v53 = vpop.f32.mrf.mxu1  ;;  %v1302_v29 = vadd.f32 %v5313_v46, %v5256_v25 }
 0x217   :  { %6505 = vst [vmem:[#allocation45_spill] sm:$0xff] %v5363_v53  ;;  %3283 = vtanh.f32 %v1183_v49  ;;  %v5378_v26 = vpop.eup %3263 }
 0x218   :  { %3285 = vtanh.f32 %v1326_v12  ;;  %v5371_v9 = vpop.f32.mrf.mxu0  ;;  %v5373_v37 = vpop.f32.mrf.mxu1  ;;  %v1306_v12 = vadd.f32 %v5317_v61, %v5260_v63  ;;  %v1296_v61 = vadd.f32 %v5305_v6, %v5268_v40 }
 0x219   :  { %6506 = vst [vmem:[#allocation48_spill] sm:$0xff] %v5373_v37  ;;  %3287 = vtanh.f32 %v1324_v1  ;;  %v5386_v38 = vpop.eup %3265 }
 0x21a   :  { %3289 = vtanh.f32 %v1320_v24  ;;  %v5382_v49 = vpop.f32.mrf.mxu0  ;;  %v5384_v53 = vpop.f32.mrf.mxu1 }
 0x21b   :  { %6507 = vst [vmem:[#allocation15_spill] sm:$0xff] %v5384_v53  ;;  %3291 = vtanh.f32 %v1318_v52  ;;  %v5390_v37 = vpop.eup %3267  ;;  %v1300_v53 = vadd.f32 %v5309_v62, %v5256_v25  ;;  %v1290_v62 = vadd.f32 %v5297_v48, %v5264_v42 }
 0x21c   :  { %3293 = vtanh.f32 %v1314_v0  ;;  %v5394_v1 = vpop.f32.mrf.mxu0  ;;  %v5396_v45 = vpop.f32.mrf.mxu1 }
 0x21d   :  { %6508 = vst [vmem:[#allocation57_spill] sm:$0xff] %v5394_v1  ;;  %6509 = vst [vmem:[#allocation58_spill] sm:$0xff] %v5396_v45  ;;  %v5398_v24 = vpop.eup %3269  ;;  %3295 = vtanh.f32 %v1312_v3  ;;  %v1294_v1 = vadd.f32 %v5301_v13, %v5268_v40  ;;  %v1284_v13 = vadd.f32 %v5286_v23, %v5276_v39 }
 0x21e   :  { %v5402_v32 = vpop.eup %3271  ;;  %3297 = vtanh.f32 %v1308_v4  ;;  %v5406_v52 = vpop.f32.mrf.mxu0 }
 0x21f   :  { %6510 = vst [vmem:[#allocation16_spill] sm:$0xff] %v5406_v52  ;;  %v1549_v46 = vpop.f32.mrf.mxu1  ;;  %v3274_v0 = vpop.eup %3273  ;;  %3299 = vtanh.f32 %v1306_v12  ;;  %v1288_v52 = vadd.f32 %v5291_v54, %v5264_v42 }
 0x220   :  { %v5411_v45 = vadd.f32 %v1549_v46, %v5280_v5  ;;  %v3276_v58 = vpop.eup %3275  ;;  %3301 = vtanh.f32 %v1302_v29  ;;  %v5415_v3 = vpop.f32.mrf.mxu0  ;;  %v1282_v29 = vadd.f32 %v5282_v8, %v5276_v39  ;;  %v1272_v8 = vadd.f32 %v5270_v10, %v5284_v47 }
 0x221   :  { %v5417_v6 = vpop.f32.mrf.mxu1  ;;  %v3278_v4 = vpop.eup %3277  ;;  %3303 = vtanh.f32 %v1300_v53 }
 0x222   :  { %6511 = vst [vmem:[#allocation31_spill] sm:$0xff] %v5411_v45  ;;  %6512 = vst [vmem:[#allocation28_spill] sm:$0xff] %v5417_v6  ;;  %v3280_v44 = vpop.eup %3279  ;;  %3305 = vtanh.f32 %v1296_v61  ;;  %v5423_v12 = vpop.f32.mrf.mxu0  ;;  %v1278_v6 = vadd.f32 %v5278_v20, %v5272_v60  ;;  %v1276_v61 = vadd.f32 %v5274_v43, %v5272_v60 }
 0x223   :  { %v5425_v46 = vpop.f32.mrf.mxu1  ;;  %v3282_v48 = vpop.eup %3281  ;;  %3307 = vtanh.f32 %v1294_v1 }
 0x224   :  { %6513 = vst [vmem:[#allocation32_spill] sm:$0xff] %v5425_v46  ;;  %v3284_v45 = vpop.eup %3283  ;;  %3309 = vtanh.f32 %v1290_v62  ;;  %v5431_v54 = vpop.f32.mrf.mxu0 }
 0x225   :  { %v5433_v53 = vpop.f32.mrf.mxu1  ;;  %v3286_v23 = vpop.eup %3285  ;;  %3311 = vtanh.f32 %v1288_v52  ;;  %1854 = vmatprep.subr.mxu0 %v3284_v45  ;;  %v1266_v45 = vadd.f32 %v5262_v59, %v5280_v5 }
 0x226   :  { %6514 = vst [vmem:[#allocation59_spill] sm:$0xff] %v5433_v53  ;;  %v3288_v46 = vpop.eup %3287  ;;  %3313 = vtanh.f32 %v1284_v13  ;;  %1997 = vmatprep.subr.mxu1 %v3286_v23  ;;  %v5439_v1 = vpop.f32.mrf.mxu0  ;;  %1855 = vmatpush1.msra.mxu0 %v3282_v48  ;;  %v1270_v53 = vadd.f32 %v5266_v41, %v5284_v47  ;;  %v1264_v48 = vadd.f32 %v5258_v17, %v5280_v5 }
 0x227   :  { %v5441_v20 = vpop.f32.mrf.mxu1  ;;  %v3290_v62 = vpop.eup %3289  ;;  %3315 = vtanh.f32 %v1282_v29  ;;  %1998 = vmatpush1.msra.mxu1 %v3288_v46  ;;  %1856 = vmatprep.subr.mxu0 %v3280_v44  ;;  %v1260_v44 = vadd.f32 %v5254_v27, %v5293_v50  ;;  %v1254_v17 = vadd.f32 %v5246_v16, %v5288_v57 }
 0x228   :  { %v3292_v43 = vpop.eup %3291  ;;  %3317 = vtanh.f32 %v1278_v6  ;;  %1999 = vmatprep.subr.mxu1 %v3290_v62  ;;  %v5447_v10 = vpop.f32.mrf.mxu0  ;;  %1857 = vmatpush1.msra.mxu0 %v3278_v4  ;;  %v1258_v4 = vadd.f32 %v5250_v51, %v5293_v50  ;;  %v1252_v51 = vadd.f32 %v5244_v30, %v5288_v57 }
 0x229   :  { %v5449_v52 = vpop.f32.mrf.mxu1  ;;  %v3294_v13 = vpop.eup %3293  ;;  %3319 = vtanh.f32 %v1276_v61  ;;  %2000 = vmatpush1.msra.mxu1 %v3292_v43  ;;  %1858 = vmatprep.subr.mxu0 %v3276_v58 }
 0x22a   :  { %v3296_v41 = vpop.eup %3295  ;;  %3321 = vtanh.f32 %v1272_v8  ;;  %2001 = vmatprep.subr.mxu1 %v3294_v13  ;;  %v5455_v59 = vpop.f32.mrf.mxu0  ;;  %1859 = vmatpush1.msra.mxu0 %v3274_v0 }
 0x22b   :  { %v5457_v6 = vpop.f32.mrf.mxu1  ;;  %v3298_v46 = vpop.eup %3297  ;;  %3323 = vtanh.f32 %v1270_v53  ;;  %2002 = vmatpush1.msra.mxu1 %v3296_v41  ;;  %1860 = vmatprep.subr.mxu0 %v5402_v32 }
 0x22c   :  { %v3300_v58 = vpop.eup %3299  ;;  %3325 = vtanh.f32 %v1266_v45  ;;  %2003 = vmatprep.subr.mxu1 %v3298_v46  ;;  %v5464_v27 = vpop.f32.mrf.mxu0  ;;  %1861 = vmatpush1.msra.mxu0 %v5398_v24  ;;  %v1395_v46 = vadd.f32 %v5361_v19, %v5288_v57 }
 0x22d   :  { %v5466_v29 = vpop.f32.mrf.mxu1  ;;  %v3302_v0 = vpop.eup %3301  ;;  %3327 = vtanh.f32 %v1264_v48  ;;  %2004 = vmatpush1.msra.mxu1 %v3300_v58  ;;  %1862 = vmatprep.subr.mxu0 %v5390_v37 }
 0x22e   :  { %v3304_v32 = vpop.eup %3303  ;;  %3329 = vtanh.f32 %v1260_v44  ;;  %2005 = vmatprep.subr.mxu1 %v3302_v0  ;;  %v5472_v16 = vpop.f32.mrf.mxu0  ;;  %1863 = vmatpush1.msra.mxu0 %v5386_v38 }
 0x22f   :  { %v5474_v53 = vpop.f32.mrf.mxu1  ;;  %v3306_v23 = vpop.eup %3305  ;;  %3331 = vtanh.f32 %v1258_v4  ;;  %2006 = vmatpush1.msra.mxu1 %v3304_v32  ;;  %1864 = vmatprep.subr.mxu0 %v5378_v26 }
 0x230   :  { %v3308_v24 = vpop.eup %3307  ;;  %3333 = vtanh.f32 %v1254_v17  ;;  %2007 = vmatprep.subr.mxu1 %v3306_v23  ;;  %v5478_v30 = vpop.f32.mrf.mxu0  ;;  %1865 = vmatpush1.msra.mxu0 %v5375_v35  ;;  %v1425_v23 = vadd.f32 %v5455_v59, %v5276_v39 }
 0x231   :  { %v5480_v37 = vpop.f32.mrf.mxu1  ;;  %v3310_v61 = vpop.eup %3309  ;;  %3335 = vtanh.f32 %v1252_v51  ;;  %2008 = vmatpush1.msra.mxu1 %v3308_v24  ;;  %1866 = vmatprep.subr.mxu0 %v5368_v28  ;;  %v1421_v51 = vadd.f32 %v5447_v10, %v5272_v60 }
 0x232   :  { %v3312_v38 = vpop.eup %3311  ;;  %2009 = vmatprep.subr.mxu1 %v3310_v61  ;;  %v5484_v8 = vpop.f32.mrf.mxu0  ;;  %1867 = vmatpush1.msra.mxu0 %v5365_v34  ;;  %3337 = vtanh.f32 %v1395_v46  ;;  %v6517_v46 = vld [vmem:[#allocation13_spill] sm:$0xff] }
 0x233   :  { %v5486_v62 = vpop.f32.mrf.mxu1  ;;  %v3314_v26 = vpop.eup %3313  ;;  %2010 = vmatpush1.msra.mxu1 %v3312_v38  ;;  %1868 = vmatprep.subr.mxu0 %v5358_v55  ;;  %v1437_v59 = vadd.f32 %v5484_v8, %v5268_v40 }
 0x234   :  { %v3316_v43 = vpop.eup %3315  ;;  %2011 = vmatprep.subr.mxu1 %v3314_v26  ;;  %v5490_v35 = vpop.f32.mrf.mxu0  ;;  %1869 = vmatpush1.msra.mxu0 %v5353_v36  ;;  %v6515_v26 = vld [vmem:[#allocation47_spill] sm:$0xff] }
 0x235   :  { %v5492_v45 = vpop.f32.mrf.mxu1  ;;  %v3318_v28 = vpop.eup %3317  ;;  %2012 = vmatpush1.msra.mxu1 %v3316_v43  ;;  %1870 = vmatprep.subr.mxu0 %v5351_v21 }
 0x236   :  { %v3320_v13 = vpop.eup %3319  ;;  %2013 = vmatprep.subr.mxu1 %v3318_v28  ;;  %v5496_v48 = vpop.f32.mrf.mxu0  ;;  %1871 = vmatpush1.msra.mxu0 %v5348_v33  ;;  %v1397_v33 = vadd.f32 %v5371_v9, %v5288_v57 }
 0x237   :  { %v5498_v34 = vpop.f32.mrf.mxu1  ;;  %v3322_v55 = vpop.eup %3321  ;;  %2014 = vmatpush1.msra.mxu1 %v3320_v13  ;;  %1872 = vmatprep.subr.mxu0 %v5346_v2  ;;  %v5566_v13 = vld [vmem:[%s6297_s5 + $0x10] sm:$0xff] }
 0x238   :  { %v3324_v41 = vpop.eup %3323  ;;  %2015 = vmatprep.subr.mxu1 %v3322_v55  ;;  %v1444_v44 = vpop.f32.mrf.mxu0  ;;  %1873 = vmatpush1.msra.mxu0 %v5343_v22  ;;  %v1401_v22 = vadd.f32 %v5382_v49, %v5293_v50  ;;  %3339 = vtanh.f32 %v1397_v33  ;;  %v6516_v55 = vld [vmem:[#allocation14_spill] sm:$0xff] }
 0x239   :  { %v5502_v36 = vpop.f32.mrf.mxu1  ;;  %v3326_v21 = vpop.eup %3325  ;;  %2016 = vmatpush1.msra.mxu1 %v3324_v41  ;;  %1874 = vmatprep.subr.mxu0 %v5340_v18  ;;  %v1409_v18 = vadd.f32 %v5415_v3, %v5280_v5  ;;  %v1445_v24 = vadd.f32 %v1444_v44, %v5256_v25 }
 0x23a   :  { %v3328_v4 = vpop.eup %3327  ;;  %2017 = vmatprep.subr.mxu1 %v3326_v21  ;;  %v1448_v2 = vpop.f32.mrf.mxu0  ;;  %1875 = vmatpush1.msra.mxu0 %v5337_v15  ;;  %v5526_v15 = vld [vmem:[%s6297_s5] sm:$0xff]  ;;  %3341 = vtanh.f32 %v1401_v22 }
 0x23b   :  { %v5510_v58 = vpop.f32.mrf.mxu1  ;;  %v3330_v17 = vpop.eup %3329  ;;  %2018 = vmatpush1.msra.mxu1 %v3328_v4  ;;  %1876 = vmatprep.subr.mxu0 %v5334_v31  ;;  %v1413_v31 = vadd.f32 %v5423_v12, %v5284_v47  ;;  %3343 = vtanh.f32 %v1409_v18  ;;  %v1449_v38 = vadd.f32 %v1448_v2, %v5260_v63 }
 0x23c   :  { %v3332_v19 = vpop.eup %3331  ;;  %2019 = vmatprep.subr.mxu1 %v3330_v17  ;;  %v5518_v0 = vpop.f32.mrf.mxu0  ;;  %1877 = vmatpush1.msra.mxu0 %v5331_v56  ;;  %v5579_v17 = vld [vmem:[%s6297_s5 + $0x18] sm:$0xff] }
 0x23d   :  { %v5520_v9 = vpop.f32.mrf.mxu1  ;;  %v3334_v49 = vpop.eup %3333  ;;  %2020 = vmatpush1.msra.mxu1 %v3332_v19  ;;  %1878 = vmatprep.subr.mxu0 %v5328_v14  ;;  %v1433_v14 = vadd.f32 %v5478_v30, %v5264_v42  ;;  %3345 = vtanh.f32 %v1413_v31 }
 0x23e   :  { %v3336_v3 = vpop.eup %3335  ;;  %2021 = vmatprep.subr.mxu1 %v3334_v49  ;;  %v5533_v56 = vpop.f32.mrf.mxu0  ;;  %1879 = vmatpush1.msra.mxu0 %v5325_v7  ;;  %v5550_v7 = vld [vmem:[%s6297_s5 + $0x8] sm:$0xff]  ;;  %3347 = vtanh.f32 %v1421_v51 }
 0x23f   :  { %v5535_v32 = vpop.f32.mrf.mxu1  ;;  %2022 = vmatpush1.msra.mxu1 %v3336_v3  ;;  %2947 = vmatmul.mubr.msk.f32.vlgmr.msra.gmra.mxu0 %vm1002_vm0, %v5526_v15  ;;  %3349 = vtanh.f32 %v1425_v23  ;;  %v5585_v49 = vpop.eup %3337 }
 0x240   :  { %2960 = vmatmul.mubr.msk.f32.vlgmr.msra.gmra.mxu1 %vm1002_vm0, %v5526_v15  ;;  %v1456_v12 = vpop.f32.mrf.mxu0  ;;  %1918 = vmatprep.mubr.f32.mxu0 %v6490_v11  ;;  %3351 = vtanh.f32 %v1433_v14 }
 0x241   :  { %v1599_v10 = vpop.f32.mrf.mxu1  ;;  %2061 = vmatprep.mubr.f32.mxu1 %v6490_v11  ;;  %v1457_v43 = vadd.f32 %v1456_v12, %v6515_v26  ;;  %3353 = vtanh.f32 %v1437_v59  ;;  %v5602_v12 = vld [vmem:[%s6297_s5 + $0x20] sm:$0xff] }
 0x242   :  { %v1460_v30 = vpop.f32.mrf.mxu0  ;;  %3355 = vtanh.f32 %v1445_v24  ;;  %v1600_v24 = vadd.f32 %v1599_v10, %v6515_v26  ;;  %v1451_v10 = vadd.f32 %v5518_v0, %v5260_v63 }
 0x243   :  { %v1603_v61 = vpop.f32.mrf.mxu1  ;;  %2948 = vmatmul.mubr.msk.f32.gmra.mxu0 %vm1002_vm0, %v5550_v7  ;;  %v1461_v41 = vadd.f32 %v1460_v30, %v6516_v55  ;;  %3357 = vtanh.f32 %v1449_v38 }
 0x244   :  { %2961 = vmatmul.mubr.msk.f32.gmra.mxu1 %vm1002_vm0, %v5550_v7  ;;  %v1462_v8 = vpop.f32.mrf.mxu0  ;;  %1924 = vmatprep.mubr.f32.mxu0 %v6490_v11  ;;  %3359 = vtanh.f32 %v1457_v43  ;;  %v1604_v14 = vadd.f32 %v1603_v61, %v6516_v55  ;;  %v1455_v61 = vadd.f32 %v5533_v56, %v6515_v26  ;;  %v1598_v43 = vadd.f32 %v5535_v32, %v6515_v26  ;;  %v5628_v56 = vld [vmem:[%s6297_s5 + $0x28] sm:$0xff] }
 0x245   :  { %v1605_v28 = vpop.f32.mrf.mxu1  ;;  %2067 = vmatprep.mubr.f32.mxu1 %v6490_v11  ;;  %3361 = vtanh.f32 %v1461_v41  ;;  %v1463_v31 = vadd.f32 %v1462_v8, %v6516_v55  ;;  %v5588_v3 = vpop.eup %3339  ;;  %v1594_v26 = vadd.f32 %v5520_v9, %v5260_v63  ;;  %v1588_v41 = vadd.f32 %v5502_v36, %v5256_v25 }
 0x246   :  { %v1466_v44 = vpop.f32.mrf.mxu0  ;;  %v1606_v51 = vadd.f32 %v1605_v28, %v6516_v55  ;;  %v1592_v28 = vadd.f32 %v5510_v58, %v5260_v63  ;;  %v1443_v9 = vadd.f32 %v5496_v48, %v5256_v25  ;;  %v5655_v63 = vld [vmem:[%s6297_s5 + $0x30] sm:$0xff]  ;;  %v1586_v58 = vadd.f32 %v5498_v34, %v5256_v25 }
 0x247   :  { %v1609_v21 = vpop.f32.mrf.mxu1  ;;  %v1467_v4 = vadd.f32 %v1466_v44, %v6517_v46  ;;  %2949 = vmatmul.mubr.msk.f32.gmra.mxu0 %vm1002_vm0, %v5566_v13  ;;  %v5593_v23 = vpop.eup %3341  ;;  %v1439_v48 = vadd.f32 %v5490_v35, %v5268_v40  ;;  %v1580_v25 = vadd.f32 %v5486_v62, %v5268_v40  ;;  %v5674_v35 = vld [vmem:[%s6297_s5 + $0x38] sm:$0xff]  ;;  %v1576_v34 = vadd.f32 %v5480_v37, %v5264_v42 }
 0x248   :  { %2962 = vmatmul.mubr.msk.f32.gmra.mxu1 %vm1002_vm0, %v5566_v13  ;;  %v1468_v33 = vpop.f32.mrf.mxu0  ;;  %1930 = vmatprep.mubr.f32.mxu0 %v6490_v11  ;;  %v1610_v22 = vadd.f32 %v1609_v21, %v6517_v46  ;;  %v5604_v59 = vpop.eup %3343  ;;  %v1431_v62 = vadd.f32 %v5472_v16, %v5264_v42 }
 0x249   :  { %v1611_v2 = vpop.f32.mrf.mxu1  ;;  %v1469_v19 = vadd.f32 %v1468_v33, %v6517_v46  ;;  %2073 = vmatprep.mubr.f32.mxu1 %v6490_v11  ;;  %3363 = vtanh.f32 %v1467_v4  ;;  %v1582_v4 = vadd.f32 %v5492_v45, %v5268_v40 }
 0x24a   :  { %v1612_v18 = vadd.f32 %v1611_v2, %v6517_v46  ;;  %v5608_v30 = vpop.eup %3345 }
 0x24b   :  { %3365 = vtanh.f32 %v1469_v19  ;;  %2950 = vmatmul.mubr.msk.f32.gmra.mxu0 %vm1002_vm0, %v5579_v17  ;;  %v5612_v38 = vpop.eup %3347  ;;  %v1427_v19 = vadd.f32 %v5464_v27, %v5276_v39  ;;  %v5696_v27 = vld [vmem:[%s6297_s5 + $0x40] sm:$0xff] }
 0x24c   :  { %3367 = vtanh.f32 %v1612_v18  ;;  %2963 = vmatmul.mubr.msk.f32.gmra.mxu1 %vm1002_vm0, %v5579_v17  ;;  %1936 = vmatprep.mubr.f32.mxu0 %v6490_v11  ;;  %v5618_v8 = vpop.eup %3349  ;;  %v1570_v18 = vadd.f32 %v5466_v29, %v5276_v39 }
 0x24d   :  { %3369 = vtanh.f32 %v1610_v22  ;;  %2079 = vmatprep.mubr.f32.mxu1 %v6490_v11  ;;  %v5630_v32 = vpop.eup %3351  ;;  %v1574_v22 = vadd.f32 %v5474_v53, %v5264_v42  ;;  %v1568_v53 = vadd.f32 %v5457_v6, %v5276_v39  ;;  %v1419_v39 = vadd.f32 %v5439_v1, %v5272_v60 }
 0x24e   :  { %3371 = vtanh.f32 %v1463_v31  ;;  %v5635_v0 = vpop.eup %3353 }
 0x24f   :  { %3373 = vtanh.f32 %v1606_v51  ;;  %2951 = vmatmul.mubr.msk.f32.gmra.mxu0 %vm1002_vm0, %v5602_v12  ;;  %v5639_v55 = vpop.eup %3355  ;;  %v1564_v51 = vadd.f32 %v5449_v52, %v5272_v60 }
 0x250   :  { %3375 = vtanh.f32 %v1604_v14  ;;  %2964 = vmatmul.mubr.msk.f32.gmra.mxu1 %vm1002_vm0, %v5602_v12  ;;  %1942 = vmatprep.mubr.f32.mxu0 %v6490_v11  ;;  %v5645_v44 = vpop.eup %3357  ;;  %v1562_v14 = vadd.f32 %v5441_v20, %v5272_v60  ;;  %v6519_v20 = vld [vmem:[#allocation32_spill] sm:$0xff] }
 0x251   :  { %3377 = vtanh.f32 %v1600_v24  ;;  %2085 = vmatprep.mubr.f32.mxu1 %v6490_v11  ;;  %v3360_v36 = vpop.eup %3359  ;;  %v1415_v24 = vadd.f32 %v5431_v54, %v5284_v47  ;;  %v5721_v54 = vld [vmem:[%s6297_s5 + $0x48] sm:$0xff] }
 0x252   :  { %3379 = vtanh.f32 %v1455_v61  ;;  %v3362_v21 = vpop.eup %3361  ;;  %v6518_v61 = vld [vmem:[#allocation59_spill] sm:$0xff] }
 0x253   :  { %3381 = vtanh.f32 %v1598_v43  ;;  %2952 = vmatmul.mubr.msk.f32.gmra.mxu0 %vm1002_vm0, %v5628_v56  ;;  %v1558_v43 = vadd.f32 %v6518_v61, %v5284_v47 }
 0x254   :  { %3383 = vtanh.f32 %v1451_v10  ;;  %2965 = vmatmul.mubr.msk.f32.gmra.mxu1 %vm1002_vm0, %v5628_v56  ;;  %1948 = vmatprep.mubr.f32.mxu0 %v6490_v11  ;;  %v1556_v10 = vadd.f32 %v6519_v20, %v5284_v47  ;;  %v6521_v47 = vld [vmem:[#allocation16_spill] sm:$0xff] }
 0x255   :  { %3385 = vtanh.f32 %v1594_v26  ;;  %2091 = vmatprep.mubr.f32.mxu1 %v6490_v11 }
 0x256   :  { %3387 = vtanh.f32 %v1592_v28  ;;  %v3364_v46 = vpop.eup %3363  ;;  %v6520_v28 = vld [vmem:[#allocation28_spill] sm:$0xff] }
 0x257   :  { %3389 = vtanh.f32 %v1588_v41  ;;  %2953 = vmatmul.mubr.msk.f32.gmra.mxu0 %vm1002_vm0, %v5655_v63  ;;  %v1552_v41 = vadd.f32 %v6520_v28, %v5280_v5 }
 0x258   :  { %v3366_v33 = vpop.eup %3365  ;;  %3391 = vtanh.f32 %v1443_v9  ;;  %2966 = vmatmul.mubr.msk.f32.gmra.mxu1 %vm1002_vm0, %v5655_v63  ;;  %1954 = vmatprep.mubr.f32.mxu0 %v6490_v11  ;;  %v1407_v9 = vadd.f32 %v6521_v47, %v5280_v5 }
 0x259   :  { %v3368_v45 = vpop.eup %3367  ;;  %3393 = vtanh.f32 %v1586_v58  ;;  %2140 = vmatprep.subr.mxu0 %v3366_v33  ;;  %2097 = vmatprep.mubr.f32.mxu1 %v6490_v11  ;;  %v6522_v58 = vld [vmem:[#allocation57_spill] sm:$0xff]  ;;  %v6524_v33 = vld [vmem:[#allocation15_spill] sm:$0xff] }
 0x25a   :  { %v3370_v40 = vpop.eup %3369  ;;  %3395 = vtanh.f32 %v1439_v48  ;;  %2283 = vmatprep.subr.mxu1 %v3368_v45  ;;  %2141 = vmatpush1.msra.mxu0 %v3364_v46  ;;  %v6523_v48 = vld [vmem:[#allocation58_spill] sm:$0xff] }
 0x25b   :  { %v3372_v2 = vpop.eup %3371  ;;  %3397 = vtanh.f32 %v1582_v4  ;;  %2284 = vmatpush1.msra.mxu1 %v3370_v40  ;;  %2954 = vmatmul.mubr.msk.f32.gmra.mxu0 %vm1002_vm0, %v5674_v35  ;;  %v1546_v46 = vadd.f32 %v6523_v48, %v5293_v50  ;;  %v5744_v45 = vld [vmem:[%s6297_s5 + $0x50] sm:$0xff]  ;;  %v6525_v40 = vld [vmem:[#allocation48_spill] sm:$0xff] }
 0x25c   :  { %v3374_v37 = vpop.eup %3373  ;;  %3399 = vtanh.f32 %v1580_v25  ;;  %2967 = vmatmul.mubr.msk.f32.gmra.mxu1 %vm1002_vm0, %v5674_v35  ;;  %2142 = vmatprep.subr.mxu0 %v3372_v2  ;;  %v1544_v25 = vadd.f32 %v6524_v33, %v5293_v50  ;;  %v6526_v2 = vld [vmem:[#allocation31_spill] sm:$0xff] }
 0x25d   :  { %v3376_v16 = vpop.eup %3375  ;;  %3401 = vtanh.f32 %v1576_v34  ;;  %2285 = vmatprep.subr.mxu1 %v3374_v37  ;;  %2143 = vmatpush1.msra.mxu0 %v3362_v21  ;;  %v1403_v21 = vadd.f32 %v6522_v58, %v5293_v50  ;;  %v6527_v50 = vld [vmem:[#allocation45_spill] sm:$0xff] }
 0x25e   :  { %v3378_v42 = vpop.eup %3377  ;;  %3403 = vtanh.f32 %v1431_v62  ;;  %2286 = vmatpush1.msra.mxu1 %v3376_v16  ;;  %2144 = vmatprep.subr.mxu0 %v3360_v36  ;;  %v1540_v62 = vadd.f32 %v6525_v40, %v5288_v57  ;;  %v5762_v16 = vld [vmem:[%s6297_s5 + $0x58] sm:$0xff] }
 0x25f   :  { %v3380_v31 = vpop.eup %3379  ;;  %3405 = vtanh.f32 %v1574_v22  ;;  %2287 = vmatprep.subr.mxu1 %v3378_v42  ;;  %1960 = vmatprep.mubr.f32.mxu0 %v6490_v11  ;;  %v1538_v22 = vadd.f32 %v6527_v50, %v5288_v57 }
 0x260   :  { %v3382_v29 = vpop.eup %3381  ;;  %3407 = vtanh.f32 %v1427_v19  ;;  %2103 = vmatprep.mubr.f32.mxu1 %v6490_v11  ;;  %2145 = vmatpush1.msra.mxu0 %v3380_v31 }
 0x261   :  { %v3384_v6 = vpop.eup %3383  ;;  %3409 = vtanh.f32 %v1570_v18  ;;  %2288 = vmatpush1.msra.mxu1 %v3382_v29  ;;  %2955 = vmatmul.mubr.msk.f32.gmra.mxu0 %vm1002_vm0, %v5696_v27 }
 0x262   :  { %v3386_v52 = vpop.eup %3385  ;;  %3411 = vtanh.f32 %v1568_v53  ;;  %2968 = vmatmul.mubr.msk.f32.gmra.mxu1 %vm1002_vm0, %v5696_v27  ;;  %2146 = vmatprep.subr.mxu0 %v3384_v6 }
 0x263   :  { %v3388_v1 = vpop.eup %3387  ;;  %3413 = vtanh.f32 %v1564_v51  ;;  %2289 = vmatprep.subr.mxu1 %v3386_v52  ;;  %2147 = vmatpush1.msra.mxu0 %v5645_v44  ;;  %v5775_v51 = vld [vmem:[%s6297_s5 + $0x60] sm:$0xff] }
 0x264   :  { %v3390_v60 = vpop.eup %3389  ;;  %3415 = vtanh.f32 %v1419_v39  ;;  %2290 = vmatpush1.msra.mxu1 %v3388_v1  ;;  %2148 = vmatprep.subr.mxu0 %v5639_v55 }
 0x265   :  { %v3392_v26 = vpop.eup %3391  ;;  %3417 = vtanh.f32 %v1562_v14  ;;  %2291 = vmatprep.subr.mxu1 %v3390_v60  ;;  %1966 = vmatprep.mubr.f32.mxu0 %v6490_v11 }
 0x266   :  { %v3394_v44 = vpop.eup %3393  ;;  %3419 = vtanh.f32 %v1415_v24  ;;  %2109 = vmatprep.mubr.f32.mxu1 %v6490_v11  ;;  %2149 = vmatpush1.msra.mxu0 %v3392_v26 }
 0x267   :  { %v3396_v55 = vpop.eup %3395  ;;  %3421 = vtanh.f32 %v1558_v43  ;;  %2292 = vmatpush1.msra.mxu1 %v3394_v44  ;;  %2956 = vmatmul.mubr.msk.f32.gmra.mxu0 %vm1002_vm0, %v5721_v54 }
 0x268   :  { %v3398_v36 = vpop.eup %3397  ;;  %3423 = vtanh.f32 %v1556_v10  ;;  %2969 = vmatmul.mubr.msk.f32.gmra.mxu1 %vm1002_vm0, %v5721_v54  ;;  %2150 = vmatprep.subr.mxu0 %v3396_v55 }
 0x269   :  { %v3400_v5 = vpop.eup %3399  ;;  %3425 = vtanh.f32 %v1552_v41  ;;  %2293 = vmatprep.subr.mxu1 %v3398_v36  ;;  %2151 = vmatpush1.msra.mxu0 %v5635_v0 }
 0x26a   :  { %v3402_v4 = vpop.eup %3401  ;;  %3427 = vtanh.f32 %v1407_v9  ;;  %2294 = vmatpush1.msra.mxu1 %v3400_v5  ;;  %2152 = vmatprep.subr.mxu0 %v5630_v32 }
 0x26b   :  { %v3404_v34 = vpop.eup %3403  ;;  %3429 = vtanh.f32 %v6526_v2  ;;  %2295 = vmatprep.subr.mxu1 %v3402_v4  ;;  %1972 = vmatprep.mubr.f32.mxu0 %v6490_v11 }
 0x26c   :  { %v3406_v0 = vpop.eup %3405  ;;  %3431 = vtanh.f32 %v1403_v21  ;;  %2115 = vmatprep.mubr.f32.mxu1 %v6490_v11  ;;  %2153 = vmatpush1.msra.mxu0 %v3404_v34 }
 0x26d   :  { %v3408_v32 = vpop.eup %3407  ;;  %3433 = vtanh.f32 %v1546_v46  ;;  %2296 = vmatpush1.msra.mxu1 %v3406_v0  ;;  %2957 = vmatmul.mubr.msk.f32.gmra.mxu0 %vm1002_vm0, %v5744_v45 }
 0x26e   :  { %v3410_v37 = vpop.eup %3409  ;;  %3435 = vtanh.f32 %v1544_v25  ;;  %2970 = vmatmul.mubr.msk.f32.gmra.mxu1 %vm1002_vm0, %v5744_v45  ;;  %2154 = vmatprep.subr.mxu0 %v3408_v32 }
 0x26f   :  { %v3412_v19 = vpop.eup %3411  ;;  %3437 = vtanh.f32 %v1540_v62  ;;  %2297 = vmatprep.subr.mxu1 %v3410_v37  ;;  %2155 = vmatpush1.msra.mxu0 %v5618_v8 }
 0x270   :  { %v3414_v57 = vpop.eup %3413  ;;  %3439 = vtanh.f32 %v1538_v22  ;;  %2298 = vmatpush1.msra.mxu1 %v3412_v19  ;;  %2156 = vmatprep.subr.mxu0 %v5612_v38 }
 0x271   :  { %v3416_v18 = vpop.eup %3415  ;;  %2299 = vmatprep.subr.mxu1 %v3414_v57  ;;  %1978 = vmatprep.mubr.f32.mxu0 %v6490_v11 }
 0x272   :  { %v3418_v42 = vpop.eup %3417  ;;  %2121 = vmatprep.mubr.f32.mxu1 %v6490_v11  ;;  %2157 = vmatpush1.msra.mxu0 %v3416_v18 }
 0x273   :  { %v3420_v53 = vpop.eup %3419  ;;  %2300 = vmatpush1.msra.mxu1 %v3418_v42  ;;  %2958 = vmatmul.mubr.msk.f32.gmra.mxu0 %vm1002_vm0, %v5762_v16 }
 0x274   :  { %v3422_v8 = vpop.eup %3421  ;;  %2971 = vmatmul.mubr.msk.f32.gmra.mxu1 %vm1002_vm0, %v5762_v16  ;;  %2158 = vmatprep.subr.mxu0 %v3420_v53 }
 0x275   :  { %v3424_v38 = vpop.eup %3423  ;;  %2301 = vmatprep.subr.mxu1 %v3422_v8  ;;  %2159 = vmatpush1.msra.mxu0 %v5608_v30 }
 0x276   :  { %v3426_v31 = vpop.eup %3425  ;;  %2302 = vmatpush1.msra.mxu1 %v3424_v38  ;;  %2160 = vmatprep.subr.mxu0 %v5604_v59 }
 0x277   :  { %v3428_v29 = vpop.eup %3427  ;;  %2303 = vmatprep.subr.mxu1 %v3426_v31  ;;  %1984 = vmatprep.mubr.f32.mxu0 %v6490_v11 }
 0x278   :  { %v3430_v39 = vpop.eup %3429  ;;  %2127 = vmatprep.mubr.f32.mxu1 %v6490_v11  ;;  %2161 = vmatpush1.msra.mxu0 %v3428_v29 }
 0x279   :  { %v3432_v6 = vpop.eup %3431  ;;  %2304 = vmatpush1.msra.mxu1 %v3430_v39  ;;  %2959 = vmatmul.mubr.msk.f32.gmra.mxu0 %vm1002_vm0, %v5775_v51 }
 0x27a   :  { %v3434_v30 = vpop.eup %3433  ;;  %2972 = vmatmul.mubr.msk.f32.gmra.mxu1 %vm1002_vm0, %v5775_v51  ;;  %2162 = vmatprep.subr.mxu0 %v3432_v6 }
 0x27b   :  { %v3436_v59 = vpop.eup %3435  ;;  %2305 = vmatprep.subr.mxu1 %v3434_v30  ;;  %2163 = vmatpush1.msra.mxu0 %v5593_v23 }
 0x27c   :  { %v3438_v14 = vpop.eup %3437  ;;  %2306 = vmatpush1.msra.mxu1 %v3436_v59  ;;  %2164 = vmatprep.subr.mxu0 %v5588_v3 }
 0x27d   :  { %v3440_v52 = vpop.eup %3439  ;;  %2307 = vmatprep.subr.mxu1 %v3438_v14  ;;  %2165 = vmatpush1.msra.mxu0 %v5585_v49 }
 0x27e   :  { %2198 = vmatprep.mubr.f32.mxu0 %v6490_v11  ;;  %2308 = vmatpush1.msra.mxu1 %v3440_v52 }
 0x27f   :  { %2341 = vmatprep.mubr.f32.mxu1 %v6490_v11  ;;  %2973 = vmatmul.mubr.msk.f32.vlgmr.msra.gmra.mxu0 %vm1002_vm0, %v5526_v15 }
 0x280   :  { %2986 = vmatmul.mubr.msk.f32.vlgmr.msra.gmra.mxu1 %vm1002_vm0, %v5526_v15  ;;  %2204 = vmatprep.mubr.f32.mxu0 %v6490_v11  ;;  %v5866_v15 = vpop.permute.xlu0 %1806 }
 0x281   :  { %2347 = vmatprep.mubr.f32.mxu1 %v6490_v11  ;;  %6528 = vst [vmem:[#allocation29_spill] sm:$0xff] %v5866_v15 }
 0x283   :  { %2974 = vmatmul.mubr.msk.f32.gmra.mxu0 %vm1002_vm0, %v5550_v7 }
 0x284   :  { %2987 = vmatmul.mubr.msk.f32.gmra.mxu1 %vm1002_vm0, %v5550_v7  ;;  %2210 = vmatprep.mubr.f32.mxu0 %v6490_v11  ;;  %v5870_v49 = vpop.permute.xlu0 %1796 }
 0x285   :  { %2353 = vmatprep.mubr.f32.mxu1 %v6490_v11  ;;  %6529 = vst [vmem:[#allocation30_spill] sm:$0xff] %v5870_v49 }
 0x287   :  { %2975 = vmatmul.mubr.msk.f32.gmra.mxu0 %vm1002_vm0, %v5566_v13 }
 0x288   :  { %2988 = vmatmul.mubr.msk.f32.gmra.mxu1 %vm1002_vm0, %v5566_v13  ;;  %2216 = vmatprep.mubr.f32.mxu0 %v6490_v11  ;;  %v5880_v24 = vpop.permute.xlu0 %1786 }
 0x289   :  { %2359 = vmatprep.mubr.f32.mxu1 %v6490_v11 }
 0x28b   :  { %2976 = vmatmul.mubr.msk.f32.gmra.mxu0 %vm1002_vm0, %v5579_v17 }
 0x28c   :  { %2989 = vmatmul.mubr.msk.f32.gmra.mxu1 %vm1002_vm0, %v5579_v17  ;;  %2222 = vmatprep.mubr.f32.mxu0 %v6490_v11  ;;  %v5890_v26 = vpop.permute.xlu0 %1776 }
 0x28d   :  { %2365 = vmatprep.mubr.f32.mxu1 %v6490_v11 }
 0x28f   :  { %2977 = vmatmul.mubr.msk.f32.gmra.mxu0 %vm1002_vm0, %v5602_v12 }
 0x290   :  { %2990 = vmatmul.mubr.msk.f32.gmra.mxu1 %vm1002_vm0, %v5602_v12  ;;  %2228 = vmatprep.mubr.f32.mxu0 %v6490_v11  ;;  %v5874_v12 = vpop.permute.xlu1 %1801  ;;  %v5900_v58 = vpop.permute.xlu0 %1766 }
 0x291   :  { %2371 = vmatprep.mubr.f32.mxu1 %v6490_v11  ;;  %6530 = vst [vmem:[#allocation21_spill] sm:$0xff] %v5874_v12 }
 0x293   :  { %2978 = vmatmul.mubr.msk.f32.gmra.mxu0 %vm1002_vm0, %v5628_v56 }
 0x294   :  { %2991 = vmatmul.mubr.msk.f32.gmra.mxu1 %vm1002_vm0, %v5628_v56  ;;  %2234 = vmatprep.mubr.f32.mxu0 %v6490_v11  ;;  %v5884_v43 = vpop.permute.xlu1 %1791 }
 0x295   :  { %2377 = vmatprep.mubr.f32.mxu1 %v6490_v11  ;;  %6531 = vst [vmem:[#allocation33_spill] sm:$0xff] %v5884_v43 }
 0x297   :  { %2979 = vmatmul.mubr.msk.f32.gmra.mxu0 %vm1002_vm0, %v5655_v63 }
 0x298   :  { %2992 = vmatmul.mubr.msk.f32.gmra.mxu1 %vm1002_vm0, %v5655_v63  ;;  %2240 = vmatprep.mubr.f32.mxu0 %v6490_v11  ;;  %v5894_v44 = vpop.permute.xlu1 %1781 }
 0x299   :  { %2383 = vmatprep.mubr.f32.mxu1 %v6490_v11 }
 0x29b   :  { %2980 = vmatmul.mubr.msk.f32.gmra.mxu0 %vm1002_vm0, %v5674_v35 }
 0x29c   :  { %2993 = vmatmul.mubr.msk.f32.gmra.mxu1 %vm1002_vm0, %v5674_v35  ;;  %2246 = vmatprep.mubr.f32.mxu0 %v6490_v11  ;;  %v5904_v48 = vpop.permute.xlu1 %1771 }
 0x29d   :  { %2389 = vmatprep.mubr.f32.mxu1 %v6490_v11 }
 0x29f   :  { %2981 = vmatmul.mubr.msk.f32.gmra.mxu0 %vm1002_vm0, %v5696_v27 }
 0x2a0   :  { %2994 = vmatmul.mubr.msk.f32.gmra.mxu1 %vm1002_vm0, %v5696_v27  ;;  %2252 = vmatprep.mubr.f32.mxu0 %v6490_v11  ;;  %v5914_v62 = vpop.permute.xlu1 %1761 }
 0x2a1   :  { %2395 = vmatprep.mubr.f32.mxu1 %v6490_v11 }
 0x2a3   :  { %2982 = vmatmul.mubr.msk.f32.gmra.mxu0 %vm1002_vm0, %v5721_v54 }
 0x2a4   :  { %2995 = vmatmul.mubr.msk.f32.gmra.mxu1 %vm1002_vm0, %v5721_v54  ;;  %2258 = vmatprep.mubr.f32.mxu0 %v6490_v11  ;;  %v5923_v19 = vpop.permute.xlu1 %1751 }
 0x2a5   :  { %2401 = vmatprep.mubr.f32.mxu1 %v6490_v11 }
 0x2a7   :  { %2983 = vmatmul.mubr.msk.f32.gmra.mxu0 %vm1002_vm0, %v5744_v45 }
 0x2a8   :  { %2996 = vmatmul.mubr.msk.f32.gmra.mxu1 %vm1002_vm0, %v5744_v45  ;;  %2264 = vmatprep.mubr.f32.mxu0 %v6490_v11  ;;  %v5910_v45 = vpop.permute.xlu0 %1756 }
 0x2a9   :  { %2407 = vmatprep.mubr.f32.mxu1 %v6490_v11 }
 0x2ab   :  { %2984 = vmatmul.mubr.msk.f32.gmra.mxu0 %vm1002_vm0, %v5762_v16 }
 0x2ac   :  { %2997 = vmatmul.mubr.msk.f32.gmra.mxu1 %vm1002_vm0, %v5762_v16  ;;  %2270 = vmatprep.mubr.f32.mxu0 %v6490_v11  ;;  %v5920_v22 = vpop.permute.xlu0 %1746 }
 0x2ad   :  { %2413 = vmatprep.mubr.f32.mxu1 %v6490_v11 }
 0x2af   :  { %2985 = vmatmul.mubr.msk.f32.gmra.mxu0 %vm1002_vm0, %v5775_v51 }
 0x2b0   :  { %2998 = vmatmul.mubr.msk.f32.gmra.mxu1 %vm1002_vm0, %v5775_v51  ;;  %2602 = vmatprep.mubr.f32.mxu0 %v6490_v11 }
 0x2b1   :  { %2673 = vmatprep.mubr.f32.mxu1 %v6490_v11 }
 0x2ff   :  { %v1914_v7 = vpop.f32.mrf.mxu0 }
 0x300   :  { %v5868_v13 = vpop.f32.mrf.mxu1  ;;  %v1915_v32 = vadd.f32 %v1914_v7, %v5920_v22 }
 0x301   :  { %v1916_v17 = vpop.f32.mrf.mxu0 }
 0x302   :  { %v5872_v3 = vpop.f32.mrf.mxu1  ;;  %v1917_v57 = vadd.f32 %v1916_v17, %v5920_v22  ;;  %3441 = vtanh.f32 %v1915_v32 }
 0x303   :  { %v1920_v23 = vpop.f32.mrf.mxu0 }
 0x304   :  { %v5876_v56 = vpop.f32.mrf.mxu1  ;;  %v1921_v18 = vadd.f32 %v1920_v23, %v5923_v19  ;;  %3443 = vtanh.f32 %v1917_v57 }
 0x305   :  { %v1922_v63 = vpop.f32.mrf.mxu0 }
 0x306   :  { %v5878_v35 = vpop.f32.mrf.mxu1  ;;  %v1923_v53 = vadd.f32 %v1922_v63, %v5923_v19  ;;  %3445 = vtanh.f32 %v1921_v18 }
 0x307   :  { %v1926_v27 = vpop.f32.mrf.mxu0 }
 0x308   :  { %v5882_v1 = vpop.f32.mrf.mxu1  ;;  %v1927_v38 = vadd.f32 %v1926_v27, %v5910_v45  ;;  %3447 = vtanh.f32 %v1923_v53 }
 0x309   :  { %v1928_v61 = vpop.f32.mrf.mxu0 }
 0x30a   :  { %v5886_v60 = vpop.f32.mrf.mxu1  ;;  %v1929_v31 = vadd.f32 %v1928_v61, %v5910_v45  ;;  %3449 = vtanh.f32 %v1927_v38 }
 0x30b   :  { %v1932_v20 = vpop.f32.mrf.mxu0 }
 0x30c   :  { %v5888_v10 = vpop.f32.mrf.mxu1  ;;  %v1933_v51 = vadd.f32 %v1932_v20, %v5914_v62  ;;  %3451 = vtanh.f32 %v1929_v31 }
 0x30d   :  { %v1934_v54 = vpop.f32.mrf.mxu0 }
 0x30e   :  { %v5892_v28 = vpop.f32.mrf.mxu1  ;;  %v1935_v39 = vadd.f32 %v1934_v54, %v5914_v62  ;;  %3453 = vtanh.f32 %v1933_v51 }
 0x30f   :  { %v1938_v41 = vpop.f32.mrf.mxu0 }
 0x310   :  { %v5896_v47 = vpop.f32.mrf.mxu1  ;;  %v1939_v30 = vadd.f32 %v1938_v41, %v5900_v58  ;;  %3455 = vtanh.f32 %v1935_v39 }
 0x311   :  { %v1940_v9 = vpop.f32.mrf.mxu0 }
 0x312   :  { %v5898_v55 = vpop.f32.mrf.mxu1  ;;  %v1941_v14 = vadd.f32 %v1940_v9, %v5900_v58  ;;  %3457 = vtanh.f32 %v1939_v30 }
 0x313   :  { %v1944_v36 = vpop.f32.mrf.mxu0 }
 0x314   :  { %v5902_v21 = vpop.f32.mrf.mxu1  ;;  %v1945_v7 = vadd.f32 %v1944_v36, %v5904_v48  ;;  %3459 = vtanh.f32 %v1941_v14 }
 0x315   :  { %v1946_v5 = vpop.f32.mrf.mxu0 }
 0x316   :  { %v5906_v46 = vpop.f32.mrf.mxu1  ;;  %v1947_v17 = vadd.f32 %v1946_v5, %v5904_v48  ;;  %3461 = vtanh.f32 %v1945_v7  ;;  %v5949_v5 = vpop.eup %3441 }
 0x317   :  { %v1950_v4 = vpop.f32.mrf.mxu0  ;;  %v5952_v32 = vpop.eup %3443 }
 0x318   :  { %v5908_v33 = vpop.f32.mrf.mxu1  ;;  %v1951_v23 = vadd.f32 %v1950_v4, %v5890_v26  ;;  %3463 = vtanh.f32 %v1947_v17 }
 0x319   :  { %v1952_v25 = vpop.f32.mrf.mxu0 }
 0x31a   :  { %v5912_v34 = vpop.f32.mrf.mxu1  ;;  %v1953_v27 = vadd.f32 %v1952_v25, %v5890_v26  ;;  %3465 = vtanh.f32 %v1951_v23 }
 0x31b   :  { %v1956_v40 = vpop.f32.mrf.mxu0 }
 0x31c   :  { %v5916_v2 = vpop.f32.mrf.mxu1  ;;  %v1957_v20 = vadd.f32 %v1956_v40, %v5894_v44  ;;  %3467 = vtanh.f32 %v1953_v27  ;;  %v5955_v40 = vpop.eup %3445 }
 0x31d   :  { %v1958_v0 = vpop.f32.mrf.mxu0  ;;  %v5958_v53 = vpop.eup %3447 }
 0x31e   :  { %v5918_v50 = vpop.f32.mrf.mxu1  ;;  %v1959_v41 = vadd.f32 %v1958_v0, %v5894_v44  ;;  %3469 = vtanh.f32 %v1957_v20  ;;  %v5961_v31 = vpop.eup %3449 }
 0x320   :  { %3471 = vtanh.f32 %v1959_v41 }
 0x321   :  { %v1962_v37 = vpop.f32.mrf.mxu0 }
 0x322   :  { %v5926_v16 = vpop.f32.mrf.mxu1  ;;  %v1963_v36 = vadd.f32 %v1962_v37, %v5880_v24 }
 0x323   :  { %v1964_v42 = vpop.f32.mrf.mxu0 }
 0x324   :  { %v5930_v8 = vpop.f32.mrf.mxu1  ;;  %v1965_v4 = vadd.f32 %v1964_v42, %v5880_v24  ;;  %3473 = vtanh.f32 %v1963_v36 }
 0x326   :  { %3475 = vtanh.f32 %v1965_v4 }
 0x327   :  { %v1968_v29 = vpop.f32.mrf.mxu0 }
 0x328   :  { %v5936_v6 = vpop.f32.mrf.mxu1  ;;  %v1969_v25 = vadd.f32 %v1968_v29, %v5884_v43  ;;  %v5964_v29 = vpop.eup %3451 }
 0x329   :  { %v1970_v59 = vpop.f32.mrf.mxu0  ;;  %v5967_v30 = vpop.eup %3453 }
 0x32a   :  { %v5940_v52 = vpop.f32.mrf.mxu1  ;;  %v1971_v0 = vadd.f32 %v1970_v59, %v5884_v43  ;;  %3477 = vtanh.f32 %v1969_v25  ;;  %v5970_v14 = vpop.eup %3455 }
 0x32b   :  { %v5972_v17 = vpop.eup %3457 }
 0x32c   :  { %3479 = vtanh.f32 %v1971_v0  ;;  %v5975_v27 = vpop.eup %3459 }
 0x32d   :  { %v1974_v63 = vpop.f32.mrf.mxu0 }
 0x32e   :  { %v2117_v61 = vpop.f32.mrf.mxu1  ;;  %v1975_v37 = vadd.f32 %v1974_v63, %v5870_v49 }
 0x32f   :  { %v1976_v54 = vpop.f32.mrf.mxu0 }
 0x330   :  { %v2119_v9 = vpop.f32.mrf.mxu1  ;;  %v1977_v42 = vadd.f32 %v1976_v54, %v5870_v49  ;;  %3481 = vtanh.f32 %v1975_v37  ;;  %v5977_v54 = vpop.eup %3461 }
 0x331   :  { %v5981_v25 = vpop.eup %3463 }
 0x332   :  { %3483 = vtanh.f32 %v1977_v42  ;;  %v5985_v37 = vpop.eup %3465 }
 0x333   :  { %v1980_v57 = vpop.f32.mrf.mxu0  ;;  %v5988_v42 = vpop.eup %3467 }
 0x334   :  { %v2123_v18 = vpop.f32.mrf.mxu1  ;;  %v1981_v39 = vadd.f32 %v1980_v57, %v5874_v12 }
 0x335   :  { %v1982_v38 = vpop.f32.mrf.mxu0 }
 0x336   :  { %v2125_v51 = vpop.f32.mrf.mxu1  ;;  %v1983_v59 = vadd.f32 %v1982_v38, %v5874_v12  ;;  %3485 = vtanh.f32 %v1981_v39  ;;  %v2124_v38 = vadd.f32 %v2123_v18, %v5874_v12  ;;  %v2120_v39 = vadd.f32 %v2119_v9, %v5870_v49 }
 0x337   :  { %v2126_v57 = vadd.f32 %v2125_v51, %v5874_v12  ;;  %v2114_v18 = vadd.f32 %v5940_v52, %v5884_v43  ;;  %v2112_v9 = vadd.f32 %v5936_v6, %v5884_v43 }
 0x338   :  { %3487 = vtanh.f32 %v1983_v59 }
 0x339   :  { %v1986_v7 = vpop.f32.mrf.mxu0 }
 0x33a   :  { %v1987_v23 = vadd.f32 %v1986_v7, %v5866_v15  ;;  %v2129_v63 = vpop.f32.mrf.mxu1  ;;  %v5993_v7 = vpop.eup %3469 }
 0x33b   :  { %v1988_v20 = vpop.f32.mrf.mxu0  ;;  %v2130_v41 = vadd.f32 %v2129_v63, %v5866_v15  ;;  %v2118_v63 = vadd.f32 %v2117_v61, %v5870_v49 }
 0x33c   :  { %v1989_v36 = vadd.f32 %v1988_v20, %v5866_v15  ;;  %v2131_v4 = vpop.f32.mrf.mxu1  ;;  %3489 = vtanh.f32 %v1987_v23  ;;  %v5998_v23 = vpop.eup %3471 }
 0x33d   :  { %v2132_v0 = vadd.f32 %v2131_v4, %v5866_v15 }
 0x33e   :  { %3491 = vtanh.f32 %v1989_v36  ;;  %v6004_v36 = vpop.eup %3473 }
 0x33f   :  { %3493 = vtanh.f32 %v2132_v0  ;;  %v5991_v59 = vpop.f32.mrf.mxu0  ;;  %v6010_v61 = vpop.eup %3475 }
 0x340   :  { %3495 = vtanh.f32 %v2130_v41  ;;  %v5996_v51 = vpop.f32.mrf.mxu1  ;;  %v2108_v41 = vadd.f32 %v5930_v8, %v5880_v24  ;;  %v6016_v52 = vpop.eup %3477 }
 0x341   :  { %6532 = vst [vmem:[#allocation34_spill] sm:$0xff] %v5996_v51  ;;  %3497 = vtanh.f32 %v2126_v57  ;;  %v6002_v20 = vpop.f32.mrf.mxu0  ;;  %v2106_v57 = vadd.f32 %v5926_v16, %v5880_v24  ;;  %v6022_v6 = vpop.eup %3479  ;;  %v2096_v16 = vadd.f32 %v5912_v34, %v5890_v26  ;;  %v2088_v34 = vadd.f32 %v5902_v21, %v5904_v48 }
 0x342   :  { %3499 = vtanh.f32 %v2124_v38  ;;  %v6008_v4 = vpop.f32.mrf.mxu1  ;;  %v2102_v38 = vadd.f32 %v5918_v50, %v5894_v44  ;;  %v3482_v8 = vpop.eup %3481  ;;  %v2094_v50 = vadd.f32 %v5908_v33, %v5890_v26  ;;  %v2084_v33 = vadd.f32 %v5898_v55, %v5900_v58 }
 0x343   :  { %6533 = vst [vmem:[#allocation35_spill] sm:$0xff] %v6008_v4  ;;  %3501 = vtanh.f32 %v2120_v39  ;;  %v6014_v0 = vpop.f32.mrf.mxu0  ;;  %v2100_v39 = vadd.f32 %v5916_v2, %v5894_v44  ;;  %v3484_v12 = vpop.eup %3483  ;;  %v2090_v2 = vadd.f32 %v5906_v46, %v5904_v48  ;;  %v2082_v46 = vadd.f32 %v5896_v47, %v5900_v58 }
 0x344   :  { %3503 = vtanh.f32 %v2118_v63  ;;  %v6020_v51 = vpop.f32.mrf.mxu1  ;;  %v2078_v21 = vadd.f32 %v5892_v28, %v5914_v62 }
 0x345   :  { %6534 = vst [vmem:[#allocation60_spill] sm:$0xff] %v6020_v51  ;;  %3505 = vtanh.f32 %v2114_v18  ;;  %v6026_v4 = vpop.f32.mrf.mxu0  ;;  %v3486_v51 = vpop.eup %3485 }
 0x346   :  { %3507 = vtanh.f32 %v2112_v9  ;;  %v6030_v15 = vpop.f32.mrf.mxu1  ;;  %v3488_v49 = vpop.eup %3487 }
 0x347   :  { %6535 = vst [vmem:[#allocation36_spill] sm:$0xff] %v6030_v15  ;;  %3509 = vtanh.f32 %v2108_v41  ;;  %v6034_v63 = vpop.f32.mrf.mxu0 }
 0x348   :  { %3511 = vtanh.f32 %v2106_v57  ;;  %v6038_v18 = vpop.f32.mrf.mxu1 }
 0x349   :  { %6536 = vst [vmem:[#allocation61_spill] sm:$0xff] %v6038_v18  ;;  %3513 = vtanh.f32 %v2102_v38  ;;  %v6042_v9 = vpop.f32.mrf.mxu0  ;;  %v3490_v15 = vpop.eup %3489 }
 0x34a   :  { %3515 = vtanh.f32 %v2100_v39  ;;  %v6046_v41 = vpop.f32.mrf.mxu1 }
 0x34b   :  { %6537 = vst [vmem:[#allocation62_spill] sm:$0xff] %v6046_v41  ;;  %v3492_v43 = vpop.eup %3491  ;;  %3517 = vtanh.f32 %v2096_v16  ;;  %v6050_v57 = vpop.f32.mrf.mxu0  ;;  %v2076_v16 = vadd.f32 %v5888_v10, %v5914_v62 }
 0x34c   :  { %v3494_v18 = vpop.eup %3493  ;;  %3519 = vtanh.f32 %v2094_v50  ;;  %v6054_v38 = vpop.f32.mrf.mxu1  ;;  %2544 = vmatprep.subr.mxu0 %v3492_v43  ;;  %v2072_v43 = vadd.f32 %v5886_v60, %v5910_v45 }
 0x34d   :  { %v3496_v11 = vpop.eup %3495  ;;  %3521 = vtanh.f32 %v2090_v2  ;;  %v6058_v39 = vpop.f32.mrf.mxu0  ;;  %2615 = vmatprep.subr.mxu1 %v3494_v18  ;;  %2545 = vmatpush1.msra.mxu0 %v3490_v15  ;;  %v2070_v15 = vadd.f32 %v5882_v1, %v5910_v45  ;;  %v2060_v2 = vadd.f32 %v5872_v3, %v5920_v22 }
 0x34e   :  { %v3498_v55 = vpop.eup %3497  ;;  %3523 = vtanh.f32 %v2088_v34  ;;  %v6062_v41 = vpop.f32.mrf.mxu1  ;;  %2616 = vmatpush1.msra.mxu1 %v3496_v11  ;;  %2546 = vmatprep.subr.mxu0 %v3488_v49  ;;  %v2066_v49 = vadd.f32 %v5878_v35, %v5923_v19 }
 0x34f   :  { %v3500_v47 = vpop.eup %3499  ;;  %3525 = vtanh.f32 %v2084_v33  ;;  %v6066_v28 = vpop.f32.mrf.mxu0  ;;  %2617 = vmatprep.subr.mxu1 %v3498_v55  ;;  %2547 = vmatpush1.msra.mxu0 %v3486_v51  ;;  %v2064_v51 = vadd.f32 %v5876_v56, %v5923_v19  ;;  %v2058_v56 = vadd.f32 %v5868_v13, %v5920_v22 }
 0x350   :  { %v3502_v50 = vpop.eup %3501  ;;  %3527 = vtanh.f32 %v2082_v46  ;;  %v6070_v10 = vpop.f32.mrf.mxu1  ;;  %2618 = vmatpush1.msra.mxu1 %v3500_v47  ;;  %2548 = vmatprep.subr.mxu0 %v3484_v12  ;;  %v2201_v46 = vadd.f32 %v5991_v59, %v5920_v22  ;;  %v2209_v47 = vadd.f32 %v6026_v4, %v5923_v19 }
 0x351   :  { %v3504_v11 = vpop.eup %3503  ;;  %3529 = vtanh.f32 %v2078_v21  ;;  %v6074_v60 = vpop.f32.mrf.mxu0  ;;  %2619 = vmatprep.subr.mxu1 %v3502_v50  ;;  %2549 = vmatpush1.msra.mxu0 %v3482_v8 }
 0x352   :  { %v3506_v18 = vpop.eup %3505  ;;  %3531 = vtanh.f32 %v2076_v16  ;;  %v6078_v1 = vpop.f32.mrf.mxu1  ;;  %2620 = vmatpush1.msra.mxu1 %v3504_v11  ;;  %2550 = vmatprep.subr.mxu0 %v6022_v6  ;;  %v2207_v16 = vadd.f32 %v6014_v0, %v5923_v19  ;;  %v2221_v11 = vadd.f32 %v6058_v39, %v5914_v62 }
 0x353   :  { %v3508_v12 = vpop.eup %3507  ;;  %3533 = vtanh.f32 %v2072_v43  ;;  %v6083_v35 = vpop.f32.mrf.mxu0  ;;  %2621 = vmatprep.subr.mxu1 %v3506_v18  ;;  %2551 = vmatpush1.msra.mxu0 %v6016_v52  ;;  %v2227_v18 = vadd.f32 %v6074_v60, %v5900_v58 }
 0x354   :  { %v3510_v8 = vpop.eup %3509  ;;  %3535 = vtanh.f32 %v2070_v15  ;;  %v6088_v34 = vpop.f32.mrf.mxu1  ;;  %2622 = vmatpush1.msra.mxu1 %v3508_v12  ;;  %2552 = vmatprep.subr.mxu0 %v6010_v61  ;;  %v2219_v15 = vadd.f32 %v6050_v57, %v5914_v62 }
 0x355   :  { %v3512_v6 = vpop.eup %3511  ;;  %3537 = vtanh.f32 %v2066_v49  ;;  %v6091_v33 = vpop.f32.mrf.mxu0  ;;  %2623 = vmatprep.subr.mxu1 %v3510_v8  ;;  %2553 = vmatpush1.msra.mxu0 %v6004_v36  ;;  %v2203_v36 = vadd.f32 %v6002_v20, %v5920_v22  ;;  %v2225_v49 = vadd.f32 %v6066_v28, %v5900_v58 }
 0x356   :  { %v3514_v3 = vpop.eup %3513  ;;  %3539 = vtanh.f32 %v2064_v51  ;;  %v6094_v52 = vpop.f32.mrf.mxu1  ;;  %2624 = vmatpush1.msra.mxu1 %v3512_v6  ;;  %2554 = vmatprep.subr.mxu0 %v5998_v23  ;;  %v2231_v51 = vadd.f32 %v6083_v35, %v5904_v48  ;;  %v2233_v12 = vadd.f32 %v6091_v33, %v5904_v48 }
 0x357   :  { %v3516_v13 = vpop.eup %3515  ;;  %3541 = vtanh.f32 %v2060_v2  ;;  %v6099_v61 = vpop.f32.mrf.mxu0  ;;  %2625 = vmatprep.subr.mxu1 %v3514_v3  ;;  %2555 = vmatpush1.msra.mxu0 %v5993_v7 }
 0x358   :  { %v3518_v21 = vpop.eup %3517  ;;  %3543 = vtanh.f32 %v2058_v56  ;;  %v6104_v55 = vpop.f32.mrf.mxu1  ;;  %2626 = vmatpush1.msra.mxu1 %v3516_v13  ;;  %2556 = vmatprep.subr.mxu0 %v5988_v42  ;;  %v2213_v42 = vadd.f32 %v6034_v63, %v5910_v45  ;;  %v2237_v2 = vadd.f32 %v6099_v61, %v5890_v26  ;;  %v6538_v61 = vmov 0.0  }
 0x359   :  { %v3520_v23 = vpop.eup %3519  ;;  %v6109_v59 = vpop.f32.mrf.mxu0  ;;  %2627 = vmatprep.subr.mxu1 %v3518_v21  ;;  %2557 = vmatpush1.msra.mxu0 %v5985_v37  ;;  %3545 = vtanh.f32 %v2201_v46  ;;  %v2215_v37 = vadd.f32 %v6042_v9, %v5910_v45 }
 0x35a   :  { %v3522_v7 = vpop.eup %3521  ;;  %v6114_v43 = vpop.f32.mrf.mxu1  ;;  %2628 = vmatpush1.msra.mxu1 %v3520_v23  ;;  %2558 = vmatprep.subr.mxu0 %v5981_v25  ;;  %3547 = vtanh.f32 %v2203_v36  ;;  %v2239_v56 = vadd.f32 %v6109_v59, %v5890_v26 }
 0x35b   :  { %v3524_v20 = vpop.eup %3523  ;;  %v2242_v0 = vpop.f32.mrf.mxu0  ;;  %2629 = vmatprep.subr.mxu1 %v3522_v7  ;;  %2559 = vmatpush1.msra.mxu0 %v5977_v54  ;;  %3549 = vtanh.f32 %v2207_v16  ;;  %v6539_v16 = vld [vmem:[#allocation33_spill] sm:$0xff] }
 0x35c   :  { %v3526_v50 = vpop.eup %3525  ;;  %v6122_v4 = vpop.f32.mrf.mxu1  ;;  %2630 = vmatpush1.msra.mxu1 %v3524_v20  ;;  %2560 = vmatprep.subr.mxu0 %v5975_v27  ;;  %3551 = vtanh.f32 %v2209_v47  ;;  %v2243_v33 = vadd.f32 %v2242_v0, %v5894_v44 }
 0x35d   :  { %v3528_v25 = vpop.eup %3527  ;;  %v2244_v63 = vpop.f32.mrf.mxu0  ;;  %2631 = vmatprep.subr.mxu1 %v3526_v50  ;;  %2561 = vmatpush1.msra.mxu0 %v5972_v17  ;;  %3553 = vtanh.f32 %v2213_v42  ;;  %v6540_v50 = vld [vmem:[#allocation30_spill] sm:$0xff] }
 0x35e   :  { %v3530_v54 = vpop.eup %3529  ;;  %v6130_v9 = vpop.f32.mrf.mxu1  ;;  %2632 = vmatpush1.msra.mxu1 %v3528_v25  ;;  %2562 = vmatprep.subr.mxu0 %v5970_v14  ;;  %3555 = vtanh.f32 %v2215_v37  ;;  %v2245_v3 = vadd.f32 %v2244_v63, %v5894_v44 }
 0x35f   :  { %v3532_v27 = vpop.eup %3531  ;;  %v2248_v57 = vpop.f32.mrf.mxu0  ;;  %2633 = vmatprep.subr.mxu1 %v3530_v54  ;;  %2563 = vmatpush1.msra.mxu0 %v5967_v30  ;;  %3557 = vtanh.f32 %v2219_v15 }
 0x360   :  { %v3534_v17 = vpop.eup %3533  ;;  %v6138_v39 = vpop.f32.mrf.mxu1  ;;  %2634 = vmatpush1.msra.mxu1 %v3532_v27  ;;  %2564 = vmatprep.subr.mxu0 %v5964_v29  ;;  %3559 = vtanh.f32 %v2221_v11  ;;  %v6541_v27 = vld [vmem:[#allocation21_spill] sm:$0xff] }
 0x361   :  { %v3536_v14 = vpop.eup %3535  ;;  %v2250_v28 = vpop.f32.mrf.mxu0  ;;  %2635 = vmatprep.subr.mxu1 %v3534_v17  ;;  %2565 = vmatpush1.msra.mxu0 %v5961_v31  ;;  %3561 = vtanh.f32 %v2225_v49  ;;  %v6155_v31 = vld [vmem:[%s6299_s7] sm:$0x1]  ;;  %s3675_s7 = smov [#allocation3]  }
 0x362   :  { %v3538_v30 = vpop.eup %3537  ;;  %v6146_v60 = vpop.f32.mrf.mxu1  ;;  %2636 = vmatpush1.msra.mxu1 %v3536_v14  ;;  %2566 = vmatprep.subr.mxu0 %v5958_v53  ;;  %3563 = vtanh.f32 %v2227_v18  ;;  %s2887_s0 = sshll.u32 %s3675_s7, 4  ;;  %s2888_s0 = int_to_ptr.vmem [resolvable:$true] %s2887_s0 }
 0x363   :  { %v3540_v29 = vpop.eup %3539  ;;  %v2254_v35 = vpop.f32.mrf.mxu0  ;;  %2637 = vmatprep.subr.mxu1 %v3538_v30  ;;  %2567 = vmatpush1.msra.mxu0 %v5955_v40  ;;  %3565 = vtanh.f32 %v2231_v51  ;;  %s3649_s3 = scalar_lea.vmem %s2888_s0, 128  ;;  %p3654_p1 = scmp.lt.s32.totalorder %s2888_s0, %s2888_s0 }
 0x364   :  { %v3542_v8 = vpop.eup %3541  ;;  %v6159_v53 = vpop.f32.mrf.mxu1  ;;  %2638 = vmatpush1.msra.mxu1 %v3540_v29  ;;  %2568 = vmatprep.subr.mxu0 %v5952_v32  ;;  %3567 = vtanh.f32 %v2233_v12  ;;  %v2249_v32 = vadd.f32 %v2248_v57, %v5880_v24  ;;  %v2255_v59 = vadd.f32 %v2254_v35, %v6539_v16  ;;  %v6542_v12 = vld [vmem:[#allocation29_spill] sm:$0xff]  ;;  %p3650_p0 = scmp.ne.s32.totalorder %s2888_s0, %s3649_s3  ;;  %p3655_p2 = scmp.lt.s32.totalorder %s3649_s3, %s3649_s3 }
 0x365   :  { %v3544_v6 = vpop.eup %3543  ;;  %v2256_v40 = vpop.f32.mrf.mxu0  ;;  %2639 = vmatprep.subr.mxu1 %v3542_v8  ;;  %2569 = vmatpush1.msra.mxu0 %v5949_v5  ;;  %3569 = vtanh.f32 %v2237_v2  ;;  %v2251_v5 = vadd.f32 %v2250_v28, %v5880_v24 }
 0x366   :  { %v6165_v13 = vpop.f32.mrf.mxu1  ;;  %2640 = vmatpush1.msra.mxu1 %v3544_v6  ;;  %2999 = vmatmul.mubr.msk.f32.vlgmr.msra.gmra.mxu0 %vm1002_vm0, %v6155_v31  ;;  %v6173_v21 = vpop.eup %3545  ;;  %3571 = vtanh.f32 %v2239_v56  ;;  %v2257_v20 = vadd.f32 %v2256_v40, %v6539_v16  ;;  %p3656_p3 = por %p3655_p2, %p3654_p1 }
 0x367   :  { %v2260_v46 = vpop.f32.mrf.mxu0  ;;  %3000 = vmatmul.mubr.msk.f32.vlgmr.msra.gmra.mxu1 %vm1002_vm0, %v6155_v31  ;;  %2744 = vmatprep.mubr.f32.mxu0 %v6538_v61  ;;  %v6177_v23 = vpop.eup %3547  ;;  %3573 = vtanh.f32 %v2243_v33 }
 0x368   :  { %v2403_v36 = vpop.f32.mrf.mxu1  ;;  %2815 = vmatprep.mubr.f32.mxu1 %v6538_v61  ;;  %v6180_v47 = vpop.eup %3549  ;;  %3575 = vtanh.f32 %v2245_v3  ;;  %v2261_v37 = vadd.f32 %v2260_v46, %v6540_v50  ;;  %p3657_p4 = pnand %p3656_p3, %p3650_p0 }
 0x369   :  { %v2262_v7 = vpop.f32.mrf.mxu0  ;;  %v6183_v0 = vpop.eup %3551  ;;  %3577 = vtanh.f32 %v2249_v32 }
 0x36a   :  { %v2405_v42 = vpop.f32.mrf.mxu1  ;;  %v6186_v15 = vpop.eup %3553  ;;  %3579 = vtanh.f32 %v2251_v5  ;;  %v2263_v63 = vadd.f32 %v2262_v7, %v6540_v50 }
 0x36b   :  { %v2266_v25 = vpop.f32.mrf.mxu0  ;;  %v6189_v11 = vpop.eup %3555  ;;  %3581 = vtanh.f32 %v2255_v59  ;;  %v2406_v7 = vadd.f32 %v2405_v42, %v6540_v50  ;;  %v2394_v42 = vadd.f32 %v6146_v60, %v5880_v24  ;;  %v2382_v60 = vadd.f32 %v6114_v43, %v5890_v26 }
 0x36c   :  { %v2409_v54 = vpop.f32.mrf.mxu1  ;;  %v2267_v49 = vadd.f32 %v2266_v25, %v6541_v27  ;;  %v6192_v17 = vpop.eup %3557  ;;  %3583 = vtanh.f32 %v2257_v20  ;;  %v2370_v43 = vadd.f32 %v6078_v1, %v5900_v58 }
 0x36d   :  { %v2268_v57 = vpop.f32.mrf.mxu0  ;;  %v6195_v51 = vpop.eup %3559  ;;  %3585 = vtanh.f32 %v2261_v37  ;;  %v2410_v5 = vadd.f32 %v2409_v54, %v6541_v27  ;;  %v2404_v37 = vadd.f32 %v2403_v36, %v6540_v50  ;;  %v2398_v54 = vadd.f32 %v6159_v53, %v6539_v16 }
 0x36e   :  { %v2269_v18 = vadd.f32 %v2268_v57, %v6541_v27  ;;  %v2411_v14 = vpop.f32.mrf.mxu1  ;;  %v6197_v30 = vpop.eup %3561  ;;  %3587 = vtanh.f32 %v2263_v63  ;;  %v2400_v63 = vadd.f32 %v6165_v13, %v6539_v16  ;;  %v2392_v50 = vadd.f32 %v6138_v39, %v5880_v24 }
 0x36f   :  { %v2272_v28 = vpop.f32.mrf.mxu0  ;;  %v6200_v35 = vpop.eup %3563  ;;  %3589 = vtanh.f32 %v2267_v49  ;;  %v2412_v32 = vadd.f32 %v2411_v14, %v6541_v27  ;;  %v2388_v13 = vadd.f32 %v6130_v9, %v5894_v44  ;;  %v2386_v53 = vadd.f32 %v6122_v4, %v5894_v44 }
 0x370   :  { %v2273_v29 = vadd.f32 %v2272_v28, %v6542_v12  ;;  %v2415_v2 = vpop.f32.mrf.mxu1  ;;  %v6202_v56 = vpop.eup %3565  ;;  %3591 = vtanh.f32 %v2269_v18  ;;  %v2380_v24 = vadd.f32 %v6104_v55, %v5890_v26  ;;  %v2376_v9 = vadd.f32 %v6094_v52, %v5904_v48 }
 0x371   :  { %v2274_v8 = vpop.f32.mrf.mxu0  ;;  %v2416_v6 = vadd.f32 %v2415_v2, %v6542_v12  ;;  %v6206_v3 = vpop.eup %3567  ;;  %v2374_v44 = vadd.f32 %v6088_v34, %v5904_v48  ;;  %v2368_v26 = vadd.f32 %v6070_v10, %v5900_v58  ;;  %v2364_v52 = vadd.f32 %v6062_v41, %v5914_v62  ;;  %v6544_v41 = vld [vmem:[#allocation61_spill] sm:$0xff] }
 0x372   :  { %v2275_v33 = vadd.f32 %v2274_v8, %v6542_v12  ;;  %v2417_v40 = vpop.f32.mrf.mxu1  ;;  %3593 = vtanh.f32 %v2273_v29  ;;  %v6210_v61 = vpop.eup %3569  ;;  %v2362_v34 = vadd.f32 %v6054_v38, %v5914_v62  ;;  %v6543_v29 = vld [vmem:[#allocation62_spill] sm:$0xff]  ;;  %v2356_v2 = vadd.f32 %v6544_v41, %v5910_v45  ;;  %v6545_v62 = vld [vmem:[#allocation36_spill] sm:$0xff] }
 0x373   :  { %v2418_v46 = vadd.f32 %v2417_v40, %v6542_v12  ;;  %v6213_v59 = vpop.eup %3571  ;;  %v2358_v58 = vadd.f32 %v6543_v29, %v5910_v45  ;;  %v2352_v38 = vadd.f32 %v6545_v62, %v5923_v19  ;;  %v6547_v45 = vld [vmem:[#allocation35_spill] sm:$0xff] }
 0x374   :  { %3595 = vtanh.f32 %v2275_v33  ;;  %v6216_v20 = vpop.eup %3573  ;;  %v6546_v33 = vld [vmem:[#allocation60_spill] sm:$0xff] }
 0x375   :  { %3597 = vtanh.f32 %v2418_v46  ;;  %v6219_v25 = vpop.eup %3575  ;;  %v2350_v40 = vadd.f32 %v6546_v33, %v5923_v19  ;;  %v2346_v46 = vadd.f32 %v6547_v45, %v5920_v22 }
 0x376   :  { %3599 = vtanh.f32 %v2416_v6  ;;  %v6223_v49 = vpop.eup %3577 }
 0x377   :  { %3601 = vtanh.f32 %v2412_v32  ;;  %v6227_v27 = vpop.eup %3579 }
 0x378   :  { %3603 = vtanh.f32 %v2410_v5  ;;  %v3582_v36 = vpop.eup %3581 }
 0x379   :  { %3605 = vtanh.f32 %v2406_v7  ;;  %v3584_v57 = vpop.eup %3583  ;;  %v6548_v7 = vld [vmem:[#allocation34_spill] sm:$0xff] }
 0x37a   :  { %3607 = vtanh.f32 %v2404_v37  ;;  %v3586_v18 = vpop.eup %3585  ;;  %v2344_v37 = vadd.f32 %v6548_v7, %v5920_v22 }
 0x37b   :  { %3609 = vtanh.f32 %v2400_v63  ;;  %v3588_v16 = vpop.eup %3587 }
 0x37c   :  { %3611 = vtanh.f32 %v2398_v54  ;;  %v3590_v14 = vpop.eup %3589 }
 0x37d   :  { %3613 = vtanh.f32 %v2394_v42  ;;  %v3592_v39 = vpop.eup %3591 }
 0x37e   :  { %3615 = vtanh.f32 %v2392_v50 }
 0x37f   :  { %3617 = vtanh.f32 %v2388_v13  ;;  %v3594_v28 = vpop.eup %3593  ;;  %v6549_v13 = vld [vmem:[#allocation10_spill] sm:$0xff] }
 0x380   :  { %3619 = vtanh.f32 %v2386_v53 }
 0x381   :  { %v3596_v4 = vpop.eup %3595  ;;  %3621 = vtanh.f32 %v2382_v60 }
 0x382   :  { %v3598_v12 = vpop.eup %3597  ;;  %3623 = vtanh.f32 %v2380_v24  ;;  %2686 = vmatprep.subr.mxu0 %v3596_v4  ;;  %v6550_v24 = vld [vmem:[#allocation6_spill] sm:$0xff] }
 0x383   :  { %v3600_v55 = vpop.eup %3599  ;;  %3625 = vtanh.f32 %v2376_v9  ;;  %2757 = vmatprep.subr.mxu1 %v3598_v12  ;;  %2687 = vmatpush1.msra.mxu0 %v3594_v28 }
 0x384   :  { %v3602_v48 = vpop.eup %3601  ;;  %3627 = vtanh.f32 %v2374_v44  ;;  %2758 = vmatpush1.msra.mxu1 %v3600_v55  ;;  %2688 = vmatprep.subr.mxu0 %v3592_v39 }
 0x385   :  { %v3604_v1 = vpop.eup %3603  ;;  %3629 = vtanh.f32 %v2370_v43  ;;  %2759 = vmatprep.subr.mxu1 %v3602_v48  ;;  %2689 = vmatpush1.msra.mxu0 %v3590_v14 }
 0x386   :  { %v3606_v10 = vpop.eup %3605  ;;  %3631 = vtanh.f32 %v2368_v26  ;;  %2760 = vmatpush1.msra.mxu1 %v3604_v1  ;;  %2690 = vmatprep.subr.mxu0 %v3588_v16 }
 0x387   :  { %v3608_v8 = vpop.eup %3607  ;;  %3633 = vtanh.f32 %v2364_v52  ;;  %2761 = vmatprep.subr.mxu1 %v3606_v10  ;;  %2691 = vmatpush1.msra.mxu0 %v3586_v18 }
 0x388   :  { %v3610_v6 = vpop.eup %3609  ;;  %3635 = vtanh.f32 %v2362_v34  ;;  %2762 = vmatpush1.msra.mxu1 %v3608_v8  ;;  %2692 = vmatprep.subr.mxu0 %v3584_v57 }
 0x389   :  { %v3612_v32 = vpop.eup %3611  ;;  %3637 = vtanh.f32 %v2358_v58  ;;  %2763 = vmatprep.subr.mxu1 %v3610_v6  ;;  %2693 = vmatpush1.msra.mxu0 %v3582_v36  ;;  %v3674_v36 = vmov 1966171168  }
 0x38a   :  { %v3614_v5 = vpop.eup %3613  ;;  %3639 = vtanh.f32 %v2356_v2  ;;  %2764 = vmatpush1.msra.mxu1 %v3612_v32  ;;  %2694 = vmatprep.subr.mxu0 %v6227_v27 }
 0x38b   :  { %v3616_v63 = vpop.eup %3615  ;;  %3641 = vtanh.f32 %v2352_v38  ;;  %2765 = vmatprep.subr.mxu1 %v3614_v5  ;;  %2695 = vmatpush1.msra.mxu0 %v6223_v49 }
 0x38c   :  { %v3618_v19 = vpop.eup %3617  ;;  %3643 = vtanh.f32 %v2350_v40  ;;  %2766 = vmatpush1.msra.mxu1 %v3616_v63  ;;  %2696 = vmatprep.subr.mxu0 %v6219_v25 }
 0x38d   :  { %v3620_v54 = vpop.eup %3619  ;;  %3645 = vtanh.f32 %v2346_v46  ;;  %2767 = vmatprep.subr.mxu1 %v3618_v19  ;;  %2697 = vmatpush1.msra.mxu0 %v6216_v20 }
 0x38e   :  { %v3622_v22 = vpop.eup %3621  ;;  %3647 = vtanh.f32 %v2344_v37  ;;  %2768 = vmatpush1.msra.mxu1 %v3620_v54  ;;  %2698 = vmatprep.subr.mxu0 %v6213_v59 }
 0x38f   :  { %v3624_v27 = vpop.eup %3623  ;;  %2769 = vmatprep.subr.mxu1 %v3622_v22  ;;  %2699 = vmatpush1.msra.mxu0 %v6210_v61 }
 0x390   :  { %v3626_v49 = vpop.eup %3625  ;;  %2770 = vmatpush1.msra.mxu1 %v3624_v27  ;;  %2700 = vmatprep.subr.mxu0 %v6206_v3 }
 0x391   :  { %v3628_v42 = vpop.eup %3627  ;;  %2771 = vmatprep.subr.mxu1 %v3626_v49  ;;  %2701 = vmatpush1.msra.mxu0 %v6202_v56 }
 0x392   :  { %v3630_v25 = vpop.eup %3629  ;;  %2772 = vmatpush1.msra.mxu1 %v3628_v42  ;;  %2702 = vmatprep.subr.mxu0 %v6200_v35 }
 0x393   :  { %v3632_v20 = vpop.eup %3631  ;;  %2773 = vmatprep.subr.mxu1 %v3630_v25  ;;  %2703 = vmatpush1.msra.mxu0 %v6197_v30 }
 0x394   :  { %v3634_v59 = vpop.eup %3633  ;;  %2774 = vmatpush1.msra.mxu1 %v3632_v20  ;;  %2704 = vmatprep.subr.mxu0 %v6195_v51 }
 0x395   :  { %v3636_v61 = vpop.eup %3635  ;;  %2775 = vmatprep.subr.mxu1 %v3634_v59  ;;  %2705 = vmatpush1.msra.mxu0 %v6192_v17 }
 0x396   :  { %v3638_v3 = vpop.eup %3637  ;;  %2776 = vmatpush1.msra.mxu1 %v3636_v61  ;;  %2706 = vmatprep.subr.mxu0 %v6189_v11  ;;  %v2529_v11 = vpop.permute.xlu1 %2528 }
 0x397   :  { %v3640_v56 = vpop.eup %3639  ;;  %2777 = vmatprep.subr.mxu1 %v3638_v3  ;;  %2707 = vmatpush1.msra.mxu0 %v6186_v15 }
 0x398   :  { %v3642_v35 = vpop.eup %3641  ;;  %2778 = vmatpush1.msra.mxu1 %v3640_v56  ;;  %2708 = vmatprep.subr.mxu0 %v6183_v0 }
 0x399   :  { %v3644_v30 = vpop.eup %3643  ;;  %2779 = vmatprep.subr.mxu1 %v3642_v35  ;;  %2709 = vmatpush1.msra.mxu0 %v6180_v47  ;;  %v2835_v47 = vunpack.c.l.s4 %v3674_v36 }
 0x39a   :  { %v3646_v51 = vpop.eup %3645  ;;  %2780 = vmatpush1.msra.mxu1 %v3644_v30  ;;  %2710 = vmatprep.subr.mxu0 %v6177_v23  ;;  %v2534_v23 = vrot.slane %v2529_v11, %v6549_v13 }
 0x39b   :  { %v3648_v17 = vpop.eup %3647  ;;  %2781 = vmatprep.subr.mxu1 %v3646_v51  ;;  %2711 = vmatpush1.msra.mxu0 %v6173_v21  ;;  %v2836_v53 = vunpack.c.0.s8 %v2835_v47 }
 0x39c   :  { %2782 = vmatpush1.msra.mxu1 %v3648_v17  ;;  %3001 = vmatmul.mubr.msk.f32.vlgmr.msra.gmra.mxu0 %vm1002_vm0, %v6155_v31 }
 0x39d   :  { %3002 = vmatmul.mubr.msk.f32.vlgmr.msra.gmra.mxu1 %vm1002_vm0, %v6155_v31  ;;  %v2839_v39 = vsub.s32 %v2836_v53, %v6550_v24 }
 0x426   :  { %v2604_v0 = vpop.f32.mrf.mxu0 }
 0x427   :  { %v2675_v15 = vpop.f32.mrf.mxu1  ;;  %v2605_v21 = vadd.f32 %v2604_v0, %v2534_v23 }
 0x428   :  { %v2606_v50 = vpop.f32.mrf.mxu0  ;;  %v2676_v60 = vadd.f32 %v2675_v15, %v2534_v23 }
 0x429   :  { %v2677_v57 = vpop.f32.mrf.mxu1  ;;  %v2607_v18 = vadd.f32 %v2606_v50, %v2534_v23 }
 0x42a   :  { %v2678_v16 = vadd.f32 %v2677_v57, %v2534_v23 }
 0x42b   :  { %v2830_v14 = vcombine.low %v2605_v21, %v2607_v18 }
 0x42c   :  { %v2831_v9 = vcombine.low %v2676_v60, %v2678_v16 }
 0x42d   :  { %v2840_v26 = vrot.slane %v2830_v14, %v2839_v39 }
 0x42e   :  { %v2847_v55 = vrot.slane %v2831_v9, %v2839_v39 }
 0x430   :  { %v2862_v10 = vcombine.low %v2840_v26, %v2847_v55 }
 0x432   :  { %v2870_v2 = vrot.slane %v2862_v10, %v2839_v39 }
 0x45c   :  { %v2746_v28 = vpop.f32.mrf.mxu0 }
 0x45d   :  { %v2817_v31 = vpop.f32.mrf.mxu1  ;;  %v2747_v4 = vadd.f32 %v2746_v28, %v2534_v23 }
 0x45e   :  { %v2748_v44 = vpop.f32.mrf.mxu0  ;;  %v2818_v52 = vadd.f32 %v2817_v31, %v2534_v23 }
 0x45f   :  { %v2749_v43 = vadd.f32 %v2748_v44, %v2534_v23  ;;  %v2819_v12 = vpop.f32.mrf.mxu1 }
 0x460   :  { %v2820_v48 = vadd.f32 %v2819_v12, %v2534_v23 }
 0x461   :  { %v2832_v34 = vcombine.low %v2747_v4, %v2749_v43 }
 0x462   :  { %v2833_v1 = vcombine.low %v2818_v52, %v2820_v48 }
 0x463   :  { %v2854_v29 = vrot.slane %v2832_v34, %v2839_v39 }
 0x464   :  { %v2861_v58 = vrot.slane %v2833_v1, %v2839_v39 }
 0x466   :  { %v2863_v41 = vcombine.low %v2854_v29, %v2861_v58 }
 0x468   :  { %v2877_v8 = vrot.slane %v2863_v41, %v2839_v39 }
 0x46a   :  { %v2878_v62 = vcombine.low %v2870_v2, %v2877_v8 }
 0x46c   :  { %2880 = vst [vmem:[#allocation3] sm:$0xff] %v2878_v62 }
 0x46d   :  { %3660 = shalt.err (!%p3657_p4)
}
 0x46e   :  { %2890 = dma.vmem_to_hbm [thread:$0]  %s2888_s0, 128, %s6301_s9, [#allocation4]  }
 0x46f   :  { %3669 = dma.done.wait [#allocation4], 128  }
 0x470   :  { %3670 = vsyncadd [#allocation4], 4294967168 }
 0x471   :  { %2894 = vsyncpa [#allocation4], 1 }

// kernel: _forward_impl.1
= control target key start
LH: loop header
LB: loop body
LE: loop exit
PB: predicated region body
PF: predicated region fallthrough
CT: control target
= control target key end

     0   :  { %s6292_s0 = inlined_call_operand.vmem [shape: f32[2,1024], index: 0, kind: input, shape index: {}]   ;;  %s6293_s1 = inlined_call_operand.vmem [shape: f32[104,2], index: 1, kind: input, shape index: {}]   ;;  %s6294_s2 = inlined_call_operand.vmem [shape: f32[104,1], index: 2, kind: input, shape index: {}]   ;;  %s6295_s3 = inlined_call_operand.vmem [shape: f32[104,104], index: 3, kind: input, shape index: {}]   ;;  %s6296_s4 = inlined_call_operand.vmem [shape: f32[104,1], index: 4, kind: input, shape index: {}]   ;;  %s6297_s5 = inlined_call_operand.vmem [shape: f32[104,104], index: 5, kind: input, shape index: {}]   ;;  %s6298_s6 = inlined_call_operand.vmem [shape: f32[104,1], index: 6, kind: input, shape index: {}]   ;;  %s6299_s7 = inlined_call_operand.vmem [shape: f32[1,104], index: 7, kind: input, shape index: {}]   ;;  %s6300_s8 = inlined_call_operand.<no memory space> [shape: f32[1,1], index: 8, kind: input, shape index: {}]   ;;  %s6301_s9 = inlined_call_operand.hbm [shape: f32[1,1024], index: 9, kind: output, shape index: {}]  }
   0x1   :  { %v14_v0 = vstv %s6300_s8 }
   0x2   :  { %15 = vst [vmem:[#allocation2] sm:$0x1] %v14_v0 }
   0x3   :  { %v49_v1 = vld [vmem:[%s6293_s1 + $0x60] sm:$0xff]  ;;  %v48_v2 = vld [vmem:[%s6293_s1 + $0x58] sm:$0xff]  ;;  %v3671_v3 = vmov 1   ;;  %v3672_v4 = vmov 0   ;;  %v47_v5 = vld [vmem:[%s6293_s1 + $0x50] sm:$0xff]  ;;  %v117_v7 = vlaneseq }
   0x4   :  { %3008 = vset.pattern.permute.xlu0 %v3671_v3  ;;  %3009 = vset.pattern.permute.xlu1 %v3672_v4  ;;  %v44_v6 = vld [vmem:[%s6293_s1 + $0x38] sm:$0xff]  ;;  %v43_v8 = vld [vmem:[%s6293_s1 + $0x30] sm:$0xff]  ;;  %v637_v9 = vld [vmem:[%s6294_s2 + $0x60] sm:$0xff] }
   0x5   :  { %342 = vperm.xlu0 %3008, %v49_v1   ;;  %107 = vperm.xlu1 %3009, %v48_v2   ;;  %v3751_v10 = vshrl.u32 %v117_v7, 7  ;;  %v40_v11 = vld [vmem:[%s6293_s1 + $0x18] sm:$0xff] }
   0x7   :  { %6344 = vst [vmem:[#allocation6_spill] sm:$0xff] %v3751_v10  ;;  %v6304_v12 = vsub.s32 3, %v3751_v10  ;;  %v6303_v13 = vsub.s32 5, %v3751_v10  ;;  %v6302_v14 = vsub.s32 7, %v3751_v10 }
   0x9   :  { %3010 = vset.pattern.permute.xlu1 %v3671_v3  ;;  %334 = vperm.xlu0 %3008, %v47_v5  }
   0xa   :  { %338 = vperm.xlu1 %3010, %v48_v2  }
   0xd   :  { %322 = vperm.xlu0 %3008, %v44_v6  }
   0xe   :  { %3011 = vset.pattern.permute.xlu1 %v3672_v4 }
   0xf   :  { %102 = vperm.xlu1 %3011, %v47_v5  }
  0x11   :  { %318 = vperm.xlu0 %3008, %v43_v8  }
  0x13   :  { %700 = vperm.xlu1 %3011, %v637_v9  }
  0x14   :  { %16 = vsyncpa [#allocation4], 0  ;;  %v46_v15 = vld [vmem:[%s6293_s1 + $0x48] sm:$0xff]  ;;  %v39_v16 = vld [vmem:[%s6293_s1 + $0x10] sm:$0xff]  ;;  %v3772_v18 = vsub.s32 1, %v3751_v10  ;;  %v123_v58 = vsub.s32 2, %v3751_v10 }
  0x15   :  { %306 = vperm.xlu0 %3008, %v40_v11   ;;  %v3768_v17 = vld [vmem:[%s6292_s0 + $0x8] sm:$0xff]  ;;  %v636_v25 = vld [vmem:[%s6294_s2 + $0x58] sm:$0xff]  ;;  %v45_v26 = vld [vmem:[%s6293_s1 + $0x40] sm:$0xff]  ;;  %v127_v59 = vsub.s32 4, %v3751_v10  ;;  %v6305_v60 = vsub.s32 6, %v3751_v10  ;;  %vm1002_vm0 = vcmask 850944  }
  0x16   :  { %v368_v19 = vrot.slane %v3768_v17, %v6304_v12  ;;  %v372_v20 = vrot.slane %v3768_v17, %v6303_v13  ;;  %v376_v21 = vrot.slane %v3768_v17, %v6302_v14  ;;  %v635_v27 = vld [vmem:[%s6294_s2 + $0x50] sm:$0xff]  ;;  %v634_v28 = vld [vmem:[%s6294_s2 + $0x48] sm:$0xff]  ;;  %v41_v30 = vld [vmem:[%s6293_s1 + $0x20] sm:$0xff]  ;;  %v140_v63 = vrot.slane %v3768_v17, %v123_v58 }
  0x17   :  { %3012 = vset.pattern.permute.xlu1 %v3671_v3  ;;  %v42_v29 = vld [vmem:[%s6293_s1 + $0x28] sm:$0xff]  ;;  %v633_v31 = vld [vmem:[%s6294_s2 + $0x40] sm:$0xff]  ;;  %v631_v32 = vld [vmem:[%s6294_s2 + $0x30] sm:$0xff]  ;;  %v144_v0 = vrot.slane %v3768_v17, %v127_v59 }
  0x18   :  { %330 = vperm.xlu1 %3012, %v46_v15   ;;  %v3784_v22 = vrot.slane %v368_v19, %v3772_v18  ;;  %v3787_v23 = vrot.slane %v372_v20, %v3772_v18  ;;  %v3790_v24 = vrot.slane %v376_v21, %v3772_v18  ;;  %v38_v33 = vld [vmem:[%s6293_s1 + $0x8] sm:$0xff]  ;;  %v632_v34 = vld [vmem:[%s6294_s2 + $0x38] sm:$0xff]  ;;  %v37_v35 = vld [vmem:[%s6293_s1] sm:$0xff] }
  0x19   :  { %302 = vperm.xlu0 %3008, %v39_v16   ;;  %v627_v36 = vld [vmem:[%s6294_s2 + $0x10] sm:$0xff]  ;;  %v625_v37 = vld [vmem:[%s6294_s2] sm:$0xff]  ;;  %v935_v38 = vld [vmem:[%s6296_s4 + $0x58] sm:$0xff] }
  0x1a   :  { %6345 = vst [vmem:[#allocation7_spill] sm:$0xff] %v3784_v22  ;;  %6346 = vst [vmem:[#allocation8_spill] sm:$0xff] %v3787_v23  ;;  %v630_v39 = vld [vmem:[%s6294_s2 + $0x28] sm:$0xff]  ;;  %v931_v41 = vld [vmem:[%s6296_s4 + $0x38] sm:$0xff] }
  0x1b   :  { %6347 = vst [vmem:[#allocation9_spill] sm:$0xff] %v3790_v24  ;;  %v933_v40 = vld [vmem:[%s6296_s4 + $0x48] sm:$0xff]  ;;  %v629_v42 = vld [vmem:[%s6294_s2 + $0x20] sm:$0xff]  ;;  %v927_v44 = vld [vmem:[%s6296_s4 + $0x18] sm:$0xff] }
  0x1c   :  { %3013 = vset.pattern.permute.xlu1 %v3672_v4  ;;  %v929_v43 = vld [vmem:[%s6296_s4 + $0x28] sm:$0xff]  ;;  %v628_v45 = vld [vmem:[%s6294_s2 + $0x18] sm:$0xff]  ;;  %v1743_v47 = vld [vmem:[%s6298_s6 + $0x60] sm:$0xff] }
  0x1d   :  { %695 = vperm.xlu1 %3013, %v636_v25   ;;  %3020 = vset.pattern.permute.xlu0 %v3672_v4  ;;  %v925_v46 = vld [vmem:[%s6296_s4 + $0x8] sm:$0xff]  ;;  %v1741_v48 = vld [vmem:[%s6298_s6 + $0x50] sm:$0xff]  ;;  %v1739_v50 = vld [vmem:[%s6298_s6 + $0x40] sm:$0xff] }
  0x1e   :  { %112 = vperm.xlu0 %3020, %v49_v1   ;;  %v626_v49 = vld [vmem:[%s6294_s2 + $0x8] sm:$0xff]  ;;  %v936_v51 = vld [vmem:[%s6296_s4 + $0x60] sm:$0xff]  ;;  %v1737_v52 = vld [vmem:[%s6298_s6 + $0x30] sm:$0xff]  ;;  %v148_v1 = vrot.slane %v3768_v17, %v6305_v60 }
  0x1f   :  { %v934_v53 = vld [vmem:[%s6296_s4 + $0x50] sm:$0xff]  ;;  %v1735_v54 = vld [vmem:[%s6298_s6 + $0x20] sm:$0xff] }
  0x20   :  { %v932_v55 = vld [vmem:[%s6296_s4 + $0x40] sm:$0xff]  ;;  %v1733_v56 = vld [vmem:[%s6298_s6 + $0x10] sm:$0xff] }
  0x21   :  { %3014 = vset.pattern.permute.xlu1 %v3671_v3  ;;  %v930_v57 = vld [vmem:[%s6296_s4 + $0x30] sm:$0xff]  ;;  %v1731_v61 = vld [vmem:[%s6298_s6] sm:$0xff] }
  0x22   :  { %326 = vperm.xlu1 %3014, %v45_v26   ;;  %97 = vperm.xlu0 %3020, %v46_v15   ;;  %v928_v62 = vld [vmem:[%s6296_s4 + $0x20] sm:$0xff]  ;;  %v926_v2 = vld [vmem:[%s6296_s4 + $0x10] sm:$0xff] }
  0x26   :  { %3015 = vset.pattern.permute.xlu1 %v3672_v4  ;;  %92 = vperm.xlu0 %3020, %v45_v26  }
  0x27   :  { %87 = vperm.xlu1 %3015, %v44_v6  }
  0x2a   :  { %690 = vperm.xlu0 %3020, %v635_v27  }
  0x2b   :  { %685 = vperm.xlu1 %3015, %v634_v28  }
  0x2e   :  { %77 = vperm.xlu0 %3020, %v42_v29  }
  0x2f   :  { %82 = vperm.xlu1 %3015, %v43_v8  }
  0x32   :  { %72 = vperm.xlu0 %3020, %v41_v30  }
  0x33   :  { %680 = vperm.xlu1 %3015, %v633_v31  }
  0x36   :  { %670 = vperm.xlu0 %3020, %v631_v32  }
  0x37   :  { %3016 = vset.pattern.permute.xlu1 %v3671_v3 }
  0x38   :  { %314 = vperm.xlu1 %3016, %v42_v29   ;;  %v1742_v29 = vld [vmem:[%s6298_s6 + $0x58] sm:$0xff] }
  0x3a   :  { %57 = vperm.xlu0 %3020, %v38_v33  }
  0x3c   :  { %3017 = vset.pattern.permute.xlu1 %v3672_v4 }
  0x3d   :  { %675 = vperm.xlu1 %3017, %v632_v34  }
  0x3e   :  { %52 = vperm.xlu0 %3020, %v37_v35  }
  0x41   :  { %3018 = vset.pattern.permute.xlu1 %v3671_v3 }
  0x42   :  { %310 = vperm.xlu1 %3018, %v41_v30   ;;  %650 = vperm.xlu0 %3020, %v627_v36  }
  0x46   :  { %3019 = vset.pattern.permute.xlu1 %v3672_v4  ;;  %640 = vperm.xlu0 %3020, %v625_v37  }
  0x47   :  { %67 = vperm.xlu1 %3019, %v40_v11   ;;  %v924_v11 = vld [vmem:[%s6296_s4] sm:$0xff] }
  0x4a   :  { %994 = vperm.xlu0 %3020, %v935_v38  }
  0x4b   :  { %665 = vperm.xlu1 %3019, %v630_v39  }
  0x4e   :  { %984 = vperm.xlu0 %3020, %v933_v40   ;;  %v1740_v40 = vld [vmem:[%s6298_s6 + $0x48] sm:$0xff] }
  0x4f   :  { %62 = vperm.xlu1 %3019, %v39_v16  }
  0x52   :  { %974 = vperm.xlu0 %3020, %v931_v41  }
  0x53   :  { %660 = vperm.xlu1 %3019, %v629_v42  }
  0x56   :  { %964 = vperm.xlu0 %3020, %v929_v43  }
  0x57   :  { %3021 = vset.pattern.permute.xlu1 %v3671_v3 }
  0x58   :  { %298 = vperm.xlu1 %3021, %v38_v33  }
  0x5a   :  { %954 = vperm.xlu0 %3020, %v927_v44  }
  0x5c   :  { %3022 = vset.pattern.permute.xlu1 %v3672_v4 }
  0x5d   :  { %655 = vperm.xlu1 %3022, %v628_v45  }
  0x5e   :  { %944 = vperm.xlu0 %3020, %v925_v46  }
  0x61   :  { %3023 = vset.pattern.permute.xlu1 %v3671_v3  ;;  %v3925_v3 = vsub.s32 0, %v3751_v10 }
  0x62   :  { %294 = vperm.xlu1 %3023, %v37_v35   ;;  %1806 = vperm.xlu0 %3020, %v1743_v47  }
  0x63   :  { %6348 = vst [vmem:[#allocation10_spill] sm:$0xff] %v3925_v3  ;;  %v3930_v5 = vrot.slane %v140_v63, %v3925_v3  ;;  %v3933_v6 = vrot.slane %v144_v0, %v3925_v3  ;;  %v3936_v7 = vrot.slane %v148_v1, %v3925_v3  ;;  %v136_v30 = vrot.slane %v3768_v17, %v3925_v3 }
  0x65   :  { %v4001_v41 = vrot.slane %v136_v30, %v3925_v3 }
  0x66   :  { %3024 = vset.pattern.permute.xlu1 %v3672_v4  ;;  %1796 = vperm.xlu0 %3020, %v1741_v48   ;;  %v364_v4 = vrot.slane %v3768_v17, %v3772_v18 }
  0x67   :  { %645 = vperm.xlu1 %3024, %v626_v49  }
  0x68   :  { %v3946_v15 = vrot.slane %v364_v4, %v3772_v18 }
  0x6a   :  { %1786 = vperm.xlu0 %3020, %v1739_v50   ;;  %6349 = vst [vmem:[#allocation11_spill] sm:$0xff] %v3946_v15 }
  0x6b   :  { %999 = vperm.xlu1 %3024, %v936_v51   ;;  %v1738_v51 = vld [vmem:[%s6298_s6 + $0x38] sm:$0xff] }
  0x6e   :  { %1776 = vperm.xlu0 %3020, %v1737_v52  }
  0x6f   :  { %989 = vperm.xlu1 %3024, %v934_v53  }
  0x72   :  { %1766 = vperm.xlu0 %3020, %v1735_v54  }
  0x73   :  { %979 = vperm.xlu1 %3024, %v932_v55  }
  0x76   :  { %1756 = vperm.xlu0 %3020, %v1733_v56  }
  0x77   :  { %969 = vperm.xlu1 %3024, %v930_v57  }
  0x7a   :  { %1746 = vperm.xlu0 %3020, %v1731_v61  }
  0x7b   :  { %959 = vperm.xlu1 %3024, %v928_v62   ;;  %v1736_v62 = vld [vmem:[%s6298_s6 + $0x28] sm:$0xff] }
  0x7f   :  { %949 = vperm.xlu1 %3024, %v926_v2  }
  0x80   :  { %v3938_v8 = vpop.permute.xlu1 %107  ;;  %v3940_v9 = vpop.permute.xlu0 %342 }
  0x81   :  { %v282_v16 = vmul.f32 %v3930_v5, %v3938_v8  ;;  %v283_v19 = vmul.f32 %v3933_v6, %v3938_v8  ;;  %v284_v20 = vmul.f32 %v3936_v7, %v3938_v8  ;;  %v3956_v21 = vmul.f32 %v3946_v15, %v3940_v9 }
  0x82   :  { %v3960_v25 = vmul.f32 %v3784_v22, %v3940_v9  ;;  %v3964_v26 = vmul.f32 %v3787_v23, %v3940_v9  ;;  %v3968_v27 = vmul.f32 %v3790_v24, %v3940_v9  ;;  %v281_v52 = vmul.f32 %v4001_v41, %v3938_v8 }
  0x83   :  { %939 = vperm.xlu1 %3024, %v924_v11  }
  0x84   :  { %v3970_v28 = vpop.permute.xlu0 %334 }
  0x85   :  { %v3977_v31 = vpop.permute.xlu1 %338  ;;  %v501_v36 = vmul.f32 %v3946_v15, %v3970_v28  ;;  %v502_v17 = vmul.f32 %v3784_v22, %v3970_v28  ;;  %v503_v37 = vmul.f32 %v3787_v23, %v3970_v28  ;;  %v504_v38 = vmul.f32 %v3790_v24, %v3970_v28 }
  0x86   :  { %v509_v32 = vmul.f32 %v3946_v15, %v3977_v31  ;;  %v510_v33 = vmul.f32 %v3784_v22, %v3977_v31  ;;  %v511_v34 = vmul.f32 %v3787_v23, %v3977_v31  ;;  %v512_v35 = vmul.f32 %v3790_v24, %v3977_v31 }
  0x87   :  { %1801 = vperm.xlu1 %3024, %v1742_v29  }
  0x88   :  { %v3995_v39 = vpop.permute.xlu0 %322  ;;  %v613_v63 = vadd.f32 %v509_v32, %v281_v52  ;;  %v614_v0 = vadd.f32 %v510_v33, %v282_v16  ;;  %v615_v1 = vadd.f32 %v511_v34, %v283_v19  ;;  %v616_v2 = vadd.f32 %v512_v35, %v284_v20  ;;  %v35_v16 = vld [vmem:[%s6292_s0] sm:$0xff]  ;;  %v1734_v33 = vld [vmem:[%s6298_s6 + $0x18] sm:$0xff] }
  0x89   :  { %v4005_v42 = vmul.f32 %v3946_v15, %v3995_v39  ;;  %v4009_v43 = vmul.f32 %v3784_v22, %v3995_v39  ;;  %v4013_v44 = vmul.f32 %v3787_v23, %v3995_v39  ;;  %v4017_v45 = vmul.f32 %v3790_v24, %v3995_v39 }
  0x8a   :  { %v4019_v46 = vpop.permute.xlu1 %102  ;;  %v120_v52 = vrot.slane %v35_v16, %v3925_v3  ;;  %v128_v14 = vrot.slane %v35_v16, %v127_v59  ;;  %v1732_v59 = vld [vmem:[%s6298_s6 + $0x8] sm:$0xff] }
  0x8b   :  { %6350 = vst [vmem:[#allocation12_spill] sm:$0xff] %v4005_v42  ;;  %6351 = vst [vmem:[#allocation13_spill] sm:$0xff] %v4009_v43  ;;  %1791 = vperm.xlu1 %3024, %v1740_v40   ;;  %v274_v47 = vmul.f32 %v3930_v5, %v4019_v46  ;;  %v275_v48 = vmul.f32 %v3933_v6, %v4019_v46  ;;  %v276_v49 = vmul.f32 %v3936_v7, %v4019_v46 }
  0x8c   :  { %6352 = vst [vmem:[#allocation14_spill] sm:$0xff] %v4013_v44  ;;  %6353 = vst [vmem:[#allocation15_spill] sm:$0xff] %v4017_v45  ;;  %v4027_v50 = vpop.permute.xlu0 %318  ;;  %v273_v20 = vmul.f32 %v4001_v41, %v4019_v46 }
  0x8d   :  { %v4036_v53 = vmul.f32 %v3946_v15, %v4027_v50  ;;  %v4040_v54 = vmul.f32 %v3784_v22, %v4027_v50  ;;  %v4044_v55 = vmul.f32 %v3787_v23, %v4027_v50  ;;  %v4048_v56 = vmul.f32 %v3790_v24, %v4027_v50 }
  0x8e   :  { %v4050_v57 = vpop.permute.xlu1 %700 }
  0x8f   :  { %6354 = vst [vmem:[#allocation16_spill] sm:$0xff] %v4036_v53  ;;  %6355 = vst [vmem:[#allocation17_spill] sm:$0xff] %v4040_v54  ;;  %1781 = vperm.xlu1 %3024, %v1738_v51  }
  0x90   :  { %6356 = vst [vmem:[#allocation18_spill] sm:$0xff] %v4044_v55  ;;  %6357 = vst [vmem:[#allocation19_spill] sm:$0xff] %v4048_v56  ;;  %v4052_v61 = vpop.permute.xlu0 %306 }
  0x91   :  { %6358 = vst [vmem:[#allocation20_spill] sm:$0xff] %v4050_v57  ;;  %6359 = vst [vmem:[#allocation21_spill] sm:$0xff] %v4052_v61  ;;  %v4059_v4 = vmul.f32 %v3946_v15, %v4052_v61  ;;  %v4063_v11 = vmul.f32 %v3784_v22, %v4052_v61  ;;  %v4067_v29 = vmul.f32 %v3787_v23, %v4052_v61 }
  0x92   :  { %v4071_v30 = vmul.f32 %v3790_v24, %v4052_v61  ;;  %v6369_v61 = vsub.s32 6, %v3751_v10 }
  0x93   :  { %6360 = vst [vmem:[#allocation22_spill] sm:$0xff] %v4059_v4  ;;  %6361 = vst [vmem:[#allocation23_spill] sm:$0xff] %v4063_v11  ;;  %v4076_v19 = vpop.permute.xlu1 %330  ;;  %1771 = vperm.xlu1 %3024, %v1736_v62   ;;  %v124_v62 = vrot.slane %v35_v16, %v123_v58  ;;  %v4131_v11 = vadd.f32 %v503_v37, %v275_v48  ;;  %v4133_v4 = vadd.f32 %v504_v38, %v276_v49 }
  0x94   :  { %6362 = vst [vmem:[#allocation24_spill] sm:$0xff] %v4067_v29  ;;  %6363 = vst [vmem:[#allocation25_spill] sm:$0xff] %v4071_v30  ;;  %v4080_v32 = vpop.permute.xlu0 %302  ;;  %v4087_v34 = vmul.f32 %v3946_v15, %v4076_v19  ;;  %v4091_v35 = vmul.f32 %v3784_v22, %v4076_v19  ;;  %v4095_v40 = vmul.f32 %v3787_v23, %v4076_v19 }
  0x95   :  { %6364 = vst [vmem:[#allocation26_spill] sm:$0xff] %v4080_v32  ;;  %v4099_v51 = vmul.f32 %v3790_v24, %v4076_v19  ;;  %v4108_v13 = vmul.f32 %v3946_v15, %v4080_v32  ;;  %v4112_v12 = vmul.f32 %v3784_v22, %v4080_v32  ;;  %v4116_v60 = vmul.f32 %v3787_v23, %v4080_v32 }
  0x96   :  { %v4120_v30 = vmul.f32 %v3790_v24, %v4080_v32  ;;  %v4129_v29 = vadd.f32 %v502_v17, %v274_v47  ;;  %v348_v32 = vrot.slane %v35_v16, %v3772_v18  ;;  %v6376_v47 = vsub.s32 7, %v3751_v10 }
  0x97   :  { %6365 = vst [vmem:[#allocation27_spill] sm:$0xff] %v4108_v13  ;;  %6366 = vst [vmem:[#allocation28_spill] sm:$0xff] %v4112_v12  ;;  %1761 = vperm.xlu1 %3024, %v1734_v33   ;;  %v4127_v13 = vadd.f32 %v501_v36, %v273_v20  ;;  %v6370_v33 = vsub.s32 3, %v3751_v10  ;;  %v6371_v12 = vsub.s32 5, %v3751_v10 }
  0x98   :  { %6367 = vst [vmem:[#allocation29_spill] sm:$0xff] %v4116_v60  ;;  %6368 = vst [vmem:[#allocation30_spill] sm:$0xff] %v4120_v30  ;;  %v4122_v58 = vpop.permute.xlu1 %695  ;;  %v132_v60 = vrot.slane %v35_v16, %v6369_v61  ;;  %v360_v48 = vrot.slane %v35_v16, %v6376_v47 }
  0x99   :  { %v352_v30 = vrot.slane %v35_v16, %v6370_v33  ;;  %v356_v45 = vrot.slane %v35_v16, %v6371_v12  ;;  %v4142_v44 = vpop.permute.xlu0 %112  ;;  %v4145_v36 = vadd.f32 %v4122_v58, %v613_v63  ;;  %v4148_v17 = vadd.f32 %v4122_v58, %v614_v0  ;;  %v2525_v16 = vld [vmem:[#allocation2] sm:$0x1] }
  0x9a   :  { %v4151_v37 = vadd.f32 %v4122_v58, %v615_v1  ;;  %v4154_v38 = vadd.f32 %v4122_v58, %v616_v2  ;;  %v289_v12 = vmul.f32 %v4001_v41, %v4142_v44  ;;  %v290_v49 = vmul.f32 %v3930_v5, %v4142_v44 }
  0x9b   :  { %6372 = vst [vmem:[#allocation31_spill] sm:$0xff] %v4145_v36  ;;  %6373 = vst [vmem:[#allocation32_spill] sm:$0xff] %v4148_v17  ;;  %v291_v61 = vmul.f32 %v3933_v6, %v4142_v44  ;;  %1751 = vperm.xlu1 %3024, %v1732_v59   ;;  %v4165_v63 = vrot.slane %v120_v52, %v3925_v3  ;;  %v4168_v0 = vrot.slane %v124_v62, %v3925_v3 }
  0x9c   :  { %6374 = vst [vmem:[#allocation33_spill] sm:$0xff] %v4151_v37  ;;  %6375 = vst [vmem:[#allocation34_spill] sm:$0xff] %v4154_v38  ;;  %v4171_v1 = vrot.slane %v128_v14, %v3925_v3  ;;  %v292_v2 = vmul.f32 %v3936_v7, %v4142_v44  ;;  %v4176_v20 = vrot.slane %v132_v60, %v3925_v3 }
  0x9d   :  { %v621_v33 = vadd.f32 %v3956_v21, %v289_v12  ;;  %v622_v59 = vadd.f32 %v3960_v25, %v290_v49  ;;  %v623_v52 = vadd.f32 %v3964_v26, %v291_v61  ;;  %v4181_v47 = vpop.permute.xlu0 %97  ;;  %v4184_v62 = vrot.slane %v348_v32, %v3772_v18  ;;  %v4193_v3 = vpop.permute.xlu1 %326 }
  0x9e   :  { %v4187_v14 = vrot.slane %v352_v30, %v3772_v18  ;;  %v4190_v10 = vrot.slane %v356_v45, %v3772_v18  ;;  %v624_v60 = vadd.f32 %v3968_v27, %v292_v2  ;;  %v4196_v21 = vrot.slane %v360_v48, %v3772_v18 }
  0x9f   :  { %v4199_v25 = vadd.f32 %v4050_v57, %v621_v33  ;;  %v4202_v26 = vadd.f32 %v4050_v57, %v622_v59  ;;  %v4205_v32 = vadd.f32 %v4050_v57, %v623_v52  ;;  %2528 = vperm.xlu1 %3024, %v2525_v16   ;;  %v277_v45 = vmul.f32 %v4165_v63, %v3938_v8 }
  0xa0   :  { %v278_v27 = vmul.f32 %v4168_v0, %v3938_v8  ;;  %v279_v18 = vmul.f32 %v4171_v1, %v3938_v8  ;;  %v4214_v30 = vadd.f32 %v4050_v57, %v624_v60  ;;  %v280_v48 = vmul.f32 %v4176_v20, %v3938_v8 }
  0xa1   :  { %6377 = vst [vmem:[#allocation35_spill] sm:$0xff] %v4199_v25  ;;  %6378 = vst [vmem:[#allocation36_spill] sm:$0xff] %v4202_v26  ;;  %v4220_v12 = vmul.f32 %v3946_v15, %v4193_v3  ;;  %v4224_v49 = vmul.f32 %v3784_v22, %v4193_v3  ;;  %v4228_v61 = vmul.f32 %v3787_v23, %v4193_v3  ;;  %v4230_v2 = vpop.permute.xlu0 %92 }
  0xa2   :  { %6379 = vst [vmem:[#allocation37_spill] sm:$0xff] %v4205_v32  ;;  %6380 = vst [vmem:[#allocation38_spill] sm:$0xff] %v4214_v30  ;;  %v4234_v16 = vmul.f32 %v3790_v24, %v4193_v3  ;;  %v4238_v8 = vmul.f32 %v4187_v14, %v3940_v9  ;;  %v4242_v33 = vmul.f32 %v4196_v21, %v3940_v9  ;;  %v4266_v17 = vpop.permute.xlu1 %87 }
  0xa3   :  { %v4246_v59 = vmul.f32 %v4184_v62, %v3940_v9  ;;  %v497_v52 = vmul.f32 %v4184_v62, %v3970_v28  ;;  %v498_v60 = vmul.f32 %v4187_v14, %v3970_v28  ;;  %v499_v30 = vmul.f32 %v4190_v10, %v3970_v28 }
  0xa4   :  { %6381 = vst [vmem:[#allocation39_spill] sm:$0xff] %v4242_v33  ;;  %v4256_v32 = vmul.f32 %v4190_v10, %v3940_v9  ;;  %v500_v26 = vmul.f32 %v4196_v21, %v3970_v28  ;;  %v266_v25 = vmul.f32 %v3930_v5, %v4181_v47  ;;  %v267_v38 = vmul.f32 %v3933_v6, %v4181_v47 }
  0xa5   :  { %6382 = vst [vmem:[#allocation40_spill] sm:$0xff] %v4246_v59  ;;  %v268_v37 = vmul.f32 %v3936_v7, %v4181_v47  ;;  %v505_v36 = vmul.f32 %v4184_v62, %v3977_v31  ;;  %v506_v9 = vmul.f32 %v4187_v14, %v3977_v31  ;;  %v507_v28 = vmul.f32 %v4190_v10, %v3977_v31 }
  0xa6   :  { %6383 = vst [vmem:[#allocation41_spill] sm:$0xff] %v4256_v32  ;;  %v508_v43 = vmul.f32 %v4196_v21, %v3977_v31  ;;  %v4278_v42 = vmul.f32 %v4184_v62, %v3995_v39  ;;  %v4282_v24 = vmul.f32 %v4187_v14, %v3995_v39  ;;  %v4286_v23 = vmul.f32 %v4190_v10, %v3995_v39 }
  0xa7   :  { %v4290_v22 = vmul.f32 %v3930_v5, %v4230_v2  ;;  %v4294_v15 = vmul.f32 %v4196_v21, %v3995_v39  ;;  %v269_v31 = vmul.f32 %v4165_v63, %v4019_v46  ;;  %v270_v56 = vmul.f32 %v4168_v0, %v4019_v46 }
  0xa8   :  { %6384 = vst [vmem:[#allocation42_spill] sm:$0xff] %v4278_v42  ;;  %6385 = vst [vmem:[#allocation43_spill] sm:$0xff] %v4282_v24  ;;  %v4300_v42 = vmul.f32 %v3933_v6, %v4230_v2  ;;  %v4304_v24 = vmul.f32 %v3936_v7, %v4230_v2  ;;  %v271_v39 = vmul.f32 %v4171_v1, %v4019_v46 }
  0xa9   :  { %6386 = vst [vmem:[#allocation44_spill] sm:$0xff] %v4286_v23  ;;  %6387 = vst [vmem:[#allocation45_spill] sm:$0xff] %v4294_v15  ;;  %v4306_v23 = vpop.permute.xlu0 %690  ;;  %v272_v15 = vmul.f32 %v4176_v20, %v4019_v46  ;;  %v4316_v55 = vmul.f32 %v3930_v5, %v4266_v17  ;;  %v609_v54 = vadd.f32 %v505_v36, %v277_v45  ;;  %v4340_v45 = vpop.permute.xlu1 %685 }
  0xaa   :  { %v265_v53 = vmul.f32 %v4001_v41, %v4181_v47  ;;  %v4322_v57 = vmul.f32 %v3933_v6, %v4266_v17  ;;  %v4326_v32 = vmul.f32 %v3936_v7, %v4266_v17  ;;  %v4330_v59 = vmul.f32 %v4184_v62, %v4027_v50 }
  0xab   :  { %6388 = vst [vmem:[#allocation46_spill] sm:$0xff] %v4316_v55  ;;  %v610_v46 = vadd.f32 %v506_v9, %v278_v27  ;;  %v4334_v55 = vadd.f32 %v4306_v23, %v4127_v13  ;;  %v4338_v36 = vadd.f32 %v4306_v23, %v4129_v29  ;;  %v791_v33 = vadd.f32 %v4122_v58, %v609_v54 }
  0xac   :  { %6389 = vst [vmem:[#allocation47_spill] sm:$0xff] %v4322_v57  ;;  %6390 = vst [vmem:[#allocation48_spill] sm:$0xff] %v4326_v32  ;;  %v611_v57 = vadd.f32 %v507_v28, %v279_v18  ;;  %v4345_v32 = vadd.f32 %v4306_v23, %v4131_v11  ;;  %v4349_v27 = vadd.f32 %v4306_v23, %v4133_v4 }
  0xad   :  { %6391 = vst [vmem:[#allocation49_spill] sm:$0xff] %v4334_v55  ;;  %6392 = vst [vmem:[#allocation50_spill] sm:$0xff] %v4338_v36  ;;  %v4353_v13 = vmul.f32 %v4187_v14, %v4027_v50  ;;  %v612_v9 = vadd.f32 %v508_v43, %v280_v48  ;;  %v792_v29 = vadd.f32 %v4122_v58, %v610_v46  ;;  %3025 = vtanh.f32 %v791_v33 }
  0xae   :  { %6393 = vst [vmem:[#allocation51_spill] sm:$0xff] %v4345_v32  ;;  %6394 = vst [vmem:[#allocation52_spill] sm:$0xff] %v4349_v27  ;;  %v601_v36 = vadd.f32 %v497_v52, %v269_v31  ;;  %v793_v18 = vadd.f32 %v4122_v58, %v611_v57  ;;  %v597_v54 = vadd.f32 %v4087_v34, %v265_v53  ;;  %v4376_v34 = vpop.permute.xlu1 %82 }
  0xaf   :  { %v598_v28 = vadd.f32 %v4091_v35, %v266_v25  ;;  %v599_v11 = vadd.f32 %v4095_v40, %v267_v38  ;;  %v794_v32 = vadd.f32 %v4122_v58, %v612_v9  ;;  %v602_v4 = vadd.f32 %v498_v60, %v270_v56 }
  0xb0   :  { %v603_v27 = vadd.f32 %v499_v30, %v271_v39  ;;  %v600_v55 = vadd.f32 %v4099_v51, %v268_v37  ;;  %v489_v43 = vmul.f32 %v4184_v62, %v4076_v19  ;;  %v604_v48 = vadd.f32 %v500_v26, %v272_v15  ;;  %v4384_v51 = vpop.permute.xlu0 %77 }
  0xb1   :  { %v4365_v52 = vadd.f32 %v4340_v45, %v597_v54  ;;  %3027 = vtanh.f32 %v792_v29  ;;  %v4368_v53 = vadd.f32 %v4340_v45, %v598_v28  ;;  %v4371_v57 = vadd.f32 %v4340_v45, %v599_v11 }
  0xb2   :  { %v4374_v56 = vadd.f32 %v4340_v45, %v600_v55  ;;  %v490_v35 = vmul.f32 %v4187_v14, %v4076_v19  ;;  %v491_v15 = vmul.f32 %v4190_v10, %v4076_v19  ;;  %v492_v40 = vmul.f32 %v4196_v21, %v4076_v19  ;;  %v4435_v28 = vpop.permute.xlu1 %680 }
  0xb3   :  { %6395 = vst [vmem:[#allocation53_spill] sm:$0xff] %v4365_v52  ;;  %6396 = vst [vmem:[#allocation54_spill] sm:$0xff] %v4368_v53  ;;  %3029 = vtanh.f32 %v793_v18  ;;  %v4388_v58 = vmul.f32 %v3930_v5, %v4384_v51  ;;  %v286_v55 = vmul.f32 %v4168_v0, %v4142_v44  ;;  %v288_v37 = vmul.f32 %v4176_v20, %v4142_v44 }
  0xb4   :  { %6397 = vst [vmem:[#allocation55_spill] sm:$0xff] %v4371_v57  ;;  %6398 = vst [vmem:[#allocation56_spill] sm:$0xff] %v4374_v56  ;;  %3031 = vtanh.f32 %v794_v32  ;;  %v4396_v38 = vmul.f32 %v4184_v62, %v4193_v3  ;;  %v4400_v19 = vmul.f32 %v4187_v14, %v4193_v3  ;;  %v4404_v25 = vmul.f32 %v3933_v6, %v4384_v51  ;;  %v4444_v57 = vpop.permute.xlu0 %72 }
  0xb5   :  { %v4408_v26 = vmul.f32 %v3936_v7, %v4384_v51  ;;  %v4412_v32 = vmul.f32 %v4190_v10, %v4193_v3  ;;  %v261_v30 = vmul.f32 %v4165_v63, %v4181_v47  ;;  %v262_v33 = vmul.f32 %v4168_v0, %v4181_v47  ;;  %6401 = vst [vmem:[#allocation59_spill] sm:$0xff] %v4444_v57 }
  0xb6   :  { %6399 = vst [vmem:[#allocation57_spill] sm:$0xff] %v4404_v25  ;;  %v783_v60 = vadd.f32 %v4306_v23, %v601_v36  ;;  %v263_v31 = vmul.f32 %v4171_v1, %v4181_v47  ;;  %v784_v39 = vadd.f32 %v4306_v23, %v602_v4  ;;  %v242_v46 = vmul.f32 %v3930_v5, %v4376_v34 }
  0xb7   :  { %6400 = vst [vmem:[#allocation58_spill] sm:$0xff] %v4408_v26  ;;  %v4426_v9 = vmul.f32 %v3933_v6, %v4376_v34  ;;  %v264_v29 = vmul.f32 %v4176_v20, %v4181_v47  ;;  %v257_v18 = vmul.f32 %v4001_v41, %v4230_v2  ;;  %v785_v36 = vadd.f32 %v4306_v23, %v603_v27 }
  0xb8   :  { %v244_v54 = vmul.f32 %v3936_v7, %v4376_v34  ;;  %v484_v11 = vmul.f32 %v4196_v21, %v4193_v3  ;;  %v253_v4 = vmul.f32 %v4165_v63, %v4230_v2  ;;  %v254_v56 = vmul.f32 %v4168_v0, %v4230_v2 }
  0xb9   :  { %v786_v47 = vadd.f32 %v4306_v23, %v604_v48  ;;  %3033 = vtanh.f32 %v783_v60  ;;  %v4448_v27 = vmul.f32 %v3930_v5, %v4444_v57  ;;  %v4452_v53 = vmul.f32 %v3933_v6, %v4444_v57 }
  0xba   :  { %v4456_v3 = vmul.f32 %v3936_v7, %v4444_v57  ;;  %3035 = vtanh.f32 %v784_v39  ;;  %v593_v52 = vadd.f32 %v489_v43, %v261_v30  ;;  %v594_v26 = vadd.f32 %v490_v35, %v262_v33  ;;  %v4466_v39 = vpop.eup %3025 }
  0xbb   :  { %6402 = vst [vmem:[#allocation60_spill] sm:$0xff] %v4448_v27  ;;  %6403 = vst [vmem:[#allocation61_spill] sm:$0xff] %v4452_v53  ;;  %v595_v25 = vadd.f32 %v491_v15, %v263_v31  ;;  %3037 = vtanh.f32 %v785_v36  ;;  %v596_v23 = vadd.f32 %v492_v40, %v264_v29  ;;  %v589_v48 = vadd.f32 %v4220_v12, %v257_v18  ;;  %v6411_v18 = vld [vmem:[#allocation41_spill] sm:$0xff] }
  0xbc   :  { %6404 = vst [vmem:[#allocation62_spill] sm:$0xff] %v4456_v3  ;;  %v590_v60 = vadd.f32 %v4224_v49, %v4290_v22  ;;  %3039 = vtanh.f32 %v786_v47  ;;  %v775_v27 = vadd.f32 %v4340_v45, %v593_v52  ;;  %v591_v53 = vadd.f32 %v4228_v61, %v4300_v42  ;;  %v4476_v49 = vpop.permute.xlu1 %314  ;;  %v6412_v47 = vld [vmem:[#allocation20_spill] sm:$0xff] }
  0xbd   :  { %v592_v3 = vadd.f32 %v4234_v16, %v4304_v24  ;;  %v776_v43 = vadd.f32 %v4340_v45, %v594_v26  ;;  %v777_v35 = vadd.f32 %v4340_v45, %v595_v25  ;;  %v4471_v12 = vadd.f32 %v4435_v28, %v589_v48  ;;  %v6409_v25 = vld [vmem:[#allocation39_spill] sm:$0xff] }
  0xbe   :  { %v4474_v22 = vadd.f32 %v4435_v28, %v590_v60  ;;  %v4478_v52 = vpop.eup %3027  ;;  %v241_v42 = vmul.f32 %v4001_v41, %v4376_v34  ;;  %v4483_v24 = vadd.f32 %v4435_v28, %v591_v53  ;;  %v618_v16 = vadd.f32 %v4238_v8, %v286_v55  ;;  %v4515_v60 = vpop.permute.xlu0 %670 }
  0xbf   :  { %6405 = vst [vmem:[#allocation63_spill] sm:$0xff] %v4471_v12  ;;  %v4486_v61 = vadd.f32 %v4435_v28, %v592_v3  ;;  %v778_v40 = vadd.f32 %v4340_v45, %v596_v23  ;;  %v620_v26 = vadd.f32 %v6409_v25, %v288_v37  ;;  %v285_v30 = vmul.f32 %v4165_v63, %v4142_v44  ;;  %v6410_v37 = vld [vmem:[#allocation40_spill] sm:$0xff]  ;;  %v6432_v12 = vld [vmem:[#allocation47_spill] sm:$0xff] }
  0xc0   :  { %6406 = vst [vmem:[#allocation64_spill] sm:$0xff] %v4474_v22  ;;  %6407 = vst [vmem:[#allocation65_spill] sm:$0xff] %v4483_v24  ;;  %v4489_v15 = vpop.eup %3029  ;;  %v287_v33 = vmul.f32 %v4171_v1, %v4142_v44  ;;  %v255_v53 = vmul.f32 %v4171_v1, %v4230_v2  ;;  %v256_v8 = vmul.f32 %v4176_v20, %v4230_v2  ;;  %3041 = vtanh.f32 %v775_v27  ;;  %v6413_v23 = vld [vmem:[#allocation16_spill] sm:$0xff]  ;;  %v6430_v22 = vld [vmem:[#allocation46_spill] sm:$0xff] }
  0xc1   :  { %6408 = vst [vmem:[#allocation66_spill] sm:$0xff] %v4486_v61  ;;  %v4497_v31 = vpop.eup %3031  ;;  %v245_v55 = vmul.f32 %v4165_v63, %v4266_v17  ;;  %v246_v45 = vmul.f32 %v4168_v0, %v4266_v17  ;;  %3043 = vtanh.f32 %v776_v43  ;;  %v617_v29 = vadd.f32 %v6410_v37, %v285_v30  ;;  %v6414_v43 = vld [vmem:[#allocation17_spill] sm:$0xff]  ;;  %v4518_v30 = vpop.permute.xlu1 %675  ;;  %v6415_v37 = vld [vmem:[#allocation18_spill] sm:$0xff]  ;;  %v6429_v61 = vld [vmem:[#allocation12_spill] sm:$0xff] }
  0xc2   :  { %v619_v44 = vadd.f32 %v6411_v18, %v287_v33  ;;  %3045 = vtanh.f32 %v777_v35  ;;  %v238_v36 = vmul.f32 %v4168_v0, %v4376_v34  ;;  %v800_v3 = vadd.f32 %v6412_v47, %v618_v16  ;;  %v6416_v18 = vld [vmem:[#allocation19_spill] sm:$0xff] }
  0xc3   :  { %v573_v2 = vadd.f32 %v6413_v23, %v241_v42  ;;  %3047 = vtanh.f32 %v778_v40  ;;  %v585_v48 = vadd.f32 %v4396_v38, %v253_v4  ;;  %v802_v27 = vadd.f32 %v6412_v47, %v620_v26 }
  0xc4   :  { %v574_v25 = vadd.f32 %v6414_v43, %v242_v46  ;;  %v586_v35 = vadd.f32 %v4400_v19, %v254_v56  ;;  %v799_v33 = vadd.f32 %v6412_v47, %v617_v29  ;;  %v575_v16 = vadd.f32 %v6415_v37, %v4426_v9 }
  0xc5   :  { %v576_v42 = vadd.f32 %v6416_v18, %v244_v54  ;;  %v587_v40 = vadd.f32 %v4412_v32, %v255_v53  ;;  %v588_v38 = vadd.f32 %v484_v11, %v256_v8  ;;  %v767_v4 = vadd.f32 %v4435_v28, %v585_v48 }
  0xc6   :  { %v801_v26 = vadd.f32 %v6412_v47, %v619_v44  ;;  %v4528_v23 = vpop.eup %3033  ;;  %3049 = vtanh.f32 %v800_v3  ;;  %v4531_v46 = vadd.f32 %v4515_v60, %v573_v2  ;;  %v4534_v56 = vadd.f32 %v4515_v60, %v574_v25  ;;  %v6421_v44 = vld [vmem:[#allocation11_spill] sm:$0xff]  ;;  %v6424_v25 = vld [vmem:[#allocation9_spill] sm:$0xff] }
  0xc7   :  { %v4537_v19 = vadd.f32 %v4515_v60, %v575_v16  ;;  %v4539_v9 = vpop.eup %3035  ;;  %v237_v32 = vmul.f32 %v4165_v63, %v4376_v34  ;;  %v768_v54 = vadd.f32 %v4435_v28, %v586_v35  ;;  %3051 = vtanh.f32 %v802_v27  ;;  %v6422_v2 = vld [vmem:[#allocation7_spill] sm:$0xff]  ;;  %v6423_v27 = vld [vmem:[#allocation8_spill] sm:$0xff] }
  0xc8   :  { %6417 = vst [vmem:[#allocation39_spill] sm:$0xff] %v4531_v46  ;;  %6418 = vst [vmem:[#allocation40_spill] sm:$0xff] %v4534_v56  ;;  %v4545_v11 = vadd.f32 %v4515_v60, %v576_v42  ;;  %v4547_v53 = vpop.eup %3037  ;;  %v769_v8 = vadd.f32 %v4435_v28, %v587_v40  ;;  %v770_v29 = vadd.f32 %v4435_v28, %v588_v38  ;;  %3053 = vtanh.f32 %v799_v33  ;;  %v4569_v28 = vpop.permute.xlu1 %310 }
  0xc9   :  { %6419 = vst [vmem:[#allocation41_spill] sm:$0xff] %v4537_v19  ;;  %v4553_v47 = vmul.f32 %v6421_v44, %v4476_v49  ;;  %v4555_v3 = vpop.eup %3039  ;;  %3055 = vtanh.f32 %v801_v26  ;;  %v4559_v48 = vmul.f32 %v6422_v2, %v4476_v49  ;;  %v4563_v43 = vmul.f32 %v6423_v27, %v4476_v49  ;;  %v6427_v19 = vld [vmem:[#allocation43_spill] sm:$0xff] }
  0xca   :  { %6420 = vst [vmem:[#allocation20_spill] sm:$0xff] %v4545_v11  ;;  %v4567_v35 = vmul.f32 %v6424_v25, %v4476_v49  ;;  %v247_v33 = vmul.f32 %v4171_v1, %v4266_v17  ;;  %v249_v37 = vmul.f32 %v4001_v41, %v4266_v17  ;;  %3057 = vtanh.f32 %v767_v4  ;;  %v6426_v11 = vld [vmem:[#allocation42_spill] sm:$0xff] }
  0xcb   :  { %v570_v16 = vadd.f32 %v4353_v13, %v238_v36  ;;  %v467_v18 = vmul.f32 %v4190_v10, %v4027_v50  ;;  %v468_v42 = vmul.f32 %v4196_v21, %v4027_v50  ;;  %v248_v40 = vmul.f32 %v4176_v20, %v4266_v17 }
  0xcc   :  { %6425 = vst [vmem:[#allocation16_spill] sm:$0xff] %v4567_v35  ;;  %3059 = vtanh.f32 %v768_v54  ;;  %v239_v38 = vmul.f32 %v4171_v1, %v4376_v34  ;;  %v240_v26 = vmul.f32 %v4176_v20, %v4376_v34  ;;  %v569_v36 = vadd.f32 %v4330_v59, %v237_v32  ;;  %v6428_v54 = vld [vmem:[#allocation44_spill] sm:$0xff]  ;;  %v6431_v34 = vld [vmem:[#allocation13_spill] sm:$0xff] }
  0xcd   :  { %3061 = vtanh.f32 %v769_v8  ;;  %v752_v4 = vadd.f32 %v4515_v60, %v570_v16  ;;  %v4587_v13 = vpop.eup %3041  ;;  %v577_v50 = vadd.f32 %v6426_v11, %v245_v55  ;;  %v578_v56 = vadd.f32 %v6427_v19, %v246_v45  ;;  %v6433_v16 = vld [vmem:[#allocation14_spill] sm:$0xff]  ;;  %v6435_v32 = vld [vmem:[#allocation48_spill] sm:$0xff]  ;;  %v6436_v55 = vld [vmem:[#allocation15_spill] sm:$0xff] }
  0xce   :  { %3063 = vtanh.f32 %v770_v29  ;;  %v4592_v17 = vpop.eup %3043  ;;  %v579_v46 = vadd.f32 %v6428_v54, %v247_v33  ;;  %v581_v24 = vadd.f32 %v6429_v61, %v249_v37  ;;  %v582_v8 = vadd.f32 %v6431_v34, %v6430_v22  ;;  %v6434_v29 = vld [vmem:[#allocation45_spill] sm:$0xff]  ;;  %v4607_v33 = vpop.permute.xlu1 %67 }
  0xcf   :  { %v583_v57 = vadd.f32 %v6433_v16, %v6432_v12  ;;  %v4600_v35 = vpop.eup %3045  ;;  %v580_v59 = vadd.f32 %v6434_v29, %v248_v40  ;;  %v584_v11 = vadd.f32 %v6436_v55, %v6435_v32  ;;  %v759_v45 = vadd.f32 %v4518_v30, %v577_v50 }
  0xd0   :  { %v760_v19 = vadd.f32 %v4518_v30, %v578_v56  ;;  %v4609_v61 = vpop.eup %3047  ;;  %v572_v37 = vadd.f32 %v468_v42, %v240_v26  ;;  %3065 = vtanh.f32 %v752_v4  ;;  %v761_v22 = vadd.f32 %v4518_v30, %v579_v46 }
  0xd1   :  { %v4613_v12 = vadd.f32 %v4518_v30, %v581_v24  ;;  %v762_v40 = vadd.f32 %v4518_v30, %v580_v59  ;;  %v4617_v54 = vadd.f32 %v4518_v30, %v582_v8  ;;  %v4620_v50 = vadd.f32 %v4518_v30, %v583_v57 }
  0xd2   :  { %v4623_v56 = vadd.f32 %v4518_v30, %v584_v11  ;;  %v571_v34 = vadd.f32 %v467_v18, %v239_v38  ;;  %v751_v42 = vadd.f32 %v4515_v60, %v569_v36  ;;  %3067 = vtanh.f32 %v759_v45  ;;  %v666_v59 = vpop.permute.xlu1 %665 }
  0xd3   :  { %v3050_v26 = vpop.eup %3049  ;;  %v229_v24 = vmul.f32 %v4165_v63, %v4384_v51  ;;  %v230_v46 = vmul.f32 %v4168_v0, %v4384_v51  ;;  %v754_v4 = vadd.f32 %v4515_v60, %v572_v37  ;;  %3069 = vtanh.f32 %v760_v19 }
  0xd4   :  { %v3052_v8 = vpop.eup %3051  ;;  %v231_v57 = vmul.f32 %v4171_v1, %v4384_v51  ;;  %v232_v30 = vmul.f32 %v4176_v20, %v4384_v51  ;;  %1048 = vmatprep.subr.mxu0 %v3050_v26  ;;  %v753_v18 = vadd.f32 %v4515_v60, %v571_v34  ;;  %3071 = vtanh.f32 %v761_v22 }
  0xd5   :  { %v3054_v38 = vpop.eup %3053  ;;  %1191 = vmatprep.subr.mxu1 %v3052_v8  ;;  %v457_v36 = vmul.f32 %v4184_v62, %v4476_v49  ;;  %v458_v16 = vmul.f32 %v4187_v14, %v4476_v49  ;;  %v459_v29 = vmul.f32 %v4190_v10, %v4476_v49  ;;  %3073 = vtanh.f32 %v762_v40 }
  0xd6   :  { %v3056_v32 = vpop.eup %3055  ;;  %1049 = vmatpush1.msra.mxu0 %v3054_v38  ;;  %3075 = vtanh.f32 %v751_v42  ;;  %v4644_v60 = vmul.f32 %v6421_v44, %v4569_v28  ;;  %v4648_v55 = vmul.f32 %v6422_v2, %v4569_v28  ;;  %v4652_v11 = vmul.f32 %v6423_v27, %v4569_v28  ;;  %v4686_v8 = vpop.permute.xlu1 %62 }
  0xd7   :  { %v3058_v45 = vpop.eup %3057  ;;  %v233_v19 = vmul.f32 %v4001_v41, %v4384_v51  ;;  %1192 = vmatpush1.msra.mxu1 %v3056_v32  ;;  %1050 = vmatprep.subr.mxu0 %v4478_v52  ;;  %3077 = vtanh.f32 %v754_v4  ;;  %v460_v37 = vmul.f32 %v4196_v21, %v4476_v49  ;;  %v4661_v22 = vmul.f32 %v6424_v25, %v4569_v28 }
  0xd8   :  { %1193 = vmatprep.subr.mxu1 %v4497_v31  ;;  %3079 = vtanh.f32 %v753_v18  ;;  %1051 = vmatpush1.msra.mxu0 %v4466_v39  ;;  %v4669_v51 = vmul.f32 %v3930_v5, %v4607_v33  ;;  %v4673_v49 = vmul.f32 %v3933_v6, %v4607_v33  ;;  %v4677_v52 = vmul.f32 %v3936_v7, %v4607_v33 }
  0xd9   :  { %v3060_v40 = vpop.eup %3059  ;;  %1194 = vmatpush1.msra.mxu1 %v4489_v15  ;;  %1052 = vmatprep.subr.mxu0 %v4539_v9  ;;  %v561_v39 = vadd.f32 %v457_v36, %v229_v24  ;;  %v562_v15 = vadd.f32 %v458_v16, %v230_v46  ;;  %v563_v9 = vadd.f32 %v459_v29, %v231_v57  ;;  %v6438_v24 = vld [vmem:[#allocation58_spill] sm:$0xff]  ;;  %v6439_v46 = vld [vmem:[#allocation16_spill] sm:$0xff]  ;;  %v6324_v38 = vmov 0.0  }
  0xda   :  { %v3062_v34 = vpop.eup %3061  ;;  %1195 = vmatprep.subr.mxu1 %v4555_v3  ;;  %1053 = vmatpush1.msra.mxu0 %v4528_v23  ;;  %v564_v42 = vadd.f32 %v460_v37, %v232_v30  ;;  %v565_v26 = vadd.f32 %v4553_v47, %v233_v19  ;;  %v566_v4 = vadd.f32 %v4559_v48, %v4388_v58  ;;  %v6437_v23 = vld [vmem:[#allocation57_spill] sm:$0xff]  ;;  %v4711_v32 = vpop.permute.xlu1 %660  ;;  %v6441_v37 = vld [vmem:[#allocation31_spill] sm:$0xff] }
  0xdb   :  { %v3064_v31 = vpop.eup %3063  ;;  %1196 = vmatpush1.msra.mxu1 %v4547_v53  ;;  %1054 = vmatprep.subr.mxu0 %v4592_v17  ;;  %v567_v3 = vadd.f32 %v4563_v43, %v6437_v23  ;;  %v568_v53 = vadd.f32 %v6439_v46, %v6438_v24  ;;  %v743_v57 = vadd.f32 %v666_v59, %v561_v39  ;;  %v6446_v23 = vld [vmem:[#allocation30_spill] sm:$0xff]  ;;  %v6448_v46 = vld [vmem:[#allocation21_spill] sm:$0xff] }
  0xdc   :  { %1197 = vmatprep.subr.mxu1 %v4609_v61  ;;  %1055 = vmatpush1.msra.mxu0 %v4587_v13  ;;  %v744_v47 = vadd.f32 %v666_v59, %v562_v15  ;;  %v745_v30 = vadd.f32 %v666_v59, %v563_v9  ;;  %v746_v58 = vadd.f32 %v666_v59, %v564_v42  ;;  %v6443_v15 = vld [vmem:[#allocation32_spill] sm:$0xff]  ;;  %v6444_v9 = vld [vmem:[#allocation59_spill] sm:$0xff] }
  0xdd   :  { %v3066_v17 = vpop.eup %3065  ;;  %1198 = vmatpush1.msra.mxu1 %v4600_v35  ;;  %1056 = vmatprep.subr.mxu0 %v3060_v40  ;;  %v4695_v48 = vadd.f32 %v666_v59, %v565_v26  ;;  %v4697_v61 = vadd.f32 %v666_v59, %v566_v4  ;;  %v4699_v13 = vadd.f32 %v666_v59, %v567_v3  ;;  %3081 = vtanh.f32 %v743_v57  ;;  %v4714_v40 = vpop.permute.xlu0 %57  ;;  %v6445_v26 = vld [vmem:[#allocation29_spill] sm:$0xff] }
  0xde   :  { %1199 = vmatprep.subr.mxu1 %v3064_v31  ;;  %1057 = vmatpush1.msra.mxu0 %v3058_v45  ;;  %v4701_v18 = vadd.f32 %v666_v59, %v568_v53  ;;  %3083 = vtanh.f32 %v744_v47  ;;  %v210_v16 = vmul.f32 %v3930_v5, %v4686_v8  ;;  %v211_v29 = vmul.f32 %v3933_v6, %v4686_v8  ;;  %v6449_v57 = vld [vmem:[#allocation33_spill] sm:$0xff] }
  0xdf   :  { %v3068_v43 = vpop.eup %3067  ;;  %1200 = vmatpush1.msra.mxu1 %v3062_v34  ;;  %1106 = vmatprep.mubr.f32.mxu0 %v6324_v38  ;;  %3085 = vtanh.f32 %v745_v30  ;;  %v212_v59 = vmul.f32 %v3936_v7, %v4686_v8  ;;  %6440 = vst [vmem:[#allocation17_spill] sm:$0xff] %v4711_v32  ;;  %v6442_v34 = vld [vmem:[#allocation28_spill] sm:$0xff]  ;;  %v225_v42 = vmul.f32 %v4001_v41, %v6444_v9 }
  0xe0   :  { %v3070_v35 = vpop.eup %3069  ;;  %1249 = vmatprep.mubr.f32.mxu1 %v6324_v38  ;;  %3087 = vtanh.f32 %v746_v58  ;;  %v4717_v31 = vadd.f32 %v6442_v34, %v210_v16  ;;  %v4723_v4 = vadd.f32 %v6445_v26, %v211_v29  ;;  %v4730_v53 = vmul.f32 %v4184_v62, %v6448_v46  ;;  %v6450_v58 = vld [vmem:[#allocation34_spill] sm:$0xff]  ;;  %v6454_v26 = vld [vmem:[#allocation36_spill] sm:$0xff] }
  0xe1   :  { %v3072_v36 = vpop.eup %3071  ;;  %1058 = vmatprep.subr.mxu0 %v3070_v35  ;;  %3089 = vtanh.f32 %v6441_v37  ;;  %v4726_v3 = vadd.f32 %v6446_v23, %v212_v59  ;;  %v449_v47 = vmul.f32 %v4184_v62, %v4569_v28  ;;  %v4739_v30 = vmul.f32 %v4187_v14, %v6448_v46 }
  0xe2   :  { %v3074_v45 = vpop.eup %3073  ;;  %1059 = vmatpush1.msra.mxu0 %v3068_v43  ;;  %3091 = vtanh.f32 %v6443_v15  ;;  %v222_v43 = vmul.f32 %v4168_v0, %v6444_v9  ;;  %v450_v35 = vmul.f32 %v4187_v14, %v4569_v28  ;;  %v223_v16 = vmul.f32 %v4171_v1, %v6444_v9 }
  0xe3   :  { %v3076_v19 = vpop.eup %3075  ;;  %1201 = vmatprep.subr.mxu1 %v3074_v45  ;;  %1060 = vmatprep.subr.mxu0 %v3066_v17  ;;  %6447 = vst [vmem:[#allocation18_spill] sm:$0xff] %v4726_v3  ;;  %3093 = vtanh.f32 %v6449_v57  ;;  %v221_v17 = vmul.f32 %v4165_v63, %v6444_v9  ;;  %v224_v29 = vmul.f32 %v4176_v20, %v6444_v9  ;;  %v4753_v45 = vpop.permute.xlu1 %298 }
  0xe4   :  { %v3078_v39 = vpop.eup %3077  ;;  %1202 = vmatpush1.msra.mxu1 %v3072_v36  ;;  %1061 = vmatpush1.msra.mxu0 %v3076_v19  ;;  %3095 = vtanh.f32 %v6450_v58  ;;  %v6451_v36 = vld [vmem:[#allocation35_spill] sm:$0xff]  ;;  %v451_v59 = vmul.f32 %v4190_v10, %v4569_v28  ;;  %v452_v19 = vmul.f32 %v4196_v21, %v4569_v28  ;;  %v206_v37 = vmul.f32 %v4168_v0, %v4686_v8  ;;  %v4767_v9 = vpop.permute.xlu0 %52  ;;  %v6457_v28 = vld [vmem:[#allocation62_spill] sm:$0xff] }
  0xe5   :  { %v3080_v24 = vpop.eup %3079  ;;  %1203 = vmatprep.subr.mxu1 %v3078_v39  ;;  %3097 = vtanh.f32 %v6451_v36  ;;  %v4760_v34 = vadd.f32 %v4644_v60, %v225_v42  ;;  %v6452_v39 = vld [vmem:[#allocation60_spill] sm:$0xff]  ;;  %v553_v23 = vadd.f32 %v449_v47, %v221_v17  ;;  %v4775_v58 = vadd.f32 %v4661_v22, %v6457_v28  ;;  %v6459_v42 = vld [vmem:[#allocation26_spill] sm:$0xff]  ;;  %v6460_v36 = vld [vmem:[#allocation37_spill] sm:$0xff] }
  0xe6   :  { %1204 = vmatpush1.msra.mxu1 %v3080_v24  ;;  %v4764_v15 = vadd.f32 %v4648_v55, %v6452_v39  ;;  %3099 = vtanh.f32 %v6454_v26  ;;  %v6455_v24 = vld [vmem:[#allocation61_spill] sm:$0xff]  ;;  %v443_v60 = vmul.f32 %v4190_v10, %v6448_v46  ;;  %v434_v55 = vmul.f32 %v4187_v14, %v6459_v42  ;;  %v6461_v47 = vld [vmem:[#allocation38_spill] sm:$0xff] }
  0xe7   :  { %v4771_v57 = vadd.f32 %v4652_v11, %v6455_v24  ;;  %6458 = vst [vmem:[#allocation8_spill] sm:$0xff] %v4775_v58  ;;  %3101 = vtanh.f32 %v6460_v36  ;;  %v554_v39 = vadd.f32 %v450_v35, %v222_v43  ;;  %v444_v17 = vmul.f32 %v4196_v21, %v6448_v46  ;;  %v6462_v35 = vld [vmem:[#allocation49_spill] sm:$0xff] }
  0xe8   :  { %6453 = vst [vmem:[#allocation19_spill] sm:$0xff] %v4764_v15  ;;  %3103 = vtanh.f32 %v6461_v47  ;;  %v555_v11 = vadd.f32 %v451_v59, %v223_v16  ;;  %v735_v24 = vadd.f32 %v4711_v32, %v553_v23  ;;  %v217_v28 = vmul.f32 %v4001_v41, %v4607_v33  ;;  %v4795_v59 = vpop.permute.xlu1 %655  ;;  %v4804_v36 = vpop.permute.xlu0 %650 }
  0xe9   :  { %6456 = vst [vmem:[#allocation7_spill] sm:$0xff] %v4771_v57  ;;  %v538_v38 = vadd.f32 %v434_v55, %v206_v37  ;;  %v556_v3 = vadd.f32 %v452_v19, %v224_v29  ;;  %v736_v58 = vadd.f32 %v4711_v32, %v554_v39  ;;  %v433_v43 = vmul.f32 %v4184_v62, %v6459_v42 }
  0xea   :  { %v3082_v26 = vpop.eup %3081  ;;  %3105 = vtanh.f32 %v6462_v35  ;;  %v213_v46 = vmul.f32 %v4165_v63, %v4607_v33  ;;  %v737_v16 = vadd.f32 %v4711_v32, %v555_v11  ;;  %v214_v29 = vmul.f32 %v4168_v0, %v4607_v33  ;;  %v6465_v35 = vld [vmem:[#allocation23_spill] sm:$0xff] }
  0xeb   :  { %v3084_v22 = vpop.eup %3083  ;;  %v215_v19 = vmul.f32 %v4171_v1, %v4607_v33  ;;  %v216_v37 = vmul.f32 %v4176_v20, %v4607_v33  ;;  %v738_v55 = vadd.f32 %v4711_v32, %v556_v3  ;;  %v205_v39 = vmul.f32 %v4165_v63, %v4686_v8  ;;  %v6463_v3 = vld [vmem:[#allocation22_spill] sm:$0xff] }
  0xec   :  { %v3086_v57 = vpop.eup %3085  ;;  %1062 = vmatprep.subr.mxu0 %v3084_v22  ;;  %v207_v47 = vmul.f32 %v4171_v1, %v4686_v8  ;;  %v208_v11 = vmul.f32 %v4176_v20, %v4686_v8  ;;  %3107 = vtanh.f32 %v735_v24  ;;  %v720_v33 = vadd.f32 %v4804_v36, %v538_v38  ;;  %v6466_v24 = vld [vmem:[#allocation24_spill] sm:$0xff]  ;;  %v6468_v38 = vld [vmem:[#allocation25_spill] sm:$0xff] }
  0xed   :  { %v3088_v23 = vpop.eup %3087  ;;  %1063 = vmatpush1.msra.mxu0 %v3082_v26  ;;  %3109 = vtanh.f32 %v736_v58  ;;  %v4816_v26 = vadd.f32 %v6463_v3, %v217_v28  ;;  %v4820_v44 = vadd.f32 %v6465_v35, %v4669_v51  ;;  %v545_v32 = vadd.f32 %v4730_v53, %v213_v46  ;;  %v6469_v46 = vld [vmem:[#allocation50_spill] sm:$0xff]  ;;  %v4844_v35 = vpop.permute.xlu1 %294 }
  0xee   :  { %1205 = vmatprep.subr.mxu1 %v3088_v23  ;;  %v4812_v22 = vpop.eup %3089  ;;  %3111 = vtanh.f32 %v737_v16  ;;  %v4827_v23 = vadd.f32 %v6466_v24, %v4673_v49  ;;  %v4831_v58 = vadd.f32 %v6468_v38, %v4677_v52  ;;  %v435_v51 = vmul.f32 %v4190_v10, %v6459_v42 }
  0xef   :  { %6464 = vst [vmem:[#allocation9_spill] sm:$0xff] %v4816_v26  ;;  %1206 = vmatpush1.msra.mxu1 %v3086_v57  ;;  %v4822_v15 = vpop.eup %3091  ;;  %v436_v57 = vmul.f32 %v4196_v21, %v6459_v42  ;;  %3113 = vtanh.f32 %v738_v55  ;;  %v546_v16 = vadd.f32 %v4739_v30, %v214_v29  ;;  %v537_v49 = vadd.f32 %v433_v43, %v205_v39 }
  0xf0   :  { %6467 = vst [vmem:[#allocation42_spill] sm:$0xff] %v4827_v23  ;;  %v4833_v28 = vpop.eup %3093  ;;  %3115 = vtanh.f32 %v6469_v46  ;;  %v547_v3 = vadd.f32 %v443_v60, %v215_v19  ;;  %v727_v52 = vadd.f32 %v4795_v59, %v545_v32  ;;  %v539_v38 = vadd.f32 %v435_v51, %v207_v47 }
  0xf1   :  { %v4840_v53 = vpop.eup %3095  ;;  %v540_v23 = vadd.f32 %v436_v57, %v208_v11  ;;  %v548_v26 = vadd.f32 %v444_v17, %v216_v37  ;;  %v728_v42 = vadd.f32 %v4795_v59, %v546_v16  ;;  %v194_v30 = vmul.f32 %v3930_v5, %v4767_v9 }
  0xf2   :  { %v4846_v24 = vpop.eup %3097  ;;  %3117 = vtanh.f32 %v720_v33  ;;  %v729_v29 = vadd.f32 %v4795_v59, %v547_v3  ;;  %v422_v32 = vmul.f32 %v6422_v2, %v4844_v35  ;;  %v423_v43 = vmul.f32 %v6423_v27, %v4844_v35 }
  0xf3   :  { %v4852_v55 = vpop.eup %3099  ;;  %v730_v60 = vadd.f32 %v4795_v59, %v548_v26  ;;  %v424_v17 = vmul.f32 %v6424_v25, %v4844_v35  ;;  %v195_v37 = vmul.f32 %v3933_v6, %v4767_v9  ;;  %v196_v39 = vmul.f32 %v3936_v7, %v4767_v9 }
  0xf4   :  { %v4861_v19 = vpop.eup %3101  ;;  %v719_v47 = vadd.f32 %v4804_v36, %v537_v49  ;;  %3119 = vtanh.f32 %v727_v52  ;;  %v721_v33 = vadd.f32 %v4804_v36, %v539_v38  ;;  %v722_v26 = vadd.f32 %v4804_v36, %v540_v23 }
  0xf5   :  { %v4868_v11 = vpop.eup %3103  ;;  %3121 = vtanh.f32 %v728_v42  ;;  %v4872_v51 = vadd.f32 %v422_v32, %v194_v30  ;;  %v430_v57 = vmul.f32 %v6422_v2, %v4753_v45  ;;  %v4876_v16 = vadd.f32 %v423_v43, %v195_v37  ;;  %v6474_v37 = vld [vmem:[#allocation51_spill] sm:$0xff] }
  0xf6   :  { %3123 = vtanh.f32 %v729_v29  ;;  %v4878_v46 = vadd.f32 %v424_v17, %v196_v39  ;;  %v431_v49 = vmul.f32 %v6423_v27, %v4753_v45  ;;  %v432_v52 = vmul.f32 %v6424_v25, %v4753_v45 }
  0xf7   :  { %6470 = vst [vmem:[#allocation43_spill] sm:$0xff] %v4872_v51  ;;  %6471 = vst [vmem:[#allocation44_spill] sm:$0xff] %v4876_v16  ;;  %v4880_v3 = vpop.eup %3105  ;;  %3125 = vtanh.f32 %v730_v60  ;;  %v418_v23 = vmul.f32 %v4187_v14, %v4844_v35  ;;  %v202_v2 = vmul.f32 %v3930_v5, %v4714_v40  ;;  %v203_v42 = vmul.f32 %v3933_v6, %v4714_v40 }
  0xf8   :  { %6472 = vst [vmem:[#allocation12_spill] sm:$0xff] %v4878_v46  ;;  %3127 = vtanh.f32 %v719_v47  ;;  %v204_v30 = vmul.f32 %v3936_v7, %v4714_v40  ;;  %v190_v27 = vmul.f32 %v4168_v0, %v4767_v9  ;;  %v425_v29 = vmul.f32 %v4184_v62, %v4753_v45 }
  0xf9   :  { %v3108_v38 = vpop.eup %3107  ;;  %3129 = vtanh.f32 %v722_v26  ;;  %v426_v5 = vmul.f32 %v4187_v14, %v4753_v45  ;;  %v4900_v43 = vadd.f32 %v430_v57, %v202_v2  ;;  %v4902_v6 = vadd.f32 %v431_v49, %v203_v42  ;;  %v6475_v26 = vld [vmem:[#allocation52_spill] sm:$0xff] }
  0xfa   :  { %v3110_v25 = vpop.eup %3109  ;;  %3131 = vtanh.f32 %v721_v33  ;;  %v522_v32 = vadd.f32 %v418_v23, %v190_v27  ;;  %v4904_v7 = vadd.f32 %v432_v52, %v204_v30  ;;  %v197_v39 = vmul.f32 %v4165_v63, %v4714_v40  ;;  %v4922_v23 = vpop.permute.xlu1 %645 }
  0xfb   :  { %v3112_v60 = vpop.eup %3111  ;;  %1064 = vmatprep.subr.mxu0 %v3110_v25  ;;  %6473 = vst [vmem:[#allocation46_spill] sm:$0xff] %v4902_v6  ;;  %3133 = vtanh.f32 %v6474_v37  ;;  %v427_v47 = vmul.f32 %v4190_v10, %v4753_v45  ;;  %v417_v14 = vmul.f32 %v4184_v62, %v4844_v35  ;;  %v198_v57 = vmul.f32 %v4168_v0, %v4714_v40  ;;  %v6477_v6 = vld [vmem:[#allocation54_spill] sm:$0xff] }
  0xfc   :  { %v3114_v17 = vpop.eup %3113  ;;  %1065 = vmatpush1.msra.mxu0 %v3108_v38  ;;  %3135 = vtanh.f32 %v6475_v26  ;;  %v428_v49 = vmul.f32 %v4196_v21, %v4753_v45  ;;  %v420_v52 = vmul.f32 %v4196_v21, %v4844_v35  ;;  %v199_v62 = vmul.f32 %v4171_v1, %v4714_v40  ;;  %v4928_v38 = vpop.permute.xlu0 %640 }
  0xfd   :  { %v4913_v33 = vpop.eup %3115  ;;  %1207 = vmatprep.subr.mxu1 %v3114_v17  ;;  %v189_v2 = vmul.f32 %v4165_v63, %v4767_v9  ;;  %v419_v0 = vmul.f32 %v4190_v10, %v4844_v35  ;;  %v529_v42 = vadd.f32 %v425_v29, %v197_v39  ;;  %v200_v21 = vmul.f32 %v4176_v20, %v4714_v40 }
  0xfe   :  { %1208 = vmatpush1.msra.mxu1 %v3112_v60  ;;  %v192_v27 = vmul.f32 %v4176_v20, %v4767_v9  ;;  %v704_v25 = vadd.f32 %v4928_v38, %v522_v32  ;;  %v530_v17 = vadd.f32 %v426_v5, %v198_v57  ;;  %v191_v63 = vmul.f32 %v4171_v1, %v4767_v9  ;;  %v6476_v60 = vld [vmem:[#allocation53_spill] sm:$0xff] }
  0xff   :  { %v3118_v30 = vpop.eup %3117  ;;  %v521_v37 = vadd.f32 %v417_v14, %v189_v2  ;;  %v531_v26 = vadd.f32 %v427_v47, %v199_v62  ;;  %v711_v16 = vadd.f32 %v4922_v23, %v529_v42  ;;  %3137 = vtanh.f32 %v6476_v60  ;;  %v6479_v2 = vld [vmem:[#allocation56_spill] sm:$0xff] }
 0x100   :  { %v524_v29 = vadd.f32 %v420_v52, %v192_v27  ;;  %v532_v39 = vadd.f32 %v428_v49, %v200_v21  ;;  %v712_v46 = vadd.f32 %v4922_v23, %v530_v17  ;;  %3139 = vtanh.f32 %v6477_v6  ;;  %v6482_v27 = vld [vmem:[#allocation65_spill] sm:$0xff]  ;;  %v6483_v17 = vld [vmem:[#allocation66_spill] sm:$0xff]  ;;  %v6485_v60 = vld [vmem:[#allocation40_spill] sm:$0xff] }
 0x101   :  { %v3120_v10 = vpop.eup %3119  ;;  %v523_v20 = vadd.f32 %v419_v0, %v191_v63  ;;  %v713_v5 = vadd.f32 %v4922_v23, %v531_v26  ;;  %3141 = vtanh.f32 %v704_v25  ;;  %v703_v14 = vadd.f32 %v4928_v38, %v521_v37  ;;  %v6480_v0 = vld [vmem:[#allocation63_spill] sm:$0xff] }
 0x102   :  { %v3122_v51 = vpop.eup %3121  ;;  %v714_v1 = vadd.f32 %v4922_v23, %v532_v39  ;;  %3143 = vtanh.f32 %v711_v16  ;;  %v706_v49 = vadd.f32 %v4928_v38, %v524_v29  ;;  %v6484_v37 = vld [vmem:[#allocation39_spill] sm:$0xff]  ;;  %v209_v26 = vmul.f32 %v4001_v41, %v4686_v8  ;;  %v6486_v39 = vld [vmem:[#allocation41_spill] sm:$0xff] }
 0x103   :  { %v3124_v32 = vpop.eup %3123  ;;  %1066 = vmatprep.subr.mxu0 %v3122_v51  ;;  %3145 = vtanh.f32 %v712_v46  ;;  %v705_v52 = vadd.f32 %v4928_v38, %v523_v20  ;;  %v6478_v46 = vld [vmem:[#allocation55_spill] sm:$0xff] }
 0x104   :  { %v3126_v47 = vpop.eup %3125  ;;  %1067 = vmatpush1.msra.mxu0 %v3120_v10  ;;  %3147 = vtanh.f32 %v713_v5  ;;  %v6487_v5 = vld [vmem:[#allocation20_spill] sm:$0xff]  ;;  %v6488_v8 = vld [vmem:[#allocation27_spill] sm:$0xff] }
 0x105   :  { %v3128_v57 = vpop.eup %3127  ;;  %1209 = vmatprep.subr.mxu1 %v3126_v47  ;;  %1068 = vmatprep.subr.mxu0 %v3118_v30  ;;  %3149 = vtanh.f32 %v714_v1  ;;  %v6481_v30 = vld [vmem:[#allocation64_spill] sm:$0xff]  ;;  %v541_v47 = vadd.f32 %v6488_v8, %v209_v26 }
 0x106   :  { %v3130_v6 = vpop.eup %3129  ;;  %1210 = vmatpush1.msra.mxu1 %v3124_v32  ;;  %1069 = vmatpush1.msra.mxu0 %v3128_v57  ;;  %3151 = vtanh.f32 %v703_v14  ;;  %v4971_v32 = vld [vmem:[%s6295_s3] sm:$0xff] }
 0x107   :  { %v3132_v62 = vpop.eup %3131  ;;  %1211 = vmatprep.subr.mxu1 %v3130_v6  ;;  %3153 = vtanh.f32 %v706_v49 }
 0x108   :  { %1212 = vmatpush1.msra.mxu1 %v3132_v62  ;;  %v4948_v51 = vpop.eup %3133  ;;  %3155 = vtanh.f32 %v705_v52 }
 0x109   :  { %v4950_v16 = vpop.eup %3135  ;;  %3157 = vtanh.f32 %v6478_v46 }
 0x10a   :  { %3159 = vtanh.f32 %v6479_v2  ;;  %v732_v2 = vadd.f32 %v4795_v59, %v4820_v44 }
 0x10b   :  { %3161 = vtanh.f32 %v6480_v0 }
 0x10c   :  { %v4955_v42 = vpop.eup %3137  ;;  %3163 = vtanh.f32 %v6481_v30 }
 0x10d   :  { %v4958_v21 = vpop.eup %3139  ;;  %3165 = vtanh.f32 %v6482_v27 }
 0x10e   :  { %v3142_v25 = vpop.eup %3141  ;;  %3167 = vtanh.f32 %v6483_v17  ;;  %v6497_v17 = vld [vmem:[#allocation18_spill] sm:$0xff] }
 0x10f   :  { %v3144_v63 = vpop.eup %3143  ;;  %3169 = vtanh.f32 %v6484_v37 }
 0x110   :  { %v3146_v10 = vpop.eup %3145  ;;  %3171 = vtanh.f32 %v6485_v60 }
 0x111   :  { %v3148_v29 = vpop.eup %3147  ;;  %3173 = vtanh.f32 %v6486_v39  ;;  %1070 = vmatprep.subr.mxu0 %v3146_v10  ;;  %v5073_v10 = vld [vmem:[%s6295_s3 + $0x18] sm:$0xff]  ;;  %v6498_v39 = vld [vmem:[#allocation46_spill] sm:$0xff] }
 0x112   :  { %v3150_v20 = vpop.eup %3149  ;;  %3175 = vtanh.f32 %v6487_v5  ;;  %1071 = vmatpush1.msra.mxu0 %v3144_v63  ;;  %v726_v63 = vadd.f32 %v4804_v36, %v6497_v17  ;;  %v6499_v5 = vld [vmem:[#allocation43_spill] sm:$0xff] }
 0x113   :  { %v3152_v1 = vpop.eup %3151  ;;  %3177 = vtanh.f32 %v4613_v12  ;;  %1213 = vmatprep.subr.mxu1 %v3150_v20  ;;  %1072 = vmatprep.subr.mxu0 %v3142_v25 }
 0x114   :  { %v3154_v14 = vpop.eup %3153  ;;  %3179 = vtanh.f32 %v4617_v54  ;;  %1214 = vmatpush1.msra.mxu1 %v3148_v29  ;;  %1073 = vmatpush1.msra.mxu0 %v3152_v1  ;;  %v723_v54 = vadd.f32 %v4804_v36, %v541_v47  ;;  %v708_v1 = vadd.f32 %v4928_v38, %v6499_v5  ;;  %v6500_v47 = vld [vmem:[#allocation12_spill] sm:$0xff] }
 0x115   :  { %v3156_v57 = vpop.eup %3155  ;;  %3181 = vtanh.f32 %v4620_v50  ;;  %1215 = vmatprep.subr.mxu1 %v3154_v14  ;;  %2895 = vmatmul.mubr.msk.f32.vlgmr.msra.gmra.mxu0 %vm1002_vm0, %v4971_v32  ;;  %v710_v14 = vadd.f32 %v4928_v38, %v6500_v47 }
 0x116   :  { %v4979_v49 = vpop.eup %3157  ;;  %3183 = vtanh.f32 %v4623_v56  ;;  %1216 = vmatpush1.msra.mxu1 %v3156_v57  ;;  %1334 = vmatprep.subr.mxu0 %v4852_v55  ;;  %v724_v56 = vadd.f32 %v4804_v36, %v4717_v31  ;;  %v6501_v57 = vld [vmem:[#allocation44_spill] sm:$0xff] }
 0x117   :  { %v3160_v12 = vpop.eup %3159  ;;  %3185 = vtanh.f32 %v4695_v48  ;;  %2908 = vmatmul.mubr.msk.f32.vlgmr.msra.gmra.mxu1 %vm1002_vm0, %v4971_v32  ;;  %1477 = vmatprep.subr.mxu1 %v4868_v11  ;;  %v725_v48 = vadd.f32 %v4804_v36, %v4723_v4  ;;  %v6490_v11 = vmov 0.0   ;;  %v6491_v4 = vld [vmem:[#allocation19_spill] sm:$0xff]  ;;  %v718_v36 = vadd.f32 %v4922_v23, %v4904_v7 }
 0x118   :  { %v4988_v50 = vpop.eup %3161  ;;  %3187 = vtanh.f32 %v4697_v61  ;;  %1335 = vmatpush1.msra.mxu0 %v4846_v24  ;;  %1478 = vmatpush1.msra.mxu1 %v4861_v19  ;;  %v5003_v61 = vld [vmem:[%s6295_s3 + $0x8] sm:$0xff]  ;;  %v717_v7 = vadd.f32 %v4922_v23, %v6498_v39 }
 0x119   :  { %v3164_v55 = vpop.eup %3163  ;;  %3189 = vtanh.f32 %v4699_v13  ;;  %1336 = vmatprep.subr.mxu0 %v4822_v15  ;;  %1479 = vmatprep.subr.mxu1 %v4840_v53  ;;  %v6489_v24 = vld [vmem:[#allocation17_spill] sm:$0xff]  ;;  %v6492_v53 = vld [vmem:[#allocation11_spill] sm:$0xff] }
 0x11a   :  { %v3166_v31 = vpop.eup %3165  ;;  %3191 = vtanh.f32 %v4701_v18  ;;  %v739_v19 = vadd.f32 %v6489_v24, %v4760_v34  ;;  %1112 = vmatprep.mubr.f32.mxu0 %v6490_v11  ;;  %1255 = vmatprep.mubr.f32.mxu1 %v6490_v11  ;;  %v740_v15 = vadd.f32 %v6489_v24, %v6491_v4  ;;  %v421_v6 = vmul.f32 %v6492_v53, %v4844_v35  ;;  %v6493_v34 = vld [vmem:[#allocation7_spill] sm:$0xff] }
 0x11b   :  { %v3168_v13 = vpop.eup %3167  ;;  %3193 = vtanh.f32 %v723_v54  ;;  %1337 = vmatpush1.msra.mxu0 %v4812_v22  ;;  %1480 = vmatpush1.msra.mxu1 %v4833_v28  ;;  %v741_v52 = vadd.f32 %v6489_v24, %v6493_v34  ;;  %v193_v35 = vmul.f32 %v4001_v41, %v4767_v9  ;;  %v6494_v22 = vld [vmem:[#allocation8_spill] sm:$0xff]  ;;  %v734_v9 = vadd.f32 %v4795_v59, %v4831_v58 }
 0x11c   :  { %v5016_v18 = vpop.eup %3169  ;;  %3195 = vtanh.f32 %v724_v56  ;;  %2896 = vmatmul.mubr.msk.f32.gmra.mxu0 %vm1002_vm0, %v5003_v61  ;;  %2909 = vmatmul.mubr.msk.f32.gmra.mxu1 %vm1002_vm0, %v5003_v61  ;;  %v742_v28 = vadd.f32 %v6489_v24, %v6494_v22  ;;  %v429_v44 = vmul.f32 %v6492_v53, %v4753_v45  ;;  %v201_v45 = vmul.f32 %v4001_v41, %v4714_v40  ;;  %v5096_v54 = vld [vmem:[%s6295_s3 + $0x20] sm:$0xff]  ;;  %v5107_v24 = vld [vmem:[%s6295_s3 + $0x28] sm:$0xff]  ;;  %v5129_v22 = vld [vmem:[%s6295_s3 + $0x38] sm:$0xff] }
 0x11d   :  { %v5024_v62 = vpop.eup %3171  ;;  %3197 = vtanh.f32 %v725_v48  ;;  %1338 = vmatprep.subr.mxu0 %v4913_v33  ;;  %1481 = vmatprep.subr.mxu1 %v4950_v16  ;;  %v525_v30 = vadd.f32 %v421_v6, %v193_v35  ;;  %v5044_v33 = vld [vmem:[%s6295_s3 + $0x10] sm:$0xff]  ;;  %v716_v41 = vadd.f32 %v4922_v23, %v4900_v43 }
 0x11e   :  { %v5032_v46 = vpop.eup %3173  ;;  %3199 = vtanh.f32 %v739_v19  ;;  %1339 = vmatpush1.msra.mxu0 %v4880_v3  ;;  %1482 = vmatpush1.msra.mxu1 %v4948_v51  ;;  %v6495_v3 = vld [vmem:[#allocation9_spill] sm:$0xff]  ;;  %v533_v26 = vadd.f32 %v429_v44, %v201_v45 }
 0x11f   :  { %v3176_v0 = vpop.eup %3175  ;;  %3201 = vtanh.f32 %v740_v15  ;;  %1340 = vmatprep.subr.mxu0 %v4958_v21  ;;  %1483 = vmatprep.subr.mxu1 %v3160_v12  ;;  %v731_v51 = vadd.f32 %v4795_v59, %v6495_v3  ;;  %v6496_v21 = vld [vmem:[#allocation42_spill] sm:$0xff] }
 0x120   :  { %v3178_v16 = vpop.eup %3177  ;;  %3203 = vtanh.f32 %v741_v52  ;;  %1118 = vmatprep.mubr.f32.mxu0 %v6490_v11  ;;  %1261 = vmatprep.mubr.f32.mxu1 %v6490_v11  ;;  %v733_v27 = vadd.f32 %v4795_v59, %v6496_v21  ;;  %v707_v59 = vadd.f32 %v4928_v38, %v525_v30  ;;  %v715_v29 = vadd.f32 %v4922_v23, %v533_v26 }
 0x121   :  { %v3180_v58 = vpop.eup %3179  ;;  %3205 = vtanh.f32 %v742_v28  ;;  %1341 = vmatpush1.msra.mxu0 %v4955_v42  ;;  %1484 = vmatpush1.msra.mxu1 %v4979_v49  ;;  %v709_v49 = vadd.f32 %v4928_v38, %v6501_v57  ;;  %v919_v28 = vld [vmem:[%s6295_s3 + $0x40] sm:$0xff] }
 0x122   :  { %v3182_v25 = vpop.eup %3181  ;;  %3207 = vtanh.f32 %v732_v2  ;;  %2897 = vmatmul.mubr.msk.f32.gmra.mxu0 %vm1002_vm0, %v5044_v33  ;;  %2910 = vmatmul.mubr.msk.f32.gmra.mxu1 %vm1002_vm0, %v5044_v33  ;;  %v921_v2 = vld [vmem:[%s6295_s3 + $0x50] sm:$0xff] }
 0x123   :  { %v3184_v37 = vpop.eup %3183  ;;  %3209 = vtanh.f32 %v734_v9  ;;  %1342 = vmatprep.subr.mxu0 %v3164_v55  ;;  %1485 = vmatprep.subr.mxu1 %v3168_v13  ;;  %v923_v9 = vld [vmem:[%s6295_s3 + $0x60] sm:$0xff] }
 0x124   :  { %v3186_v42 = vpop.eup %3185  ;;  %3211 = vtanh.f32 %v731_v51  ;;  %1343 = vmatpush1.msra.mxu0 %v4988_v50  ;;  %1486 = vmatpush1.msra.mxu1 %v3166_v31 }
 0x125   :  { %v3188_v40 = vpop.eup %3187  ;;  %3213 = vtanh.f32 %v733_v27  ;;  %1344 = vmatprep.subr.mxu0 %v3180_v58  ;;  %1487 = vmatprep.subr.mxu1 %v3184_v37  ;;  %v5252_v58 = vpop.permute.xlu0 %994 }
 0x126   :  { %v3190_v60 = vpop.eup %3189  ;;  %3215 = vtanh.f32 %v726_v63  ;;  %1124 = vmatprep.mubr.f32.mxu0 %v6490_v11  ;;  %1267 = vmatprep.mubr.f32.mxu1 %v6490_v11  ;;  %6504 = vst [vmem:[#allocation14_spill] sm:$0xff] %v5252_v58 }
 0x127   :  { %v3192_v43 = vpop.eup %3191  ;;  %3217 = vtanh.f32 %v707_v59  ;;  %1345 = vmatpush1.msra.mxu0 %v3178_v16  ;;  %1488 = vmatpush1.msra.mxu1 %v3182_v25 }
 0x128   :  { %v3194_v20 = vpop.eup %3193  ;;  %3219 = vtanh.f32 %v716_v41  ;;  %2898 = vmatmul.mubr.msk.f32.gmra.mxu0 %vm1002_vm0, %v5073_v10  ;;  %2911 = vmatmul.mubr.msk.f32.gmra.mxu1 %vm1002_vm0, %v5073_v10 }
 0x129   :  { %v3196_v8 = vpop.eup %3195  ;;  %3221 = vtanh.f32 %v718_v36  ;;  %1346 = vmatprep.subr.mxu0 %v5024_v62  ;;  %1489 = vmatprep.subr.mxu1 %v3176_v0  ;;  %v922_v0 = vld [vmem:[%s6295_s3 + $0x58] sm:$0xff]  ;;  %v5260_v63 = vpop.permute.xlu0 %984 }
 0x12a   :  { %v3198_v23 = vpop.eup %3197  ;;  %3223 = vtanh.f32 %v715_v29  ;;  %1347 = vmatpush1.msra.mxu0 %v5016_v18  ;;  %1490 = vmatpush1.msra.mxu1 %v5032_v46  ;;  %v5118_v18 = vld [vmem:[%s6295_s3 + $0x30] sm:$0xff]  ;;  %v920_v46 = vld [vmem:[%s6295_s3 + $0x48] sm:$0xff] }
 0x12b   :  { %v3200_v12 = vpop.eup %3199  ;;  %3225 = vtanh.f32 %v717_v7  ;;  %1348 = vmatprep.subr.mxu0 %v3188_v40  ;;  %1491 = vmatprep.subr.mxu1 %v3192_v43 }
 0x12c   :  { %v3202_v50 = vpop.eup %3201  ;;  %3227 = vtanh.f32 %v708_v1  ;;  %1130 = vmatprep.mubr.f32.mxu0 %v6490_v11  ;;  %1273 = vmatprep.mubr.f32.mxu1 %v6490_v11 }
 0x12d   :  { %v3204_v38 = vpop.eup %3203  ;;  %3229 = vtanh.f32 %v710_v14  ;;  %1349 = vmatpush1.msra.mxu0 %v3186_v42  ;;  %1492 = vmatpush1.msra.mxu1 %v3190_v60  ;;  %v5268_v40 = vpop.permute.xlu0 %974 }
 0x12e   :  { %v3206_v56 = vpop.eup %3205  ;;  %3231 = vtanh.f32 %v709_v49  ;;  %2899 = vmatmul.mubr.msk.f32.gmra.mxu0 %vm1002_vm0, %v5096_v54  ;;  %2912 = vmatmul.mubr.msk.f32.gmra.mxu1 %vm1002_vm0, %v5096_v54 }
 0x12f   :  { %v3208_v55 = vpop.eup %3207  ;;  %1350 = vmatprep.subr.mxu0 %v3202_v50  ;;  %1493 = vmatprep.subr.mxu1 %v3206_v56 }
 0x130   :  { %v3210_v48 = vpop.eup %3209  ;;  %1351 = vmatpush1.msra.mxu0 %v3200_v12  ;;  %1494 = vmatpush1.msra.mxu1 %v3204_v38 }
 0x131   :  { %v3212_v31 = vpop.eup %3211  ;;  %1352 = vmatprep.subr.mxu0 %v3208_v55  ;;  %1495 = vmatprep.subr.mxu1 %v3210_v48  ;;  %v5276_v39 = vpop.permute.xlu0 %964 }
 0x132   :  { %v3214_v19 = vpop.eup %3213  ;;  %1136 = vmatprep.mubr.f32.mxu0 %v6490_v11  ;;  %1279 = vmatprep.mubr.f32.mxu1 %v6490_v11 }
 0x133   :  { %v3216_v13 = vpop.eup %3215  ;;  %1353 = vmatpush1.msra.mxu0 %v3212_v31  ;;  %1496 = vmatpush1.msra.mxu1 %v3214_v19 }
 0x134   :  { %v3218_v4 = vpop.eup %3217  ;;  %2900 = vmatmul.mubr.msk.f32.gmra.mxu0 %vm1002_vm0, %v5107_v24  ;;  %2913 = vmatmul.mubr.msk.f32.gmra.mxu1 %vm1002_vm0, %v5107_v24 }
 0x135   :  { %v3220_v15 = vpop.eup %3219  ;;  %1354 = vmatprep.subr.mxu0 %v3196_v8  ;;  %1497 = vmatprep.subr.mxu1 %v3216_v13  ;;  %v5284_v47 = vpop.permute.xlu0 %954 }
 0x136   :  { %v3222_v53 = vpop.eup %3221  ;;  %1355 = vmatpush1.msra.mxu0 %v3194_v20  ;;  %1498 = vmatpush1.msra.mxu1 %v3198_v23 }
 0x137   :  { %v3224_v6 = vpop.eup %3223  ;;  %1356 = vmatprep.subr.mxu0 %v3220_v15  ;;  %1499 = vmatprep.subr.mxu1 %v3222_v53 }
 0x138   :  { %v3226_v34 = vpop.eup %3225  ;;  %1142 = vmatprep.mubr.f32.mxu0 %v6490_v11  ;;  %1285 = vmatprep.mubr.f32.mxu1 %v6490_v11 }
 0x139   :  { %v3228_v52 = vpop.eup %3227  ;;  %1357 = vmatpush1.msra.mxu0 %v3224_v6  ;;  %1500 = vmatpush1.msra.mxu1 %v3226_v34  ;;  %v5293_v50 = vpop.permute.xlu0 %944 }
 0x13a   :  { %v3230_v62 = vpop.eup %3229  ;;  %2901 = vmatmul.mubr.msk.f32.gmra.mxu0 %vm1002_vm0, %v5118_v18  ;;  %2914 = vmatmul.mubr.msk.f32.gmra.mxu1 %vm1002_vm0, %v5118_v18 }
 0x13b   :  { %v3232_v35 = vpop.eup %3231  ;;  %1358 = vmatprep.subr.mxu0 %v3228_v52  ;;  %1501 = vmatprep.subr.mxu1 %v3230_v62 }
 0x13c   :  { %1359 = vmatpush1.msra.mxu0 %v3218_v4  ;;  %1502 = vmatpush1.msra.mxu1 %v3232_v35 }
 0x13d   :  { %1148 = vmatprep.mubr.f32.mxu0 %v6490_v11  ;;  %1291 = vmatprep.mubr.f32.mxu1 %v6490_v11 }
 0x13e   :  { %2902 = vmatmul.mubr.msk.f32.gmra.mxu0 %vm1002_vm0, %v5129_v22  ;;  %2915 = vmatmul.mubr.msk.f32.gmra.mxu1 %vm1002_vm0, %v5129_v22 }
 0x13f   :  { %1154 = vmatprep.mubr.f32.mxu0 %v6490_v11  ;;  %1297 = vmatprep.mubr.f32.mxu1 %v6490_v11 }
 0x142   :  { %2903 = vmatmul.mubr.msk.f32.gmra.mxu0 %vm1002_vm0, %v919_v28  ;;  %2916 = vmatmul.mubr.msk.f32.gmra.mxu1 %vm1002_vm0, %v919_v28 }
 0x143   :  { %1160 = vmatprep.mubr.f32.mxu0 %v6490_v11  ;;  %1303 = vmatprep.mubr.f32.mxu1 %v6490_v11 }
 0x146   :  { %2904 = vmatmul.mubr.msk.f32.gmra.mxu0 %vm1002_vm0, %v920_v46  ;;  %2917 = vmatmul.mubr.msk.f32.gmra.mxu1 %vm1002_vm0, %v920_v46 }
 0x147   :  { %1166 = vmatprep.mubr.f32.mxu0 %v6490_v11  ;;  %1309 = vmatprep.mubr.f32.mxu1 %v6490_v11 }
 0x14a   :  { %2905 = vmatmul.mubr.msk.f32.gmra.mxu0 %vm1002_vm0, %v921_v2  ;;  %2918 = vmatmul.mubr.msk.f32.gmra.mxu1 %vm1002_vm0, %v921_v2 }
 0x14b   :  { %1172 = vmatprep.mubr.f32.mxu0 %v6490_v11  ;;  %1315 = vmatprep.mubr.f32.mxu1 %v6490_v11 }
 0x14e   :  { %2906 = vmatmul.mubr.msk.f32.gmra.mxu0 %vm1002_vm0, %v922_v0  ;;  %2919 = vmatmul.mubr.msk.f32.gmra.mxu1 %vm1002_vm0, %v922_v0 }
 0x14f   :  { %1178 = vmatprep.mubr.f32.mxu0 %v6490_v11  ;;  %1321 = vmatprep.mubr.f32.mxu1 %v6490_v11 }
 0x152   :  { %2907 = vmatmul.mubr.msk.f32.gmra.mxu0 %vm1002_vm0, %v923_v9  ;;  %2920 = vmatmul.mubr.msk.f32.gmra.mxu1 %vm1002_vm0, %v923_v9 }
 0x153   :  { %1392 = vmatprep.mubr.f32.mxu0 %v6490_v11  ;;  %1535 = vmatprep.mubr.f32.mxu1 %v6490_v11 }
 0x156   :  { %2921 = vmatmul.mubr.msk.f32.vlgmr.msra.gmra.mxu0 %vm1002_vm0, %v4971_v32  ;;  %2934 = vmatmul.mubr.msk.f32.vlgmr.msra.gmra.mxu1 %vm1002_vm0, %v4971_v32  ;;  %v5242_v32 = vpop.permute.xlu1 %999 }
 0x157   :  { %1398 = vmatprep.mubr.f32.mxu0 %v6490_v11  ;;  %1541 = vmatprep.mubr.f32.mxu1 %v6490_v11  ;;  %6502 = vst [vmem:[#allocation13_spill] sm:$0xff] %v5242_v32 }
 0x15a   :  { %2922 = vmatmul.mubr.msk.f32.gmra.mxu0 %vm1002_vm0, %v5003_v61  ;;  %2935 = vmatmul.mubr.msk.f32.gmra.mxu1 %vm1002_vm0, %v5003_v61  ;;  %v5248_v44 = vpop.permute.xlu1 %989 }
 0x15b   :  { %1404 = vmatprep.mubr.f32.mxu0 %v6490_v11  ;;  %1547 = vmatprep.mubr.f32.mxu1 %v6490_v11  ;;  %6503 = vst [vmem:[#allocation47_spill] sm:$0xff] %v5248_v44 }
 0x15e   :  { %2923 = vmatmul.mubr.msk.f32.gmra.mxu0 %vm1002_vm0, %v5044_v33  ;;  %2936 = vmatmul.mubr.msk.f32.gmra.mxu1 %vm1002_vm0, %v5044_v33  ;;  %v5256_v25 = vpop.permute.xlu1 %979 }
 0x15f   :  { %1410 = vmatprep.mubr.f32.mxu0 %v6490_v11  ;;  %1553 = vmatprep.mubr.f32.mxu1 %v6490_v11 }
 0x162   :  { %2924 = vmatmul.mubr.msk.f32.gmra.mxu0 %vm1002_vm0, %v5073_v10  ;;  %2937 = vmatmul.mubr.msk.f32.gmra.mxu1 %vm1002_vm0, %v5073_v10  ;;  %v5264_v42 = vpop.permute.xlu1 %969 }
 0x163   :  { %1416 = vmatprep.mubr.f32.mxu0 %v6490_v11  ;;  %1559 = vmatprep.mubr.f32.mxu1 %v6490_v11 }
 0x166   :  { %2925 = vmatmul.mubr.msk.f32.gmra.mxu0 %vm1002_vm0, %v5096_v54  ;;  %2938 = vmatmul.mubr.msk.f32.gmra.mxu1 %vm1002_vm0, %v5096_v54  ;;  %v5272_v60 = vpop.permute.xlu1 %959 }
 0x167   :  { %1422 = vmatprep.mubr.f32.mxu0 %v6490_v11  ;;  %1565 = vmatprep.mubr.f32.mxu1 %v6490_v11 }
 0x16a   :  { %2926 = vmatmul.mubr.msk.f32.gmra.mxu0 %vm1002_vm0, %v5107_v24  ;;  %2939 = vmatmul.mubr.msk.f32.gmra.mxu1 %vm1002_vm0, %v5107_v24  ;;  %v5280_v5 = vpop.permute.xlu1 %949 }
 0x16b   :  { %1428 = vmatprep.mubr.f32.mxu0 %v6490_v11  ;;  %1571 = vmatprep.mubr.f32.mxu1 %v6490_v11 }
 0x16e   :  { %2927 = vmatmul.mubr.msk.f32.gmra.mxu0 %vm1002_vm0, %v5118_v18  ;;  %2940 = vmatmul.mubr.msk.f32.gmra.mxu1 %vm1002_vm0, %v5118_v18  ;;  %v5288_v57 = vpop.permute.xlu1 %939 }
 0x16f   :  { %1434 = vmatprep.mubr.f32.mxu0 %v6490_v11  ;;  %1577 = vmatprep.mubr.f32.mxu1 %v6490_v11 }
 0x172   :  { %2928 = vmatmul.mubr.msk.f32.gmra.mxu0 %vm1002_vm0, %v5129_v22  ;;  %2941 = vmatmul.mubr.msk.f32.gmra.mxu1 %vm1002_vm0, %v5129_v22 }
 0x173   :  { %1440 = vmatprep.mubr.f32.mxu0 %v6490_v11  ;;  %1583 = vmatprep.mubr.f32.mxu1 %v6490_v11 }
 0x176   :  { %2929 = vmatmul.mubr.msk.f32.gmra.mxu0 %vm1002_vm0, %v919_v28  ;;  %2942 = vmatmul.mubr.msk.f32.gmra.mxu1 %vm1002_vm0, %v919_v28 }
 0x177   :  { %1446 = vmatprep.mubr.f32.mxu0 %v6490_v11  ;;  %1589 = vmatprep.mubr.f32.mxu1 %v6490_v11 }
 0x17a   :  { %2930 = vmatmul.mubr.msk.f32.gmra.mxu0 %vm1002_vm0, %v920_v46  ;;  %2943 = vmatmul.mubr.msk.f32.gmra.mxu1 %vm1002_vm0, %v920_v46 }
 0x17b   :  { %1452 = vmatprep.mubr.f32.mxu0 %v6490_v11  ;;  %1595 = vmatprep.mubr.f32.mxu1 %v6490_v11 }
 0x17e   :  { %2931 = vmatmul.mubr.msk.f32.gmra.mxu0 %vm1002_vm0, %v921_v2  ;;  %2944 = vmatmul.mubr.msk.f32.gmra.mxu1 %vm1002_vm0, %v921_v2 }
 0x17f   :  { %1458 = vmatprep.mubr.f32.mxu0 %v6490_v11  ;;  %1601 = vmatprep.mubr.f32.mxu1 %v6490_v11 }
 0x182   :  { %2932 = vmatmul.mubr.msk.f32.gmra.mxu0 %vm1002_vm0, %v922_v0  ;;  %2945 = vmatmul.mubr.msk.f32.gmra.mxu1 %vm1002_vm0, %v922_v0 }
 0x183   :  { %1464 = vmatprep.mubr.f32.mxu0 %v6490_v11  ;;  %1607 = vmatprep.mubr.f32.mxu1 %v6490_v11 }
 0x186   :  { %2933 = vmatmul.mubr.msk.f32.gmra.mxu0 %vm1002_vm0, %v923_v9  ;;  %2946 = vmatmul.mubr.msk.f32.gmra.mxu1 %vm1002_vm0, %v923_v9 }
 0x187   :  { %1912 = vmatprep.mubr.f32.mxu0 %v6490_v11  ;;  %2055 = vmatprep.mubr.f32.mxu1 %v6490_v11 }
 0x1d5   :  { %v1108_v61 = vpop.f32.mrf.mxu0 }
 0x1d6   :  { %v1109_v49 = vadd.f32 %v1108_v61, %v5288_v57 }
 0x1d7   :  { %v5244_v30 = vpop.f32.mrf.mxu1  ;;  %v1110_v33 = vpop.f32.mrf.mxu0 }
 0x1d8   :  { %v1111_v38 = vadd.f32 %v1110_v33, %v5288_v57  ;;  %3233 = vtanh.f32 %v1109_v49 }
 0x1d9   :  { %v5246_v16 = vpop.f32.mrf.mxu1 }
 0x1da   :  { %3235 = vtanh.f32 %v1111_v38 }
 0x1dc   :  { %v1114_v3 = vpop.f32.mrf.mxu0  ;;  %v5250_v51 = vpop.f32.mrf.mxu1 }
 0x1dd   :  { %v1115_v56 = vadd.f32 %v1114_v3, %v5293_v50 }
 0x1de   :  { %v1116_v21 = vpop.f32.mrf.mxu0  ;;  %v5254_v27 = vpop.f32.mrf.mxu1 }
 0x1df   :  { %v1117_v31 = vadd.f32 %v1116_v21, %v5293_v50  ;;  %3237 = vtanh.f32 %v1115_v56 }
 0x1e1   :  { %3239 = vtanh.f32 %v1117_v31 }
 0x1e2   :  { %v1120_v45 = vpop.f32.mrf.mxu0  ;;  %v5258_v17 = vpop.f32.mrf.mxu1 }
 0x1e3   :  { %v1121_v24 = vadd.f32 %v1120_v45, %v5280_v5 }
 0x1e4   :  { %v1122_v37 = vpop.f32.mrf.mxu0  ;;  %v5262_v59 = vpop.f32.mrf.mxu1 }
 0x1e5   :  { %v1123_v4 = vadd.f32 %v1122_v37, %v5280_v5  ;;  %3241 = vtanh.f32 %v1121_v24 }
 0x1e7   :  { %3243 = vtanh.f32 %v1123_v4 }
 0x1e8   :  { %v1126_v26 = vpop.f32.mrf.mxu0  ;;  %v5266_v41 = vpop.f32.mrf.mxu1 }
 0x1e9   :  { %v1127_v15 = vadd.f32 %v1126_v26, %v5284_v47 }
 0x1ea   :  { %v1128_v36 = vpop.f32.mrf.mxu0  ;;  %v5270_v10 = vpop.f32.mrf.mxu1 }
 0x1eb   :  { %v1129_v18 = vadd.f32 %v1128_v36, %v5284_v47  ;;  %3245 = vtanh.f32 %v1127_v15 }
 0x1ed   :  { %3247 = vtanh.f32 %v1129_v18 }
 0x1ee   :  { %v1132_v29 = vpop.f32.mrf.mxu0  ;;  %v5274_v43 = vpop.f32.mrf.mxu1 }
 0x1ef   :  { %v1133_v34 = vadd.f32 %v1132_v29, %v5272_v60 }
 0x1f0   :  { %v1134_v7 = vpop.f32.mrf.mxu0  ;;  %v5278_v20 = vpop.f32.mrf.mxu1 }
 0x1f1   :  { %v1135_v35 = vadd.f32 %v1134_v7, %v5272_v60  ;;  %3249 = vtanh.f32 %v1133_v34  ;;  %v5325_v7 = vpop.eup %3233 }
 0x1f3   :  { %3251 = vtanh.f32 %v1135_v35 }
 0x1f4   :  { %v1138_v1 = vpop.f32.mrf.mxu0  ;;  %v5282_v8 = vpop.f32.mrf.mxu1 }
 0x1f5   :  { %v1139_v22 = vadd.f32 %v1138_v1, %v5276_v39 }
 0x1f6   :  { %v1140_v14 = vpop.f32.mrf.mxu0  ;;  %v5286_v23 = vpop.f32.mrf.mxu1 }
 0x1f7   :  { %v1141_v2 = vadd.f32 %v1140_v14, %v5276_v39  ;;  %3253 = vtanh.f32 %v1139_v22  ;;  %v5328_v14 = vpop.eup %3235 }
 0x1f8   :  { %v5331_v56 = vpop.eup %3237 }
 0x1f9   :  { %3255 = vtanh.f32 %v1141_v2  ;;  %v5334_v31 = vpop.eup %3239 }
 0x1fa   :  { %v1144_v12 = vpop.f32.mrf.mxu0  ;;  %v5291_v54 = vpop.f32.mrf.mxu1 }
 0x1fb   :  { %v1145_v0 = vadd.f32 %v1144_v12, %v5264_v42  ;;  %v5337_v15 = vpop.eup %3241 }
 0x1fc   :  { %v1146_v55 = vpop.f32.mrf.mxu0  ;;  %v5297_v48 = vpop.f32.mrf.mxu1 }
 0x1fd   :  { %v1147_v33 = vadd.f32 %v1146_v55, %v5264_v42  ;;  %3257 = vtanh.f32 %v1145_v0  ;;  %v5340_v18 = vpop.eup %3243 }
 0x1fe   :  { %v1150_v19 = vpop.f32.mrf.mxu0  ;;  %v5301_v13 = vpop.f32.mrf.mxu1 }
 0x1ff   :  { %v1151_v3 = vadd.f32 %v1150_v19, %v5268_v40  ;;  %3259 = vtanh.f32 %v1147_v33  ;;  %v5343_v22 = vpop.eup %3245 }
 0x200   :  { %v1152_v53 = vpop.f32.mrf.mxu0  ;;  %v5305_v6 = vpop.f32.mrf.mxu1 }
 0x201   :  { %v1153_v37 = vadd.f32 %v1152_v53, %v5268_v40  ;;  %3261 = vtanh.f32 %v1151_v3  ;;  %v5346_v2 = vpop.eup %3247 }
 0x202   :  { %v1156_v52 = vpop.f32.mrf.mxu0  ;;  %v5309_v62 = vpop.f32.mrf.mxu1 }
 0x203   :  { %v1157_v26 = vadd.f32 %v1156_v52, %v5256_v25  ;;  %3263 = vtanh.f32 %v1153_v37  ;;  %v5348_v33 = vpop.eup %3249 }
 0x204   :  { %v1158_v28 = vpop.f32.mrf.mxu0  ;;  %v5313_v46 = vpop.f32.mrf.mxu1 }
 0x205   :  { %v1159_v1 = vadd.f32 %v1158_v28, %v5256_v25  ;;  %3265 = vtanh.f32 %v1157_v26 }
 0x206   :  { %v1162_v9 = vpop.f32.mrf.mxu0  ;;  %v5317_v61 = vpop.f32.mrf.mxu1 }
 0x207   :  { %v1163_v49 = vadd.f32 %v1162_v9, %v5260_v63  ;;  %3267 = vtanh.f32 %v1159_v1 }
 0x208   :  { %v1164_v21 = vpop.f32.mrf.mxu0  ;;  %v5321_v45 = vpop.f32.mrf.mxu1 }
 0x209   :  { %v1165_v55 = vadd.f32 %v1164_v21, %v5260_v63  ;;  %3269 = vtanh.f32 %v1163_v49  ;;  %v5351_v21 = vpop.eup %3251 }
 0x20a   :  { %v1168_v36 = vpop.f32.mrf.mxu0  ;;  %v1311_v29 = vpop.f32.mrf.mxu1 }
 0x20b   :  { %v1169_v24 = vadd.f32 %v1168_v36, %v5248_v44  ;;  %3271 = vtanh.f32 %v1165_v55  ;;  %v5353_v36 = vpop.eup %3253 }
 0x20c   :  { %v1170_v12 = vpop.f32.mrf.mxu0  ;;  %v1313_v38 = vpop.f32.mrf.mxu1 }
 0x20d   :  { %v1171_v53 = vadd.f32 %v1170_v12, %v5248_v44  ;;  %3273 = vtanh.f32 %v1169_v24  ;;  %v5358_v55 = vpop.eup %3255 }
 0x20e   :  { %v1174_v19 = vpop.f32.mrf.mxu0  ;;  %v1317_v4 = vpop.f32.mrf.mxu1 }
 0x20f   :  { %v1175_v34 = vadd.f32 %v1174_v19, %v5252_v58  ;;  %3275 = vtanh.f32 %v1171_v53 }
 0x210   :  { %v1176_v52 = vpop.f32.mrf.mxu0  ;;  %v1319_v35 = vpop.f32.mrf.mxu1 }
 0x211   :  { %v1177_v28 = vadd.f32 %v1176_v52, %v5252_v58  ;;  %3277 = vtanh.f32 %v1175_v34  ;;  %v1320_v24 = vadd.f32 %v1319_v35, %v5252_v58  ;;  %v5365_v34 = vpop.eup %3257  ;;  %v1318_v52 = vadd.f32 %v1317_v4, %v5252_v58 }
 0x212   :  { %v1180_v0 = vpop.f32.mrf.mxu0  ;;  %v1323_v9 = vpop.f32.mrf.mxu1  ;;  %v1308_v4 = vadd.f32 %v5321_v45, %v5260_v63 }
 0x213   :  { %v1181_v3 = vadd.f32 %v1180_v0, %v5242_v32  ;;  %3279 = vtanh.f32 %v1177_v28  ;;  %v1324_v1 = vadd.f32 %v1323_v9, %v5242_v32  ;;  %v5368_v28 = vpop.eup %3259  ;;  %v1314_v0 = vadd.f32 %v1313_v38, %v5248_v44 }
 0x214   :  { %v1182_v37 = vpop.f32.mrf.mxu0  ;;  %v1325_v26 = vpop.f32.mrf.mxu1 }
 0x215   :  { %v1183_v49 = vadd.f32 %v1182_v37, %v5242_v32  ;;  %v1326_v12 = vadd.f32 %v1325_v26, %v5242_v32  ;;  %3281 = vtanh.f32 %v1181_v3  ;;  %v5375_v35 = vpop.eup %3261  ;;  %v1312_v3 = vadd.f32 %v1311_v29, %v5248_v44 }
 0x216   :  { %v5361_v19 = vpop.f32.mrf.mxu0  ;;  %v5363_v53 = vpop.f32.mrf.mxu1  ;;  %v1302_v29 = vadd.f32 %v5313_v46, %v5256_v25 }
 0x217   :  { %6505 = vst [vmem:[#allocation45_spill] sm:$0xff] %v5363_v53  ;;  %3283 = vtanh.f32 %v1183_v49  ;;  %v5378_v26 = vpop.eup %3263 }
 0x218   :  { %3285 = vtanh.f32 %v1326_v12  ;;  %v5371_v9 = vpop.f32.mrf.mxu0  ;;  %v5373_v37 = vpop.f32.mrf.mxu1  ;;  %v1306_v12 = vadd.f32 %v5317_v61, %v5260_v63  ;;  %v1296_v61 = vadd.f32 %v5305_v6, %v5268_v40 }
 0x219   :  { %6506 = vst [vmem:[#allocation48_spill] sm:$0xff] %v5373_v37  ;;  %3287 = vtanh.f32 %v1324_v1  ;;  %v5386_v38 = vpop.eup %3265 }
 0x21a   :  { %3289 = vtanh.f32 %v1320_v24  ;;  %v5382_v49 = vpop.f32.mrf.mxu0  ;;  %v5384_v53 = vpop.f32.mrf.mxu1 }
 0x21b   :  { %6507 = vst [vmem:[#allocation15_spill] sm:$0xff] %v5384_v53  ;;  %3291 = vtanh.f32 %v1318_v52  ;;  %v5390_v37 = vpop.eup %3267  ;;  %v1300_v53 = vadd.f32 %v5309_v62, %v5256_v25  ;;  %v1290_v62 = vadd.f32 %v5297_v48, %v5264_v42 }
 0x21c   :  { %3293 = vtanh.f32 %v1314_v0  ;;  %v5394_v1 = vpop.f32.mrf.mxu0  ;;  %v5396_v45 = vpop.f32.mrf.mxu1 }
 0x21d   :  { %6508 = vst [vmem:[#allocation57_spill] sm:$0xff] %v5394_v1  ;;  %6509 = vst [vmem:[#allocation58_spill] sm:$0xff] %v5396_v45  ;;  %v5398_v24 = vpop.eup %3269  ;;  %3295 = vtanh.f32 %v1312_v3  ;;  %v1294_v1 = vadd.f32 %v5301_v13, %v5268_v40  ;;  %v1284_v13 = vadd.f32 %v5286_v23, %v5276_v39 }
 0x21e   :  { %v5402_v32 = vpop.eup %3271  ;;  %3297 = vtanh.f32 %v1308_v4  ;;  %v5406_v52 = vpop.f32.mrf.mxu0 }
 0x21f   :  { %6510 = vst [vmem:[#allocation16_spill] sm:$0xff] %v5406_v52  ;;  %v1549_v46 = vpop.f32.mrf.mxu1  ;;  %v3274_v0 = vpop.eup %3273  ;;  %3299 = vtanh.f32 %v1306_v12  ;;  %v1288_v52 = vadd.f32 %v5291_v54, %v5264_v42 }
 0x220   :  { %v5411_v45 = vadd.f32 %v1549_v46, %v5280_v5  ;;  %v3276_v58 = vpop.eup %3275  ;;  %3301 = vtanh.f32 %v1302_v29  ;;  %v5415_v3 = vpop.f32.mrf.mxu0  ;;  %v1282_v29 = vadd.f32 %v5282_v8, %v5276_v39  ;;  %v1272_v8 = vadd.f32 %v5270_v10, %v5284_v47 }
 0x221   :  { %v5417_v6 = vpop.f32.mrf.mxu1  ;;  %v3278_v4 = vpop.eup %3277  ;;  %3303 = vtanh.f32 %v1300_v53 }
 0x222   :  { %6511 = vst [vmem:[#allocation31_spill] sm:$0xff] %v5411_v45  ;;  %6512 = vst [vmem:[#allocation28_spill] sm:$0xff] %v5417_v6  ;;  %v3280_v44 = vpop.eup %3279  ;;  %3305 = vtanh.f32 %v1296_v61  ;;  %v5423_v12 = vpop.f32.mrf.mxu0  ;;  %v1278_v6 = vadd.f32 %v5278_v20, %v5272_v60  ;;  %v1276_v61 = vadd.f32 %v5274_v43, %v5272_v60 }
 0x223   :  { %v5425_v46 = vpop.f32.mrf.mxu1  ;;  %v3282_v48 = vpop.eup %3281  ;;  %3307 = vtanh.f32 %v1294_v1 }
 0x224   :  { %6513 = vst [vmem:[#allocation32_spill] sm:$0xff] %v5425_v46  ;;  %v3284_v45 = vpop.eup %3283  ;;  %3309 = vtanh.f32 %v1290_v62  ;;  %v5431_v54 = vpop.f32.mrf.mxu0 }
 0x225   :  { %v5433_v53 = vpop.f32.mrf.mxu1  ;;  %v3286_v23 = vpop.eup %3285  ;;  %3311 = vtanh.f32 %v1288_v52  ;;  %1854 = vmatprep.subr.mxu0 %v3284_v45  ;;  %v1266_v45 = vadd.f32 %v5262_v59, %v5280_v5 }
 0x226   :  { %6514 = vst [vmem:[#allocation59_spill] sm:$0xff] %v5433_v53  ;;  %v3288_v46 = vpop.eup %3287  ;;  %3313 = vtanh.f32 %v1284_v13  ;;  %1997 = vmatprep.subr.mxu1 %v3286_v23  ;;  %v5439_v1 = vpop.f32.mrf.mxu0  ;;  %1855 = vmatpush1.msra.mxu0 %v3282_v48  ;;  %v1270_v53 = vadd.f32 %v5266_v41, %v5284_v47  ;;  %v1264_v48 = vadd.f32 %v5258_v17, %v5280_v5 }
 0x227   :  { %v5441_v20 = vpop.f32.mrf.mxu1  ;;  %v3290_v62 = vpop.eup %3289  ;;  %3315 = vtanh.f32 %v1282_v29  ;;  %1998 = vmatpush1.msra.mxu1 %v3288_v46  ;;  %1856 = vmatprep.subr.mxu0 %v3280_v44  ;;  %v1260_v44 = vadd.f32 %v5254_v27, %v5293_v50  ;;  %v1254_v17 = vadd.f32 %v5246_v16, %v5288_v57 }
 0x228   :  { %v3292_v43 = vpop.eup %3291  ;;  %3317 = vtanh.f32 %v1278_v6  ;;  %1999 = vmatprep.subr.mxu1 %v3290_v62  ;;  %v5447_v10 = vpop.f32.mrf.mxu0  ;;  %1857 = vmatpush1.msra.mxu0 %v3278_v4  ;;  %v1258_v4 = vadd.f32 %v5250_v51, %v5293_v50  ;;  %v1252_v51 = vadd.f32 %v5244_v30, %v5288_v57 }
 0x229   :  { %v5449_v52 = vpop.f32.mrf.mxu1  ;;  %v3294_v13 = vpop.eup %3293  ;;  %3319 = vtanh.f32 %v1276_v61  ;;  %2000 = vmatpush1.msra.mxu1 %v3292_v43  ;;  %1858 = vmatprep.subr.mxu0 %v3276_v58 }
 0x22a   :  { %v3296_v41 = vpop.eup %3295  ;;  %3321 = vtanh.f32 %v1272_v8  ;;  %2001 = vmatprep.subr.mxu1 %v3294_v13  ;;  %v5455_v59 = vpop.f32.mrf.mxu0  ;;  %1859 = vmatpush1.msra.mxu0 %v3274_v0 }
 0x22b   :  { %v5457_v6 = vpop.f32.mrf.mxu1  ;;  %v3298_v46 = vpop.eup %3297  ;;  %3323 = vtanh.f32 %v1270_v53  ;;  %2002 = vmatpush1.msra.mxu1 %v3296_v41  ;;  %1860 = vmatprep.subr.mxu0 %v5402_v32 }
 0x22c   :  { %v3300_v58 = vpop.eup %3299  ;;  %3325 = vtanh.f32 %v1266_v45  ;;  %2003 = vmatprep.subr.mxu1 %v3298_v46  ;;  %v5464_v27 = vpop.f32.mrf.mxu0  ;;  %1861 = vmatpush1.msra.mxu0 %v5398_v24  ;;  %v1395_v46 = vadd.f32 %v5361_v19, %v5288_v57 }
 0x22d   :  { %v5466_v29 = vpop.f32.mrf.mxu1  ;;  %v3302_v0 = vpop.eup %3301  ;;  %3327 = vtanh.f32 %v1264_v48  ;;  %2004 = vmatpush1.msra.mxu1 %v3300_v58  ;;  %1862 = vmatprep.subr.mxu0 %v5390_v37 }
 0x22e   :  { %v3304_v32 = vpop.eup %3303  ;;  %3329 = vtanh.f32 %v1260_v44  ;;  %2005 = vmatprep.subr.mxu1 %v3302_v0  ;;  %v5472_v16 = vpop.f32.mrf.mxu0  ;;  %1863 = vmatpush1.msra.mxu0 %v5386_v38 }
 0x22f   :  { %v5474_v53 = vpop.f32.mrf.mxu1  ;;  %v3306_v23 = vpop.eup %3305  ;;  %3331 = vtanh.f32 %v1258_v4  ;;  %2006 = vmatpush1.msra.mxu1 %v3304_v32  ;;  %1864 = vmatprep.subr.mxu0 %v5378_v26 }
 0x230   :  { %v3308_v24 = vpop.eup %3307  ;;  %3333 = vtanh.f32 %v1254_v17  ;;  %2007 = vmatprep.subr.mxu1 %v3306_v23  ;;  %v5478_v30 = vpop.f32.mrf.mxu0  ;;  %1865 = vmatpush1.msra.mxu0 %v5375_v35  ;;  %v1425_v23 = vadd.f32 %v5455_v59, %v5276_v39 }
 0x231   :  { %v5480_v37 = vpop.f32.mrf.mxu1  ;;  %v3310_v61 = vpop.eup %3309  ;;  %3335 = vtanh.f32 %v1252_v51  ;;  %2008 = vmatpush1.msra.mxu1 %v3308_v24  ;;  %1866 = vmatprep.subr.mxu0 %v5368_v28  ;;  %v1421_v51 = vadd.f32 %v5447_v10, %v5272_v60 }
 0x232   :  { %v3312_v38 = vpop.eup %3311  ;;  %2009 = vmatprep.subr.mxu1 %v3310_v61  ;;  %v5484_v8 = vpop.f32.mrf.mxu0  ;;  %1867 = vmatpush1.msra.mxu0 %v5365_v34  ;;  %3337 = vtanh.f32 %v1395_v46  ;;  %v6517_v46 = vld [vmem:[#allocation13_spill] sm:$0xff] }
 0x233   :  { %v5486_v62 = vpop.f32.mrf.mxu1  ;;  %v3314_v26 = vpop.eup %3313  ;;  %2010 = vmatpush1.msra.mxu1 %v3312_v38  ;;  %1868 = vmatprep.subr.mxu0 %v5358_v55  ;;  %v1437_v59 = vadd.f32 %v5484_v8, %v5268_v40 }
 0x234   :  { %v3316_v43 = vpop.eup %3315  ;;  %2011 = vmatprep.subr.mxu1 %v3314_v26  ;;  %v5490_v35 = vpop.f32.mrf.mxu0  ;;  %1869 = vmatpush1.msra.mxu0 %v5353_v36  ;;  %v6515_v26 = vld [vmem:[#allocation47_spill] sm:$0xff] }
 0x235   :  { %v5492_v45 = vpop.f32.mrf.mxu1  ;;  %v3318_v28 = vpop.eup %3317  ;;  %2012 = vmatpush1.msra.mxu1 %v3316_v43  ;;  %1870 = vmatprep.subr.mxu0 %v5351_v21 }
 0x236   :  { %v3320_v13 = vpop.eup %3319  ;;  %2013 = vmatprep.subr.mxu1 %v3318_v28  ;;  %v5496_v48 = vpop.f32.mrf.mxu0  ;;  %1871 = vmatpush1.msra.mxu0 %v5348_v33  ;;  %v1397_v33 = vadd.f32 %v5371_v9, %v5288_v57 }
 0x237   :  { %v5498_v34 = vpop.f32.mrf.mxu1  ;;  %v3322_v55 = vpop.eup %3321  ;;  %2014 = vmatpush1.msra.mxu1 %v3320_v13  ;;  %1872 = vmatprep.subr.mxu0 %v5346_v2  ;;  %v5566_v13 = vld [vmem:[%s6297_s5 + $0x10] sm:$0xff] }
 0x238   :  { %v3324_v41 = vpop.eup %3323  ;;  %2015 = vmatprep.subr.mxu1 %v3322_v55  ;;  %v1444_v44 = vpop.f32.mrf.mxu0  ;;  %1873 = vmatpush1.msra.mxu0 %v5343_v22  ;;  %v1401_v22 = vadd.f32 %v5382_v49, %v5293_v50  ;;  %3339 = vtanh.f32 %v1397_v33  ;;  %v6516_v55 = vld [vmem:[#allocation14_spill] sm:$0xff] }
 0x239   :  { %v5502_v36 = vpop.f32.mrf.mxu1  ;;  %v3326_v21 = vpop.eup %3325  ;;  %2016 = vmatpush1.msra.mxu1 %v3324_v41  ;;  %1874 = vmatprep.subr.mxu0 %v5340_v18  ;;  %v1409_v18 = vadd.f32 %v5415_v3, %v5280_v5  ;;  %v1445_v24 = vadd.f32 %v1444_v44, %v5256_v25 }
 0x23a   :  { %v3328_v4 = vpop.eup %3327  ;;  %2017 = vmatprep.subr.mxu1 %v3326_v21  ;;  %v1448_v2 = vpop.f32.mrf.mxu0  ;;  %1875 = vmatpush1.msra.mxu0 %v5337_v15  ;;  %v5526_v15 = vld [vmem:[%s6297_s5] sm:$0xff]  ;;  %3341 = vtanh.f32 %v1401_v22 }
 0x23b   :  { %v5510_v58 = vpop.f32.mrf.mxu1  ;;  %v3330_v17 = vpop.eup %3329  ;;  %2018 = vmatpush1.msra.mxu1 %v3328_v4  ;;  %1876 = vmatprep.subr.mxu0 %v5334_v31  ;;  %v1413_v31 = vadd.f32 %v5423_v12, %v5284_v47  ;;  %3343 = vtanh.f32 %v1409_v18  ;;  %v1449_v38 = vadd.f32 %v1448_v2, %v5260_v63 }
 0x23c   :  { %v3332_v19 = vpop.eup %3331  ;;  %2019 = vmatprep.subr.mxu1 %v3330_v17  ;;  %v5518_v0 = vpop.f32.mrf.mxu0  ;;  %1877 = vmatpush1.msra.mxu0 %v5331_v56  ;;  %v5579_v17 = vld [vmem:[%s6297_s5 + $0x18] sm:$0xff] }
 0x23d   :  { %v5520_v9 = vpop.f32.mrf.mxu1  ;;  %v3334_v49 = vpop.eup %3333  ;;  %2020 = vmatpush1.msra.mxu1 %v3332_v19  ;;  %1878 = vmatprep.subr.mxu0 %v5328_v14  ;;  %v1433_v14 = vadd.f32 %v5478_v30, %v5264_v42  ;;  %3345 = vtanh.f32 %v1413_v31 }
 0x23e   :  { %v3336_v3 = vpop.eup %3335  ;;  %2021 = vmatprep.subr.mxu1 %v3334_v49  ;;  %v5533_v56 = vpop.f32.mrf.mxu0  ;;  %1879 = vmatpush1.msra.mxu0 %v5325_v7  ;;  %v5550_v7 = vld [vmem:[%s6297_s5 + $0x8] sm:$0xff]  ;;  %3347 = vtanh.f32 %v1421_v51 }
 0x23f   :  { %v5535_v32 = vpop.f32.mrf.mxu1  ;;  %2022 = vmatpush1.msra.mxu1 %v3336_v3  ;;  %2947 = vmatmul.mubr.msk.f32.vlgmr.msra.gmra.mxu0 %vm1002_vm0, %v5526_v15  ;;  %3349 = vtanh.f32 %v1425_v23  ;;  %v5585_v49 = vpop.eup %3337 }
 0x240   :  { %2960 = vmatmul.mubr.msk.f32.vlgmr.msra.gmra.mxu1 %vm1002_vm0, %v5526_v15  ;;  %v1456_v12 = vpop.f32.mrf.mxu0  ;;  %1918 = vmatprep.mubr.f32.mxu0 %v6490_v11  ;;  %3351 = vtanh.f32 %v1433_v14 }
 0x241   :  { %v1599_v10 = vpop.f32.mrf.mxu1  ;;  %2061 = vmatprep.mubr.f32.mxu1 %v6490_v11  ;;  %v1457_v43 = vadd.f32 %v1456_v12, %v6515_v26  ;;  %3353 = vtanh.f32 %v1437_v59  ;;  %v5602_v12 = vld [vmem:[%s6297_s5 + $0x20] sm:$0xff] }
 0x242   :  { %v1460_v30 = vpop.f32.mrf.mxu0  ;;  %3355 = vtanh.f32 %v1445_v24  ;;  %v1600_v24 = vadd.f32 %v1599_v10, %v6515_v26  ;;  %v1451_v10 = vadd.f32 %v5518_v0, %v5260_v63 }
 0x243   :  { %v1603_v61 = vpop.f32.mrf.mxu1  ;;  %2948 = vmatmul.mubr.msk.f32.gmra.mxu0 %vm1002_vm0, %v5550_v7  ;;  %v1461_v41 = vadd.f32 %v1460_v30, %v6516_v55  ;;  %3357 = vtanh.f32 %v1449_v38 }
 0x244   :  { %2961 = vmatmul.mubr.msk.f32.gmra.mxu1 %vm1002_vm0, %v5550_v7  ;;  %v1462_v8 = vpop.f32.mrf.mxu0  ;;  %1924 = vmatprep.mubr.f32.mxu0 %v6490_v11  ;;  %3359 = vtanh.f32 %v1457_v43  ;;  %v1604_v14 = vadd.f32 %v1603_v61, %v6516_v55  ;;  %v1455_v61 = vadd.f32 %v5533_v56, %v6515_v26  ;;  %v1598_v43 = vadd.f32 %v5535_v32, %v6515_v26  ;;  %v5628_v56 = vld [vmem:[%s6297_s5 + $0x28] sm:$0xff] }
 0x245   :  { %v1605_v28 = vpop.f32.mrf.mxu1  ;;  %2067 = vmatprep.mubr.f32.mxu1 %v6490_v11  ;;  %3361 = vtanh.f32 %v1461_v41  ;;  %v1463_v31 = vadd.f32 %v1462_v8, %v6516_v55  ;;  %v5588_v3 = vpop.eup %3339  ;;  %v1594_v26 = vadd.f32 %v5520_v9, %v5260_v63  ;;  %v1588_v41 = vadd.f32 %v5502_v36, %v5256_v25 }
 0x246   :  { %v1466_v44 = vpop.f32.mrf.mxu0  ;;  %v1606_v51 = vadd.f32 %v1605_v28, %v6516_v55  ;;  %v1592_v28 = vadd.f32 %v5510_v58, %v5260_v63  ;;  %v1443_v9 = vadd.f32 %v5496_v48, %v5256_v25  ;;  %v5655_v63 = vld [vmem:[%s6297_s5 + $0x30] sm:$0xff]  ;;  %v1586_v58 = vadd.f32 %v5498_v34, %v5256_v25 }
 0x247   :  { %v1609_v21 = vpop.f32.mrf.mxu1  ;;  %v1467_v4 = vadd.f32 %v1466_v44, %v6517_v46  ;;  %2949 = vmatmul.mubr.msk.f32.gmra.mxu0 %vm1002_vm0, %v5566_v13  ;;  %v5593_v23 = vpop.eup %3341  ;;  %v1439_v48 = vadd.f32 %v5490_v35, %v5268_v40  ;;  %v1580_v25 = vadd.f32 %v5486_v62, %v5268_v40  ;;  %v5674_v35 = vld [vmem:[%s6297_s5 + $0x38] sm:$0xff]  ;;  %v1576_v34 = vadd.f32 %v5480_v37, %v5264_v42 }
 0x248   :  { %2962 = vmatmul.mubr.msk.f32.gmra.mxu1 %vm1002_vm0, %v5566_v13  ;;  %v1468_v33 = vpop.f32.mrf.mxu0  ;;  %1930 = vmatprep.mubr.f32.mxu0 %v6490_v11  ;;  %v1610_v22 = vadd.f32 %v1609_v21, %v6517_v46  ;;  %v5604_v59 = vpop.eup %3343  ;;  %v1431_v62 = vadd.f32 %v5472_v16, %v5264_v42 }
 0x249   :  { %v1611_v2 = vpop.f32.mrf.mxu1  ;;  %v1469_v19 = vadd.f32 %v1468_v33, %v6517_v46  ;;  %2073 = vmatprep.mubr.f32.mxu1 %v6490_v11  ;;  %3363 = vtanh.f32 %v1467_v4  ;;  %v1582_v4 = vadd.f32 %v5492_v45, %v5268_v40 }
 0x24a   :  { %v1612_v18 = vadd.f32 %v1611_v2, %v6517_v46  ;;  %v5608_v30 = vpop.eup %3345 }
 0x24b   :  { %3365 = vtanh.f32 %v1469_v19  ;;  %2950 = vmatmul.mubr.msk.f32.gmra.mxu0 %vm1002_vm0, %v5579_v17  ;;  %v5612_v38 = vpop.eup %3347  ;;  %v1427_v19 = vadd.f32 %v5464_v27, %v5276_v39  ;;  %v5696_v27 = vld [vmem:[%s6297_s5 + $0x40] sm:$0xff] }
 0x24c   :  { %3367 = vtanh.f32 %v1612_v18  ;;  %2963 = vmatmul.mubr.msk.f32.gmra.mxu1 %vm1002_vm0, %v5579_v17  ;;  %1936 = vmatprep.mubr.f32.mxu0 %v6490_v11  ;;  %v5618_v8 = vpop.eup %3349  ;;  %v1570_v18 = vadd.f32 %v5466_v29, %v5276_v39 }
 0x24d   :  { %3369 = vtanh.f32 %v1610_v22  ;;  %2079 = vmatprep.mubr.f32.mxu1 %v6490_v11  ;;  %v5630_v32 = vpop.eup %3351  ;;  %v1574_v22 = vadd.f32 %v5474_v53, %v5264_v42  ;;  %v1568_v53 = vadd.f32 %v5457_v6, %v5276_v39  ;;  %v1419_v39 = vadd.f32 %v5439_v1, %v5272_v60 }
 0x24e   :  { %3371 = vtanh.f32 %v1463_v31  ;;  %v5635_v0 = vpop.eup %3353 }
 0x24f   :  { %3373 = vtanh.f32 %v1606_v51  ;;  %2951 = vmatmul.mubr.msk.f32.gmra.mxu0 %vm1002_vm0, %v5602_v12  ;;  %v5639_v55 = vpop.eup %3355  ;;  %v1564_v51 = vadd.f32 %v5449_v52, %v5272_v60 }
 0x250   :  { %3375 = vtanh.f32 %v1604_v14  ;;  %2964 = vmatmul.mubr.msk.f32.gmra.mxu1 %vm1002_vm0, %v5602_v12  ;;  %1942 = vmatprep.mubr.f32.mxu0 %v6490_v11  ;;  %v5645_v44 = vpop.eup %3357  ;;  %v1562_v14 = vadd.f32 %v5441_v20, %v5272_v60  ;;  %v6519_v20 = vld [vmem:[#allocation32_spill] sm:$0xff] }
 0x251   :  { %3377 = vtanh.f32 %v1600_v24  ;;  %2085 = vmatprep.mubr.f32.mxu1 %v6490_v11  ;;  %v3360_v36 = vpop.eup %3359  ;;  %v1415_v24 = vadd.f32 %v5431_v54, %v5284_v47  ;;  %v5721_v54 = vld [vmem:[%s6297_s5 + $0x48] sm:$0xff] }
 0x252   :  { %3379 = vtanh.f32 %v1455_v61  ;;  %v3362_v21 = vpop.eup %3361  ;;  %v6518_v61 = vld [vmem:[#allocation59_spill] sm:$0xff] }
 0x253   :  { %3381 = vtanh.f32 %v1598_v43  ;;  %2952 = vmatmul.mubr.msk.f32.gmra.mxu0 %vm1002_vm0, %v5628_v56  ;;  %v1558_v43 = vadd.f32 %v6518_v61, %v5284_v47 }
 0x254   :  { %3383 = vtanh.f32 %v1451_v10  ;;  %2965 = vmatmul.mubr.msk.f32.gmra.mxu1 %vm1002_vm0, %v5628_v56  ;;  %1948 = vmatprep.mubr.f32.mxu0 %v6490_v11  ;;  %v1556_v10 = vadd.f32 %v6519_v20, %v5284_v47  ;;  %v6521_v47 = vld [vmem:[#allocation16_spill] sm:$0xff] }
 0x255   :  { %3385 = vtanh.f32 %v1594_v26  ;;  %2091 = vmatprep.mubr.f32.mxu1 %v6490_v11 }
 0x256   :  { %3387 = vtanh.f32 %v1592_v28  ;;  %v3364_v46 = vpop.eup %3363  ;;  %v6520_v28 = vld [vmem:[#allocation28_spill] sm:$0xff] }
 0x257   :  { %3389 = vtanh.f32 %v1588_v41  ;;  %2953 = vmatmul.mubr.msk.f32.gmra.mxu0 %vm1002_vm0, %v5655_v63  ;;  %v1552_v41 = vadd.f32 %v6520_v28, %v5280_v5 }
 0x258   :  { %v3366_v33 = vpop.eup %3365  ;;  %3391 = vtanh.f32 %v1443_v9  ;;  %2966 = vmatmul.mubr.msk.f32.gmra.mxu1 %vm1002_vm0, %v5655_v63  ;;  %1954 = vmatprep.mubr.f32.mxu0 %v6490_v11  ;;  %v1407_v9 = vadd.f32 %v6521_v47, %v5280_v5 }
 0x259   :  { %v3368_v45 = vpop.eup %3367  ;;  %3393 = vtanh.f32 %v1586_v58  ;;  %2140 = vmatprep.subr.mxu0 %v3366_v33  ;;  %2097 = vmatprep.mubr.f32.mxu1 %v6490_v11  ;;  %v6522_v58 = vld [vmem:[#allocation57_spill] sm:$0xff]  ;;  %v6524_v33 = vld [vmem:[#allocation15_spill] sm:$0xff] }
 0x25a   :  { %v3370_v40 = vpop.eup %3369  ;;  %3395 = vtanh.f32 %v1439_v48  ;;  %2283 = vmatprep.subr.mxu1 %v3368_v45  ;;  %2141 = vmatpush1.msra.mxu0 %v3364_v46  ;;  %v6523_v48 = vld [vmem:[#allocation58_spill] sm:$0xff] }
 0x25b   :  { %v3372_v2 = vpop.eup %3371  ;;  %3397 = vtanh.f32 %v1582_v4  ;;  %2284 = vmatpush1.msra.mxu1 %v3370_v40  ;;  %2954 = vmatmul.mubr.msk.f32.gmra.mxu0 %vm1002_vm0, %v5674_v35  ;;  %v1546_v46 = vadd.f32 %v6523_v48, %v5293_v50  ;;  %v5744_v45 = vld [vmem:[%s6297_s5 + $0x50] sm:$0xff]  ;;  %v6525_v40 = vld [vmem:[#allocation48_spill] sm:$0xff] }
 0x25c   :  { %v3374_v37 = vpop.eup %3373  ;;  %3399 = vtanh.f32 %v1580_v25  ;;  %2967 = vmatmul.mubr.msk.f32.gmra.mxu1 %vm1002_vm0, %v5674_v35  ;;  %2142 = vmatprep.subr.mxu0 %v3372_v2  ;;  %v1544_v25 = vadd.f32 %v6524_v33, %v5293_v50  ;;  %v6526_v2 = vld [vmem:[#allocation31_spill] sm:$0xff] }
 0x25d   :  { %v3376_v16 = vpop.eup %3375  ;;  %3401 = vtanh.f32 %v1576_v34  ;;  %2285 = vmatprep.subr.mxu1 %v3374_v37  ;;  %2143 = vmatpush1.msra.mxu0 %v3362_v21  ;;  %v1403_v21 = vadd.f32 %v6522_v58, %v5293_v50  ;;  %v6527_v50 = vld [vmem:[#allocation45_spill] sm:$0xff] }
 0x25e   :  { %v3378_v42 = vpop.eup %3377  ;;  %3403 = vtanh.f32 %v1431_v62  ;;  %2286 = vmatpush1.msra.mxu1 %v3376_v16  ;;  %2144 = vmatprep.subr.mxu0 %v3360_v36  ;;  %v1540_v62 = vadd.f32 %v6525_v40, %v5288_v57  ;;  %v5762_v16 = vld [vmem:[%s6297_s5 + $0x58] sm:$0xff] }
 0x25f   :  { %v3380_v31 = vpop.eup %3379  ;;  %3405 = vtanh.f32 %v1574_v22  ;;  %2287 = vmatprep.subr.mxu1 %v3378_v42  ;;  %1960 = vmatprep.mubr.f32.mxu0 %v6490_v11  ;;  %v1538_v22 = vadd.f32 %v6527_v50, %v5288_v57 }
 0x260   :  { %v3382_v29 = vpop.eup %3381  ;;  %3407 = vtanh.f32 %v1427_v19  ;;  %2103 = vmatprep.mubr.f32.mxu1 %v6490_v11  ;;  %2145 = vmatpush1.msra.mxu0 %v3380_v31 }
 0x261   :  { %v3384_v6 = vpop.eup %3383  ;;  %3409 = vtanh.f32 %v1570_v18  ;;  %2288 = vmatpush1.msra.mxu1 %v3382_v29  ;;  %2955 = vmatmul.mubr.msk.f32.gmra.mxu0 %vm1002_vm0, %v5696_v27 }
 0x262   :  { %v3386_v52 = vpop.eup %3385  ;;  %3411 = vtanh.f32 %v1568_v53  ;;  %2968 = vmatmul.mubr.msk.f32.gmra.mxu1 %vm1002_vm0, %v5696_v27  ;;  %2146 = vmatprep.subr.mxu0 %v3384_v6 }
 0x263   :  { %v3388_v1 = vpop.eup %3387  ;;  %3413 = vtanh.f32 %v1564_v51  ;;  %2289 = vmatprep.subr.mxu1 %v3386_v52  ;;  %2147 = vmatpush1.msra.mxu0 %v5645_v44  ;;  %v5775_v51 = vld [vmem:[%s6297_s5 + $0x60] sm:$0xff] }
 0x264   :  { %v3390_v60 = vpop.eup %3389  ;;  %3415 = vtanh.f32 %v1419_v39  ;;  %2290 = vmatpush1.msra.mxu1 %v3388_v1  ;;  %2148 = vmatprep.subr.mxu0 %v5639_v55 }
 0x265   :  { %v3392_v26 = vpop.eup %3391  ;;  %3417 = vtanh.f32 %v1562_v14  ;;  %2291 = vmatprep.subr.mxu1 %v3390_v60  ;;  %1966 = vmatprep.mubr.f32.mxu0 %v6490_v11 }
 0x266   :  { %v3394_v44 = vpop.eup %3393  ;;  %3419 = vtanh.f32 %v1415_v24  ;;  %2109 = vmatprep.mubr.f32.mxu1 %v6490_v11  ;;  %2149 = vmatpush1.msra.mxu0 %v3392_v26 }
 0x267   :  { %v3396_v55 = vpop.eup %3395  ;;  %3421 = vtanh.f32 %v1558_v43  ;;  %2292 = vmatpush1.msra.mxu1 %v3394_v44  ;;  %2956 = vmatmul.mubr.msk.f32.gmra.mxu0 %vm1002_vm0, %v5721_v54 }
 0x268   :  { %v3398_v36 = vpop.eup %3397  ;;  %3423 = vtanh.f32 %v1556_v10  ;;  %2969 = vmatmul.mubr.msk.f32.gmra.mxu1 %vm1002_vm0, %v5721_v54  ;;  %2150 = vmatprep.subr.mxu0 %v3396_v55 }
 0x269   :  { %v3400_v5 = vpop.eup %3399  ;;  %3425 = vtanh.f32 %v1552_v41  ;;  %2293 = vmatprep.subr.mxu1 %v3398_v36  ;;  %2151 = vmatpush1.msra.mxu0 %v5635_v0 }
 0x26a   :  { %v3402_v4 = vpop.eup %3401  ;;  %3427 = vtanh.f32 %v1407_v9  ;;  %2294 = vmatpush1.msra.mxu1 %v3400_v5  ;;  %2152 = vmatprep.subr.mxu0 %v5630_v32 }
 0x26b   :  { %v3404_v34 = vpop.eup %3403  ;;  %3429 = vtanh.f32 %v6526_v2  ;;  %2295 = vmatprep.subr.mxu1 %v3402_v4  ;;  %1972 = vmatprep.mubr.f32.mxu0 %v6490_v11 }
 0x26c   :  { %v3406_v0 = vpop.eup %3405  ;;  %3431 = vtanh.f32 %v1403_v21  ;;  %2115 = vmatprep.mubr.f32.mxu1 %v6490_v11  ;;  %2153 = vmatpush1.msra.mxu0 %v3404_v34 }
 0x26d   :  { %v3408_v32 = vpop.eup %3407  ;;  %3433 = vtanh.f32 %v1546_v46  ;;  %2296 = vmatpush1.msra.mxu1 %v3406_v0  ;;  %2957 = vmatmul.mubr.msk.f32.gmra.mxu0 %vm1002_vm0, %v5744_v45 }
 0x26e   :  { %v3410_v37 = vpop.eup %3409  ;;  %3435 = vtanh.f32 %v1544_v25  ;;  %2970 = vmatmul.mubr.msk.f32.gmra.mxu1 %vm1002_vm0, %v5744_v45  ;;  %2154 = vmatprep.subr.mxu0 %v3408_v32 }
 0x26f   :  { %v3412_v19 = vpop.eup %3411  ;;  %3437 = vtanh.f32 %v1540_v62  ;;  %2297 = vmatprep.subr.mxu1 %v3410_v37  ;;  %2155 = vmatpush1.msra.mxu0 %v5618_v8 }
 0x270   :  { %v3414_v57 = vpop.eup %3413  ;;  %3439 = vtanh.f32 %v1538_v22  ;;  %2298 = vmatpush1.msra.mxu1 %v3412_v19  ;;  %2156 = vmatprep.subr.mxu0 %v5612_v38 }
 0x271   :  { %v3416_v18 = vpop.eup %3415  ;;  %2299 = vmatprep.subr.mxu1 %v3414_v57  ;;  %1978 = vmatprep.mubr.f32.mxu0 %v6490_v11 }
 0x272   :  { %v3418_v42 = vpop.eup %3417  ;;  %2121 = vmatprep.mubr.f32.mxu1 %v6490_v11  ;;  %2157 = vmatpush1.msra.mxu0 %v3416_v18 }
 0x273   :  { %v3420_v53 = vpop.eup %3419  ;;  %2300 = vmatpush1.msra.mxu1 %v3418_v42  ;;  %2958 = vmatmul.mubr.msk.f32.gmra.mxu0 %vm1002_vm0, %v5762_v16 }
 0x274   :  { %v3422_v8 = vpop.eup %3421  ;;  %2971 = vmatmul.mubr.msk.f32.gmra.mxu1 %vm1002_vm0, %v5762_v16  ;;  %2158 = vmatprep.subr.mxu0 %v3420_v53 }
 0x275   :  { %v3424_v38 = vpop.eup %3423  ;;  %2301 = vmatprep.subr.mxu1 %v3422_v8  ;;  %2159 = vmatpush1.msra.mxu0 %v5608_v30 }
 0x276   :  { %v3426_v31 = vpop.eup %3425  ;;  %2302 = vmatpush1.msra.mxu1 %v3424_v38  ;;  %2160 = vmatprep.subr.mxu0 %v5604_v59 }
 0x277   :  { %v3428_v29 = vpop.eup %3427  ;;  %2303 = vmatprep.subr.mxu1 %v3426_v31  ;;  %1984 = vmatprep.mubr.f32.mxu0 %v6490_v11 }
 0x278   :  { %v3430_v39 = vpop.eup %3429  ;;  %2127 = vmatprep.mubr.f32.mxu1 %v6490_v11  ;;  %2161 = vmatpush1.msra.mxu0 %v3428_v29 }
 0x279   :  { %v3432_v6 = vpop.eup %3431  ;;  %2304 = vmatpush1.msra.mxu1 %v3430_v39  ;;  %2959 = vmatmul.mubr.msk.f32.gmra.mxu0 %vm1002_vm0, %v5775_v51 }
 0x27a   :  { %v3434_v30 = vpop.eup %3433  ;;  %2972 = vmatmul.mubr.msk.f32.gmra.mxu1 %vm1002_vm0, %v5775_v51  ;;  %2162 = vmatprep.subr.mxu0 %v3432_v6 }
 0x27b   :  { %v3436_v59 = vpop.eup %3435  ;;  %2305 = vmatprep.subr.mxu1 %v3434_v30  ;;  %2163 = vmatpush1.msra.mxu0 %v5593_v23 }
 0x27c   :  { %v3438_v14 = vpop.eup %3437  ;;  %2306 = vmatpush1.msra.mxu1 %v3436_v59  ;;  %2164 = vmatprep.subr.mxu0 %v5588_v3 }
 0x27d   :  { %v3440_v52 = vpop.eup %3439  ;;  %2307 = vmatprep.subr.mxu1 %v3438_v14  ;;  %2165 = vmatpush1.msra.mxu0 %v5585_v49 }
 0x27e   :  { %2198 = vmatprep.mubr.f32.mxu0 %v6490_v11  ;;  %2308 = vmatpush1.msra.mxu1 %v3440_v52 }
 0x27f   :  { %2341 = vmatprep.mubr.f32.mxu1 %v6490_v11  ;;  %2973 = vmatmul.mubr.msk.f32.vlgmr.msra.gmra.mxu0 %vm1002_vm0, %v5526_v15 }
 0x280   :  { %2986 = vmatmul.mubr.msk.f32.vlgmr.msra.gmra.mxu1 %vm1002_vm0, %v5526_v15  ;;  %2204 = vmatprep.mubr.f32.mxu0 %v6490_v11  ;;  %v5866_v15 = vpop.permute.xlu0 %1806 }
 0x281   :  { %2347 = vmatprep.mubr.f32.mxu1 %v6490_v11  ;;  %6528 = vst [vmem:[#allocation29_spill] sm:$0xff] %v5866_v15 }
 0x283   :  { %2974 = vmatmul.mubr.msk.f32.gmra.mxu0 %vm1002_vm0, %v5550_v7 }
 0x284   :  { %2987 = vmatmul.mubr.msk.f32.gmra.mxu1 %vm1002_vm0, %v5550_v7  ;;  %2210 = vmatprep.mubr.f32.mxu0 %v6490_v11  ;;  %v5870_v49 = vpop.permute.xlu0 %1796 }
 0x285   :  { %2353 = vmatprep.mubr.f32.mxu1 %v6490_v11  ;;  %6529 = vst [vmem:[#allocation30_spill] sm:$0xff] %v5870_v49 }
 0x287   :  { %2975 = vmatmul.mubr.msk.f32.gmra.mxu0 %vm1002_vm0, %v5566_v13 }
 0x288   :  { %2988 = vmatmul.mubr.msk.f32.gmra.mxu1 %vm1002_vm0, %v5566_v13  ;;  %2216 = vmatprep.mubr.f32.mxu0 %v6490_v11  ;;  %v5880_v24 = vpop.permute.xlu0 %1786 }
 0x289   :  { %2359 = vmatprep.mubr.f32.mxu1 %v6490_v11 }
 0x28b   :  { %2976 = vmatmul.mubr.msk.f32.gmra.mxu0 %vm1002_vm0, %v5579_v17 }
 0x28c   :  { %2989 = vmatmul.mubr.msk.f32.gmra.mxu1 %vm1002_vm0, %v5579_v17  ;;  %2222 = vmatprep.mubr.f32.mxu0 %v6490_v11  ;;  %v5890_v26 = vpop.permute.xlu0 %1776 }
 0x28d   :  { %2365 = vmatprep.mubr.f32.mxu1 %v6490_v11 }
 0x28f   :  { %2977 = vmatmul.mubr.msk.f32.gmra.mxu0 %vm1002_vm0, %v5602_v12 }
 0x290   :  { %2990 = vmatmul.mubr.msk.f32.gmra.mxu1 %vm1002_vm0, %v5602_v12  ;;  %2228 = vmatprep.mubr.f32.mxu0 %v6490_v11  ;;  %v5874_v12 = vpop.permute.xlu1 %1801  ;;  %v5900_v58 = vpop.permute.xlu0 %1766 }
 0x291   :  { %2371 = vmatprep.mubr.f32.mxu1 %v6490_v11  ;;  %6530 = vst [vmem:[#allocation21_spill] sm:$0xff] %v5874_v12 }
 0x293   :  { %2978 = vmatmul.mubr.msk.f32.gmra.mxu0 %vm1002_vm0, %v5628_v56 }
 0x294   :  { %2991 = vmatmul.mubr.msk.f32.gmra.mxu1 %vm1002_vm0, %v5628_v56  ;;  %2234 = vmatprep.mubr.f32.mxu0 %v6490_v11  ;;  %v5884_v43 = vpop.permute.xlu1 %1791 }
 0x295   :  { %2377 = vmatprep.mubr.f32.mxu1 %v6490_v11  ;;  %6531 = vst [vmem:[#allocation33_spill] sm:$0xff] %v5884_v43 }
 0x297   :  { %2979 = vmatmul.mubr.msk.f32.gmra.mxu0 %vm1002_vm0, %v5655_v63 }
 0x298   :  { %2992 = vmatmul.mubr.msk.f32.gmra.mxu1 %vm1002_vm0, %v5655_v63  ;;  %2240 = vmatprep.mubr.f32.mxu0 %v6490_v11  ;;  %v5894_v44 = vpop.permute.xlu1 %1781 }
 0x299   :  { %2383 = vmatprep.mubr.f32.mxu1 %v6490_v11 }
 0x29b   :  { %2980 = vmatmul.mubr.msk.f32.gmra.mxu0 %vm1002_vm0, %v5674_v35 }
 0x29c   :  { %2993 = vmatmul.mubr.msk.f32.gmra.mxu1 %vm1002_vm0, %v5674_v35  ;;  %2246 = vmatprep.mubr.f32.mxu0 %v6490_v11  ;;  %v5904_v48 = vpop.permute.xlu1 %1771 }
 0x29d   :  { %2389 = vmatprep.mubr.f32.mxu1 %v6490_v11 }
 0x29f   :  { %2981 = vmatmul.mubr.msk.f32.gmra.mxu0 %vm1002_vm0, %v5696_v27 }
 0x2a0   :  { %2994 = vmatmul.mubr.msk.f32.gmra.mxu1 %vm1002_vm0, %v5696_v27  ;;  %2252 = vmatprep.mubr.f32.mxu0 %v6490_v11  ;;  %v5914_v62 = vpop.permute.xlu1 %1761 }
 0x2a1   :  { %2395 = vmatprep.mubr.f32.mxu1 %v6490_v11 }
 0x2a3   :  { %2982 = vmatmul.mubr.msk.f32.gmra.mxu0 %vm1002_vm0, %v5721_v54 }
 0x2a4   :  { %2995 = vmatmul.mubr.msk.f32.gmra.mxu1 %vm1002_vm0, %v5721_v54  ;;  %2258 = vmatprep.mubr.f32.mxu0 %v6490_v11  ;;  %v5923_v19 = vpop.permute.xlu1 %1751 }
 0x2a5   :  { %2401 = vmatprep.mubr.f32.mxu1 %v6490_v11 }
 0x2a7   :  { %2983 = vmatmul.mubr.msk.f32.gmra.mxu0 %vm1002_vm0, %v5744_v45 }
 0x2a8   :  { %2996 = vmatmul.mubr.msk.f32.gmra.mxu1 %vm1002_vm0, %v5744_v45  ;;  %2264 = vmatprep.mubr.f32.mxu0 %v6490_v11  ;;  %v5910_v45 = vpop.permute.xlu0 %1756 }
 0x2a9   :  { %2407 = vmatprep.mubr.f32.mxu1 %v6490_v11 }
 0x2ab   :  { %2984 = vmatmul.mubr.msk.f32.gmra.mxu0 %vm1002_vm0, %v5762_v16 }
 0x2ac   :  { %2997 = vmatmul.mubr.msk.f32.gmra.mxu1 %vm1002_vm0, %v5762_v16  ;;  %2270 = vmatprep.mubr.f32.mxu0 %v6490_v11  ;;  %v5920_v22 = vpop.permute.xlu0 %1746 }
 0x2ad   :  { %2413 = vmatprep.mubr.f32.mxu1 %v6490_v11 }
 0x2af   :  { %2985 = vmatmul.mubr.msk.f32.gmra.mxu0 %vm1002_vm0, %v5775_v51 }
 0x2b0   :  { %2998 = vmatmul.mubr.msk.f32.gmra.mxu1 %vm1002_vm0, %v5775_v51  ;;  %2602 = vmatprep.mubr.f32.mxu0 %v6490_v11 }
 0x2b1   :  { %2673 = vmatprep.mubr.f32.mxu1 %v6490_v11 }
 0x2ff   :  { %v1914_v7 = vpop.f32.mrf.mxu0 }
 0x300   :  { %v5868_v13 = vpop.f32.mrf.mxu1  ;;  %v1915_v32 = vadd.f32 %v1914_v7, %v5920_v22 }
 0x301   :  { %v1916_v17 = vpop.f32.mrf.mxu0 }
 0x302   :  { %v5872_v3 = vpop.f32.mrf.mxu1  ;;  %v1917_v57 = vadd.f32 %v1916_v17, %v5920_v22  ;;  %3441 = vtanh.f32 %v1915_v32 }
 0x303   :  { %v1920_v23 = vpop.f32.mrf.mxu0 }
 0x304   :  { %v5876_v56 = vpop.f32.mrf.mxu1  ;;  %v1921_v18 = vadd.f32 %v1920_v23, %v5923_v19  ;;  %3443 = vtanh.f32 %v1917_v57 }
 0x305   :  { %v1922_v63 = vpop.f32.mrf.mxu0 }
 0x306   :  { %v5878_v35 = vpop.f32.mrf.mxu1  ;;  %v1923_v53 = vadd.f32 %v1922_v63, %v5923_v19  ;;  %3445 = vtanh.f32 %v1921_v18 }
 0x307   :  { %v1926_v27 = vpop.f32.mrf.mxu0 }
 0x308   :  { %v5882_v1 = vpop.f32.mrf.mxu1  ;;  %v1927_v38 = vadd.f32 %v1926_v27, %v5910_v45  ;;  %3447 = vtanh.f32 %v1923_v53 }
 0x309   :  { %v1928_v61 = vpop.f32.mrf.mxu0 }
 0x30a   :  { %v5886_v60 = vpop.f32.mrf.mxu1  ;;  %v1929_v31 = vadd.f32 %v1928_v61, %v5910_v45  ;;  %3449 = vtanh.f32 %v1927_v38 }
 0x30b   :  { %v1932_v20 = vpop.f32.mrf.mxu0 }
 0x30c   :  { %v5888_v10 = vpop.f32.mrf.mxu1  ;;  %v1933_v51 = vadd.f32 %v1932_v20, %v5914_v62  ;;  %3451 = vtanh.f32 %v1929_v31 }
 0x30d   :  { %v1934_v54 = vpop.f32.mrf.mxu0 }
 0x30e   :  { %v5892_v28 = vpop.f32.mrf.mxu1  ;;  %v1935_v39 = vadd.f32 %v1934_v54, %v5914_v62  ;;  %3453 = vtanh.f32 %v1933_v51 }
 0x30f   :  { %v1938_v41 = vpop.f32.mrf.mxu0 }
 0x310   :  { %v5896_v47 = vpop.f32.mrf.mxu1  ;;  %v1939_v30 = vadd.f32 %v1938_v41, %v5900_v58  ;;  %3455 = vtanh.f32 %v1935_v39 }
 0x311   :  { %v1940_v9 = vpop.f32.mrf.mxu0 }
 0x312   :  { %v5898_v55 = vpop.f32.mrf.mxu1  ;;  %v1941_v14 = vadd.f32 %v1940_v9, %v5900_v58  ;;  %3457 = vtanh.f32 %v1939_v30 }
 0x313   :  { %v1944_v36 = vpop.f32.mrf.mxu0 }
 0x314   :  { %v5902_v21 = vpop.f32.mrf.mxu1  ;;  %v1945_v7 = vadd.f32 %v1944_v36, %v5904_v48  ;;  %3459 = vtanh.f32 %v1941_v14 }
 0x315   :  { %v1946_v5 = vpop.f32.mrf.mxu0 }
 0x316   :  { %v5906_v46 = vpop.f32.mrf.mxu1  ;;  %v1947_v17 = vadd.f32 %v1946_v5, %v5904_v48  ;;  %3461 = vtanh.f32 %v1945_v7  ;;  %v5949_v5 = vpop.eup %3441 }
 0x317   :  { %v1950_v4 = vpop.f32.mrf.mxu0  ;;  %v5952_v32 = vpop.eup %3443 }
 0x318   :  { %v5908_v33 = vpop.f32.mrf.mxu1  ;;  %v1951_v23 = vadd.f32 %v1950_v4, %v5890_v26  ;;  %3463 = vtanh.f32 %v1947_v17 }
 0x319   :  { %v1952_v25 = vpop.f32.mrf.mxu0 }
 0x31a   :  { %v5912_v34 = vpop.f32.mrf.mxu1  ;;  %v1953_v27 = vadd.f32 %v1952_v25, %v5890_v26  ;;  %3465 = vtanh.f32 %v1951_v23 }
 0x31b   :  { %v1956_v40 = vpop.f32.mrf.mxu0 }
 0x31c   :  { %v5916_v2 = vpop.f32.mrf.mxu1  ;;  %v1957_v20 = vadd.f32 %v1956_v40, %v5894_v44  ;;  %3467 = vtanh.f32 %v1953_v27  ;;  %v5955_v40 = vpop.eup %3445 }
 0x31d   :  { %v1958_v0 = vpop.f32.mrf.mxu0  ;;  %v5958_v53 = vpop.eup %3447 }
 0x31e   :  { %v5918_v50 = vpop.f32.mrf.mxu1  ;;  %v1959_v41 = vadd.f32 %v1958_v0, %v5894_v44  ;;  %3469 = vtanh.f32 %v1957_v20  ;;  %v5961_v31 = vpop.eup %3449 }
 0x320   :  { %3471 = vtanh.f32 %v1959_v41 }
 0x321   :  { %v1962_v37 = vpop.f32.mrf.mxu0 }
 0x322   :  { %v5926_v16 = vpop.f32.mrf.mxu1  ;;  %v1963_v36 = vadd.f32 %v1962_v37, %v5880_v24 }
 0x323   :  { %v1964_v42 = vpop.f32.mrf.mxu0 }
 0x324   :  { %v5930_v8 = vpop.f32.mrf.mxu1  ;;  %v1965_v4 = vadd.f32 %v1964_v42, %v5880_v24  ;;  %3473 = vtanh.f32 %v1963_v36 }
 0x326   :  { %3475 = vtanh.f32 %v1965_v4 }
 0x327   :  { %v1968_v29 = vpop.f32.mrf.mxu0 }
 0x328   :  { %v5936_v6 = vpop.f32.mrf.mxu1  ;;  %v1969_v25 = vadd.f32 %v1968_v29, %v5884_v43  ;;  %v5964_v29 = vpop.eup %3451 }
 0x329   :  { %v1970_v59 = vpop.f32.mrf.mxu0  ;;  %v5967_v30 = vpop.eup %3453 }
 0x32a   :  { %v5940_v52 = vpop.f32.mrf.mxu1  ;;  %v1971_v0 = vadd.f32 %v1970_v59, %v5884_v43  ;;  %3477 = vtanh.f32 %v1969_v25  ;;  %v5970_v14 = vpop.eup %3455 }
 0x32b   :  { %v5972_v17 = vpop.eup %3457 }
 0x32c   :  { %3479 = vtanh.f32 %v1971_v0  ;;  %v5975_v27 = vpop.eup %3459 }
 0x32d   :  { %v1974_v63 = vpop.f32.mrf.mxu0 }
 0x32e   :  { %v2117_v61 = vpop.f32.mrf.mxu1  ;;  %v1975_v37 = vadd.f32 %v1974_v63, %v5870_v49 }
 0x32f   :  { %v1976_v54 = vpop.f32.mrf.mxu0 }
 0x330   :  { %v2119_v9 = vpop.f32.mrf.mxu1  ;;  %v1977_v42 = vadd.f32 %v1976_v54, %v5870_v49  ;;  %3481 = vtanh.f32 %v1975_v37  ;;  %v5977_v54 = vpop.eup %3461 }
 0x331   :  { %v5981_v25 = vpop.eup %3463 }
 0x332   :  { %3483 = vtanh.f32 %v1977_v42  ;;  %v5985_v37 = vpop.eup %3465 }
 0x333   :  { %v1980_v57 = vpop.f32.mrf.mxu0  ;;  %v5988_v42 = vpop.eup %3467 }
 0x334   :  { %v2123_v18 = vpop.f32.mrf.mxu1  ;;  %v1981_v39 = vadd.f32 %v1980_v57, %v5874_v12 }
 0x335   :  { %v1982_v38 = vpop.f32.mrf.mxu0 }
 0x336   :  { %v2125_v51 = vpop.f32.mrf.mxu1  ;;  %v1983_v59 = vadd.f32 %v1982_v38, %v5874_v12  ;;  %3485 = vtanh.f32 %v1981_v39  ;;  %v2124_v38 = vadd.f32 %v2123_v18, %v5874_v12  ;;  %v2120_v39 = vadd.f32 %v2119_v9, %v5870_v49 }
 0x337   :  { %v2126_v57 = vadd.f32 %v2125_v51, %v5874_v12  ;;  %v2114_v18 = vadd.f32 %v5940_v52, %v5884_v43  ;;  %v2112_v9 = vadd.f32 %v5936_v6, %v5884_v43 }
 0x338   :  { %3487 = vtanh.f32 %v1983_v59 }
 0x339   :  { %v1986_v7 = vpop.f32.mrf.mxu0 }
 0x33a   :  { %v1987_v23 = vadd.f32 %v1986_v7, %v5866_v15  ;;  %v2129_v63 = vpop.f32.mrf.mxu1  ;;  %v5993_v7 = vpop.eup %3469 }
 0x33b   :  { %v1988_v20 = vpop.f32.mrf.mxu0  ;;  %v2130_v41 = vadd.f32 %v2129_v63, %v5866_v15  ;;  %v2118_v63 = vadd.f32 %v2117_v61, %v5870_v49 }
 0x33c   :  { %v1989_v36 = vadd.f32 %v1988_v20, %v5866_v15  ;;  %v2131_v4 = vpop.f32.mrf.mxu1  ;;  %3489 = vtanh.f32 %v1987_v23  ;;  %v5998_v23 = vpop.eup %3471 }
 0x33d   :  { %v2132_v0 = vadd.f32 %v2131_v4, %v5866_v15 }
 0x33e   :  { %3491 = vtanh.f32 %v1989_v36  ;;  %v6004_v36 = vpop.eup %3473 }
 0x33f   :  { %3493 = vtanh.f32 %v2132_v0  ;;  %v5991_v59 = vpop.f32.mrf.mxu0  ;;  %v6010_v61 = vpop.eup %3475 }
 0x340   :  { %3495 = vtanh.f32 %v2130_v41  ;;  %v5996_v51 = vpop.f32.mrf.mxu1  ;;  %v2108_v41 = vadd.f32 %v5930_v8, %v5880_v24  ;;  %v6016_v52 = vpop.eup %3477 }
 0x341   :  { %6532 = vst [vmem:[#allocation34_spill] sm:$0xff] %v5996_v51  ;;  %3497 = vtanh.f32 %v2126_v57  ;;  %v6002_v20 = vpop.f32.mrf.mxu0  ;;  %v2106_v57 = vadd.f32 %v5926_v16, %v5880_v24  ;;  %v6022_v6 = vpop.eup %3479  ;;  %v2096_v16 = vadd.f32 %v5912_v34, %v5890_v26  ;;  %v2088_v34 = vadd.f32 %v5902_v21, %v5904_v48 }
 0x342   :  { %3499 = vtanh.f32 %v2124_v38  ;;  %v6008_v4 = vpop.f32.mrf.mxu1  ;;  %v2102_v38 = vadd.f32 %v5918_v50, %v5894_v44  ;;  %v3482_v8 = vpop.eup %3481  ;;  %v2094_v50 = vadd.f32 %v5908_v33, %v5890_v26  ;;  %v2084_v33 = vadd.f32 %v5898_v55, %v5900_v58 }
 0x343   :  { %6533 = vst [vmem:[#allocation35_spill] sm:$0xff] %v6008_v4  ;;  %3501 = vtanh.f32 %v2120_v39  ;;  %v6014_v0 = vpop.f32.mrf.mxu0  ;;  %v2100_v39 = vadd.f32 %v5916_v2, %v5894_v44  ;;  %v3484_v12 = vpop.eup %3483  ;;  %v2090_v2 = vadd.f32 %v5906_v46, %v5904_v48  ;;  %v2082_v46 = vadd.f32 %v5896_v47, %v5900_v58 }
 0x344   :  { %3503 = vtanh.f32 %v2118_v63  ;;  %v6020_v51 = vpop.f32.mrf.mxu1  ;;  %v2078_v21 = vadd.f32 %v5892_v28, %v5914_v62 }
 0x345   :  { %6534 = vst [vmem:[#allocation60_spill] sm:$0xff] %v6020_v51  ;;  %3505 = vtanh.f32 %v2114_v18  ;;  %v6026_v4 = vpop.f32.mrf.mxu0  ;;  %v3486_v51 = vpop.eup %3485 }
 0x346   :  { %3507 = vtanh.f32 %v2112_v9  ;;  %v6030_v15 = vpop.f32.mrf.mxu1  ;;  %v3488_v49 = vpop.eup %3487 }
 0x347   :  { %6535 = vst [vmem:[#allocation36_spill] sm:$0xff] %v6030_v15  ;;  %3509 = vtanh.f32 %v2108_v41  ;;  %v6034_v63 = vpop.f32.mrf.mxu0 }
 0x348   :  { %3511 = vtanh.f32 %v2106_v57  ;;  %v6038_v18 = vpop.f32.mrf.mxu1 }
 0x349   :  { %6536 = vst [vmem:[#allocation61_spill] sm:$0xff] %v6038_v18  ;;  %3513 = vtanh.f32 %v2102_v38  ;;  %v6042_v9 = vpop.f32.mrf.mxu0  ;;  %v3490_v15 = vpop.eup %3489 }
 0x34a   :  { %3515 = vtanh.f32 %v2100_v39  ;;  %v6046_v41 = vpop.f32.mrf.mxu1 }
 0x34b   :  { %6537 = vst [vmem:[#allocation62_spill] sm:$0xff] %v6046_v41  ;;  %v3492_v43 = vpop.eup %3491  ;;  %3517 = vtanh.f32 %v2096_v16  ;;  %v6050_v57 = vpop.f32.mrf.mxu0  ;;  %v2076_v16 = vadd.f32 %v5888_v10, %v5914_v62 }
 0x34c   :  { %v3494_v18 = vpop.eup %3493  ;;  %3519 = vtanh.f32 %v2094_v50  ;;  %v6054_v38 = vpop.f32.mrf.mxu1  ;;  %2544 = vmatprep.subr.mxu0 %v3492_v43  ;;  %v2072_v43 = vadd.f32 %v5886_v60, %v5910_v45 }
 0x34d   :  { %v3496_v11 = vpop.eup %3495  ;;  %3521 = vtanh.f32 %v2090_v2  ;;  %v6058_v39 = vpop.f32.mrf.mxu0  ;;  %2615 = vmatprep.subr.mxu1 %v3494_v18  ;;  %2545 = vmatpush1.msra.mxu0 %v3490_v15  ;;  %v2070_v15 = vadd.f32 %v5882_v1, %v5910_v45  ;;  %v2060_v2 = vadd.f32 %v5872_v3, %v5920_v22 }
 0x34e   :  { %v3498_v55 = vpop.eup %3497  ;;  %3523 = vtanh.f32 %v2088_v34  ;;  %v6062_v41 = vpop.f32.mrf.mxu1  ;;  %2616 = vmatpush1.msra.mxu1 %v3496_v11  ;;  %2546 = vmatprep.subr.mxu0 %v3488_v49  ;;  %v2066_v49 = vadd.f32 %v5878_v35, %v5923_v19 }
 0x34f   :  { %v3500_v47 = vpop.eup %3499  ;;  %3525 = vtanh.f32 %v2084_v33  ;;  %v6066_v28 = vpop.f32.mrf.mxu0  ;;  %2617 = vmatprep.subr.mxu1 %v3498_v55  ;;  %2547 = vmatpush1.msra.mxu0 %v3486_v51  ;;  %v2064_v51 = vadd.f32 %v5876_v56, %v5923_v19  ;;  %v2058_v56 = vadd.f32 %v5868_v13, %v5920_v22 }
 0x350   :  { %v3502_v50 = vpop.eup %3501  ;;  %3527 = vtanh.f32 %v2082_v46  ;;  %v6070_v10 = vpop.f32.mrf.mxu1  ;;  %2618 = vmatpush1.msra.mxu1 %v3500_v47  ;;  %2548 = vmatprep.subr.mxu0 %v3484_v12  ;;  %v2201_v46 = vadd.f32 %v5991_v59, %v5920_v22  ;;  %v2209_v47 = vadd.f32 %v6026_v4, %v5923_v19 }
 0x351   :  { %v3504_v11 = vpop.eup %3503  ;;  %3529 = vtanh.f32 %v2078_v21  ;;  %v6074_v60 = vpop.f32.mrf.mxu0  ;;  %2619 = vmatprep.subr.mxu1 %v3502_v50  ;;  %2549 = vmatpush1.msra.mxu0 %v3482_v8 }
 0x352   :  { %v3506_v18 = vpop.eup %3505  ;;  %3531 = vtanh.f32 %v2076_v16  ;;  %v6078_v1 = vpop.f32.mrf.mxu1  ;;  %2620 = vmatpush1.msra.mxu1 %v3504_v11  ;;  %2550 = vmatprep.subr.mxu0 %v6022_v6  ;;  %v2207_v16 = vadd.f32 %v6014_v0, %v5923_v19  ;;  %v2221_v11 = vadd.f32 %v6058_v39, %v5914_v62 }
 0x353   :  { %v3508_v12 = vpop.eup %3507  ;;  %3533 = vtanh.f32 %v2072_v43  ;;  %v6083_v35 = vpop.f32.mrf.mxu0  ;;  %2621 = vmatprep.subr.mxu1 %v3506_v18  ;;  %2551 = vmatpush1.msra.mxu0 %v6016_v52  ;;  %v2227_v18 = vadd.f32 %v6074_v60, %v5900_v58 }
 0x354   :  { %v3510_v8 = vpop.eup %3509  ;;  %3535 = vtanh.f32 %v2070_v15  ;;  %v6088_v34 = vpop.f32.mrf.mxu1  ;;  %2622 = vmatpush1.msra.mxu1 %v3508_v12  ;;  %2552 = vmatprep.subr.mxu0 %v6010_v61  ;;  %v2219_v15 = vadd.f32 %v6050_v57, %v5914_v62 }
 0x355   :  { %v3512_v6 = vpop.eup %3511  ;;  %3537 = vtanh.f32 %v2066_v49  ;;  %v6091_v33 = vpop.f32.mrf.mxu0  ;;  %2623 = vmatprep.subr.mxu1 %v3510_v8  ;;  %2553 = vmatpush1.msra.mxu0 %v6004_v36  ;;  %v2203_v36 = vadd.f32 %v6002_v20, %v5920_v22  ;;  %v2225_v49 = vadd.f32 %v6066_v28, %v5900_v58 }
 0x356   :  { %v3514_v3 = vpop.eup %3513  ;;  %3539 = vtanh.f32 %v2064_v51  ;;  %v6094_v52 = vpop.f32.mrf.mxu1  ;;  %2624 = vmatpush1.msra.mxu1 %v3512_v6  ;;  %2554 = vmatprep.subr.mxu0 %v5998_v23  ;;  %v2231_v51 = vadd.f32 %v6083_v35, %v5904_v48  ;;  %v2233_v12 = vadd.f32 %v6091_v33, %v5904_v48 }
 0x357   :  { %v3516_v13 = vpop.eup %3515  ;;  %3541 = vtanh.f32 %v2060_v2  ;;  %v6099_v61 = vpop.f32.mrf.mxu0  ;;  %2625 = vmatprep.subr.mxu1 %v3514_v3  ;;  %2555 = vmatpush1.msra.mxu0 %v5993_v7 }
 0x358   :  { %v3518_v21 = vpop.eup %3517  ;;  %3543 = vtanh.f32 %v2058_v56  ;;  %v6104_v55 = vpop.f32.mrf.mxu1  ;;  %2626 = vmatpush1.msra.mxu1 %v3516_v13  ;;  %2556 = vmatprep.subr.mxu0 %v5988_v42  ;;  %v2213_v42 = vadd.f32 %v6034_v63, %v5910_v45  ;;  %v2237_v2 = vadd.f32 %v6099_v61, %v5890_v26  ;;  %v6538_v61 = vmov 0.0  }
 0x359   :  { %v3520_v23 = vpop.eup %3519  ;;  %v6109_v59 = vpop.f32.mrf.mxu0  ;;  %2627 = vmatprep.subr.mxu1 %v3518_v21  ;;  %2557 = vmatpush1.msra.mxu0 %v5985_v37  ;;  %3545 = vtanh.f32 %v2201_v46  ;;  %v2215_v37 = vadd.f32 %v6042_v9, %v5910_v45 }
 0x35a   :  { %v3522_v7 = vpop.eup %3521  ;;  %v6114_v43 = vpop.f32.mrf.mxu1  ;;  %2628 = vmatpush1.msra.mxu1 %v3520_v23  ;;  %2558 = vmatprep.subr.mxu0 %v5981_v25  ;;  %3547 = vtanh.f32 %v2203_v36  ;;  %v2239_v56 = vadd.f32 %v6109_v59, %v5890_v26 }
 0x35b   :  { %v3524_v20 = vpop.eup %3523  ;;  %v2242_v0 = vpop.f32.mrf.mxu0  ;;  %2629 = vmatprep.subr.mxu1 %v3522_v7  ;;  %2559 = vmatpush1.msra.mxu0 %v5977_v54  ;;  %3549 = vtanh.f32 %v2207_v16  ;;  %v6539_v16 = vld [vmem:[#allocation33_spill] sm:$0xff] }
 0x35c   :  { %v3526_v50 = vpop.eup %3525  ;;  %v6122_v4 = vpop.f32.mrf.mxu1  ;;  %2630 = vmatpush1.msra.mxu1 %v3524_v20  ;;  %2560 = vmatprep.subr.mxu0 %v5975_v27  ;;  %3551 = vtanh.f32 %v2209_v47  ;;  %v2243_v33 = vadd.f32 %v2242_v0, %v5894_v44 }
 0x35d   :  { %v3528_v25 = vpop.eup %3527  ;;  %v2244_v63 = vpop.f32.mrf.mxu0  ;;  %2631 = vmatprep.subr.mxu1 %v3526_v50  ;;  %2561 = vmatpush1.msra.mxu0 %v5972_v17  ;;  %3553 = vtanh.f32 %v2213_v42  ;;  %v6540_v50 = vld [vmem:[#allocation30_spill] sm:$0xff] }
 0x35e   :  { %v3530_v54 = vpop.eup %3529  ;;  %v6130_v9 = vpop.f32.mrf.mxu1  ;;  %2632 = vmatpush1.msra.mxu1 %v3528_v25  ;;  %2562 = vmatprep.subr.mxu0 %v5970_v14  ;;  %3555 = vtanh.f32 %v2215_v37  ;;  %v2245_v3 = vadd.f32 %v2244_v63, %v5894_v44 }
 0x35f   :  { %v3532_v27 = vpop.eup %3531  ;;  %v2248_v57 = vpop.f32.mrf.mxu0  ;;  %2633 = vmatprep.subr.mxu1 %v3530_v54  ;;  %2563 = vmatpush1.msra.mxu0 %v5967_v30  ;;  %3557 = vtanh.f32 %v2219_v15 }
 0x360   :  { %v3534_v17 = vpop.eup %3533  ;;  %v6138_v39 = vpop.f32.mrf.mxu1  ;;  %2634 = vmatpush1.msra.mxu1 %v3532_v27  ;;  %2564 = vmatprep.subr.mxu0 %v5964_v29  ;;  %3559 = vtanh.f32 %v2221_v11  ;;  %v6541_v27 = vld [vmem:[#allocation21_spill] sm:$0xff] }
 0x361   :  { %v3536_v14 = vpop.eup %3535  ;;  %v2250_v28 = vpop.f32.mrf.mxu0  ;;  %2635 = vmatprep.subr.mxu1 %v3534_v17  ;;  %2565 = vmatpush1.msra.mxu0 %v5961_v31  ;;  %3561 = vtanh.f32 %v2225_v49  ;;  %v6155_v31 = vld [vmem:[%s6299_s7] sm:$0x1]  ;;  %s3675_s7 = smov [#allocation3]  }
 0x362   :  { %v3538_v30 = vpop.eup %3537  ;;  %v6146_v60 = vpop.f32.mrf.mxu1  ;;  %2636 = vmatpush1.msra.mxu1 %v3536_v14  ;;  %2566 = vmatprep.subr.mxu0 %v5958_v53  ;;  %3563 = vtanh.f32 %v2227_v18  ;;  %s2887_s0 = sshll.u32 %s3675_s7, 4  ;;  %s2888_s0 = int_to_ptr.vmem [resolvable:$true] %s2887_s0 }
 0x363   :  { %v3540_v29 = vpop.eup %3539  ;;  %v2254_v35 = vpop.f32.mrf.mxu0  ;;  %2637 = vmatprep.subr.mxu1 %v3538_v30  ;;  %2567 = vmatpush1.msra.mxu0 %v5955_v40  ;;  %3565 = vtanh.f32 %v2231_v51  ;;  %s3649_s3 = scalar_lea.vmem %s2888_s0, 128  ;;  %p3654_p1 = scmp.lt.s32.totalorder %s2888_s0, %s2888_s0 }
 0x364   :  { %v3542_v8 = vpop.eup %3541  ;;  %v6159_v53 = vpop.f32.mrf.mxu1  ;;  %2638 = vmatpush1.msra.mxu1 %v3540_v29  ;;  %2568 = vmatprep.subr.mxu0 %v5952_v32  ;;  %3567 = vtanh.f32 %v2233_v12  ;;  %v2249_v32 = vadd.f32 %v2248_v57, %v5880_v24  ;;  %v2255_v59 = vadd.f32 %v2254_v35, %v6539_v16  ;;  %v6542_v12 = vld [vmem:[#allocation29_spill] sm:$0xff]  ;;  %p3650_p0 = scmp.ne.s32.totalorder %s2888_s0, %s3649_s3  ;;  %p3655_p2 = scmp.lt.s32.totalorder %s3649_s3, %s3649_s3 }
 0x365   :  { %v3544_v6 = vpop.eup %3543  ;;  %v2256_v40 = vpop.f32.mrf.mxu0  ;;  %2639 = vmatprep.subr.mxu1 %v3542_v8  ;;  %2569 = vmatpush1.msra.mxu0 %v5949_v5  ;;  %3569 = vtanh.f32 %v2237_v2  ;;  %v2251_v5 = vadd.f32 %v2250_v28, %v5880_v24 }
 0x366   :  { %v6165_v13 = vpop.f32.mrf.mxu1  ;;  %2640 = vmatpush1.msra.mxu1 %v3544_v6  ;;  %2999 = vmatmul.mubr.msk.f32.vlgmr.msra.gmra.mxu0 %vm1002_vm0, %v6155_v31  ;;  %v6173_v21 = vpop.eup %3545  ;;  %3571 = vtanh.f32 %v2239_v56  ;;  %v2257_v20 = vadd.f32 %v2256_v40, %v6539_v16  ;;  %p3656_p3 = por %p3655_p2, %p3654_p1 }
 0x367   :  { %v2260_v46 = vpop.f32.mrf.mxu0  ;;  %3000 = vmatmul.mubr.msk.f32.vlgmr.msra.gmra.mxu1 %vm1002_vm0, %v6155_v31  ;;  %2744 = vmatprep.mubr.f32.mxu0 %v6538_v61  ;;  %v6177_v23 = vpop.eup %3547  ;;  %3573 = vtanh.f32 %v2243_v33 }
 0x368   :  { %v2403_v36 = vpop.f32.mrf.mxu1  ;;  %2815 = vmatprep.mubr.f32.mxu1 %v6538_v61  ;;  %v6180_v47 = vpop.eup %3549  ;;  %3575 = vtanh.f32 %v2245_v3  ;;  %v2261_v37 = vadd.f32 %v2260_v46, %v6540_v50  ;;  %p3657_p4 = pnand %p3656_p3, %p3650_p0 }
 0x369   :  { %v2262_v7 = vpop.f32.mrf.mxu0  ;;  %v6183_v0 = vpop.eup %3551  ;;  %3577 = vtanh.f32 %v2249_v32 }
 0x36a   :  { %v2405_v42 = vpop.f32.mrf.mxu1  ;;  %v6186_v15 = vpop.eup %3553  ;;  %3579 = vtanh.f32 %v2251_v5  ;;  %v2263_v63 = vadd.f32 %v2262_v7, %v6540_v50 }
 0x36b   :  { %v2266_v25 = vpop.f32.mrf.mxu0  ;;  %v6189_v11 = vpop.eup %3555  ;;  %3581 = vtanh.f32 %v2255_v59  ;;  %v2406_v7 = vadd.f32 %v2405_v42, %v6540_v50  ;;  %v2394_v42 = vadd.f32 %v6146_v60, %v5880_v24  ;;  %v2382_v60 = vadd.f32 %v6114_v43, %v5890_v26 }
 0x36c   :  { %v2409_v54 = vpop.f32.mrf.mxu1  ;;  %v2267_v49 = vadd.f32 %v2266_v25, %v6541_v27  ;;  %v6192_v17 = vpop.eup %3557  ;;  %3583 = vtanh.f32 %v2257_v20  ;;  %v2370_v43 = vadd.f32 %v6078_v1, %v5900_v58 }
 0x36d   :  { %v2268_v57 = vpop.f32.mrf.mxu0  ;;  %v6195_v51 = vpop.eup %3559  ;;  %3585 = vtanh.f32 %v2261_v37  ;;  %v2410_v5 = vadd.f32 %v2409_v54, %v6541_v27  ;;  %v2404_v37 = vadd.f32 %v2403_v36, %v6540_v50  ;;  %v2398_v54 = vadd.f32 %v6159_v53, %v6539_v16 }
 0x36e   :  { %v2269_v18 = vadd.f32 %v2268_v57, %v6541_v27  ;;  %v2411_v14 = vpop.f32.mrf.mxu1  ;;  %v6197_v30 = vpop.eup %3561  ;;  %3587 = vtanh.f32 %v2263_v63  ;;  %v2400_v63 = vadd.f32 %v6165_v13, %v6539_v16  ;;  %v2392_v50 = vadd.f32 %v6138_v39, %v5880_v24 }
 0x36f   :  { %v2272_v28 = vpop.f32.mrf.mxu0  ;;  %v6200_v35 = vpop.eup %3563  ;;  %3589 = vtanh.f32 %v2267_v49  ;;  %v2412_v32 = vadd.f32 %v2411_v14, %v6541_v27  ;;  %v2388_v13 = vadd.f32 %v6130_v9, %v5894_v44  ;;  %v2386_v53 = vadd.f32 %v6122_v4, %v5894_v44 }
 0x370   :  { %v2273_v29 = vadd.f32 %v2272_v28, %v6542_v12  ;;  %v2415_v2 = vpop.f32.mrf.mxu1  ;;  %v6202_v56 = vpop.eup %3565  ;;  %3591 = vtanh.f32 %v2269_v18  ;;  %v2380_v24 = vadd.f32 %v6104_v55, %v5890_v26  ;;  %v2376_v9 = vadd.f32 %v6094_v52, %v5904_v48 }
 0x371   :  { %v2274_v8 = vpop.f32.mrf.mxu0  ;;  %v2416_v6 = vadd.f32 %v2415_v2, %v6542_v12  ;;  %v6206_v3 = vpop.eup %3567  ;;  %v2374_v44 = vadd.f32 %v6088_v34, %v5904_v48  ;;  %v2368_v26 = vadd.f32 %v6070_v10, %v5900_v58  ;;  %v2364_v52 = vadd.f32 %v6062_v41, %v5914_v62  ;;  %v6544_v41 = vld [vmem:[#allocation61_spill] sm:$0xff] }
 0x372   :  { %v2275_v33 = vadd.f32 %v2274_v8, %v6542_v12  ;;  %v2417_v40 = vpop.f32.mrf.mxu1  ;;  %3593 = vtanh.f32 %v2273_v29  ;;  %v6210_v61 = vpop.eup %3569  ;;  %v2362_v34 = vadd.f32 %v6054_v38, %v5914_v62  ;;  %v6543_v29 = vld [vmem:[#allocation62_spill] sm:$0xff]  ;;  %v2356_v2 = vadd.f32 %v6544_v41, %v5910_v45  ;;  %v6545_v62 = vld [vmem:[#allocation36_spill] sm:$0xff] }
 0x373   :  { %v2418_v46 = vadd.f32 %v2417_v40, %v6542_v12  ;;  %v6213_v59 = vpop.eup %3571  ;;  %v2358_v58 = vadd.f32 %v6543_v29, %v5910_v45  ;;  %v2352_v38 = vadd.f32 %v6545_v62, %v5923_v19  ;;  %v6547_v45 = vld [vmem:[#allocation35_spill] sm:$0xff] }
 0x374   :  { %3595 = vtanh.f32 %v2275_v33  ;;  %v6216_v20 = vpop.eup %3573  ;;  %v6546_v33 = vld [vmem:[#allocation60_spill] sm:$0xff] }
 0x375   :  { %3597 = vtanh.f32 %v2418_v46  ;;  %v6219_v25 = vpop.eup %3575  ;;  %v2350_v40 = vadd.f32 %v6546_v33, %v5923_v19  ;;  %v2346_v46 = vadd.f32 %v6547_v45, %v5920_v22 }
 0x376   :  { %3599 = vtanh.f32 %v2416_v6  ;;  %v6223_v49 = vpop.eup %3577 }
 0x377   :  { %3601 = vtanh.f32 %v2412_v32  ;;  %v6227_v27 = vpop.eup %3579 }
 0x378   :  { %3603 = vtanh.f32 %v2410_v5  ;;  %v3582_v36 = vpop.eup %3581 }
 0x379   :  { %3605 = vtanh.f32 %v2406_v7  ;;  %v3584_v57 = vpop.eup %3583  ;;  %v6548_v7 = vld [vmem:[#allocation34_spill] sm:$0xff] }
 0x37a   :  { %3607 = vtanh.f32 %v2404_v37  ;;  %v3586_v18 = vpop.eup %3585  ;;  %v2344_v37 = vadd.f32 %v6548_v7, %v5920_v22 }
 0x37b   :  { %3609 = vtanh.f32 %v2400_v63  ;;  %v3588_v16 = vpop.eup %3587 }
 0x37c   :  { %3611 = vtanh.f32 %v2398_v54  ;;  %v3590_v14 = vpop.eup %3589 }
 0x37d   :  { %3613 = vtanh.f32 %v2394_v42  ;;  %v3592_v39 = vpop.eup %3591 }
 0x37e   :  { %3615 = vtanh.f32 %v2392_v50 }
 0x37f   :  { %3617 = vtanh.f32 %v2388_v13  ;;  %v3594_v28 = vpop.eup %3593  ;;  %v6549_v13 = vld [vmem:[#allocation10_spill] sm:$0xff] }
 0x380   :  { %3619 = vtanh.f32 %v2386_v53 }
 0x381   :  { %v3596_v4 = vpop.eup %3595  ;;  %3621 = vtanh.f32 %v2382_v60 }
 0x382   :  { %v3598_v12 = vpop.eup %3597  ;;  %3623 = vtanh.f32 %v2380_v24  ;;  %2686 = vmatprep.subr.mxu0 %v3596_v4  ;;  %v6550_v24 = vld [vmem:[#allocation6_spill] sm:$0xff] }
 0x383   :  { %v3600_v55 = vpop.eup %3599  ;;  %3625 = vtanh.f32 %v2376_v9  ;;  %2757 = vmatprep.subr.mxu1 %v3598_v12  ;;  %2687 = vmatpush1.msra.mxu0 %v3594_v28 }
 0x384   :  { %v3602_v48 = vpop.eup %3601  ;;  %3627 = vtanh.f32 %v2374_v44  ;;  %2758 = vmatpush1.msra.mxu1 %v3600_v55  ;;  %2688 = vmatprep.subr.mxu0 %v3592_v39 }
 0x385   :  { %v3604_v1 = vpop.eup %3603  ;;  %3629 = vtanh.f32 %v2370_v43  ;;  %2759 = vmatprep.subr.mxu1 %v3602_v48  ;;  %2689 = vmatpush1.msra.mxu0 %v3590_v14 }
 0x386   :  { %v3606_v10 = vpop.eup %3605  ;;  %3631 = vtanh.f32 %v2368_v26  ;;  %2760 = vmatpush1.msra.mxu1 %v3604_v1  ;;  %2690 = vmatprep.subr.mxu0 %v3588_v16 }
 0x387   :  { %v3608_v8 = vpop.eup %3607  ;;  %3633 = vtanh.f32 %v2364_v52  ;;  %2761 = vmatprep.subr.mxu1 %v3606_v10  ;;  %2691 = vmatpush1.msra.mxu0 %v3586_v18 }
 0x388   :  { %v3610_v6 = vpop.eup %3609  ;;  %3635 = vtanh.f32 %v2362_v34  ;;  %2762 = vmatpush1.msra.mxu1 %v3608_v8  ;;  %2692 = vmatprep.subr.mxu0 %v3584_v57 }
 0x389   :  { %v3612_v32 = vpop.eup %3611  ;;  %3637 = vtanh.f32 %v2358_v58  ;;  %2763 = vmatprep.subr.mxu1 %v3610_v6  ;;  %2693 = vmatpush1.msra.mxu0 %v3582_v36  ;;  %v3674_v36 = vmov 1966171168  }
 0x38a   :  { %v3614_v5 = vpop.eup %3613  ;;  %3639 = vtanh.f32 %v2356_v2  ;;  %2764 = vmatpush1.msra.mxu1 %v3612_v32  ;;  %2694 = vmatprep.subr.mxu0 %v6227_v27 }
 0x38b   :  { %v3616_v63 = vpop.eup %3615  ;;  %3641 = vtanh.f32 %v2352_v38  ;;  %2765 = vmatprep.subr.mxu1 %v3614_v5  ;;  %2695 = vmatpush1.msra.mxu0 %v6223_v49 }
 0x38c   :  { %v3618_v19 = vpop.eup %3617  ;;  %3643 = vtanh.f32 %v2350_v40  ;;  %2766 = vmatpush1.msra.mxu1 %v3616_v63  ;;  %2696 = vmatprep.subr.mxu0 %v6219_v25 }
 0x38d   :  { %v3620_v54 = vpop.eup %3619  ;;  %3645 = vtanh.f32 %v2346_v46  ;;  %2767 = vmatprep.subr.mxu1 %v3618_v19  ;;  %2697 = vmatpush1.msra.mxu0 %v6216_v20 }
 0x38e   :  { %v3622_v22 = vpop.eup %3621  ;;  %3647 = vtanh.f32 %v2344_v37  ;;  %2768 = vmatpush1.msra.mxu1 %v3620_v54  ;;  %2698 = vmatprep.subr.mxu0 %v6213_v59 }
 0x38f   :  { %v3624_v27 = vpop.eup %3623  ;;  %2769 = vmatprep.subr.mxu1 %v3622_v22  ;;  %2699 = vmatpush1.msra.mxu0 %v6210_v61 }
 0x390   :  { %v3626_v49 = vpop.eup %3625  ;;  %2770 = vmatpush1.msra.mxu1 %v3624_v27  ;;  %2700 = vmatprep.subr.mxu0 %v6206_v3 }
 0x391   :  { %v3628_v42 = vpop.eup %3627  ;;  %2771 = vmatprep.subr.mxu1 %v3626_v49  ;;  %2701 = vmatpush1.msra.mxu0 %v6202_v56 }
 0x392   :  { %v3630_v25 = vpop.eup %3629  ;;  %2772 = vmatpush1.msra.mxu1 %v3628_v42  ;;  %2702 = vmatprep.subr.mxu0 %v6200_v35 }
 0x393   :  { %v3632_v20 = vpop.eup %3631  ;;  %2773 = vmatprep.subr.mxu1 %v3630_v25  ;;  %2703 = vmatpush1.msra.mxu0 %v6197_v30 }
 0x394   :  { %v3634_v59 = vpop.eup %3633  ;;  %2774 = vmatpush1.msra.mxu1 %v3632_v20  ;;  %2704 = vmatprep.subr.mxu0 %v6195_v51 }
 0x395   :  { %v3636_v61 = vpop.eup %3635  ;;  %2775 = vmatprep.subr.mxu1 %v3634_v59  ;;  %2705 = vmatpush1.msra.mxu0 %v6192_v17 }
 0x396   :  { %v3638_v3 = vpop.eup %3637  ;;  %2776 = vmatpush1.msra.mxu1 %v3636_v61  ;;  %2706 = vmatprep.subr.mxu0 %v6189_v11  ;;  %v2529_v11 = vpop.permute.xlu1 %2528 }
 0x397   :  { %v3640_v56 = vpop.eup %3639  ;;  %2777 = vmatprep.subr.mxu1 %v3638_v3  ;;  %2707 = vmatpush1.msra.mxu0 %v6186_v15 }
 0x398   :  { %v3642_v35 = vpop.eup %3641  ;;  %2778 = vmatpush1.msra.mxu1 %v3640_v56  ;;  %2708 = vmatprep.subr.mxu0 %v6183_v0 }
 0x399   :  { %v3644_v30 = vpop.eup %3643  ;;  %2779 = vmatprep.subr.mxu1 %v3642_v35  ;;  %2709 = vmatpush1.msra.mxu0 %v6180_v47  ;;  %v2835_v47 = vunpack.c.l.s4 %v3674_v36 }
 0x39a   :  { %v3646_v51 = vpop.eup %3645  ;;  %2780 = vmatpush1.msra.mxu1 %v3644_v30  ;;  %2710 = vmatprep.subr.mxu0 %v6177_v23  ;;  %v2534_v23 = vrot.slane %v2529_v11, %v6549_v13 }
 0x39b   :  { %v3648_v17 = vpop.eup %3647  ;;  %2781 = vmatprep.subr.mxu1 %v3646_v51  ;;  %2711 = vmatpush1.msra.mxu0 %v6173_v21  ;;  %v2836_v53 = vunpack.c.0.s8 %v2835_v47 }
 0x39c   :  { %2782 = vmatpush1.msra.mxu1 %v3648_v17  ;;  %3001 = vmatmul.mubr.msk.f32.vlgmr.msra.gmra.mxu0 %vm1002_vm0, %v6155_v31 }
 0x39d   :  { %3002 = vmatmul.mubr.msk.f32.vlgmr.msra.gmra.mxu1 %vm1002_vm0, %v6155_v31  ;;  %v2839_v39 = vsub.s32 %v2836_v53, %v6550_v24 }
 0x426   :  { %v2604_v0 = vpop.f32.mrf.mxu0 }
 0x427   :  { %v2675_v15 = vpop.f32.mrf.mxu1  ;;  %v2605_v21 = vadd.f32 %v2604_v0, %v2534_v23 }
 0x428   :  { %v2606_v50 = vpop.f32.mrf.mxu0  ;;  %v2676_v60 = vadd.f32 %v2675_v15, %v2534_v23 }
 0x429   :  { %v2677_v57 = vpop.f32.mrf.mxu1  ;;  %v2607_v18 = vadd.f32 %v2606_v50, %v2534_v23 }
 0x42a   :  { %v2678_v16 = vadd.f32 %v2677_v57, %v2534_v23 }
 0x42b   :  { %v2830_v14 = vcombine.low %v2605_v21, %v2607_v18 }
 0x42c   :  { %v2831_v9 = vcombine.low %v2676_v60, %v2678_v16 }
 0x42d   :  { %v2840_v26 = vrot.slane %v2830_v14, %v2839_v39 }
 0x42e   :  { %v2847_v55 = vrot.slane %v2831_v9, %v2839_v39 }
 0x430   :  { %v2862_v10 = vcombine.low %v2840_v26, %v2847_v55 }
 0x432   :  { %v2870_v2 = vrot.slane %v2862_v10, %v2839_v39 }
 0x45c   :  { %v2746_v28 = vpop.f32.mrf.mxu0 }
 0x45d   :  { %v2817_v31 = vpop.f32.mrf.mxu1  ;;  %v2747_v4 = vadd.f32 %v2746_v28, %v2534_v23 }
 0x45e   :  { %v2748_v44 = vpop.f32.mrf.mxu0  ;;  %v2818_v52 = vadd.f32 %v2817_v31, %v2534_v23 }
 0x45f   :  { %v2749_v43 = vadd.f32 %v2748_v44, %v2534_v23  ;;  %v2819_v12 = vpop.f32.mrf.mxu1 }
 0x460   :  { %v2820_v48 = vadd.f32 %v2819_v12, %v2534_v23 }
 0x461   :  { %v2832_v34 = vcombine.low %v2747_v4, %v2749_v43 }
 0x462   :  { %v2833_v1 = vcombine.low %v2818_v52, %v2820_v48 }
 0x463   :  { %v2854_v29 = vrot.slane %v2832_v34, %v2839_v39 }
 0x464   :  { %v2861_v58 = vrot.slane %v2833_v1, %v2839_v39 }
 0x466   :  { %v2863_v41 = vcombine.low %v2854_v29, %v2861_v58 }
 0x468   :  { %v2877_v8 = vrot.slane %v2863_v41, %v2839_v39 }
 0x46a   :  { %v2878_v62 = vcombine.low %v2870_v2, %v2877_v8 }
 0x46c   :  { %2880 = vst [vmem:[#allocation3] sm:$0xff] %v2878_v62 }
 0x46d   :  { %3660 = shalt.err (!%p3657_p4)
}
 0x46e   :  { %2890 = dma.vmem_to_hbm [thread:$0]  %s2888_s0, 128, %s6301_s9, [#allocation4]  }
 0x46f   :  { %3669 = dma.done.wait [#allocation4], 128  }
 0x470   :  { %3670 = vsyncadd [#allocation4], 4294967168 }
 0x471   :  { %2894 = vsyncpa [#allocation4], 1 }

</bundles_post_ra>
